<compile_context>
chip_gen: v5e
topology: v5e:2x2
jax: 0.10.0
libtpu: 0.0.40
codegen_flags: <defaults>
</compile_context>

<pallas_src>
import jax
import jax.numpy as jnp
from jax import lax
from jax.experimental import pallas as pl
from jax.experimental.pallas import tpu as pltpu


# ----------------------------------------------------------------------------
# Static helper: which input column-phase / offset feeds kernel-column tap kw
# for an output column of parity `ph` (0 = even output cols 2i, 1 = odd 2i+1).
# Phase arrays are padded with one zero column: E = [e0..e_{W-1}, 0],
# O = [0, o0..o_{W-1}].  Slicing [off:off+W] yields input col (2i + ph - 1 + kw).
# ----------------------------------------------------------------------------
def _col_tap(ph, kw):
    if ph == 0:
        return ((1, 0), (0, 0), (1, 1))[kw]
    return ((0, 0), (1, 1), (0, 1))[kw]


# ----------------------------------------------------------------------------
# Fused kernel: 1x1 conv + bilinear x2 + [Conv3x3+ReLU+BN] x2, one row band.
# ----------------------------------------------------------------------------
def _upconv_band_kernel(xp_ref, sk_ref, upw_ref, upb_ref,
                        w1u_ref, w1s_ref, b1_ref, s1_ref, t1_ref,
                        w2_ref, b2_ref, s2_ref, t2_ref,
                        o_ref,
                        upE, upO, y1E, y1O):
    b = pl.program_id(1)
    nb = pl.num_programs(1)
    bf16 = jnp.bfloat16

    TBp4, Wp1, C = upE.shape
    TB = TBp4 - 4                      # output rows per band
    W = Wp1 - 1                        # low-res width == W2 // 2
    TLR = TB // 2 + 4                  # low-res rows needed for this band
    _, _, WXP, Cin = xp_ref.shape

    # ---- up path: 1x1 conv at LOW resolution, bilinear x2 in f32, in VMEM ----
    xw = xp_ref[0, pl.ds(b * (TB // 2), TLR), :, :]          # (TLR, WXP, Cin) bf16
    z = jnp.dot(xw.reshape(TLR * WXP, Cin), upw_ref[...],
                preferred_element_type=jnp.float32)
    z = (z + upb_ref[...]).reshape(TLR, WXP, C)              # f32 interpolation
    zc0 = z[:, 0:W, :]
    zc1 = z[:, 1:W + 1, :]
    zc2 = z[:, 2:W + 2, :]
    zuE = 0.25 * zc0 + 0.75 * zc1      # even up columns, low-res rows
    zuO = 0.75 * zc1 + 0.25 * zc2      # odd  up columns, low-res rows

    hq = TB // 2
    for zu, scr, lo in ((zuE, upE, 0), (zuO, upO, 1)):
        re = 0.25 * zu[0:hq + 2] + 0.75 * zu[1:hq + 3]
        ro = 0.75 * zu[1:hq + 3] + 0.25 * zu[2:hq + 4]
        # row interleave touches leading dims only (layout preserving)
        ub = jnp.stack([re, ro], axis=1).reshape(TB + 4, W, C)
        scr[:, lo:lo + W, :] = ub.astype(bf16)
        zc = jnp.zeros((TB + 4, 1, C), bf16)
        if lo == 0:
            scr[:, W:W + 1, :] = zc          # zero only the border column
        else:
            scr[:, 0:1, :] = zc

    # up rows outside the image are conv1's zero padding
    @pl.when(b == 0)
    def _():
        z2 = jnp.zeros((2, Wp1, C), bf16)
        upE[0:2, :, :] = z2
        upO[0:2, :, :] = z2

    @pl.when(b == nb - 1)
    def _():
        z2 = jnp.zeros((2, Wp1, C), bf16)
        upE[TB + 2:TB + 4, :, :] = z2
        upO[TB + 2:TB + 4, :, :] = z2

    # ---- conv1: 3x3 over concat([up, skip]) + ReLU + folded BN --------------
    row0 = b * TB
    M1 = (TB + 2) * W
    for ph in (0, 1):
        acc = jnp.zeros((M1, C), jnp.float32)
        for kh in range(3):
            for kw in range(3):
                t = kh * 3 + kw
                sph, off = _col_tap(ph, kw)
                u_src = upE if sph == 0 else upO
                u = u_src[kh:kh + TB + 2, off:off + W, :].reshape(M1, C)
                s = sk_ref[0, pl.ds(row0 + kh, TB + 2), sph,
                           off:off + W, :].reshape(M1, C)
                acc = acc + jnp.dot(u, w1u_ref[t * C:(t + 1) * C, :],
                                    preferred_element_type=jnp.float32)
                acc = acc + jnp.dot(s, w1s_ref[t * C:(t + 1) * C, :],
                                    preferred_element_type=jnp.float32)
        # Conv -> ReLU -> BN (matches LWNet ConvBlock ordering)
        y1 = jnp.maximum(acc + b1_ref[...], 0.0) * s1_ref[...] + t1_ref[...]
        dst = y1E if ph == 0 else y1O
        lo = 0 if ph == 0 else 1
        dst[:, lo:lo + W, :] = y1.reshape(TB + 2, W, C).astype(bf16)
        zc = jnp.zeros((TB + 2, 1, C), bf16)
        if ph == 0:
            dst[:, W:W + 1, :] = zc
        else:
            dst[:, 0:1, :] = zc

    # y1 rows outside the image are conv2's zero padding
    @pl.when(b == 0)
    def _():
        z1 = jnp.zeros((1, Wp1, C), bf16)
        y1E[0:1, :, :] = z1
        y1O[0:1, :, :] = z1

    @pl.when(b == nb - 1)
    def _():
        z1 = jnp.zeros((1, Wp1, C), bf16)
        y1E[TB + 1:TB + 2, :, :] = z1
        y1O[TB + 1:TB + 2, :, :] = z1

    # ---- conv2: 3x3 + ReLU + folded BN --------------------------------------
    M2 = TB * W
    for ph in (0, 1):
        acc = jnp.zeros((M2, C), jnp.float32)
        for kh in range(3):
            for kw in range(3):
                t = kh * 3 + kw
                sph, off = _col_tap(ph, kw)
                src = y1E if sph == 0 else y1O
                a = src[kh:kh + TB, off:off + W, :].reshape(M2, C)
                acc = acc + jnp.dot(a, w2_ref[t * C:(t + 1) * C, :],
                                    preferred_element_type=jnp.float32)
        y2 = jnp.maximum(acc + b2_ref[...], 0.0) * s2_ref[...] + t2_ref[...]
        o_ref[0, :, ph, :, :] = y2.reshape(TB, W, C).astype(o_ref.dtype)


# ----------------------------------------------------------------------------
# Wrapper
# ----------------------------------------------------------------------------
def _pick_band_rows(h2, target=64):
    tb = min(target, h2)
    while tb > 2:
        if h2 % tb == 0 and tb % 2 == 0:
            return tb
        tb -= 1
    return h2


def upconv_block_forward(x_nchw, skip_nchw, params, band_rows=None,
                         out_dtype=jnp.float32):
    """UpConvBlock forward: NCHW in / NCHW out (like PyTorch)."""
    N, Cin, H, W = x_nchw.shape
    C = params['up_w'].shape[1]
    H2, W2 = 2 * H, 2 * W
    assert skip_nchw.shape == (N, C, H2, W2), skip_nchw.shape
    assert W % 8 == 0, "low-res width must be a multiple of 8"
    TB = band_rows if band_rows is not None else _pick_band_rows(H2)
    assert H2 % TB == 0 and TB % 2 == 0, (H2, TB)
    nb = H2 // TB
    bf16 = jnp.bfloat16

    # Low-res input: NHWC bf16, edge-pad rows by 2 / cols by 1 (handles the
    # bilinear border clamp), padded width rounded up to a multiple of 8.
    WXP = ((W + 2 + 7) // 8) * 8
    x = jnp.transpose(x_nchw, (0, 2, 3, 1)).astype(bf16)
    x_p = jnp.pad(x, ((0, 0), (2, 2), (1, WXP - (W + 1)), (0, 0)), mode='edge')

    # Skip: NHWC bf16, split even/odd columns, one zero-pad column per phase,
    # two zero-pad rows top/bottom (single fused XLA pass over skip).
    s = jnp.transpose(skip_nchw, (0, 2, 3, 1)).astype(bf16)
    zcol = jnp.zeros((N, H2, 1, C), bf16)
    s_e = jnp.concatenate([s[:, :, 0::2, :], zcol], axis=2)    # (N,H2,W+1,C)
    s_o = jnp.concatenate([zcol, s[:, :, 1::2, :]], axis=2)
    s_ph = jnp.stack([s_e, s_o], axis=2)                        # (N,H2,2,W+1,C)
    s_ph = jnp.pad(s_ph, ((0, 0), (2, 2), (0, 0), (0, 0), (0, 0)))

    # Weights: pre-cast to bf16, tap-major rows (kh, kw, ci) to match the
    # accumulating matmuls; biases / folded BN as (1, C) f32.
    upw = params['up_w'].astype(bf16)                            # (Cin, C)
    upb = params['up_b'].reshape(1, C).astype(jnp.float32)
    w1u = params['c1_w_hwio'][:, :, :C, :].reshape(9 * C, C).astype(bf16)
    w1s = params['c1_w_hwio'][:, :, C:, :].reshape(9 * C, C).astype(bf16)
    w2 = params['c2_w_hwio'].reshape(9 * C, C).astype(bf16)
    vec = lambda a: a.reshape(1, C).astype(jnp.float32)

    cvec = pl.BlockSpec((1, C), lambda n, b: (0, 0))
    out = pl.pallas_call(
        _upconv_band_kernel,
        out_shape=jax.ShapeDtypeStruct((N, H2, 2, W, C), out_dtype),
        grid=(N, nb),
        in_specs=[
            pl.BlockSpec((1, H + 4, WXP, Cin), lambda n, b: (n, 0, 0, 0)),
            pl.BlockSpec((1, H2 + 4, 2, W + 1, C), lambda n, b: (n, 0, 0, 0, 0)),
            pl.BlockSpec((Cin, C), lambda n, b: (0, 0)),
            cvec,
            pl.BlockSpec((9 * C, C), lambda n, b: (0, 0)),
            pl.BlockSpec((9 * C, C), lambda n, b: (0, 0)),
            cvec, cvec, cvec,
            pl.BlockSpec((9 * C, C), lambda n, b: (0, 0)),
            cvec, cvec, cvec,
        ],
        out_specs=pl.BlockSpec((1, TB, 2, W, C), lambda n, b: (n, b, 0, 0, 0)),
        scratch_shapes=[
            pltpu.VMEM((TB + 4, W + 1, C), bf16),   # up, even output cols
            pltpu.VMEM((TB + 4, W + 1, C), bf16),   # up, odd  output cols
            pltpu.VMEM((TB + 2, W + 1, C), bf16),   # y1, even output cols
            pltpu.VMEM((TB + 2, W + 1, C), bf16),   # y1, odd  output cols
        ],
        compiler_params=pltpu.CompilerParams(
            dimension_semantics=("parallel", "parallel"),
            # raise on v5e/v6e (128 MiB physical); keep <=~56 MiB on v7x
            vmem_limit_bytes=48 * 1024 * 1024),
    )(x_p, s_ph, upw, upb, w1u, w1s,
      vec(params['c1_b']), vec(params['bn1_scale']), vec(params['bn1_shift']),
      w2, vec(params['c2_b']), vec(params['bn2_scale']), vec(params['bn2_shift']))

    # (N, H2, 2, W, C) -> NCHW, re-interleaving the column phases for free in
    # the (required anyway) NCHW epilogue transpose.
    return jnp.transpose(out, (0, 4, 1, 3, 2)).reshape(N, C, H2, W2)


# ----------------------------------------------------------------------------
# Pure-JAX reference (PyTorch-order semantics) and parameter init
# ----------------------------------------------------------------------------
def _up2_along(x, axis):
    L = x.shape[axis]
    first = lax.slice_in_dim(x, 0, 1, axis=axis)
    last = lax.slice_in_dim(x, L - 1, L, axis=axis)
    prev = jnp.concatenate([first, lax.slice_in_dim(x, 0, L - 1, axis=axis)], axis=axis)
    nxt = jnp.concatenate([lax.slice_in_dim(x, 1, L, axis=axis), last], axis=axis)
    even = 0.25 * prev + 0.75 * x
    odd = 0.75 * x + 0.25 * nxt
    y = jnp.stack([even, odd], axis=axis + 1)
    new_shape = list(x.shape)
    new_shape[axis] = 2 * L
    return y.reshape(new_shape)


def bilinear_up2_nhwc(x):
    return _up2_along(_up2_along(x, 1), 2)


def ref_forward(x_nchw, skip_nchw, p):
    x = jnp.transpose(x_nchw, (0, 2, 3, 1))
    skip = jnp.transpose(skip_nchw, (0, 2, 3, 1))
    up = bilinear_up2_nhwc(x)
    up = jnp.einsum('nhwc,cd->nhwd', up, p['up_w'],
                    precision=lax.Precision.HIGHEST) + p['up_b']
    cat = jnp.concatenate([up, skip], axis=-1)

    def block(z, w_hwio, bias, scale, shift):
        y = lax.conv_general_dilated(
            z, w_hwio, (1, 1), 'SAME',
            dimension_numbers=('NHWC', 'HWIO', 'NHWC'),
            precision=lax.Precision.HIGHEST) + bias
        y = jnp.maximum(y, 0.0)
        return y * scale + shift

    y = block(cat, p['c1_w_hwio'], p['c1_b'], p['bn1_scale'], p['bn1_shift'])
    y = block(y, p['c2_w_hwio'], p['c2_b'], p['bn2_scale'], p['bn2_shift'])
    return jnp.transpose(y, (0, 3, 1, 2))


def init_params(key, in_channels, out_channels):
    ks = jax.random.split(key, 16)
    eps = 1e-5

    def bn(kg, kb, km, kv, c):
        gamma = 1.0 + 0.1 * jax.random.normal(kg, (c,), jnp.float32)
        beta = 0.1 * jax.random.normal(kb, (c,), jnp.float32)
        mean = 0.1 * jax.random.normal(km, (c,), jnp.float32)
        var = 1.0 + 0.2 * jax.random.uniform(kv, (c,), jnp.float32)
        scale = gamma / jnp.sqrt(var + eps)
        shift = beta - mean * scale
        return scale, shift

    c = out_channels
    c2 = 2 * out_channels
    up_w = 0.1 * jax.random.normal(ks[0], (in_channels, c), jnp.float32)
    up_b = 0.1 * jax.random.normal(ks[1], (c,), jnp.float32)
    c1_w_hwio = 0.1 * jax.random.normal(ks[2], (3, 3, c2, c), jnp.float32)
    c1_b = 0.1 * jax.random.normal(ks[3], (c,), jnp.float32)
    bn1_scale, bn1_shift = bn(ks[4], ks[5], ks[6], ks[7], c)
    c2_w_hwio = 0.1 * jax.random.normal(ks[8], (3, 3, c, c), jnp.float32)
    c2_b = 0.1 * jax.random.normal(ks[9], (c,), jnp.float32)
    bn2_scale, bn2_shift = bn(ks[10], ks[11], ks[12], ks[13], c)
    return dict(
        up_w=up_w, up_b=up_b,
        c1_w_hwio=c1_w_hwio, c1_b=c1_b, bn1_scale=bn1_scale, bn1_shift=bn1_shift,
        c2_w_hwio=c2_w_hwio, c2_b=c2_b, bn2_scale=bn2_scale, bn2_shift=bn2_shift,
    )


if __name__ == "__main__":
    key = jax.random.PRNGKey(0)
    N, in_channels, out_channels, H, W = 2, 8, 4, 8, 8

    kx, ks_, kp = jax.random.split(key, 3)
    x = jax.random.normal(kx, (N, in_channels, H, W), jnp.float32)
    skip = jax.random.normal(ks_, (N, out_channels, 2 * H, 2 * W), jnp.float32)
    params = init_params(kp, in_channels, out_channels)

    fwd = jax.jit(lambda a, s, p: upconv_block_forward(a, s, p, band_rows=8))
    out = jax.block_until_ready(fwd(x, skip, params))
    assert out.shape == (N, out_channels, 2 * H, 2 * W), out.shape

    ref = jax.block_until_ready(ref_forward(x, skip, params))
    max_err = float(jnp.max(jnp.abs(out - ref)))
    assert max_err < 5e-2, f"mismatch vs reference: {max_err}"

    print("KERNEL_OK")
</pallas_src>

<mosaic_0001>
module attributes {stable_mosaic.version = 11 : i64} {
  func.func @_upconv_band_kernel(%arg0: i32, %arg1: i32, %arg2: memref<1x12x16x8xbf16, #tpu.memory_space<vmem>>, %arg3: memref<1x20x2x9x4xbf16, #tpu.memory_space<vmem>>, %arg4: memref<8x4xbf16, #tpu.memory_space<vmem>>, %arg5: memref<1x4xf32, #tpu.memory_space<vmem>>, %arg6: memref<36x4xbf16, #tpu.memory_space<vmem>>, %arg7: memref<36x4xbf16, #tpu.memory_space<vmem>>, %arg8: memref<1x4xf32, #tpu.memory_space<vmem>>, %arg9: memref<1x4xf32, #tpu.memory_space<vmem>>, %arg10: memref<1x4xf32, #tpu.memory_space<vmem>>, %arg11: memref<36x4xbf16, #tpu.memory_space<vmem>>, %arg12: memref<1x4xf32, #tpu.memory_space<vmem>>, %arg13: memref<1x4xf32, #tpu.memory_space<vmem>>, %arg14: memref<1x4xf32, #tpu.memory_space<vmem>>, %arg15: memref<1x8x2x8x4xf32, #tpu.memory_space<vmem>>, %arg16: memref<12x9x4xbf16, #tpu.memory_space<vmem>>, %arg17: memref<12x9x4xbf16, #tpu.memory_space<vmem>>, %arg18: memref<10x9x4xbf16, #tpu.memory_space<vmem>>, %arg19: memref<10x9x4xbf16, #tpu.memory_space<vmem>>) attributes {dimension_semantics = [#tpu.dimension_semantics<parallel>, #tpu.dimension_semantics<parallel>], iteration_bounds = array<i64: 2, 2>, scalar_prefetch = 0 : i64, scratch_operands = 4 : i64, tpu.core_type = #tpu.core_type<tc>, window_params = [{transform_indices = @transform_0, window_bounds = array<i64: 1, 12, 16, 8>}, {transform_indices = @transform_1, window_bounds = array<i64: 1, 20, 2, 9, 4>}, {pipeline_mode = #tpu.pipeline_mode<synchronous>, transform_indices = @transform_2, window_bounds = array<i64: 8, 4>}, {pipeline_mode = #tpu.pipeline_mode<synchronous>, transform_indices = @transform_3, window_bounds = array<i64: 1, 4>}, {pipeline_mode = #tpu.pipeline_mode<synchronous>, transform_indices = @transform_4, window_bounds = array<i64: 36, 4>}, {pipeline_mode = #tpu.pipeline_mode<synchronous>, transform_indices = @transform_5, window_bounds = array<i64: 36, 4>}, {pipeline_mode = #tpu.pipeline_mode<synchronous>, transform_indices = @transform_6, window_bounds = array<i64: 1, 4>}, {pipeline_mode = #tpu.pipeline_mode<synchronous>, transform_indices = @transform_7, window_bounds = array<i64: 1, 4>}, {pipeline_mode = #tpu.pipeline_mode<synchronous>, transform_indices = @transform_8, window_bounds = array<i64: 1, 4>}, {pipeline_mode = #tpu.pipeline_mode<synchronous>, transform_indices = @transform_9, window_bounds = array<i64: 36, 4>}, {pipeline_mode = #tpu.pipeline_mode<synchronous>, transform_indices = @transform_10, window_bounds = array<i64: 1, 4>}, {pipeline_mode = #tpu.pipeline_mode<synchronous>, transform_indices = @transform_11, window_bounds = array<i64: 1, 4>}, {pipeline_mode = #tpu.pipeline_mode<synchronous>, transform_indices = @transform_12, window_bounds = array<i64: 1, 4>}, {transform_indices = @transform_13, window_bounds = array<i64: 1, 8, 2, 8, 4>}]} {
    %c4_i32 = arith.constant 4 : i32
    %0 = arith.muli %arg1, %c4_i32 : i32
    %c0 = arith.constant 0 : index
    %1 = arith.index_cast %0 : i32 to index
    %c0_0 = arith.constant 0 : index
    %c0_1 = arith.constant 0 : index
    %2 = vector.load %arg2[%c0, %1, %c0_0, %c0_1] : memref<1x12x16x8xbf16, #tpu.memory_space<vmem>>, vector<1x8x16x8xbf16>
    %3 = vector.shape_cast %2 : vector<1x8x16x8xbf16> to vector<8x16x8xbf16>
    %4 = vector.shape_cast %3 : vector<8x16x8xbf16> to vector<128x8xbf16>
    %c0_2 = arith.constant 0 : index
    %c0_3 = arith.constant 0 : index
    %5 = vector.load %arg4[%c0_2, %c0_3] : memref<8x4xbf16, #tpu.memory_space<vmem>>, vector<8x4xbf16>
    %cst = arith.constant dense<0.000000e+00> : vector<128x4xf32>
    %6 = tpu.matmul %4, %5, %cst {dimension_numbers = #tpu.dot_dimension_numbers<[1], [0], [0], [1], [0, 0, 1, 1], [], []>} : vector<128x8xbf16>, vector<8x4xbf16>, vector<128x4xf32> -> vector<128x4xf32>
    %c0_4 = arith.constant 0 : index
    %c0_5 = arith.constant 0 : index
    %7 = vector.load %arg5[%c0_4, %c0_5] : memref<1x4xf32, #tpu.memory_space<vmem>>, vector<1x4xf32>
    %8 = vector.broadcast %7 : vector<1x4xf32> to vector<128x4xf32>
    %9 = arith.addf %6, %8 : vector<128x4xf32>
    %10 = vector.shape_cast %9 : vector<128x4xf32> to vector<8x16x4xf32>
    %11 = vector.extract_strided_slice %10 {offsets = [0, 0, 0], sizes = [8, 8, 4], strides = [1, 1, 1]} : vector<8x16x4xf32> to vector<8x8x4xf32>
    %12 = vector.extract_strided_slice %10 {offsets = [0, 1, 0], sizes = [8, 8, 4], strides = [1, 1, 1]} : vector<8x16x4xf32> to vector<8x8x4xf32>
    %13 = vector.extract_strided_slice %10 {offsets = [0, 2, 0], sizes = [8, 8, 4], strides = [1, 1, 1]} : vector<8x16x4xf32> to vector<8x8x4xf32>
    %cst_6 = arith.constant 2.500000e-01 : f32
    %14 = vector.broadcast %cst_6 : f32 to vector<8x8x4xf32>
    %15 = arith.mulf %14, %11 : vector<8x8x4xf32>
    %cst_7 = arith.constant 7.500000e-01 : f32
    %16 = vector.broadcast %cst_7 : f32 to vector<8x8x4xf32>
    %17 = arith.mulf %16, %12 : vector<8x8x4xf32>
    %18 = arith.addf %15, %17 : vector<8x8x4xf32>
    %cst_8 = arith.constant 7.500000e-01 : f32
    %19 = vector.broadcast %cst_8 : f32 to vector<8x8x4xf32>
    %20 = arith.mulf %19, %12 : vector<8x8x4xf32>
    %cst_9 = arith.constant 2.500000e-01 : f32
    %21 = vector.broadcast %cst_9 : f32 to vector<8x8x4xf32>
    %22 = arith.mulf %21, %13 : vector<8x8x4xf32>
    %23 = arith.addf %20, %22 : vector<8x8x4xf32>
    %24 = vector.extract_strided_slice %18 {offsets = [0, 0, 0], sizes = [6, 8, 4], strides = [1, 1, 1]} : vector<8x8x4xf32> to vector<6x8x4xf32>
    %cst_10 = arith.constant 2.500000e-01 : f32
    %25 = vector.broadcast %cst_10 : f32 to vector<6x8x4xf32>
    %26 = arith.mulf %25, %24 : vector<6x8x4xf32>
    %27 = vector.extract_strided_slice %18 {offsets = [1, 0, 0], sizes = [6, 8, 4], strides = [1, 1, 1]} : vector<8x8x4xf32> to vector<6x8x4xf32>
    %cst_11 = arith.constant 7.500000e-01 : f32
    %28 = vector.broadcast %cst_11 : f32 to vector<6x8x4xf32>
    %29 = arith.mulf %28, %27 : vector<6x8x4xf32>
    %30 = arith.addf %26, %29 : vector<6x8x4xf32>
    %31 = vector.extract_strided_slice %18 {offsets = [1, 0, 0], sizes = [6, 8, 4], strides = [1, 1, 1]} : vector<8x8x4xf32> to vector<6x8x4xf32>
    %cst_12 = arith.constant 7.500000e-01 : f32
    %32 = vector.broadcast %cst_12 : f32 to vector<6x8x4xf32>
    %33 = arith.mulf %32, %31 : vector<6x8x4xf32>
    %34 = vector.extract_strided_slice %18 {offsets = [2, 0, 0], sizes = [6, 8, 4], strides = [1, 1, 1]} : vector<8x8x4xf32> to vector<6x8x4xf32>
    %cst_13 = arith.constant 2.500000e-01 : f32
    %35 = vector.broadcast %cst_13 : f32 to vector<6x8x4xf32>
    %36 = arith.mulf %35, %34 : vector<6x8x4xf32>
    %37 = arith.addf %33, %36 : vector<6x8x4xf32>
    %38 = vector.shape_cast %30 : vector<6x8x4xf32> to vector<6x1x8x4xf32>
    %39 = vector.shape_cast %37 : vector<6x8x4xf32> to vector<6x1x8x4xf32>
    %40 = tpu.concatenate %38, %39 in 1 : vector<6x1x8x4xf32>, vector<6x1x8x4xf32> -> vector<6x2x8x4xf32>
    %41 = vector.shape_cast %40 : vector<6x2x8x4xf32> to vector<12x8x4xf32>
    %42 = arith.truncf %41 : vector<12x8x4xf32> to vector<12x8x4xbf16>
    %c0_14 = arith.constant 0 : index
    %c0_15 = arith.constant 0 : index
    %c0_16 = arith.constant 0 : index
    %43 = vector.load %arg16[%c0_14, %c0_15, %c0_16] : memref<12x9x4xbf16, #tpu.memory_space<vmem>>, vector<12x8x4xbf16>
    tpu.vector_store %arg16[%c0_14, %c0_15, %c0_16], %42 {strides = array<i32>} : memref<12x9x4xbf16, #tpu.memory_space<vmem>>, vector<12x8x4xbf16>,
    %cst_17 = arith.constant 0.000000e+00 : bf16
    %44 = vector.broadcast %cst_17 : bf16 to vector<12x1x4xbf16>
    %c0_18 = arith.constant 0 : index
    %c8 = arith.constant 8 : index
    %c0_19 = arith.constant 0 : index
    %45 = vector.load %arg16[%c0_18, %c8, %c0_19] : memref<12x9x4xbf16, #tpu.memory_space<vmem>>, vector<12x1x4xbf16>
    tpu.vector_store %arg16[%c0_18, %c8, %c0_19], %44 {strides = array<i32>} : memref<12x9x4xbf16, #tpu.memory_space<vmem>>, vector<12x1x4xbf16>,
    %46 = vector.extract_strided_slice %23 {offsets = [0, 0, 0], sizes = [6, 8, 4], strides = [1, 1, 1]} : vector<8x8x4xf32> to vector<6x8x4xf32>
    %cst_20 = arith.constant 2.500000e-01 : f32
    %47 = vector.broadcast %cst_20 : f32 to vector<6x8x4xf32>
    %48 = arith.mulf %47, %46 : vector<6x8x4xf32>
    %49 = vector.extract_strided_slice %23 {offsets = [1, 0, 0], sizes = [6, 8, 4], strides = [1, 1, 1]} : vector<8x8x4xf32> to vector<6x8x4xf32>
    %cst_21 = arith.constant 7.500000e-01 : f32
    %50 = vector.broadcast %cst_21 : f32 to vector<6x8x4xf32>
    %51 = arith.mulf %50, %49 : vector<6x8x4xf32>
    %52 = arith.addf %48, %51 : vector<6x8x4xf32>
    %53 = vector.extract_strided_slice %23 {offsets = [1, 0, 0], sizes = [6, 8, 4], strides = [1, 1, 1]} : vector<8x8x4xf32> to vector<6x8x4xf32>
    %cst_22 = arith.constant 7.500000e-01 : f32
    %54 = vector.broadcast %cst_22 : f32 to vector<6x8x4xf32>
    %55 = arith.mulf %54, %53 : vector<6x8x4xf32>
    %56 = vector.extract_strided_slice %23 {offsets = [2, 0, 0], sizes = [6, 8, 4], strides = [1, 1, 1]} : vector<8x8x4xf32> to vector<6x8x4xf32>
    %cst_23 = arith.constant 2.500000e-01 : f32
    %57 = vector.broadcast %cst_23 : f32 to vector<6x8x4xf32>
    %58 = arith.mulf %57, %56 : vector<6x8x4xf32>
    %59 = arith.addf %55, %58 : vector<6x8x4xf32>
    %60 = vector.shape_cast %52 : vector<6x8x4xf32> to vector<6x1x8x4xf32>
    %61 = vector.shape_cast %59 : vector<6x8x4xf32> to vector<6x1x8x4xf32>
    %62 = tpu.concatenate %60, %61 in 1 : vector<6x1x8x4xf32>, vector<6x1x8x4xf32> -> vector<6x2x8x4xf32>
    %63 = vector.shape_cast %62 : vector<6x2x8x4xf32> to vector<12x8x4xf32>
    %64 = arith.truncf %63 : vector<12x8x4xf32> to vector<12x8x4xbf16>
    %c0_24 = arith.constant 0 : index
    %c1 = arith.constant 1 : index
    %c0_25 = arith.constant 0 : index
    %65 = vector.load %arg17[%c0_24, %c1, %c0_25] : memref<12x9x4xbf16, #tpu.memory_space<vmem>>, vector<12x8x4xbf16>
    tpu.vector_store %arg17[%c0_24, %c1, %c0_25], %64 {strides = array<i32>} : memref<12x9x4xbf16, #tpu.memory_space<vmem>>, vector<12x8x4xbf16>,
    %cst_26 = arith.constant 0.000000e+00 : bf16
    %66 = vector.broadcast %cst_26 : bf16 to vector<12x1x4xbf16>
    %c0_27 = arith.constant 0 : index
    %c0_28 = arith.constant 0 : index
    %c0_29 = arith.constant 0 : index
    %67 = vector.load %arg17[%c0_27, %c0_28, %c0_29] : memref<12x9x4xbf16, #tpu.memory_space<vmem>>, vector<12x1x4xbf16>
    tpu.vector_store %arg17[%c0_27, %c0_28, %c0_29], %66 {strides = array<i32>} : memref<12x9x4xbf16, #tpu.memory_space<vmem>>, vector<12x1x4xbf16>,
    %c0_i32 = arith.constant 0 : i32
    %68 = arith.cmpi eq, %arg1, %c0_i32 : i32
    %69 = arith.extui %68 : i1 to i32
    %c0_i32_30 = arith.constant 0 : i32
    %70 = arith.cmpi ne, %69, %c0_i32_30 : i32
    scf.if %70 {
      %cst_443 = arith.constant 0.000000e+00 : bf16
      %471 = vector.broadcast %cst_443 : bf16 to vector<2x9x4xbf16>
      %c0_444 = arith.constant 0 : index
      %c0_445 = arith.constant 0 : index
      %c0_446 = arith.constant 0 : index
      %472 = vector.load %arg16[%c0_444, %c0_445, %c0_446] : memref<12x9x4xbf16, #tpu.memory_space<vmem>>, vector<2x9x4xbf16>
      tpu.vector_store %arg16[%c0_444, %c0_445, %c0_446], %471 {strides = array<i32>} : memref<12x9x4xbf16, #tpu.memory_space<vmem>>, vector<2x9x4xbf16>,
      %c0_447 = arith.constant 0 : index
      %c0_448 = arith.constant 0 : index
      %c0_449 = arith.constant 0 : index
      %473 = vector.load %arg17[%c0_447, %c0_448, %c0_449] : memref<12x9x4xbf16, #tpu.memory_space<vmem>>, vector<2x9x4xbf16>
      tpu.vector_store %arg17[%c0_447, %c0_448, %c0_449], %471 {strides = array<i32>} : memref<12x9x4xbf16, #tpu.memory_space<vmem>>, vector<2x9x4xbf16>,
    } else {
    }
    %c1_i32 = arith.constant 1 : i32
    %71 = arith.cmpi eq, %arg1, %c1_i32 : i32
    %72 = arith.extui %71 : i1 to i32
    %c0_i32_31 = arith.constant 0 : i32
    %73 = arith.cmpi ne, %72, %c0_i32_31 : i32
    scf.if %73 {
      %cst_443 = arith.constant 0.000000e+00 : bf16
      %471 = vector.broadcast %cst_443 : bf16 to vector<2x9x4xbf16>
      %c10 = arith.constant 10 : index
      %c0_444 = arith.constant 0 : index
      %c0_445 = arith.constant 0 : index
      %472 = vector.load %arg16[%c10, %c0_444, %c0_445] : memref<12x9x4xbf16, #tpu.memory_space<vmem>>, vector<2x9x4xbf16>
      tpu.vector_store %arg16[%c10, %c0_444, %c0_445], %471 {strides = array<i32>} : memref<12x9x4xbf16, #tpu.memory_space<vmem>>, vector<2x9x4xbf16>,
      %c10_446 = arith.constant 10 : index
      %c0_447 = arith.constant 0 : index
      %c0_448 = arith.constant 0 : index
      %473 = vector.load %arg17[%c10_446, %c0_447, %c0_448] : memref<12x9x4xbf16, #tpu.memory_space<vmem>>, vector<2x9x4xbf16>
      tpu.vector_store %arg17[%c10_446, %c0_447, %c0_448], %471 {strides = array<i32>} : memref<12x9x4xbf16, #tpu.memory_space<vmem>>, vector<2x9x4xbf16>,
    } else {
    }
    %c8_i32 = arith.constant 8 : i32
    %74 = arith.muli %arg1, %c8_i32 : i32
    %cst_32 = arith.constant 0.000000e+00 : f32
    %75 = vector.broadcast %cst_32 : f32 to vector<80x4xf32>
    %c0_33 = arith.constant 0 : index
    %c0_34 = arith.constant 0 : index
    %c0_35 = arith.constant 0 : index
    %76 = vector.load %arg17[%c0_33, %c0_34, %c0_35] : memref<12x9x4xbf16, #tpu.memory_space<vmem>>, vector<10x8x4xbf16>
    %77 = vector.shape_cast %76 : vector<10x8x4xbf16> to vector<80x4xbf16>
    %c0_i32_36 = arith.constant 0 : i32
    %78 = arith.addi %74, %c0_i32_36 : i32
    %c0_37 = arith.constant 0 : index
    %79 = arith.index_cast %78 : i32 to index
    %c1_38 = arith.constant 1 : index
    %c0_39 = arith.constant 0 : index
    %c0_40 = arith.constant 0 : index
    %80 = vector.load %arg3[%c0_37, %79, %c1_38, %c0_39, %c0_40] : memref<1x20x2x9x4xbf16, #tpu.memory_space<vmem>>, vector<1x10x1x8x4xbf16>
    %81 = vector.shape_cast %80 : vector<1x10x1x8x4xbf16> to vector<10x8x4xbf16>
    %82 = vector.shape_cast %81 : vector<10x8x4xbf16> to vector<80x4xbf16>
    %c0_41 = arith.constant 0 : index
    %c0_42 = arith.constant 0 : index
    %83 = vector.load %arg6[%c0_41, %c0_42] : memref<36x4xbf16, #tpu.memory_space<vmem>>, vector<4x4xbf16>
    %cst_43 = arith.constant dense<0.000000e+00> : vector<80x4xf32>
    %84 = tpu.matmul %77, %83, %cst_43 {dimension_numbers = #tpu.dot_dimension_numbers<[1], [0], [0], [1], [0, 0, 1, 1], [], []>} : vector<80x4xbf16>, vector<4x4xbf16>, vector<80x4xf32> -> vector<80x4xf32>
    %85 = arith.addf %75, %84 : vector<80x4xf32>
    %c0_44 = arith.constant 0 : index
    %c0_45 = arith.constant 0 : index
    %86 = vector.load %arg7[%c0_44, %c0_45] : memref<36x4xbf16, #tpu.memory_space<vmem>>, vector<4x4xbf16>
    %cst_46 = arith.constant dense<0.000000e+00> : vector<80x4xf32>
    %87 = tpu.matmul %82, %86, %cst_46 {dimension_numbers = #tpu.dot_dimension_numbers<[1], [0], [0], [1], [0, 0, 1, 1], [], []>} : vector<80x4xbf16>, vector<4x4xbf16>, vector<80x4xf32> -> vector<80x4xf32>
    %88 = arith.addf %85, %87 : vector<80x4xf32>
    %c0_47 = arith.constant 0 : index
    %c0_48 = arith.constant 0 : index
    %c0_49 = arith.constant 0 : index
    %89 = vector.load %arg16[%c0_47, %c0_48, %c0_49] : memref<12x9x4xbf16, #tpu.memory_space<vmem>>, vector<10x8x4xbf16>
    %90 = vector.shape_cast %89 : vector<10x8x4xbf16> to vector<80x4xbf16>
    %c0_i32_50 = arith.constant 0 : i32
    %91 = arith.addi %74, %c0_i32_50 : i32
    %c0_51 = arith.constant 0 : index
    %92 = arith.index_cast %91 : i32 to index
    %c0_52 = arith.constant 0 : index
    %c0_53 = arith.constant 0 : index
    %c0_54 = arith.constant 0 : index
    %93 = vector.load %arg3[%c0_51, %92, %c0_52, %c0_53, %c0_54] : memref<1x20x2x9x4xbf16, #tpu.memory_space<vmem>>, vector<1x10x1x8x4xbf16>
    %94 = vector.shape_cast %93 : vector<1x10x1x8x4xbf16> to vector<10x8x4xbf16>
    %95 = vector.shape_cast %94 : vector<10x8x4xbf16> to vector<80x4xbf16>
    %c4 = arith.constant 4 : index
    %c0_55 = arith.constant 0 : index
    %96 = vector.load %arg6[%c4, %c0_55] : memref<36x4xbf16, #tpu.memory_space<vmem>>, vector<4x4xbf16>
    %cst_56 = arith.constant dense<0.000000e+00> : vector<80x4xf32>
    %97 = tpu.matmul %90, %96, %cst_56 {dimension_numbers = #tpu.dot_dimension_numbers<[1], [0], [0], [1], [0, 0, 1, 1], [], []>} : vector<80x4xbf16>, vector<4x4xbf16>, vector<80x4xf32> -> vector<80x4xf32>
    %98 = arith.addf %88, %97 : vector<80x4xf32>
    %c4_57 = arith.constant 4 : index
    %c0_58 = arith.constant 0 : index
    %99 = vector.load %arg7[%c4_57, %c0_58] : memref<36x4xbf16, #tpu.memory_space<vmem>>, vector<4x4xbf16>
    %cst_59 = arith.constant dense<0.000000e+00> : vector<80x4xf32>
    %100 = tpu.matmul %95, %99, %cst_59 {dimension_numbers = #tpu.dot_dimension_numbers<[1], [0], [0], [1], [0, 0, 1, 1], [], []>} : vector<80x4xbf16>, vector<4x4xbf16>, vector<80x4xf32> -> vector<80x4xf32>
    %101 = arith.addf %98, %100 : vector<80x4xf32>
    %c0_60 = arith.constant 0 : index
    %c1_61 = arith.constant 1 : index
    %c0_62 = arith.constant 0 : index
    %102 = vector.load %arg17[%c0_60, %c1_61, %c0_62] : memref<12x9x4xbf16, #tpu.memory_space<vmem>>, vector<10x8x4xbf16>
    %103 = vector.shape_cast %102 : vector<10x8x4xbf16> to vector<80x4xbf16>
    %c0_i32_63 = arith.constant 0 : i32
    %104 = arith.addi %74, %c0_i32_63 : i32
    %c0_64 = arith.constant 0 : index
    %105 = arith.index_cast %104 : i32 to index
    %c1_65 = arith.constant 1 : index
    %c1_66 = arith.constant 1 : index
    %c0_67 = arith.constant 0 : index
    %106 = vector.load %arg3[%c0_64, %105, %c1_65, %c1_66, %c0_67] : memref<1x20x2x9x4xbf16, #tpu.memory_space<vmem>>, vector<1x10x1x8x4xbf16>
    %107 = vector.shape_cast %106 : vector<1x10x1x8x4xbf16> to vector<10x8x4xbf16>
    %108 = vector.shape_cast %107 : vector<10x8x4xbf16> to vector<80x4xbf16>
    %c8_68 = arith.constant 8 : index
    %c0_69 = arith.constant 0 : index
    %109 = vector.load %arg6[%c8_68, %c0_69] : memref<36x4xbf16, #tpu.memory_space<vmem>>, vector<4x4xbf16>
    %cst_70 = arith.constant dense<0.000000e+00> : vector<80x4xf32>
    %110 = tpu.matmul %103, %109, %cst_70 {dimension_numbers = #tpu.dot_dimension_numbers<[1], [0], [0], [1], [0, 0, 1, 1], [], []>} : vector<80x4xbf16>, vector<4x4xbf16>, vector<80x4xf32> -> vector<80x4xf32>
    %111 = arith.addf %101, %110 : vector<80x4xf32>
    %c8_71 = arith.constant 8 : index
    %c0_72 = arith.constant 0 : index
    %112 = vector.load %arg7[%c8_71, %c0_72] : memref<36x4xbf16, #tpu.memory_space<vmem>>, vector<4x4xbf16>
    %cst_73 = arith.constant dense<0.000000e+00> : vector<80x4xf32>
    %113 = tpu.matmul %108, %112, %cst_73 {dimension_numbers = #tpu.dot_dimension_numbers<[1], [0], [0], [1], [0, 0, 1, 1], [], []>} : vector<80x4xbf16>, vector<4x4xbf16>, vector<80x4xf32> -> vector<80x4xf32>
    %114 = arith.addf %111, %113 : vector<80x4xf32>
    %c1_74 = arith.constant 1 : index
    %c0_75 = arith.constant 0 : index
    %c0_76 = arith.constant 0 : index
    %115 = vector.load %arg17[%c1_74, %c0_75, %c0_76] : memref<12x9x4xbf16, #tpu.memory_space<vmem>>, vector<10x8x4xbf16>
    %116 = vector.shape_cast %115 : vector<10x8x4xbf16> to vector<80x4xbf16>
    %c1_i32_77 = arith.constant 1 : i32
    %117 = arith.addi %74, %c1_i32_77 : i32
    %c0_78 = arith.constant 0 : index
    %118 = arith.index_cast %117 : i32 to index
    %c1_79 = arith.constant 1 : index
    %c0_80 = arith.constant 0 : index
    %c0_81 = arith.constant 0 : index
    %119 = vector.load %arg3[%c0_78, %118, %c1_79, %c0_80, %c0_81] : memref<1x20x2x9x4xbf16, #tpu.memory_space<vmem>>, vector<1x10x1x8x4xbf16>
    %120 = vector.shape_cast %119 : vector<1x10x1x8x4xbf16> to vector<10x8x4xbf16>
    %121 = vector.shape_cast %120 : vector<10x8x4xbf16> to vector<80x4xbf16>
    %c12 = arith.constant 12 : index
    %c0_82 = arith.constant 0 : index
    %122 = vector.load %arg6[%c12, %c0_82] : memref<36x4xbf16, #tpu.memory_space<vmem>>, vector<4x4xbf16>
    %cst_83 = arith.constant dense<0.000000e+00> : vector<80x4xf32>
    %123 = tpu.matmul %116, %122, %cst_83 {dimension_numbers = #tpu.dot_dimension_numbers<[1], [0], [0], [1], [0, 0, 1, 1], [], []>} : vector<80x4xbf16>, vector<4x4xbf16>, vector<80x4xf32> -> vector<80x4xf32>
    %124 = arith.addf %114, %123 : vector<80x4xf32>
    %c12_84 = arith.constant 12 : index
    %c0_85 = arith.constant 0 : index
    %125 = vector.load %arg7[%c12_84, %c0_85] : memref<36x4xbf16, #tpu.memory_space<vmem>>, vector<4x4xbf16>
    %cst_86 = arith.constant dense<0.000000e+00> : vector<80x4xf32>
    %126 = tpu.matmul %121, %125, %cst_86 {dimension_numbers = #tpu.dot_dimension_numbers<[1], [0], [0], [1], [0, 0, 1, 1], [], []>} : vector<80x4xbf16>, vector<4x4xbf16>, vector<80x4xf32> -> vector<80x4xf32>
    %127 = arith.addf %124, %126 : vector<80x4xf32>
    %c1_87 = arith.constant 1 : index
    %c0_88 = arith.constant 0 : index
    %c0_89 = arith.constant 0 : index
    %128 = vector.load %arg16[%c1_87, %c0_88, %c0_89] : memref<12x9x4xbf16, #tpu.memory_space<vmem>>, vector<10x8x4xbf16>
    %129 = vector.shape_cast %128 : vector<10x8x4xbf16> to vector<80x4xbf16>
    %c1_i32_90 = arith.constant 1 : i32
    %130 = arith.addi %74, %c1_i32_90 : i32
    %c0_91 = arith.constant 0 : index
    %131 = arith.index_cast %130 : i32 to index
    %c0_92 = arith.constant 0 : index
    %c0_93 = arith.constant 0 : index
    %c0_94 = arith.constant 0 : index
    %132 = vector.load %arg3[%c0_91, %131, %c0_92, %c0_93, %c0_94] : memref<1x20x2x9x4xbf16, #tpu.memory_space<vmem>>, vector<1x10x1x8x4xbf16>
    %133 = vector.shape_cast %132 : vector<1x10x1x8x4xbf16> to vector<10x8x4xbf16>
    %134 = vector.shape_cast %133 : vector<10x8x4xbf16> to vector<80x4xbf16>
    %c16 = arith.constant 16 : index
    %c0_95 = arith.constant 0 : index
    %135 = vector.load %arg6[%c16, %c0_95] : memref<36x4xbf16, #tpu.memory_space<vmem>>, vector<4x4xbf16>
    %cst_96 = arith.constant dense<0.000000e+00> : vector<80x4xf32>
    %136 = tpu.matmul %129, %135, %cst_96 {dimension_numbers = #tpu.dot_dimension_numbers<[1], [0], [0], [1], [0, 0, 1, 1], [], []>} : vector<80x4xbf16>, vector<4x4xbf16>, vector<80x4xf32> -> vector<80x4xf32>
    %137 = arith.addf %127, %136 : vector<80x4xf32>
    %c16_97 = arith.constant 16 : index
    %c0_98 = arith.constant 0 : index
    %138 = vector.load %arg7[%c16_97, %c0_98] : memref<36x4xbf16, #tpu.memory_space<vmem>>, vector<4x4xbf16>
    %cst_99 = arith.constant dense<0.000000e+00> : vector<80x4xf32>
    %139 = tpu.matmul %134, %138, %cst_99 {dimension_numbers = #tpu.dot_dimension_numbers<[1], [0], [0], [1], [0, 0, 1, 1], [], []>} : vector<80x4xbf16>, vector<4x4xbf16>, vector<80x4xf32> -> vector<80x4xf32>
    %140 = arith.addf %137, %139 : vector<80x4xf32>
    %c1_100 = arith.constant 1 : index
    %c1_101 = arith.constant 1 : index
    %c0_102 = arith.constant 0 : index
    %141 = vector.load %arg17[%c1_100, %c1_101, %c0_102] : memref<12x9x4xbf16, #tpu.memory_space<vmem>>, vector<10x8x4xbf16>
    %142 = vector.shape_cast %141 : vector<10x8x4xbf16> to vector<80x4xbf16>
    %c1_i32_103 = arith.constant 1 : i32
    %143 = arith.addi %74, %c1_i32_103 : i32
    %c0_104 = arith.constant 0 : index
    %144 = arith.index_cast %143 : i32 to index
    %c1_105 = arith.constant 1 : index
    %c1_106 = arith.constant 1 : index
    %c0_107 = arith.constant 0 : index
    %145 = vector.load %arg3[%c0_104, %144, %c1_105, %c1_106, %c0_107] : memref<1x20x2x9x4xbf16, #tpu.memory_space<vmem>>, vector<1x10x1x8x4xbf16>
    %146 = vector.shape_cast %145 : vector<1x10x1x8x4xbf16> to vector<10x8x4xbf16>
    %147 = vector.shape_cast %146 : vector<10x8x4xbf16> to vector<80x4xbf16>
    %c20 = arith.constant 20 : index
    %c0_108 = arith.constant 0 : index
    %148 = vector.load %arg6[%c20, %c0_108] : memref<36x4xbf16, #tpu.memory_space<vmem>>, vector<4x4xbf16>
    %cst_109 = arith.constant dense<0.000000e+00> : vector<80x4xf32>
    %149 = tpu.matmul %142, %148, %cst_109 {dimension_numbers = #tpu.dot_dimension_numbers<[1], [0], [0], [1], [0, 0, 1, 1], [], []>} : vector<80x4xbf16>, vector<4x4xbf16>, vector<80x4xf32> -> vector<80x4xf32>
    %150 = arith.addf %140, %149 : vector<80x4xf32>
    %c20_110 = arith.constant 20 : index
    %c0_111 = arith.constant 0 : index
    %151 = vector.load %arg7[%c20_110, %c0_111] : memref<36x4xbf16, #tpu.memory_space<vmem>>, vector<4x4xbf16>
    %cst_112 = arith.constant dense<0.000000e+00> : vector<80x4xf32>
    %152 = tpu.matmul %147, %151, %cst_112 {dimension_numbers = #tpu.dot_dimension_numbers<[1], [0], [0], [1], [0, 0, 1, 1], [], []>} : vector<80x4xbf16>, vector<4x4xbf16>, vector<80x4xf32> -> vector<80x4xf32>
    %153 = arith.addf %150, %152 : vector<80x4xf32>
    %c2 = arith.constant 2 : index
    %c0_113 = arith.constant 0 : index
    %c0_114 = arith.constant 0 : index
    %154 = vector.load %arg17[%c2, %c0_113, %c0_114] : memref<12x9x4xbf16, #tpu.memory_space<vmem>>, vector<10x8x4xbf16>
    %155 = vector.shape_cast %154 : vector<10x8x4xbf16> to vector<80x4xbf16>
    %c2_i32 = arith.constant 2 : i32
    %156 = arith.addi %74, %c2_i32 : i32
    %c0_115 = arith.constant 0 : index
    %157 = arith.index_cast %156 : i32 to index
    %c1_116 = arith.constant 1 : index
    %c0_117 = arith.constant 0 : index
    %c0_118 = arith.constant 0 : index
    %158 = vector.load %arg3[%c0_115, %157, %c1_116, %c0_117, %c0_118] : memref<1x20x2x9x4xbf16, #tpu.memory_space<vmem>>, vector<1x10x1x8x4xbf16>
    %159 = vector.shape_cast %158 : vector<1x10x1x8x4xbf16> to vector<10x8x4xbf16>
    %160 = vector.shape_cast %159 : vector<10x8x4xbf16> to vector<80x4xbf16>
    %c24 = arith.constant 24 : index
    %c0_119 = arith.constant 0 : index
    %161 = vector.load %arg6[%c24, %c0_119] : memref<36x4xbf16, #tpu.memory_space<vmem>>, vector<4x4xbf16>
    %cst_120 = arith.constant dense<0.000000e+00> : vector<80x4xf32>
    %162 = tpu.matmul %155, %161, %cst_120 {dimension_numbers = #tpu.dot_dimension_numbers<[1], [0], [0], [1], [0, 0, 1, 1], [], []>} : vector<80x4xbf16>, vector<4x4xbf16>, vector<80x4xf32> -> vector<80x4xf32>
    %163 = arith.addf %153, %162 : vector<80x4xf32>
    %c24_121 = arith.constant 24 : index
    %c0_122 = arith.constant 0 : index
    %164 = vector.load %arg7[%c24_121, %c0_122] : memref<36x4xbf16, #tpu.memory_space<vmem>>, vector<4x4xbf16>
    %cst_123 = arith.constant dense<0.000000e+00> : vector<80x4xf32>
    %165 = tpu.matmul %160, %164, %cst_123 {dimension_numbers = #tpu.dot_dimension_numbers<[1], [0], [0], [1], [0, 0, 1, 1], [], []>} : vector<80x4xbf16>, vector<4x4xbf16>, vector<80x4xf32> -> vector<80x4xf32>
    %166 = arith.addf %163, %165 : vector<80x4xf32>
    %c2_124 = arith.constant 2 : index
    %c0_125 = arith.constant 0 : index
    %c0_126 = arith.constant 0 : index
    %167 = vector.load %arg16[%c2_124, %c0_125, %c0_126] : memref<12x9x4xbf16, #tpu.memory_space<vmem>>, vector<10x8x4xbf16>
    %168 = vector.shape_cast %167 : vector<10x8x4xbf16> to vector<80x4xbf16>
    %c2_i32_127 = arith.constant 2 : i32
    %169 = arith.addi %74, %c2_i32_127 : i32
    %c0_128 = arith.constant 0 : index
    %170 = arith.index_cast %169 : i32 to index
    %c0_129 = arith.constant 0 : index
    %c0_130 = arith.constant 0 : index
    %c0_131 = arith.constant 0 : index
    %171 = vector.load %arg3[%c0_128, %170, %c0_129, %c0_130, %c0_131] : memref<1x20x2x9x4xbf16, #tpu.memory_space<vmem>>, vector<1x10x1x8x4xbf16>
    %172 = vector.shape_cast %171 : vector<1x10x1x8x4xbf16> to vector<10x8x4xbf16>
    %173 = vector.shape_cast %172 : vector<10x8x4xbf16> to vector<80x4xbf16>
    %c28 = arith.constant 28 : index
    %c0_132 = arith.constant 0 : index
    %174 = vector.load %arg6[%c28, %c0_132] : memref<36x4xbf16, #tpu.memory_space<vmem>>, vector<4x4xbf16>
    %cst_133 = arith.constant dense<0.000000e+00> : vector<80x4xf32>
    %175 = tpu.matmul %168, %174, %cst_133 {dimension_numbers = #tpu.dot_dimension_numbers<[1], [0], [0], [1], [0, 0, 1, 1], [], []>} : vector<80x4xbf16>, vector<4x4xbf16>, vector<80x4xf32> -> vector<80x4xf32>
    %176 = arith.addf %166, %175 : vector<80x4xf32>
    %c28_134 = arith.constant 28 : index
    %c0_135 = arith.constant 0 : index
    %177 = vector.load %arg7[%c28_134, %c0_135] : memref<36x4xbf16, #tpu.memory_space<vmem>>, vector<4x4xbf16>
    %cst_136 = arith.constant dense<0.000000e+00> : vector<80x4xf32>
    %178 = tpu.matmul %173, %177, %cst_136 {dimension_numbers = #tpu.dot_dimension_numbers<[1], [0], [0], [1], [0, 0, 1, 1], [], []>} : vector<80x4xbf16>, vector<4x4xbf16>, vector<80x4xf32> -> vector<80x4xf32>
    %179 = arith.addf %176, %178 : vector<80x4xf32>
    %c2_137 = arith.constant 2 : index
    %c1_138 = arith.constant 1 : index
    %c0_139 = arith.constant 0 : index
    %180 = vector.load %arg17[%c2_137, %c1_138, %c0_139] : memref<12x9x4xbf16, #tpu.memory_space<vmem>>, vector<10x8x4xbf16>
    %181 = vector.shape_cast %180 : vector<10x8x4xbf16> to vector<80x4xbf16>
    %c2_i32_140 = arith.constant 2 : i32
    %182 = arith.addi %74, %c2_i32_140 : i32
    %c0_141 = arith.constant 0 : index
    %183 = arith.index_cast %182 : i32 to index
    %c1_142 = arith.constant 1 : index
    %c1_143 = arith.constant 1 : index
    %c0_144 = arith.constant 0 : index
    %184 = vector.load %arg3[%c0_141, %183, %c1_142, %c1_143, %c0_144] : memref<1x20x2x9x4xbf16, #tpu.memory_space<vmem>>, vector<1x10x1x8x4xbf16>
    %185 = vector.shape_cast %184 : vector<1x10x1x8x4xbf16> to vector<10x8x4xbf16>
    %186 = vector.shape_cast %185 : vector<10x8x4xbf16> to vector<80x4xbf16>
    %c32 = arith.constant 32 : index
    %c0_145 = arith.constant 0 : index
    %187 = vector.load %arg6[%c32, %c0_145] : memref<36x4xbf16, #tpu.memory_space<vmem>>, vector<4x4xbf16>
    %cst_146 = arith.constant dense<0.000000e+00> : vector<80x4xf32>
    %188 = tpu.matmul %181, %187, %cst_146 {dimension_numbers = #tpu.dot_dimension_numbers<[1], [0], [0], [1], [0, 0, 1, 1], [], []>} : vector<80x4xbf16>, vector<4x4xbf16>, vector<80x4xf32> -> vector<80x4xf32>
    %189 = arith.addf %179, %188 : vector<80x4xf32>
    %c32_147 = arith.constant 32 : index
    %c0_148 = arith.constant 0 : index
    %190 = vector.load %arg7[%c32_147, %c0_148] : memref<36x4xbf16, #tpu.memory_space<vmem>>, vector<4x4xbf16>
    %cst_149 = arith.constant dense<0.000000e+00> : vector<80x4xf32>
    %191 = tpu.matmul %186, %190, %cst_149 {dimension_numbers = #tpu.dot_dimension_numbers<[1], [0], [0], [1], [0, 0, 1, 1], [], []>} : vector<80x4xbf16>, vector<4x4xbf16>, vector<80x4xf32> -> vector<80x4xf32>
    %192 = arith.addf %189, %191 : vector<80x4xf32>
    %c0_150 = arith.constant 0 : index
    %c0_151 = arith.constant 0 : index
    %193 = vector.load %arg8[%c0_150, %c0_151] : memref<1x4xf32, #tpu.memory_space<vmem>>, vector<1x4xf32>
    %194 = vector.broadcast %193 : vector<1x4xf32> to vector<80x4xf32>
    %195 = arith.addf %192, %194 : vector<80x4xf32>
    %cst_152 = arith.constant 0.000000e+00 : f32
    %196 = vector.broadcast %cst_152 : f32 to vector<80x4xf32>
    %197 = arith.maximumf %195, %196 : vector<80x4xf32>
    %c0_153 = arith.constant 0 : index
    %c0_154 = arith.constant 0 : index
    %198 = vector.load %arg9[%c0_153, %c0_154] : memref<1x4xf32, #tpu.memory_space<vmem>>, vector<1x4xf32>
    %199 = vector.broadcast %198 : vector<1x4xf32> to vector<80x4xf32>
    %200 = arith.mulf %197, %199 : vector<80x4xf32>
    %c0_155 = arith.constant 0 : index
    %c0_156 = arith.constant 0 : index
    %201 = vector.load %arg10[%c0_155, %c0_156] : memref<1x4xf32, #tpu.memory_space<vmem>>, vector<1x4xf32>
    %202 = vector.broadcast %201 : vector<1x4xf32> to vector<80x4xf32>
    %203 = arith.addf %200, %202 : vector<80x4xf32>
    %204 = vector.shape_cast %203 : vector<80x4xf32> to vector<10x8x4xf32>
    %205 = arith.truncf %204 : vector<10x8x4xf32> to vector<10x8x4xbf16>
    %c0_157 = arith.constant 0 : index
    %c0_158 = arith.constant 0 : index
    %c0_159 = arith.constant 0 : index
    %206 = vector.load %arg18[%c0_157, %c0_158, %c0_159] : memref<10x9x4xbf16, #tpu.memory_space<vmem>>, vector<10x8x4xbf16>
    tpu.vector_store %arg18[%c0_157, %c0_158, %c0_159], %205 {strides = array<i32>} : memref<10x9x4xbf16, #tpu.memory_space<vmem>>, vector<10x8x4xbf16>,
    %cst_160 = arith.constant 0.000000e+00 : bf16
    %207 = vector.broadcast %cst_160 : bf16 to vector<10x1x4xbf16>
    %c0_161 = arith.constant 0 : index
    %c8_162 = arith.constant 8 : index
    %c0_163 = arith.constant 0 : index
    %208 = vector.load %arg18[%c0_161, %c8_162, %c0_163] : memref<10x9x4xbf16, #tpu.memory_space<vmem>>, vector<10x1x4xbf16>
    tpu.vector_store %arg18[%c0_161, %c8_162, %c0_163], %207 {strides = array<i32>} : memref<10x9x4xbf16, #tpu.memory_space<vmem>>, vector<10x1x4xbf16>,
    %cst_164 = arith.constant 0.000000e+00 : f32
    %209 = vector.broadcast %cst_164 : f32 to vector<80x4xf32>
    %c0_165 = arith.constant 0 : index
    %c0_166 = arith.constant 0 : index
    %c0_167 = arith.constant 0 : index
    %210 = vector.load %arg16[%c0_165, %c0_166, %c0_167] : memref<12x9x4xbf16, #tpu.memory_space<vmem>>, vector<10x8x4xbf16>
    %211 = vector.shape_cast %210 : vector<10x8x4xbf16> to vector<80x4xbf16>
    %c0_i32_168 = arith.constant 0 : i32
    %212 = arith.addi %74, %c0_i32_168 : i32
    %c0_169 = arith.constant 0 : index
    %213 = arith.index_cast %212 : i32 to index
    %c0_170 = arith.constant 0 : index
    %c0_171 = arith.constant 0 : index
    %c0_172 = arith.constant 0 : index
    %214 = vector.load %arg3[%c0_169, %213, %c0_170, %c0_171, %c0_172] : memref<1x20x2x9x4xbf16, #tpu.memory_space<vmem>>, vector<1x10x1x8x4xbf16>
    %215 = vector.shape_cast %214 : vector<1x10x1x8x4xbf16> to vector<10x8x4xbf16>
    %216 = vector.shape_cast %215 : vector<10x8x4xbf16> to vector<80x4xbf16>
    %c0_173 = arith.constant 0 : index
    %c0_174 = arith.constant 0 : index
    %217 = vector.load %arg6[%c0_173, %c0_174] : memref<36x4xbf16, #tpu.memory_space<vmem>>, vector<4x4xbf16>
    %cst_175 = arith.constant dense<0.000000e+00> : vector<80x4xf32>
    %218 = tpu.matmul %211, %217, %cst_175 {dimension_numbers = #tpu.dot_dimension_numbers<[1], [0], [0], [1], [0, 0, 1, 1], [], []>} : vector<80x4xbf16>, vector<4x4xbf16>, vector<80x4xf32> -> vector<80x4xf32>
    %219 = arith.addf %209, %218 : vector<80x4xf32>
    %c0_176 = arith.constant 0 : index
    %c0_177 = arith.constant 0 : index
    %220 = vector.load %arg7[%c0_176, %c0_177] : memref<36x4xbf16, #tpu.memory_space<vmem>>, vector<4x4xbf16>
    %cst_178 = arith.constant dense<0.000000e+00> : vector<80x4xf32>
    %221 = tpu.matmul %216, %220, %cst_178 {dimension_numbers = #tpu.dot_dimension_numbers<[1], [0], [0], [1], [0, 0, 1, 1], [], []>} : vector<80x4xbf16>, vector<4x4xbf16>, vector<80x4xf32> -> vector<80x4xf32>
    %222 = arith.addf %219, %221 : vector<80x4xf32>
    %c0_179 = arith.constant 0 : index
    %c1_180 = arith.constant 1 : index
    %c0_181 = arith.constant 0 : index
    %223 = vector.load %arg17[%c0_179, %c1_180, %c0_181] : memref<12x9x4xbf16, #tpu.memory_space<vmem>>, vector<10x8x4xbf16>
    %224 = vector.shape_cast %223 : vector<10x8x4xbf16> to vector<80x4xbf16>
    %c0_i32_182 = arith.constant 0 : i32
    %225 = arith.addi %74, %c0_i32_182 : i32
    %c0_183 = arith.constant 0 : index
    %226 = arith.index_cast %225 : i32 to index
    %c1_184 = arith.constant 1 : index
    %c1_185 = arith.constant 1 : index
    %c0_186 = arith.constant 0 : index
    %227 = vector.load %arg3[%c0_183, %226, %c1_184, %c1_185, %c0_186] : memref<1x20x2x9x4xbf16, #tpu.memory_space<vmem>>, vector<1x10x1x8x4xbf16>
    %228 = vector.shape_cast %227 : vector<1x10x1x8x4xbf16> to vector<10x8x4xbf16>
    %229 = vector.shape_cast %228 : vector<10x8x4xbf16> to vector<80x4xbf16>
    %c4_187 = arith.constant 4 : index
    %c0_188 = arith.constant 0 : index
    %230 = vector.load %arg6[%c4_187, %c0_188] : memref<36x4xbf16, #tpu.memory_space<vmem>>, vector<4x4xbf16>
    %cst_189 = arith.constant dense<0.000000e+00> : vector<80x4xf32>
    %231 = tpu.matmul %224, %230, %cst_189 {dimension_numbers = #tpu.dot_dimension_numbers<[1], [0], [0], [1], [0, 0, 1, 1], [], []>} : vector<80x4xbf16>, vector<4x4xbf16>, vector<80x4xf32> -> vector<80x4xf32>
    %232 = arith.addf %222, %231 : vector<80x4xf32>
    %c4_190 = arith.constant 4 : index
    %c0_191 = arith.constant 0 : index
    %233 = vector.load %arg7[%c4_190, %c0_191] : memref<36x4xbf16, #tpu.memory_space<vmem>>, vector<4x4xbf16>
    %cst_192 = arith.constant dense<0.000000e+00> : vector<80x4xf32>
    %234 = tpu.matmul %229, %233, %cst_192 {dimension_numbers = #tpu.dot_dimension_numbers<[1], [0], [0], [1], [0, 0, 1, 1], [], []>} : vector<80x4xbf16>, vector<4x4xbf16>, vector<80x4xf32> -> vector<80x4xf32>
    %235 = arith.addf %232, %234 : vector<80x4xf32>
    %c0_193 = arith.constant 0 : index
    %c1_194 = arith.constant 1 : index
    %c0_195 = arith.constant 0 : index
    %236 = vector.load %arg16[%c0_193, %c1_194, %c0_195] : memref<12x9x4xbf16, #tpu.memory_space<vmem>>, vector<10x8x4xbf16>
    %237 = vector.shape_cast %236 : vector<10x8x4xbf16> to vector<80x4xbf16>
    %c0_i32_196 = arith.constant 0 : i32
    %238 = arith.addi %74, %c0_i32_196 : i32
    %c0_197 = arith.constant 0 : index
    %239 = arith.index_cast %238 : i32 to index
    %c0_198 = arith.constant 0 : index
    %c1_199 = arith.constant 1 : index
    %c0_200 = arith.constant 0 : index
    %240 = vector.load %arg3[%c0_197, %239, %c0_198, %c1_199, %c0_200] : memref<1x20x2x9x4xbf16, #tpu.memory_space<vmem>>, vector<1x10x1x8x4xbf16>
    %241 = vector.shape_cast %240 : vector<1x10x1x8x4xbf16> to vector<10x8x4xbf16>
    %242 = vector.shape_cast %241 : vector<10x8x4xbf16> to vector<80x4xbf16>
    %c8_201 = arith.constant 8 : index
    %c0_202 = arith.constant 0 : index
    %243 = vector.load %arg6[%c8_201, %c0_202] : memref<36x4xbf16, #tpu.memory_space<vmem>>, vector<4x4xbf16>
    %cst_203 = arith.constant dense<0.000000e+00> : vector<80x4xf32>
    %244 = tpu.matmul %237, %243, %cst_203 {dimension_numbers = #tpu.dot_dimension_numbers<[1], [0], [0], [1], [0, 0, 1, 1], [], []>} : vector<80x4xbf16>, vector<4x4xbf16>, vector<80x4xf32> -> vector<80x4xf32>
    %245 = arith.addf %235, %244 : vector<80x4xf32>
    %c8_204 = arith.constant 8 : index
    %c0_205 = arith.constant 0 : index
    %246 = vector.load %arg7[%c8_204, %c0_205] : memref<36x4xbf16, #tpu.memory_space<vmem>>, vector<4x4xbf16>
    %cst_206 = arith.constant dense<0.000000e+00> : vector<80x4xf32>
    %247 = tpu.matmul %242, %246, %cst_206 {dimension_numbers = #tpu.dot_dimension_numbers<[1], [0], [0], [1], [0, 0, 1, 1], [], []>} : vector<80x4xbf16>, vector<4x4xbf16>, vector<80x4xf32> -> vector<80x4xf32>
    %248 = arith.addf %245, %247 : vector<80x4xf32>
    %c1_207 = arith.constant 1 : index
    %c0_208 = arith.constant 0 : index
    %c0_209 = arith.constant 0 : index
    %249 = vector.load %arg16[%c1_207, %c0_208, %c0_209] : memref<12x9x4xbf16, #tpu.memory_space<vmem>>, vector<10x8x4xbf16>
    %250 = vector.shape_cast %249 : vector<10x8x4xbf16> to vector<80x4xbf16>
    %c1_i32_210 = arith.constant 1 : i32
    %251 = arith.addi %74, %c1_i32_210 : i32
    %c0_211 = arith.constant 0 : index
    %252 = arith.index_cast %251 : i32 to index
    %c0_212 = arith.constant 0 : index
    %c0_213 = arith.constant 0 : index
    %c0_214 = arith.constant 0 : index
    %253 = vector.load %arg3[%c0_211, %252, %c0_212, %c0_213, %c0_214] : memref<1x20x2x9x4xbf16, #tpu.memory_space<vmem>>, vector<1x10x1x8x4xbf16>
    %254 = vector.shape_cast %253 : vector<1x10x1x8x4xbf16> to vector<10x8x4xbf16>
    %255 = vector.shape_cast %254 : vector<10x8x4xbf16> to vector<80x4xbf16>
    %c12_215 = arith.constant 12 : index
    %c0_216 = arith.constant 0 : index
    %256 = vector.load %arg6[%c12_215, %c0_216] : memref<36x4xbf16, #tpu.memory_space<vmem>>, vector<4x4xbf16>
    %cst_217 = arith.constant dense<0.000000e+00> : vector<80x4xf32>
    %257 = tpu.matmul %250, %256, %cst_217 {dimension_numbers = #tpu.dot_dimension_numbers<[1], [0], [0], [1], [0, 0, 1, 1], [], []>} : vector<80x4xbf16>, vector<4x4xbf16>, vector<80x4xf32> -> vector<80x4xf32>
    %258 = arith.addf %248, %257 : vector<80x4xf32>
    %c12_218 = arith.constant 12 : index
    %c0_219 = arith.constant 0 : index
    %259 = vector.load %arg7[%c12_218, %c0_219] : memref<36x4xbf16, #tpu.memory_space<vmem>>, vector<4x4xbf16>
    %cst_220 = arith.constant dense<0.000000e+00> : vector<80x4xf32>
    %260 = tpu.matmul %255, %259, %cst_220 {dimension_numbers = #tpu.dot_dimension_numbers<[1], [0], [0], [1], [0, 0, 1, 1], [], []>} : vector<80x4xbf16>, vector<4x4xbf16>, vector<80x4xf32> -> vector<80x4xf32>
    %261 = arith.addf %258, %260 : vector<80x4xf32>
    %c1_221 = arith.constant 1 : index
    %c1_222 = arith.constant 1 : index
    %c0_223 = arith.constant 0 : index
    %262 = vector.load %arg17[%c1_221, %c1_222, %c0_223] : memref<12x9x4xbf16, #tpu.memory_space<vmem>>, vector<10x8x4xbf16>
    %263 = vector.shape_cast %262 : vector<10x8x4xbf16> to vector<80x4xbf16>
    %c1_i32_224 = arith.constant 1 : i32
    %264 = arith.addi %74, %c1_i32_224 : i32
    %c0_225 = arith.constant 0 : index
    %265 = arith.index_cast %264 : i32 to index
    %c1_226 = arith.constant 1 : index
    %c1_227 = arith.constant 1 : index
    %c0_228 = arith.constant 0 : index
    %266 = vector.load %arg3[%c0_225, %265, %c1_226, %c1_227, %c0_228] : memref<1x20x2x9x4xbf16, #tpu.memory_space<vmem>>, vector<1x10x1x8x4xbf16>
    %267 = vector.shape_cast %266 : vector<1x10x1x8x4xbf16> to vector<10x8x4xbf16>
    %268 = vector.shape_cast %267 : vector<10x8x4xbf16> to vector<80x4xbf16>
    %c16_229 = arith.constant 16 : index
    %c0_230 = arith.constant 0 : index
    %269 = vector.load %arg6[%c16_229, %c0_230] : memref<36x4xbf16, #tpu.memory_space<vmem>>, vector<4x4xbf16>
    %cst_231 = arith.constant dense<0.000000e+00> : vector<80x4xf32>
    %270 = tpu.matmul %263, %269, %cst_231 {dimension_numbers = #tpu.dot_dimension_numbers<[1], [0], [0], [1], [0, 0, 1, 1], [], []>} : vector<80x4xbf16>, vector<4x4xbf16>, vector<80x4xf32> -> vector<80x4xf32>
    %271 = arith.addf %261, %270 : vector<80x4xf32>
    %c16_232 = arith.constant 16 : index
    %c0_233 = arith.constant 0 : index
    %272 = vector.load %arg7[%c16_232, %c0_233] : memref<36x4xbf16, #tpu.memory_space<vmem>>, vector<4x4xbf16>
    %cst_234 = arith.constant dense<0.000000e+00> : vector<80x4xf32>
    %273 = tpu.matmul %268, %272, %cst_234 {dimension_numbers = #tpu.dot_dimension_numbers<[1], [0], [0], [1], [0, 0, 1, 1], [], []>} : vector<80x4xbf16>, vector<4x4xbf16>, vector<80x4xf32> -> vector<80x4xf32>
    %274 = arith.addf %271, %273 : vector<80x4xf32>
    %c1_235 = arith.constant 1 : index
    %c1_236 = arith.constant 1 : index
    %c0_237 = arith.constant 0 : index
    %275 = vector.load %arg16[%c1_235, %c1_236, %c0_237] : memref<12x9x4xbf16, #tpu.memory_space<vmem>>, vector<10x8x4xbf16>
    %276 = vector.shape_cast %275 : vector<10x8x4xbf16> to vector<80x4xbf16>
    %c1_i32_238 = arith.constant 1 : i32
    %277 = arith.addi %74, %c1_i32_238 : i32
    %c0_239 = arith.constant 0 : index
    %278 = arith.index_cast %277 : i32 to index
    %c0_240 = arith.constant 0 : index
    %c1_241 = arith.constant 1 : index
    %c0_242 = arith.constant 0 : index
    %279 = vector.load %arg3[%c0_239, %278, %c0_240, %c1_241, %c0_242] : memref<1x20x2x9x4xbf16, #tpu.memory_space<vmem>>, vector<1x10x1x8x4xbf16>
    %280 = vector.shape_cast %279 : vector<1x10x1x8x4xbf16> to vector<10x8x4xbf16>
    %281 = vector.shape_cast %280 : vector<10x8x4xbf16> to vector<80x4xbf16>
    %c20_243 = arith.constant 20 : index
    %c0_244 = arith.constant 0 : index
    %282 = vector.load %arg6[%c20_243, %c0_244] : memref<36x4xbf16, #tpu.memory_space<vmem>>, vector<4x4xbf16>
    %cst_245 = arith.constant dense<0.000000e+00> : vector<80x4xf32>
    %283 = tpu.matmul %276, %282, %cst_245 {dimension_numbers = #tpu.dot_dimension_numbers<[1], [0], [0], [1], [0, 0, 1, 1], [], []>} : vector<80x4xbf16>, vector<4x4xbf16>, vector<80x4xf32> -> vector<80x4xf32>
    %284 = arith.addf %274, %283 : vector<80x4xf32>
    %c20_246 = arith.constant 20 : index
    %c0_247 = arith.constant 0 : index
    %285 = vector.load %arg7[%c20_246, %c0_247] : memref<36x4xbf16, #tpu.memory_space<vmem>>, vector<4x4xbf16>
    %cst_248 = arith.constant dense<0.000000e+00> : vector<80x4xf32>
    %286 = tpu.matmul %281, %285, %cst_248 {dimension_numbers = #tpu.dot_dimension_numbers<[1], [0], [0], [1], [0, 0, 1, 1], [], []>} : vector<80x4xbf16>, vector<4x4xbf16>, vector<80x4xf32> -> vector<80x4xf32>
    %287 = arith.addf %284, %286 : vector<80x4xf32>
    %c2_249 = arith.constant 2 : index
    %c0_250 = arith.constant 0 : index
    %c0_251 = arith.constant 0 : index
    %288 = vector.load %arg16[%c2_249, %c0_250, %c0_251] : memref<12x9x4xbf16, #tpu.memory_space<vmem>>, vector<10x8x4xbf16>
    %289 = vector.shape_cast %288 : vector<10x8x4xbf16> to vector<80x4xbf16>
    %c2_i32_252 = arith.constant 2 : i32
    %290 = arith.addi %74, %c2_i32_252 : i32
    %c0_253 = arith.constant 0 : index
    %291 = arith.index_cast %290 : i32 to index
    %c0_254 = arith.constant 0 : index
    %c0_255 = arith.constant 0 : index
    %c0_256 = arith.constant 0 : index
    %292 = vector.load %arg3[%c0_253, %291, %c0_254, %c0_255, %c0_256] : memref<1x20x2x9x4xbf16, #tpu.memory_space<vmem>>, vector<1x10x1x8x4xbf16>
    %293 = vector.shape_cast %292 : vector<1x10x1x8x4xbf16> to vector<10x8x4xbf16>
    %294 = vector.shape_cast %293 : vector<10x8x4xbf16> to vector<80x4xbf16>
    %c24_257 = arith.constant 24 : index
    %c0_258 = arith.constant 0 : index
    %295 = vector.load %arg6[%c24_257, %c0_258] : memref<36x4xbf16, #tpu.memory_space<vmem>>, vector<4x4xbf16>
    %cst_259 = arith.constant dense<0.000000e+00> : vector<80x4xf32>
    %296 = tpu.matmul %289, %295, %cst_259 {dimension_numbers = #tpu.dot_dimension_numbers<[1], [0], [0], [1], [0, 0, 1, 1], [], []>} : vector<80x4xbf16>, vector<4x4xbf16>, vector<80x4xf32> -> vector<80x4xf32>
    %297 = arith.addf %287, %296 : vector<80x4xf32>
    %c24_260 = arith.constant 24 : index
    %c0_261 = arith.constant 0 : index
    %298 = vector.load %arg7[%c24_260, %c0_261] : memref<36x4xbf16, #tpu.memory_space<vmem>>, vector<4x4xbf16>
    %cst_262 = arith.constant dense<0.000000e+00> : vector<80x4xf32>
    %299 = tpu.matmul %294, %298, %cst_262 {dimension_numbers = #tpu.dot_dimension_numbers<[1], [0], [0], [1], [0, 0, 1, 1], [], []>} : vector<80x4xbf16>, vector<4x4xbf16>, vector<80x4xf32> -> vector<80x4xf32>
    %300 = arith.addf %297, %299 : vector<80x4xf32>
    %c2_263 = arith.constant 2 : index
    %c1_264 = arith.constant 1 : index
    %c0_265 = arith.constant 0 : index
    %301 = vector.load %arg17[%c2_263, %c1_264, %c0_265] : memref<12x9x4xbf16, #tpu.memory_space<vmem>>, vector<10x8x4xbf16>
    %302 = vector.shape_cast %301 : vector<10x8x4xbf16> to vector<80x4xbf16>
    %c2_i32_266 = arith.constant 2 : i32
    %303 = arith.addi %74, %c2_i32_266 : i32
    %c0_267 = arith.constant 0 : index
    %304 = arith.index_cast %303 : i32 to index
    %c1_268 = arith.constant 1 : index
    %c1_269 = arith.constant 1 : index
    %c0_270 = arith.constant 0 : index
    %305 = vector.load %arg3[%c0_267, %304, %c1_268, %c1_269, %c0_270] : memref<1x20x2x9x4xbf16, #tpu.memory_space<vmem>>, vector<1x10x1x8x4xbf16>
    %306 = vector.shape_cast %305 : vector<1x10x1x8x4xbf16> to vector<10x8x4xbf16>
    %307 = vector.shape_cast %306 : vector<10x8x4xbf16> to vector<80x4xbf16>
    %c28_271 = arith.constant 28 : index
    %c0_272 = arith.constant 0 : index
    %308 = vector.load %arg6[%c28_271, %c0_272] : memref<36x4xbf16, #tpu.memory_space<vmem>>, vector<4x4xbf16>
    %cst_273 = arith.constant dense<0.000000e+00> : vector<80x4xf32>
    %309 = tpu.matmul %302, %308, %cst_273 {dimension_numbers = #tpu.dot_dimension_numbers<[1], [0], [0], [1], [0, 0, 1, 1], [], []>} : vector<80x4xbf16>, vector<4x4xbf16>, vector<80x4xf32> -> vector<80x4xf32>
    %310 = arith.addf %300, %309 : vector<80x4xf32>
    %c28_274 = arith.constant 28 : index
    %c0_275 = arith.constant 0 : index
    %311 = vector.load %arg7[%c28_274, %c0_275] : memref<36x4xbf16, #tpu.memory_space<vmem>>, vector<4x4xbf16>
    %cst_276 = arith.constant dense<0.000000e+00> : vector<80x4xf32>
    %312 = tpu.matmul %307, %311, %cst_276 {dimension_numbers = #tpu.dot_dimension_numbers<[1], [0], [0], [1], [0, 0, 1, 1], [], []>} : vector<80x4xbf16>, vector<4x4xbf16>, vector<80x4xf32> -> vector<80x4xf32>
    %313 = arith.addf %310, %312 : vector<80x4xf32>
    %c2_277 = arith.constant 2 : index
    %c1_278 = arith.constant 1 : index
    %c0_279 = arith.constant 0 : index
    %314 = vector.load %arg16[%c2_277, %c1_278, %c0_279] : memref<12x9x4xbf16, #tpu.memory_space<vmem>>, vector<10x8x4xbf16>
    %315 = vector.shape_cast %314 : vector<10x8x4xbf16> to vector<80x4xbf16>
    %c2_i32_280 = arith.constant 2 : i32
    %316 = arith.addi %74, %c2_i32_280 : i32
    %c0_281 = arith.constant 0 : index
    %317 = arith.index_cast %316 : i32 to index
    %c0_282 = arith.constant 0 : index
    %c1_283 = arith.constant 1 : index
    %c0_284 = arith.constant 0 : index
    %318 = vector.load %arg3[%c0_281, %317, %c0_282, %c1_283, %c0_284] : memref<1x20x2x9x4xbf16, #tpu.memory_space<vmem>>, vector<1x10x1x8x4xbf16>
    %319 = vector.shape_cast %318 : vector<1x10x1x8x4xbf16> to vector<10x8x4xbf16>
    %320 = vector.shape_cast %319 : vector<10x8x4xbf16> to vector<80x4xbf16>
    %c32_285 = arith.constant 32 : index
    %c0_286 = arith.constant 0 : index
    %321 = vector.load %arg6[%c32_285, %c0_286] : memref<36x4xbf16, #tpu.memory_space<vmem>>, vector<4x4xbf16>
    %cst_287 = arith.constant dense<0.000000e+00> : vector<80x4xf32>
    %322 = tpu.matmul %315, %321, %cst_287 {dimension_numbers = #tpu.dot_dimension_numbers<[1], [0], [0], [1], [0, 0, 1, 1], [], []>} : vector<80x4xbf16>, vector<4x4xbf16>, vector<80x4xf32> -> vector<80x4xf32>
    %323 = arith.addf %313, %322 : vector<80x4xf32>
    %c32_288 = arith.constant 32 : index
    %c0_289 = arith.constant 0 : index
    %324 = vector.load %arg7[%c32_288, %c0_289] : memref<36x4xbf16, #tpu.memory_space<vmem>>, vector<4x4xbf16>
    %cst_290 = arith.constant dense<0.000000e+00> : vector<80x4xf32>
    %325 = tpu.matmul %320, %324, %cst_290 {dimension_numbers = #tpu.dot_dimension_numbers<[1], [0], [0], [1], [0, 0, 1, 1], [], []>} : vector<80x4xbf16>, vector<4x4xbf16>, vector<80x4xf32> -> vector<80x4xf32>
    %326 = arith.addf %323, %325 : vector<80x4xf32>
    %c0_291 = arith.constant 0 : index
    %c0_292 = arith.constant 0 : index
    %327 = vector.load %arg8[%c0_291, %c0_292] : memref<1x4xf32, #tpu.memory_space<vmem>>, vector<1x4xf32>
    %328 = vector.broadcast %327 : vector<1x4xf32> to vector<80x4xf32>
    %329 = arith.addf %326, %328 : vector<80x4xf32>
    %cst_293 = arith.constant 0.000000e+00 : f32
    %330 = vector.broadcast %cst_293 : f32 to vector<80x4xf32>
    %331 = arith.maximumf %329, %330 : vector<80x4xf32>
    %c0_294 = arith.constant 0 : index
    %c0_295 = arith.constant 0 : index
    %332 = vector.load %arg9[%c0_294, %c0_295] : memref<1x4xf32, #tpu.memory_space<vmem>>, vector<1x4xf32>
    %333 = vector.broadcast %332 : vector<1x4xf32> to vector<80x4xf32>
    %334 = arith.mulf %331, %333 : vector<80x4xf32>
    %c0_296 = arith.constant 0 : index
    %c0_297 = arith.constant 0 : index
    %335 = vector.load %arg10[%c0_296, %c0_297] : memref<1x4xf32, #tpu.memory_space<vmem>>, vector<1x4xf32>
    %336 = vector.broadcast %335 : vector<1x4xf32> to vector<80x4xf32>
    %337 = arith.addf %334, %336 : vector<80x4xf32>
    %338 = vector.shape_cast %337 : vector<80x4xf32> to vector<10x8x4xf32>
    %339 = arith.truncf %338 : vector<10x8x4xf32> to vector<10x8x4xbf16>
    %c0_298 = arith.constant 0 : index
    %c1_299 = arith.constant 1 : index
    %c0_300 = arith.constant 0 : index
    %340 = vector.load %arg19[%c0_298, %c1_299, %c0_300] : memref<10x9x4xbf16, #tpu.memory_space<vmem>>, vector<10x8x4xbf16>
    tpu.vector_store %arg19[%c0_298, %c1_299, %c0_300], %339 {strides = array<i32>} : memref<10x9x4xbf16, #tpu.memory_space<vmem>>, vector<10x8x4xbf16>,
    %cst_301 = arith.constant 0.000000e+00 : bf16
    %341 = vector.broadcast %cst_301 : bf16 to vector<10x1x4xbf16>
    %c0_302 = arith.constant 0 : index
    %c0_303 = arith.constant 0 : index
    %c0_304 = arith.constant 0 : index
    %342 = vector.load %arg19[%c0_302, %c0_303, %c0_304] : memref<10x9x4xbf16, #tpu.memory_space<vmem>>, vector<10x1x4xbf16>
    tpu.vector_store %arg19[%c0_302, %c0_303, %c0_304], %341 {strides = array<i32>} : memref<10x9x4xbf16, #tpu.memory_space<vmem>>, vector<10x1x4xbf16>,
    %c0_i32_305 = arith.constant 0 : i32
    %343 = arith.cmpi eq, %arg1, %c0_i32_305 : i32
    %344 = arith.extui %343 : i1 to i32
    %c0_i32_306 = arith.constant 0 : i32
    %345 = arith.cmpi ne, %344, %c0_i32_306 : i32
    scf.if %345 {
      %cst_443 = arith.constant 0.000000e+00 : bf16
      %471 = vector.broadcast %cst_443 : bf16 to vector<1x9x4xbf16>
      %c0_444 = arith.constant 0 : index
      %c0_445 = arith.constant 0 : index
      %c0_446 = arith.constant 0 : index
      %472 = vector.load %arg18[%c0_444, %c0_445, %c0_446] : memref<10x9x4xbf16, #tpu.memory_space<vmem>>, vector<1x9x4xbf16>
      tpu.vector_store %arg18[%c0_444, %c0_445, %c0_446], %471 {strides = array<i32>} : memref<10x9x4xbf16, #tpu.memory_space<vmem>>, vector<1x9x4xbf16>,
      %c0_447 = arith.constant 0 : index
      %c0_448 = arith.constant 0 : index
      %c0_449 = arith.constant 0 : index
      %473 = vector.load %arg19[%c0_447, %c0_448, %c0_449] : memref<10x9x4xbf16, #tpu.memory_space<vmem>>, vector<1x9x4xbf16>
      tpu.vector_store %arg19[%c0_447, %c0_448, %c0_449], %471 {strides = array<i32>} : memref<10x9x4xbf16, #tpu.memory_space<vmem>>, vector<1x9x4xbf16>,
    } else {
    }
    %c1_i32_307 = arith.constant 1 : i32
    %346 = arith.cmpi eq, %arg1, %c1_i32_307 : i32
    %347 = arith.extui %346 : i1 to i32
    %c0_i32_308 = arith.constant 0 : i32
    %348 = arith.cmpi ne, %347, %c0_i32_308 : i32
    scf.if %348 {
      %cst_443 = arith.constant 0.000000e+00 : bf16
      %471 = vector.broadcast %cst_443 : bf16 to vector<1x9x4xbf16>
      %c9 = arith.constant 9 : index
      %c0_444 = arith.constant 0 : index
      %c0_445 = arith.constant 0 : index
      %472 = vector.load %arg18[%c9, %c0_444, %c0_445] : memref<10x9x4xbf16, #tpu.memory_space<vmem>>, vector<1x9x4xbf16>
      tpu.vector_store %arg18[%c9, %c0_444, %c0_445], %471 {strides = array<i32>} : memref<10x9x4xbf16, #tpu.memory_space<vmem>>, vector<1x9x4xbf16>,
      %c9_446 = arith.constant 9 : index
      %c0_447 = arith.constant 0 : index
      %c0_448 = arith.constant 0 : index
      %473 = vector.load %arg19[%c9_446, %c0_447, %c0_448] : memref<10x9x4xbf16, #tpu.memory_space<vmem>>, vector<1x9x4xbf16>
      tpu.vector_store %arg19[%c9_446, %c0_447, %c0_448], %471 {strides = array<i32>} : memref<10x9x4xbf16, #tpu.memory_space<vmem>>, vector<1x9x4xbf16>,
    } else {
    }
    %cst_309 = arith.constant 0.000000e+00 : f32
    %349 = vector.broadcast %cst_309 : f32 to vector<64x4xf32>
    %c0_310 = arith.constant 0 : index
    %c0_311 = arith.constant 0 : index
    %c0_312 = arith.constant 0 : index
    %350 = vector.load %arg19[%c0_310, %c0_311, %c0_312] : memref<10x9x4xbf16, #tpu.memory_space<vmem>>, vector<8x8x4xbf16>
    %351 = vector.shape_cast %350 : vector<8x8x4xbf16> to vector<64x4xbf16>
    %c0_313 = arith.constant 0 : index
    %c0_314 = arith.constant 0 : index
    %352 = vector.load %arg11[%c0_313, %c0_314] : memref<36x4xbf16, #tpu.memory_space<vmem>>, vector<4x4xbf16>
    %cst_315 = arith.constant dense<0.000000e+00> : vector<64x4xf32>
    %353 = tpu.matmul %351, %352, %cst_315 {dimension_numbers = #tpu.dot_dimension_numbers<[1], [0], [0], [1], [0, 0, 1, 1], [], []>} : vector<64x4xbf16>, vector<4x4xbf16>, vector<64x4xf32> -> vector<64x4xf32>
    %354 = arith.addf %349, %353 : vector<64x4xf32>
    %c0_316 = arith.constant 0 : index
    %c0_317 = arith.constant 0 : index
    %c0_318 = arith.constant 0 : index
    %355 = vector.load %arg18[%c0_316, %c0_317, %c0_318] : memref<10x9x4xbf16, #tpu.memory_space<vmem>>, vector<8x8x4xbf16>
    %356 = vector.shape_cast %355 : vector<8x8x4xbf16> to vector<64x4xbf16>
    %c4_319 = arith.constant 4 : index
    %c0_320 = arith.constant 0 : index
    %357 = vector.load %arg11[%c4_319, %c0_320] : memref<36x4xbf16, #tpu.memory_space<vmem>>, vector<4x4xbf16>
    %cst_321 = arith.constant dense<0.000000e+00> : vector<64x4xf32>
    %358 = tpu.matmul %356, %357, %cst_321 {dimension_numbers = #tpu.dot_dimension_numbers<[1], [0], [0], [1], [0, 0, 1, 1], [], []>} : vector<64x4xbf16>, vector<4x4xbf16>, vector<64x4xf32> -> vector<64x4xf32>
    %359 = arith.addf %354, %358 : vector<64x4xf32>
    %c0_322 = arith.constant 0 : index
    %c1_323 = arith.constant 1 : index
    %c0_324 = arith.constant 0 : index
    %360 = vector.load %arg19[%c0_322, %c1_323, %c0_324] : memref<10x9x4xbf16, #tpu.memory_space<vmem>>, vector<8x8x4xbf16>
    %361 = vector.shape_cast %360 : vector<8x8x4xbf16> to vector<64x4xbf16>
    %c8_325 = arith.constant 8 : index
    %c0_326 = arith.constant 0 : index
    %362 = vector.load %arg11[%c8_325, %c0_326] : memref<36x4xbf16, #tpu.memory_space<vmem>>, vector<4x4xbf16>
    %cst_327 = arith.constant dense<0.000000e+00> : vector<64x4xf32>
    %363 = tpu.matmul %361, %362, %cst_327 {dimension_numbers = #tpu.dot_dimension_numbers<[1], [0], [0], [1], [0, 0, 1, 1], [], []>} : vector<64x4xbf16>, vector<4x4xbf16>, vector<64x4xf32> -> vector<64x4xf32>
    %364 = arith.addf %359, %363 : vector<64x4xf32>
    %c1_328 = arith.constant 1 : index
    %c0_329 = arith.constant 0 : index
    %c0_330 = arith.constant 0 : index
    %365 = vector.load %arg19[%c1_328, %c0_329, %c0_330] : memref<10x9x4xbf16, #tpu.memory_space<vmem>>, vector<8x8x4xbf16>
    %366 = vector.shape_cast %365 : vector<8x8x4xbf16> to vector<64x4xbf16>
    %c12_331 = arith.constant 12 : index
    %c0_332 = arith.constant 0 : index
    %367 = vector.load %arg11[%c12_331, %c0_332] : memref<36x4xbf16, #tpu.memory_space<vmem>>, vector<4x4xbf16>
    %cst_333 = arith.constant dense<0.000000e+00> : vector<64x4xf32>
    %368 = tpu.matmul %366, %367, %cst_333 {dimension_numbers = #tpu.dot_dimension_numbers<[1], [0], [0], [1], [0, 0, 1, 1], [], []>} : vector<64x4xbf16>, vector<4x4xbf16>, vector<64x4xf32> -> vector<64x4xf32>
    %369 = arith.addf %364, %368 : vector<64x4xf32>
    %c1_334 = arith.constant 1 : index
    %c0_335 = arith.constant 0 : index
    %c0_336 = arith.constant 0 : index
    %370 = vector.load %arg18[%c1_334, %c0_335, %c0_336] : memref<10x9x4xbf16, #tpu.memory_space<vmem>>, vector<8x8x4xbf16>
    %371 = vector.shape_cast %370 : vector<8x8x4xbf16> to vector<64x4xbf16>
    %c16_337 = arith.constant 16 : index
    %c0_338 = arith.constant 0 : index
    %372 = vector.load %arg11[%c16_337, %c0_338] : memref<36x4xbf16, #tpu.memory_space<vmem>>, vector<4x4xbf16>
    %cst_339 = arith.constant dense<0.000000e+00> : vector<64x4xf32>
    %373 = tpu.matmul %371, %372, %cst_339 {dimension_numbers = #tpu.dot_dimension_numbers<[1], [0], [0], [1], [0, 0, 1, 1], [], []>} : vector<64x4xbf16>, vector<4x4xbf16>, vector<64x4xf32> -> vector<64x4xf32>
    %374 = arith.addf %369, %373 : vector<64x4xf32>
    %c1_340 = arith.constant 1 : index
    %c1_341 = arith.constant 1 : index
    %c0_342 = arith.constant 0 : index
    %375 = vector.load %arg19[%c1_340, %c1_341, %c0_342] : memref<10x9x4xbf16, #tpu.memory_space<vmem>>, vector<8x8x4xbf16>
    %376 = vector.shape_cast %375 : vector<8x8x4xbf16> to vector<64x4xbf16>
    %c20_343 = arith.constant 20 : index
    %c0_344 = arith.constant 0 : index
    %377 = vector.load %arg11[%c20_343, %c0_344] : memref<36x4xbf16, #tpu.memory_space<vmem>>, vector<4x4xbf16>
    %cst_345 = arith.constant dense<0.000000e+00> : vector<64x4xf32>
    %378 = tpu.matmul %376, %377, %cst_345 {dimension_numbers = #tpu.dot_dimension_numbers<[1], [0], [0], [1], [0, 0, 1, 1], [], []>} : vector<64x4xbf16>, vector<4x4xbf16>, vector<64x4xf32> -> vector<64x4xf32>
    %379 = arith.addf %374, %378 : vector<64x4xf32>
    %c2_346 = arith.constant 2 : index
    %c0_347 = arith.constant 0 : index
    %c0_348 = arith.constant 0 : index
    %380 = vector.load %arg19[%c2_346, %c0_347, %c0_348] : memref<10x9x4xbf16, #tpu.memory_space<vmem>>, vector<8x8x4xbf16>
    %381 = vector.shape_cast %380 : vector<8x8x4xbf16> to vector<64x4xbf16>
    %c24_349 = arith.constant 24 : index
    %c0_350 = arith.constant 0 : index
    %382 = vector.load %arg11[%c24_349, %c0_350] : memref<36x4xbf16, #tpu.memory_space<vmem>>, vector<4x4xbf16>
    %cst_351 = arith.constant dense<0.000000e+00> : vector<64x4xf32>
    %383 = tpu.matmul %381, %382, %cst_351 {dimension_numbers = #tpu.dot_dimension_numbers<[1], [0], [0], [1], [0, 0, 1, 1], [], []>} : vector<64x4xbf16>, vector<4x4xbf16>, vector<64x4xf32> -> vector<64x4xf32>
    %384 = arith.addf %379, %383 : vector<64x4xf32>
    %c2_352 = arith.constant 2 : index
    %c0_353 = arith.constant 0 : index
    %c0_354 = arith.constant 0 : index
    %385 = vector.load %arg18[%c2_352, %c0_353, %c0_354] : memref<10x9x4xbf16, #tpu.memory_space<vmem>>, vector<8x8x4xbf16>
    %386 = vector.shape_cast %385 : vector<8x8x4xbf16> to vector<64x4xbf16>
    %c28_355 = arith.constant 28 : index
    %c0_356 = arith.constant 0 : index
    %387 = vector.load %arg11[%c28_355, %c0_356] : memref<36x4xbf16, #tpu.memory_space<vmem>>, vector<4x4xbf16>
    %cst_357 = arith.constant dense<0.000000e+00> : vector<64x4xf32>
    %388 = tpu.matmul %386, %387, %cst_357 {dimension_numbers = #tpu.dot_dimension_numbers<[1], [0], [0], [1], [0, 0, 1, 1], [], []>} : vector<64x4xbf16>, vector<4x4xbf16>, vector<64x4xf32> -> vector<64x4xf32>
    %389 = arith.addf %384, %388 : vector<64x4xf32>
    %c2_358 = arith.constant 2 : index
    %c1_359 = arith.constant 1 : index
    %c0_360 = arith.constant 0 : index
    %390 = vector.load %arg19[%c2_358, %c1_359, %c0_360] : memref<10x9x4xbf16, #tpu.memory_space<vmem>>, vector<8x8x4xbf16>
    %391 = vector.shape_cast %390 : vector<8x8x4xbf16> to vector<64x4xbf16>
    %c32_361 = arith.constant 32 : index
    %c0_362 = arith.constant 0 : index
    %392 = vector.load %arg11[%c32_361, %c0_362] : memref<36x4xbf16, #tpu.memory_space<vmem>>, vector<4x4xbf16>
    %cst_363 = arith.constant dense<0.000000e+00> : vector<64x4xf32>
    %393 = tpu.matmul %391, %392, %cst_363 {dimension_numbers = #tpu.dot_dimension_numbers<[1], [0], [0], [1], [0, 0, 1, 1], [], []>} : vector<64x4xbf16>, vector<4x4xbf16>, vector<64x4xf32> -> vector<64x4xf32>
    %394 = arith.addf %389, %393 : vector<64x4xf32>
    %c0_364 = arith.constant 0 : index
    %c0_365 = arith.constant 0 : index
    %395 = vector.load %arg12[%c0_364, %c0_365] : memref<1x4xf32, #tpu.memory_space<vmem>>, vector<1x4xf32>
    %396 = vector.broadcast %395 : vector<1x4xf32> to vector<64x4xf32>
    %397 = arith.addf %394, %396 : vector<64x4xf32>
    %cst_366 = arith.constant 0.000000e+00 : f32
    %398 = vector.broadcast %cst_366 : f32 to vector<64x4xf32>
    %399 = arith.maximumf %397, %398 : vector<64x4xf32>
    %c0_367 = arith.constant 0 : index
    %c0_368 = arith.constant 0 : index
    %400 = vector.load %arg13[%c0_367, %c0_368] : memref<1x4xf32, #tpu.memory_space<vmem>>, vector<1x4xf32>
    %401 = vector.broadcast %400 : vector<1x4xf32> to vector<64x4xf32>
    %402 = arith.mulf %399, %401 : vector<64x4xf32>
    %c0_369 = arith.constant 0 : index
    %c0_370 = arith.constant 0 : index
    %403 = vector.load %arg14[%c0_369, %c0_370] : memref<1x4xf32, #tpu.memory_space<vmem>>, vector<1x4xf32>
    %404 = vector.broadcast %403 : vector<1x4xf32> to vector<64x4xf32>
    %405 = arith.addf %402, %404 : vector<64x4xf32>
    %406 = vector.shape_cast %405 : vector<64x4xf32> to vector<8x8x4xf32>
    %c0_371 = arith.constant 0 : index
    %c0_372 = arith.constant 0 : index
    %c0_373 = arith.constant 0 : index
    %c0_374 = arith.constant 0 : index
    %c0_375 = arith.constant 0 : index
    %407 = vector.load %arg15[%c0_371, %c0_372, %c0_373, %c0_374, %c0_375] : memref<1x8x2x8x4xf32, #tpu.memory_space<vmem>>, vector<1x8x1x8x4xf32>
    %408 = vector.shape_cast %407 : vector<1x8x1x8x4xf32> to vector<8x8x4xf32>
    %409 = vector.shape_cast %406 : vector<8x8x4xf32> to vector<1x8x1x8x4xf32>
    tpu.vector_store %arg15[%c0_371, %c0_372, %c0_373, %c0_374, %c0_375], %409 {strides = array<i32>} : memref<1x8x2x8x4xf32, #tpu.memory_space<vmem>>, vector<1x8x1x8x4xf32>,
    %cst_376 = arith.constant 0.000000e+00 : f32
    %410 = vector.broadcast %cst_376 : f32 to vector<64x4xf32>
    %c0_377 = arith.constant 0 : index
    %c0_378 = arith.constant 0 : index
    %c0_379 = arith.constant 0 : index
    %411 = vector.load %arg18[%c0_377, %c0_378, %c0_379] : memref<10x9x4xbf16, #tpu.memory_space<vmem>>, vector<8x8x4xbf16>
    %412 = vector.shape_cast %411 : vector<8x8x4xbf16> to vector<64x4xbf16>
    %c0_380 = arith.constant 0 : index
    %c0_381 = arith.constant 0 : index
    %413 = vector.load %arg11[%c0_380, %c0_381] : memref<36x4xbf16, #tpu.memory_space<vmem>>, vector<4x4xbf16>
    %cst_382 = arith.constant dense<0.000000e+00> : vector<64x4xf32>
    %414 = tpu.matmul %412, %413, %cst_382 {dimension_numbers = #tpu.dot_dimension_numbers<[1], [0], [0], [1], [0, 0, 1, 1], [], []>} : vector<64x4xbf16>, vector<4x4xbf16>, vector<64x4xf32> -> vector<64x4xf32>
    %415 = arith.addf %410, %414 : vector<64x4xf32>
    %c0_383 = arith.constant 0 : index
    %c1_384 = arith.constant 1 : index
    %c0_385 = arith.constant 0 : index
    %416 = vector.load %arg19[%c0_383, %c1_384, %c0_385] : memref<10x9x4xbf16, #tpu.memory_space<vmem>>, vector<8x8x4xbf16>
    %417 = vector.shape_cast %416 : vector<8x8x4xbf16> to vector<64x4xbf16>
    %c4_386 = arith.constant 4 : index
    %c0_387 = arith.constant 0 : index
    %418 = vector.load %arg11[%c4_386, %c0_387] : memref<36x4xbf16, #tpu.memory_space<vmem>>, vector<4x4xbf16>
    %cst_388 = arith.constant dense<0.000000e+00> : vector<64x4xf32>
    %419 = tpu.matmul %417, %418, %cst_388 {dimension_numbers = #tpu.dot_dimension_numbers<[1], [0], [0], [1], [0, 0, 1, 1], [], []>} : vector<64x4xbf16>, vector<4x4xbf16>, vector<64x4xf32> -> vector<64x4xf32>
    %420 = arith.addf %415, %419 : vector<64x4xf32>
    %c0_389 = arith.constant 0 : index
    %c1_390 = arith.constant 1 : index
    %c0_391 = arith.constant 0 : index
    %421 = vector.load %arg18[%c0_389, %c1_390, %c0_391] : memref<10x9x4xbf16, #tpu.memory_space<vmem>>, vector<8x8x4xbf16>
    %422 = vector.shape_cast %421 : vector<8x8x4xbf16> to vector<64x4xbf16>
    %c8_392 = arith.constant 8 : index
    %c0_393 = arith.constant 0 : index
    %423 = vector.load %arg11[%c8_392, %c0_393] : memref<36x4xbf16, #tpu.memory_space<vmem>>, vector<4x4xbf16>
    %cst_394 = arith.constant dense<0.000000e+00> : vector<64x4xf32>
    %424 = tpu.matmul %422, %423, %cst_394 {dimension_numbers = #tpu.dot_dimension_numbers<[1], [0], [0], [1], [0, 0, 1, 1], [], []>} : vector<64x4xbf16>, vector<4x4xbf16>, vector<64x4xf32> -> vector<64x4xf32>
    %425 = arith.addf %420, %424 : vector<64x4xf32>
    %c1_395 = arith.constant 1 : index
    %c0_396 = arith.constant 0 : index
    %c0_397 = arith.constant 0 : index
    %426 = vector.load %arg18[%c1_395, %c0_396, %c0_397] : memref<10x9x4xbf16, #tpu.memory_space<vmem>>, vector<8x8x4xbf16>
    %427 = vector.shape_cast %426 : vector<8x8x4xbf16> to vector<64x4xbf16>
    %c12_398 = arith.constant 12 : index
    %c0_399 = arith.constant 0 : index
    %428 = vector.load %arg11[%c12_398, %c0_399] : memref<36x4xbf16, #tpu.memory_space<vmem>>, vector<4x4xbf16>
    %cst_400 = arith.constant dense<0.000000e+00> : vector<64x4xf32>
    %429 = tpu.matmul %427, %428, %cst_400 {dimension_numbers = #tpu.dot_dimension_numbers<[1], [0], [0], [1], [0, 0, 1, 1], [], []>} : vector<64x4xbf16>, vector<4x4xbf16>, vector<64x4xf32> -> vector<64x4xf32>
    %430 = arith.addf %425, %429 : vector<64x4xf32>
    %c1_401 = arith.constant 1 : index
    %c1_402 = arith.constant 1 : index
    %c0_403 = arith.constant 0 : index
    %431 = vector.load %arg19[%c1_401, %c1_402, %c0_403] : memref<10x9x4xbf16, #tpu.memory_space<vmem>>, vector<8x8x4xbf16>
    %432 = vector.shape_cast %431 : vector<8x8x4xbf16> to vector<64x4xbf16>
    %c16_404 = arith.constant 16 : index
    %c0_405 = arith.constant 0 : index
    %433 = vector.load %arg11[%c16_404, %c0_405] : memref<36x4xbf16, #tpu.memory_space<vmem>>, vector<4x4xbf16>
    %cst_406 = arith.constant dense<0.000000e+00> : vector<64x4xf32>
    %434 = tpu.matmul %432, %433, %cst_406 {dimension_numbers = #tpu.dot_dimension_numbers<[1], [0], [0], [1], [0, 0, 1, 1], [], []>} : vector<64x4xbf16>, vector<4x4xbf16>, vector<64x4xf32> -> vector<64x4xf32>
    %435 = arith.addf %430, %434 : vector<64x4xf32>
    %c1_407 = arith.constant 1 : index
    %c1_408 = arith.constant 1 : index
    %c0_409 = arith.constant 0 : index
    %436 = vector.load %arg18[%c1_407, %c1_408, %c0_409] : memref<10x9x4xbf16, #tpu.memory_space<vmem>>, vector<8x8x4xbf16>
    %437 = vector.shape_cast %436 : vector<8x8x4xbf16> to vector<64x4xbf16>
    %c20_410 = arith.constant 20 : index
    %c0_411 = arith.constant 0 : index
    %438 = vector.load %arg11[%c20_410, %c0_411] : memref<36x4xbf16, #tpu.memory_space<vmem>>, vector<4x4xbf16>
    %cst_412 = arith.constant dense<0.000000e+00> : vector<64x4xf32>
    %439 = tpu.matmul %437, %438, %cst_412 {dimension_numbers = #tpu.dot_dimension_numbers<[1], [0], [0], [1], [0, 0, 1, 1], [], []>} : vector<64x4xbf16>, vector<4x4xbf16>, vector<64x4xf32> -> vector<64x4xf32>
    %440 = arith.addf %435, %439 : vector<64x4xf32>
    %c2_413 = arith.constant 2 : index
    %c0_414 = arith.constant 0 : index
    %c0_415 = arith.constant 0 : index
    %441 = vector.load %arg18[%c2_413, %c0_414, %c0_415] : memref<10x9x4xbf16, #tpu.memory_space<vmem>>, vector<8x8x4xbf16>
    %442 = vector.shape_cast %441 : vector<8x8x4xbf16> to vector<64x4xbf16>
    %c24_416 = arith.constant 24 : index
    %c0_417 = arith.constant 0 : index
    %443 = vector.load %arg11[%c24_416, %c0_417] : memref<36x4xbf16, #tpu.memory_space<vmem>>, vector<4x4xbf16>
    %cst_418 = arith.constant dense<0.000000e+00> : vector<64x4xf32>
    %444 = tpu.matmul %442, %443, %cst_418 {dimension_numbers = #tpu.dot_dimension_numbers<[1], [0], [0], [1], [0, 0, 1, 1], [], []>} : vector<64x4xbf16>, vector<4x4xbf16>, vector<64x4xf32> -> vector<64x4xf32>
    %445 = arith.addf %440, %444 : vector<64x4xf32>
    %c2_419 = arith.constant 2 : index
    %c1_420 = arith.constant 1 : index
    %c0_421 = arith.constant 0 : index
    %446 = vector.load %arg19[%c2_419, %c1_420, %c0_421] : memref<10x9x4xbf16, #tpu.memory_space<vmem>>, vector<8x8x4xbf16>
    %447 = vector.shape_cast %446 : vector<8x8x4xbf16> to vector<64x4xbf16>
    %c28_422 = arith.constant 28 : index
    %c0_423 = arith.constant 0 : index
    %448 = vector.load %arg11[%c28_422, %c0_423] : memref<36x4xbf16, #tpu.memory_space<vmem>>, vector<4x4xbf16>
    %cst_424 = arith.constant dense<0.000000e+00> : vector<64x4xf32>
    %449 = tpu.matmul %447, %448, %cst_424 {dimension_numbers = #tpu.dot_dimension_numbers<[1], [0], [0], [1], [0, 0, 1, 1], [], []>} : vector<64x4xbf16>, vector<4x4xbf16>, vector<64x4xf32> -> vector<64x4xf32>
    %450 = arith.addf %445, %449 : vector<64x4xf32>
    %c2_425 = arith.constant 2 : index
    %c1_426 = arith.constant 1 : index
    %c0_427 = arith.constant 0 : index
    %451 = vector.load %arg18[%c2_425, %c1_426, %c0_427] : memref<10x9x4xbf16, #tpu.memory_space<vmem>>, vector<8x8x4xbf16>
    %452 = vector.shape_cast %451 : vector<8x8x4xbf16> to vector<64x4xbf16>
    %c32_428 = arith.constant 32 : index
    %c0_429 = arith.constant 0 : index
    %453 = vector.load %arg11[%c32_428, %c0_429] : memref<36x4xbf16, #tpu.memory_space<vmem>>, vector<4x4xbf16>
    %cst_430 = arith.constant dense<0.000000e+00> : vector<64x4xf32>
    %454 = tpu.matmul %452, %453, %cst_430 {dimension_numbers = #tpu.dot_dimension_numbers<[1], [0], [0], [1], [0, 0, 1, 1], [], []>} : vector<64x4xbf16>, vector<4x4xbf16>, vector<64x4xf32> -> vector<64x4xf32>
    %455 = arith.addf %450, %454 : vector<64x4xf32>
    %c0_431 = arith.constant 0 : index
    %c0_432 = arith.constant 0 : index
    %456 = vector.load %arg12[%c0_431, %c0_432] : memref<1x4xf32, #tpu.memory_space<vmem>>, vector<1x4xf32>
    %457 = vector.broadcast %456 : vector<1x4xf32> to vector<64x4xf32>
    %458 = arith.addf %455, %457 : vector<64x4xf32>
    %cst_433 = arith.constant 0.000000e+00 : f32
    %459 = vector.broadcast %cst_433 : f32 to vector<64x4xf32>
    %460 = arith.maximumf %458, %459 : vector<64x4xf32>
    %c0_434 = arith.constant 0 : index
    %c0_435 = arith.constant 0 : index
    %461 = vector.load %arg13[%c0_434, %c0_435] : memref<1x4xf32, #tpu.memory_space<vmem>>, vector<1x4xf32>
    %462 = vector.broadcast %461 : vector<1x4xf32> to vector<64x4xf32>
    %463 = arith.mulf %460, %462 : vector<64x4xf32>
    %c0_436 = arith.constant 0 : index
    %c0_437 = arith.constant 0 : index
    %464 = vector.load %arg14[%c0_436, %c0_437] : memref<1x4xf32, #tpu.memory_space<vmem>>, vector<1x4xf32>
    %465 = vector.broadcast %464 : vector<1x4xf32> to vector<64x4xf32>
    %466 = arith.addf %463, %465 : vector<64x4xf32>
    %467 = vector.shape_cast %466 : vector<64x4xf32> to vector<8x8x4xf32>
    %c0_438 = arith.constant 0 : index
    %c0_439 = arith.constant 0 : index
    %c1_440 = arith.constant 1 : index
    %c0_441 = arith.constant 0 : index
    %c0_442 = arith.constant 0 : index
    %468 = vector.load %arg15[%c0_438, %c0_439, %c1_440, %c0_441, %c0_442] : memref<1x8x2x8x4xf32, #tpu.memory_space<vmem>>, vector<1x8x1x8x4xf32>
    %469 = vector.shape_cast %468 : vector<1x8x1x8x4xf32> to vector<8x8x4xf32>
    %470 = vector.shape_cast %467 : vector<8x8x4xf32> to vector<1x8x1x8x4xf32>
    tpu.vector_store %arg15[%c0_438, %c0_439, %c1_440, %c0_441, %c0_442], %470 {strides = array<i32>} : memref<1x8x2x8x4xf32, #tpu.memory_space<vmem>>, vector<1x8x1x8x4xf32>,
    return
  }
  func.func @transform_0(%arg0: i32, %arg1: i32) -> (i32, i32, i32, i32) {
    %c0_i32 = arith.constant 0 : i32
    %c0_i32_0 = arith.constant 0 : i32
    %c0_i32_1 = arith.constant 0 : i32
    %c0_i32_2 = arith.constant 0 : i32
    return %arg0, %c0_i32, %c0_i32_0, %c0_i32_1 : i32, i32, i32, i32
  }
  func.func @transform_1(%arg0: i32, %arg1: i32) -> (i32, i32, i32, i32, i32) {
    %c0_i32 = arith.constant 0 : i32
    %c0_i32_0 = arith.constant 0 : i32
    %c0_i32_1 = arith.constant 0 : i32
    %c0_i32_2 = arith.constant 0 : i32
    %c0_i32_3 = arith.constant 0 : i32
    return %arg0, %c0_i32, %c0_i32_0, %c0_i32_1, %c0_i32_2 : i32, i32, i32, i32, i32
  }
  func.func @transform_2(%arg0: i32, %arg1: i32) -> (i32, i32) {
    %c0_i32 = arith.constant 0 : i32
    %c0_i32_0 = arith.constant 0 : i32
    %c0_i32_1 = arith.constant 0 : i32
    return %c0_i32, %c0_i32_0 : i32, i32
  }
  func.func @transform_3(%arg0: i32, %arg1: i32) -> (i32, i32) {
    %c0_i32 = arith.constant 0 : i32
    %c0_i32_0 = arith.constant 0 : i32
    %c0_i32_1 = arith.constant 0 : i32
    return %c0_i32, %c0_i32_0 : i32, i32
  }
  func.func @transform_4(%arg0: i32, %arg1: i32) -> (i32, i32) {
    %c0_i32 = arith.constant 0 : i32
    %c0_i32_0 = arith.constant 0 : i32
    %c0_i32_1 = arith.constant 0 : i32
    return %c0_i32, %c0_i32_0 : i32, i32
  }
  func.func @transform_5(%arg0: i32, %arg1: i32) -> (i32, i32) {
    %c0_i32 = arith.constant 0 : i32
    %c0_i32_0 = arith.constant 0 : i32
    %c0_i32_1 = arith.constant 0 : i32
    return %c0_i32, %c0_i32_0 : i32, i32
  }
  func.func @transform_6(%arg0: i32, %arg1: i32) -> (i32, i32) {
    %c0_i32 = arith.constant 0 : i32
    %c0_i32_0 = arith.constant 0 : i32
    %c0_i32_1 = arith.constant 0 : i32
    return %c0_i32, %c0_i32_0 : i32, i32
  }
  func.func @transform_7(%arg0: i32, %arg1: i32) -> (i32, i32) {
    %c0_i32 = arith.constant 0 : i32
    %c0_i32_0 = arith.constant 0 : i32
    %c0_i32_1 = arith.constant 0 : i32
    return %c0_i32, %c0_i32_0 : i32, i32
  }
  func.func @transform_8(%arg0: i32, %arg1: i32) -> (i32, i32) {
    %c0_i32 = arith.constant 0 : i32
    %c0_i32_0 = arith.constant 0 : i32
    %c0_i32_1 = arith.constant 0 : i32
    return %c0_i32, %c0_i32_0 : i32, i32
  }
  func.func @transform_9(%arg0: i32, %arg1: i32) -> (i32, i32) {
    %c0_i32 = arith.constant 0 : i32
    %c0_i32_0 = arith.constant 0 : i32
    %c0_i32_1 = arith.constant 0 : i32
    return %c0_i32, %c0_i32_0 : i32, i32
  }
  func.func @transform_10(%arg0: i32, %arg1: i32) -> (i32, i32) {
    %c0_i32 = arith.constant 0 : i32
    %c0_i32_0 = arith.constant 0 : i32
    %c0_i32_1 = arith.constant 0 : i32
    return %c0_i32, %c0_i32_0 : i32, i32
  }
  func.func @transform_11(%arg0: i32, %arg1: i32) -> (i32, i32) {
    %c0_i32 = arith.constant 0 : i32
    %c0_i32_0 = arith.constant 0 : i32
    %c0_i32_1 = arith.constant 0 : i32
    return %c0_i32, %c0_i32_0 : i32, i32
  }
  func.func @transform_12(%arg0: i32, %arg1: i32) -> (i32, i32) {
    %c0_i32 = arith.constant 0 : i32
    %c0_i32_0 = arith.constant 0 : i32
    %c0_i32_1 = arith.constant 0 : i32
    return %c0_i32, %c0_i32_0 : i32, i32
  }
  func.func @transform_13(%arg0: i32, %arg1: i32) -> (i32, i32, i32, i32, i32) {
    %c0_i32 = arith.constant 0 : i32
    %c0_i32_0 = arith.constant 0 : i32
    %c0_i32_1 = arith.constant 0 : i32
    %c0_i32_2 = arith.constant 0 : i32
    return %arg0, %arg1, %c0_i32, %c0_i32_0, %c0_i32_1 : i32, i32, i32, i32, i32
  }
}

</mosaic_0001>

<bundles_post_ra>
// kernel: _lambda_.1
= control target key start
LH: loop header
LB: loop body
LE: loop exit
PB: predicated region body
PF: predicated region fallthrough
CT: control target
= control target key end

     0   :  { %s11681_s25 = smov 0   ;;  %s11683_s26 = smov 0   ;;  %s14899_s0 = inlined_call_operand.vmem [shape: bf16[2,12,16,8], index: 0, kind: input, shape index: {}]   ;;  %s14900_s1 = inlined_call_operand.vmem [shape: bf16[2,20,2,9,4], index: 1, kind: input, shape index: {}]   ;;  %s14901_s2 = inlined_call_operand.vmem [shape: bf16[8,4], index: 2, kind: input, shape index: {}]   ;;  %s14902_s3 = inlined_call_operand.vmem [shape: f32[1,4], index: 3, kind: input, shape index: {}]   ;;  %s14903_s4 = inlined_call_operand.vmem [shape: bf16[36,4], index: 4, kind: input, shape index: {}]   ;;  %s14904_s5 = inlined_call_operand.vmem [shape: bf16[36,4], index: 5, kind: input, shape index: {}]   ;;  %s14905_s6 = inlined_call_operand.vmem [shape: f32[1,4], index: 6, kind: input, shape index: {}]   ;;  %s14906_s7 = inlined_call_operand.vmem [shape: f32[1,4], index: 7, kind: input, shape index: {}]   ;;  %s14907_s8 = inlined_call_operand.vmem [shape: f32[1,4], index: 8, kind: input, shape index: {}]   ;;  %s14908_s9 = inlined_call_operand.vmem [shape: bf16[36,4], index: 9, kind: input, shape index: {}]   ;;  %s14909_s10 = inlined_call_operand.vmem [shape: f32[1,4], index: 10, kind: input, shape index: {}]   ;;  %s14910_s11 = inlined_call_operand.vmem [shape: f32[1,4], index: 11, kind: input, shape index: {}]   ;;  %s14911_s12 = inlined_call_operand.vmem [shape: f32[1,4], index: 12, kind: input, shape index: {}]   ;;  %s14912_s13 = inlined_call_operand.vmem [shape: f32[2,16,2,8,4], index: 13, kind: output, shape index: {}]  }
   0x1   :  { %14918 = sst [smem:[#allocation20_spill]] %s14901_s2  ;;  %s11685_s27 = smov 0  }
   0x2   :  { %14919 = sst [smem:[#allocation21_spill]] %s14910_s11  ;;  %s11687_s28 = smov 0  }
   0x3   :  { %14920 = sst [smem:[#allocation22_spill]] %s14911_s12  ;;  %s11689_s29 = smov 0  }
   0x4 LB: > { %14921 = sst [smem:[#allocation6_spill]] %s11597_s27  ;;  %s32_s30 = sadd.s32 1, %s11597_s27  ;;  %s11605_s29 = sphi %s11689_s29, %s23_s29   ;;  %s11601_s28 = sphi %s11687_s28, %s14959_s28   ;;  %s11597_s27 = sphi %s11685_s27, %s14958_s27   ;;  %s11593_s26 = sphi %s11683_s26, %s14957_s26   ;;  %s11589_s25 = sphi %s11681_s25, %s14956_s25  }
   0x5   : > { %14922 = sst [smem:[#allocation7_spill]] %s11601_s28  ;;  %s35_s14 = sadd.s32 1, %s11601_s28 }
   0x6   : > { %14923 = sst [smem:[#allocation8_spill]] %s11605_s29  ;;  %p33_p0 = scmp.ge.s32.totalorder %s32_s30, 2 }
   0x7   : > { %p10297_p1 = scmp.ge.s32.totalorder %s11605_s29, 1  ;;  %p411_p2 = scmp.lt.s32.totalorder %s11605_s29, 5 }
   0x8   : > { %s14961_s30 = smov (%p33_p0, %s32_s30), 0  ;;  %s14963_s14 = smov (!%p33_p0, %s35_s14), %s11601_s28 }
   0x9   : > { %14924 = sst [smem:[#allocation9_spill]] %s14961_s30  ;;  %p412_p3 = pnand %p10297_p1, %p411_p2 }
   0xa   : > { %p37_p4 = scmp.ge.s32.totalorder %s14963_s14, 2 }
   0xb   : > { %415 = sbr.rel (%p412_p3) target bundleno = 1763 (0x6e3), region = 72 }
   0xc   : > { %s14965_s14 = smov (%p37_p4, %s14963_s14), 0 }
   0xd   : > { %14925 = sst [smem:[#allocation10_spill]] %s14965_s14 }
  0x10   : > { %s14926_s2 = sld [smem:[#allocation20_spill]]  ;;  %vm577_vm0 = vcmask 1043456   ;;  %p465_p5 = scmp.lt.s32.totalorder %s11593_s26, 1  ;;  %vm552_vm1 = vcmask 64512   ;;  %vm842_vm2 = vcmask 24576   ;;  %vm670_vm5 = vcmask 1046528  }
  0x11   : > { %s10300_s17 = sshll.u32 %s11589_s25, 3  ;;  %s11363_s18 = sshll.u32 %s11589_s25, 5  ;;  %vm843_vm3 = vsmask.f32 256  ;;  %v845_v13 = vld [vmem:[#allocation2 + $0x4] sm:$0x1] }
  0x12   : > { %p478_p6 = scmp.lt.s32.totalorder %s10300_s17, 15  ;;  %s14967_s26 = smov (!%p465_p5, %s11593_s26), 1  ;;  %vm11739_vm4 = vmand %vm842_vm2, %vm843_vm3  ;;  %v848_v14 = vld [vmem:[#allocation2 + $0xc] sm:$0x1]  ;;  %v851_v15 = vld [vmem:[#allocation2 + $0x14] sm:$0x1] }
  0x13   : > { %s11508_s19 = smul.u32 96, %s14967_s26  ;;  %s10302_s20 = sshll.u32 %s14967_s26, 5  ;;  %v846_v16 = vsel %vm11739_vm4, 0, %v845_v13  ;;  %v849_v17 = vsel %vm11739_vm4, 0, %v848_v14  ;;  %v852_v18 = vsel %vm11739_vm4, 0, %v851_v15  ;;  %vm829_vm6 = vcmask 27648  }
  0x14   : > { %s14969_s17 = smov (!%p478_p6, %s10300_s17), 15  ;;  %s11509_s21 = smul.u32 320, %s14967_s26  ;;  %v854_v19 = vld [vmem:[#allocation2 + $0x1c] sm:$0x1]  ;;  %847 = vst [vmem:[#allocation2 + $0x4] sm:$0x1] %v846_v16 }
  0x15   : > { %s10301_s22 = sshll.u32 %s14969_s17, 1  ;;  %s469_s15 = scalar_lea.vmem %s14899_s0, %s11508_s19  ;;  %v855_v20 = vsel %vm11739_vm4, 0, %v854_v19  ;;  %v857_v21 = vld [vmem:[#allocation2 + $0x24] sm:$0x1]  ;;  %v11754_v22 = vld [vmem:[%s14902_s3] ss:$0 sm:$0xff] }
  0x16   : > { %v507_v0 = vld [vmem:[%s14926_s2] sm:$0xf]  ;;  %s482_s16 = sadd.s32 %s10302_s20, %s10301_s22  ;;  %s11724_s30 = scalar_lea.vmem %s14900_s1, %s11509_s21  ;;  %850 = vst [vmem:[#allocation2 + $0xc] sm:$0x1] %v849_v17  ;;  %v858_v23 = vsel %vm11739_vm4, 0, %v857_v21 }
  0x17   : > { %v579_v1 = vsel %vm577_vm0, %v507_v0, 0  ;;  %s10303_s28 = sshll.u32 %s482_s16, 3  ;;  %s490_s11 = scalar_lea.vmem %s469_s15, %s11363_s18  ;;  %853 = vst [vmem:[#allocation2 + $0x14] sm:$0x1] %v852_v18  ;;  %v860_v24 = vld [vmem:[#allocation2 + $0x2c] sm:$0x1] }
  0x18   : > { %588 = vmatpush.bf16.msra.mxu0 %v579_v1  ;;  %s11729_s12 = scalar_lea.vmem %s14912_s13, %s10303_s28  ;;  %v11364_v2 = vld [vmem:[%s490_s11] sm:$0xff]  ;;  %v11365_v3 = vld [vmem:[%s490_s11 + $0x8] sm:$0xff]  ;;  %v11366_v4 = vld [vmem:[%s490_s11 + $0x10] sm:$0xff]  ;;  %856 = vst [vmem:[#allocation2 + $0x1c] sm:$0x1] %v855_v20  ;;  %v861_v26 = vsel %vm11739_vm4, 0, %v860_v24 }
  0x19   : > { %v11367_v5 = vld [vmem:[%s490_s11 + $0x18] sm:$0xff]  ;;  %v11368_v6 = vld [vmem:[%s490_s11 + $0x20] sm:$0xff]  ;;  %v11369_v7 = vld [vmem:[%s490_s11 + $0x28] sm:$0xff]  ;;  %859 = vst [vmem:[#allocation2 + $0x24] sm:$0x1] %v858_v23  ;;  %p10347_p7 = scmp.ne.s32.totalorder %s11589_s25, 0 }
  0x1a   : > { %v11370_v8 = vld [vmem:[%s490_s11 + $0x30] sm:$0xff]  ;;  %v11371_v9 = vld [vmem:[%s490_s11 + $0x38] sm:$0xff]  ;;  %v869_v29 = vld [vmem:[#allocation2 + $0x44] sm:$0x1]  ;;  %862 = vst [vmem:[#allocation2 + $0x2c] sm:$0x1] %v861_v26 }
  0x1b   : > { %10339 = vmatmul.msk.bf16.vlgmr.msra.gmra.mxu0 %vm552_vm1, %v11364_v2  ;;  %v863_v25 = vld [vmem:[#allocation2 + $0x34] sm:$0x1]  ;;  %v866_v28 = vld [vmem:[#allocation2 + $0x3c] sm:$0x1]  ;;  %v872_v32 = vld [vmem:[#allocation2 + $0x4c] sm:$0x1] }
  0x1c   : > { %v864_v27 = vsel %vm11739_vm4, 0, %v863_v25  ;;  %v867_v31 = vsel %vm11739_vm4, 0, %v866_v28  ;;  %v870_v35 = vsel %vm11739_vm4, 0, %v869_v29  ;;  %v873_v36 = vsel %vm11739_vm4, 0, %v872_v32  ;;  %v875_v37 = vld [vmem:[#allocation2 + $0x54] sm:$0x1] }
  0x1d   : > { %865 = vst [vmem:[#allocation2 + $0x34] sm:$0x1] %v864_v27  ;;  %v876_v38 = vsel %vm11739_vm4, 0, %v875_v37  ;;  %v878_v39 = vld [vmem:[#allocation2 + $0x5c] sm:$0x1] }
  0x1e   : > { %868 = vst [vmem:[#allocation2 + $0x3c] sm:$0x1] %v867_v31  ;;  %v879_v40 = vsel %vm11739_vm4, 0, %v878_v39  ;;  %vm958_vm7 = vsmask.f32 7938 }
  0x1f   : > { %871 = vst [vmem:[#allocation2 + $0x44] sm:$0x1] %v870_v35  ;;  %v963_v17 = vld [vmem:[#allocation3 + $0x4] sm:$0x1]  ;;  %vm11781_vm8 = vmand %vm829_vm6, %vm958_vm7  ;;  %v960_v20 = vld [vmem:[#allocation3] sm:$0xf] }
  0x20   : > { %874 = vst [vmem:[#allocation2 + $0x4c] sm:$0x1] %v873_v36 }
  0x21   : > { %877 = vst [vmem:[#allocation2 + $0x54] sm:$0x1] %v876_v38 }
  0x22   : > { %880 = vst [vmem:[#allocation2 + $0x5c] sm:$0x1] %v879_v40 }
  0x2b   : > { %10340 = vmatmul.msk.bf16.gmra.mxu0 %vm552_vm1, %v11365_v3 }
  0x3b   : > { %10341 = vmatmul.msk.bf16.gmra.mxu0 %vm552_vm1, %v11366_v4 }
  0x4b   : > { %10342 = vmatmul.msk.bf16.gmra.mxu0 %vm552_vm1, %v11367_v5 }
  0x5b   : > { %10343 = vmatmul.msk.bf16.gmra.mxu0 %vm552_vm1, %v11368_v6 }
  0x6b   : > { %10344 = vmatmul.msk.bf16.gmra.mxu0 %vm552_vm1, %v11369_v7 }
  0x7b   : > { %10345 = vmatmul.msk.bf16.gmra.mxu0 %vm552_vm1, %v11370_v8 }
  0x8b   : > { %10346 = vmatmul.msk.bf16.gmra.mxu0 %vm552_vm1, %v11371_v9 }
  0x98   : > { %v590_v10 = vpop.f32.mrf.mxu0 }
  0x99   : > { %v591_v33 = vadd.f32 %v11754_v22, %v590_v10 }
  0x9b   : > { %v638_v43 = vmul.f32 0.75, %v591_v33  ;;  %v630_v44 = vmul.f32 0.25, %v591_v33 }
  0x9d   : > { %v671_v48 = vrot.slane %v638_v43, 1  ;;  %v735_v50 = vrot.slane %v630_v44, 1 }
  0xa0   : > { %v592_v12 = vpop.f32.mrf.mxu0 }
  0xa1   : > { %v593_v30 = vadd.f32 %v11754_v22, %v592_v12 }
  0xa3   : > { %v639_v41 = vmul.f32 0.75, %v593_v30  ;;  %v711_v42 = vmul.f32 0.25, %v593_v30 }
  0xa5   : > { %v672_v46 = vrot.slane %v639_v41, 1  ;;  %v736_v47 = vrot.slane %v711_v42, 1 }
  0xa7   : > { %v673_v54 = vsel %vm670_vm5, %v671_v48, %v672_v46  ;;  %v737_v55 = vsel %vm670_vm5, %v735_v50, %v736_v47  ;;  %v776_v58 = vadd.f32 %v736_v47, %v639_v41 }
  0xa8   : > { %v595_v34 = vpop.f32.mrf.mxu0  ;;  %v703_v63 = vadd.f32 %v673_v54, %v630_v44  ;;  %v775_v0 = vadd.f32 %v737_v55, %v638_v43 }
  0xa9   : > { %v596_v45 = vadd.f32 %v11754_v22, %v595_v34  ;;  %v882_v7 = vmul.f32 0.25, %v776_v58 }
  0xaa   : > { %v791_v9 = vmul.f32 0.25, %v703_v63  ;;  %v881_v10 = vmul.f32 0.25, %v775_v0  ;;  %v969_v63 = vld [vmem:[#allocation3 + $0xc] sm:$0x1] }
  0xab   : > { %v631_v51 = vmul.f32 0.25, %v596_v45  ;;  %v640_v52 = vmul.f32 0.75, %v596_v45 }
  0xad   : > { %v674_v59 = vrot.slane %v640_v52, 1  ;;  %v738_v60 = vrot.slane %v631_v51, 1 }
  0xb0   : > { %v597_v49 = vpop.f32.mrf.mxu0 }
  0xb1   : > { %v598_v53 = vadd.f32 %v11754_v22, %v597_v49 }
  0xb3   : > { %v641_v56 = vmul.f32 0.75, %v598_v53  ;;  %v712_v57 = vmul.f32 0.25, %v598_v53 }
  0xb5   : > { %v675_v61 = vrot.slane %v641_v56, 1  ;;  %v739_v62 = vrot.slane %v712_v57, 1 }
  0xb7   : > { %v676_v1 = vsel %vm670_vm5, %v674_v59, %v675_v61  ;;  %v740_v2 = vsel %vm670_vm5, %v738_v60, %v739_v62  ;;  %v778_v3 = vadd.f32 %v739_v62, %v641_v56  ;;  %v966_v62 = vld [vmem:[#allocation3 + $0x8] sm:$0xf] }
  0xb8   : > { %v704_v4 = vadd.f32 %v676_v1, %v631_v51  ;;  %v777_v5 = vadd.f32 %v740_v2, %v640_v52  ;;  %v600_v6 = vpop.f32.mrf.mxu0 }
  0xb9   : > { %v894_v8 = vmul.f32 0.75, %v778_v3  ;;  %v601_v21 = vadd.f32 %v11754_v22, %v600_v6  ;;  %v884_v41 = vmul.f32 0.25, %v778_v3  ;;  %v975_v6 = vld [vmem:[#allocation3 + $0x14] sm:$0x1] }
  0xba   : > { %v797_v12 = vmul.f32 0.75, %v704_v4  ;;  %v893_v13 = vmul.f32 0.75, %v777_v5  ;;  %v792_v40 = vmul.f32 0.25, %v704_v4  ;;  %v883_v46 = vmul.f32 0.25, %v777_v5  ;;  %v972_v5 = vld [vmem:[#allocation3 + $0x10] sm:$0xf] }
  0xbb   : > { %v906_v14 = vadd.f32 %v894_v8, %v882_v7  ;;  %v632_v28 = vmul.f32 0.25, %v601_v21  ;;  %v642_v29 = vmul.f32 0.75, %v601_v21 }
  0xbc   : > { %v803_v15 = vadd.f32 %v797_v12, %v791_v9  ;;  %v905_v16 = vadd.f32 %v893_v13, %v881_v10 }
  0xbd   : > { %v934_v18 = vpack.c.bf16 %v906_v14, %v906_v14  ;;  %v677_v33 = vrot.slane %v642_v29, 1  ;;  %v741_v34 = vrot.slane %v632_v28, 1 }
  0xbe   : > { %v817_v23 = vpack.c.bf16 %v803_v15, %v803_v15  ;;  %v933_v24 = vpack.c.bf16 %v905_v16, %v905_v16 }
  0xbf   : > { %v964_v25 = vsel %vm11739_vm4, %v934_v18, %v963_v17 }
  0xc0   : > { %830 = vst.msk [vmem:[#allocation2] sm:$0xf] %vm829_vm6, %v817_v23  ;;  %v961_v26 = vsel %vm11781_vm8, %v933_v24, %v960_v20  ;;  %v602_v27 = vpop.f32.mrf.mxu0 }
  0xc1   : > { %962 = vst [vmem:[#allocation3] sm:$0xf] %v961_v26  ;;  %v603_v30 = vadd.f32 %v11754_v22, %v602_v27 }
  0xc2   : > { %965 = vst [vmem:[#allocation3 + $0x4] sm:$0x1] %v964_v25 }
  0xc3   : > { %v643_v31 = vmul.f32 0.75, %v603_v30  ;;  %v713_v32 = vmul.f32 0.25, %v603_v30 }
  0xc5   : > { %v678_v35 = vrot.slane %v643_v31, 1  ;;  %v742_v36 = vrot.slane %v713_v32, 1 }
  0xc7   : > { %v679_v37 = vsel %vm670_vm5, %v677_v33, %v678_v35  ;;  %v743_v38 = vsel %vm670_vm5, %v741_v34, %v742_v36  ;;  %v780_v39 = vadd.f32 %v742_v36, %v643_v31 }
  0xc8   : > { %v1032_v42 = vld [vmem:[#allocation3] sm:$0x1]  ;;  %v705_v43 = vadd.f32 %v679_v37, %v632_v28  ;;  %v779_v44 = vadd.f32 %v743_v38, %v642_v29  ;;  %v605_v45 = vpop.f32.mrf.mxu0 }
  0xc9   : > { %v1033_v47 = vsel %vm11739_vm4, 0, %v1032_v42  ;;  %v886_v48 = vmul.f32 0.25, %v780_v39  ;;  %v896_v49 = vmul.f32 0.75, %v780_v39  ;;  %v606_v0 = vadd.f32 %v11754_v22, %v605_v45 }
  0xca   : > { %1034 = vst [vmem:[#allocation3] sm:$0x1] %v1033_v47  ;;  %v793_v50 = vmul.f32 0.25, %v705_v43  ;;  %v798_v51 = vmul.f32 0.75, %v705_v43  ;;  %v885_v52 = vmul.f32 0.25, %v779_v44  ;;  %v895_v53 = vmul.f32 0.75, %v779_v44 }
  0xcb   : > { %v908_v54 = vadd.f32 %v896_v49, %v884_v41  ;;  %v922_v55 = vadd.f32 %v894_v8, %v886_v48  ;;  %v978_v47 = vld [vmem:[#allocation3 + $0x18] sm:$0xf] }
  0xcc   : > { %v804_v56 = vadd.f32 %v798_v51, %v792_v40  ;;  %v811_v57 = vadd.f32 %v797_v12, %v793_v50  ;;  %v907_v58 = vadd.f32 %v895_v53, %v883_v46  ;;  %v921_v59 = vadd.f32 %v893_v13, %v885_v52 }
  0xcd   : > { %v936_v60 = vpack.c.bf16 %v922_v55, %v922_v55  ;;  %v938_v61 = vpack.c.bf16 %v908_v54, %v908_v54  ;;  %v633_v12 = vmul.f32 0.25, %v606_v0  ;;  %v644_v13 = vmul.f32 0.75, %v606_v0  ;;  %v981_v54 = vld [vmem:[#allocation3 + $0x1c] sm:$0x1] }
  0xce   : > { %v818_v1 = vpack.c.bf16 %v811_v57, %v811_v57  ;;  %v819_v2 = vpack.c.bf16 %v804_v56, %v804_v56  ;;  %v935_v3 = vpack.c.bf16 %v921_v59, %v921_v59  ;;  %v937_v4 = vpack.c.bf16 %v907_v58, %v907_v58  ;;  %v984_v58 = vld [vmem:[#allocation3 + $0x20] sm:$0xf] }
  0xcf   : > { %v970_v8 = vsel %vm11739_vm4, %v936_v60, %v969_v63  ;;  %v976_v15 = vsel %vm11739_vm4, %v938_v61, %v975_v6  ;;  %v680_v18 = vrot.slane %v644_v13, 1  ;;  %v744_v20 = vrot.slane %v633_v12, 1  ;;  %v987_v60 = vld [vmem:[#allocation3 + $0x24] sm:$0x1] }
  0xd0   : > { %831 = vst.msk [vmem:[#allocation2 + $0x8] sm:$0xf] %vm829_vm6, %v818_v1  ;;  %v967_v7 = vsel %vm11781_vm8, %v935_v3, %v966_v62  ;;  %v607_v9 = vpop.f32.mrf.mxu0  ;;  %v973_v10 = vsel %vm11781_vm8, %v937_v4, %v972_v5 }
  0xd1   : > { %832 = vst.msk [vmem:[#allocation2 + $0x10] sm:$0xf] %vm829_vm6, %v819_v2  ;;  %v608_v14 = vadd.f32 %v11754_v22, %v607_v9 }
  0xd2   : > { %968 = vst [vmem:[#allocation3 + $0x8] sm:$0xf] %v967_v7 }
  0xd3   : > { %971 = vst [vmem:[#allocation3 + $0xc] sm:$0x1] %v970_v8  ;;  %v645_v16 = vmul.f32 0.75, %v608_v14  ;;  %v714_v17 = vmul.f32 0.25, %v608_v14 }
  0xd4   : > { %974 = vst [vmem:[#allocation3 + $0x10] sm:$0xf] %v973_v10 }
  0xd5   : > { %977 = vst [vmem:[#allocation3 + $0x14] sm:$0x1] %v976_v15  ;;  %v681_v21 = vrot.slane %v645_v16, 1  ;;  %v745_v23 = vrot.slane %v714_v17, 1 }
  0xd7   : > { %v682_v24 = vsel %vm670_vm5, %v680_v18, %v681_v21  ;;  %v746_v25 = vsel %vm670_vm5, %v744_v20, %v745_v23  ;;  %v782_v26 = vadd.f32 %v745_v23, %v645_v16 }
  0xd8   : > { %v706_v27 = vadd.f32 %v682_v24, %v633_v12  ;;  %v781_v28 = vadd.f32 %v746_v25, %v644_v13  ;;  %v610_v29 = vpop.f32.mrf.mxu0 }
  0xd9   : > { %v1035_v30 = vld [vmem:[#allocation3 + $0x8] sm:$0x1]  ;;  %v11810_v31 = vmul.f32 0.25, %v782_v26  ;;  %v11812_v32 = vmul.f32 0.75, %v782_v26  ;;  %v611_v55 = vadd.f32 %v11754_v22, %v610_v29 }
  0xda   : > { %v1036_v33 = vsel %vm11739_vm4, 0, %v1035_v30  ;;  %v11816_v34 = vmul.f32 0.25, %v706_v27  ;;  %v11818_v35 = vmul.f32 0.75, %v706_v27  ;;  %v11820_v36 = vmul.f32 0.25, %v781_v28 }
  0xdb   : > { %1037 = vst [vmem:[#allocation3 + $0x8] sm:$0x1] %v1036_v33  ;;  %v1038_v37 = vld [vmem:[#allocation3 + $0x10] sm:$0x1]  ;;  %v897_v38 = vmul.f32 0.75, %v781_v28  ;;  %v910_v39 = vadd.f32 %v11812_v32, %v886_v48  ;;  %v924_v40 = vadd.f32 %v896_v49, %v11810_v31  ;;  %v634_v61 = vmul.f32 0.25, %v611_v55 }
  0xdc   : > { %v1039_v41 = vsel %vm11739_vm4, 0, %v1038_v37  ;;  %v805_v42 = vadd.f32 %v11818_v35, %v793_v50  ;;  %v812_v43 = vadd.f32 %v798_v51, %v11816_v34  ;;  %v923_v44 = vadd.f32 %v895_v53, %v11820_v36 }
  0xdd   : > { %1040 = vst [vmem:[#allocation3 + $0x10] sm:$0x1] %v1039_v41  ;;  %v909_v45 = vadd.f32 %v897_v38, %v885_v52  ;;  %v940_v46 = vpack.c.bf16 %v924_v40, %v924_v40  ;;  %v942_v49 = vpack.c.bf16 %v910_v39, %v910_v39  ;;  %v646_v62 = vmul.f32 0.75, %v611_v55  ;;  %v990_v39 = vld [vmem:[#allocation3 + $0x28] sm:$0xf] }
  0xde   : > { %v820_v56 = vpack.c.bf16 %v812_v43, %v812_v43  ;;  %v821_v48 = vpack.c.bf16 %v805_v42, %v805_v42  ;;  %v939_v57 = vpack.c.bf16 %v923_v44, %v923_v44  ;;  %v747_v4 = vrot.slane %v634_v61, 1  ;;  %v996_v44 = vld [vmem:[#allocation3 + $0x30] sm:$0xf] }
  0xdf   : > { %v941_v59 = vpack.c.bf16 %v909_v45, %v909_v45  ;;  %v982_v51 = vsel %vm11739_vm4, %v940_v46, %v981_v54  ;;  %v988_v0 = vsel %vm11739_vm4, %v942_v49, %v987_v60  ;;  %v683_v3 = vrot.slane %v646_v62, 1 }
  0xe0   : > { %833 = vst.msk [vmem:[#allocation2 + $0x18] sm:$0xf] %vm829_vm6, %v820_v56  ;;  %v979_v50 = vsel %vm11781_vm8, %v939_v57, %v978_v47  ;;  %v612_v52 = vpop.f32.mrf.mxu0 }
  0xe1   : > { %834 = vst.msk [vmem:[#allocation2 + $0x20] sm:$0xf] %vm829_vm6, %v821_v48  ;;  %v985_v53 = vsel %vm11781_vm8, %v941_v59, %v984_v58  ;;  %v613_v63 = vadd.f32 %v11754_v22, %v612_v52 }
  0xe2   : > { %980 = vst [vmem:[#allocation3 + $0x18] sm:$0xf] %v979_v50 }
  0xe3   : > { %983 = vst [vmem:[#allocation3 + $0x1c] sm:$0x1] %v982_v51  ;;  %v647_v1 = vmul.f32 0.75, %v613_v63  ;;  %v715_v2 = vmul.f32 0.25, %v613_v63 }
  0xe4   : > { %986 = vst [vmem:[#allocation3 + $0x20] sm:$0xf] %v985_v53 }
  0xe5   : > { %989 = vst [vmem:[#allocation3 + $0x24] sm:$0x1] %v988_v0  ;;  %v684_v5 = vrot.slane %v647_v1, 1  ;;  %v748_v6 = vrot.slane %v715_v2, 1 }
  0xe7   : > { %v685_v7 = vsel %vm670_vm5, %v683_v3, %v684_v5  ;;  %v749_v8 = vsel %vm670_vm5, %v747_v4, %v748_v6  ;;  %v784_v9 = vadd.f32 %v748_v6, %v647_v1 }
  0xe8   : > { %v707_v10 = vadd.f32 %v685_v7, %v634_v61  ;;  %v783_v12 = vadd.f32 %v749_v8, %v646_v62  ;;  %v615_v13 = vpop.f32.mrf.mxu0 }
  0xe9   : > { %v1041_v14 = vld [vmem:[#allocation3 + $0x18] sm:$0x1]  ;;  %v11843_v15 = vmul.f32 0.25, %v784_v9  ;;  %v11845_v16 = vmul.f32 0.75, %v784_v9  ;;  %v616_v40 = vadd.f32 %v11754_v22, %v615_v13 }
  0xea   : > { %v1042_v17 = vsel %vm11739_vm4, 0, %v1041_v14  ;;  %v11849_v18 = vmul.f32 0.25, %v707_v10  ;;  %v11851_v20 = vmul.f32 0.75, %v707_v10  ;;  %v11853_v21 = vmul.f32 0.25, %v783_v12 }
  0xeb   : > { %1043 = vst [vmem:[#allocation3 + $0x18] sm:$0x1] %v1042_v17  ;;  %v1044_v23 = vld [vmem:[#allocation3 + $0x20] sm:$0x1]  ;;  %v899_v24 = vmul.f32 0.75, %v783_v12  ;;  %v912_v25 = vadd.f32 %v11845_v16, %v11810_v31  ;;  %v926_v26 = vadd.f32 %v11812_v32, %v11843_v15  ;;  %v635_v47 = vmul.f32 0.25, %v616_v40 }
  0xec   : > { %v1045_v27 = vsel %vm11739_vm4, 0, %v1044_v23  ;;  %v806_v28 = vadd.f32 %v11851_v20, %v11816_v34  ;;  %v813_v29 = vadd.f32 %v11818_v35, %v11849_v18  ;;  %v925_v30 = vadd.f32 %v897_v38, %v11853_v21  ;;  %v993_v31 = vld [vmem:[#allocation3 + $0x2c] sm:$0x1]  ;;  %v999_v34 = vld [vmem:[#allocation3 + $0x34] sm:$0x1] }
  0xed   : > { %1046 = vst [vmem:[#allocation3 + $0x20] sm:$0x1] %v1045_v27  ;;  %v911_v33 = vadd.f32 %v899_v24, %v11820_v36  ;;  %v944_v37 = vpack.c.bf16 %v926_v26, %v926_v26  ;;  %v946_v43 = vpack.c.bf16 %v912_v25, %v912_v25  ;;  %v648_v54 = vmul.f32 0.75, %v616_v40  ;;  %v1005_v25 = vld [vmem:[#allocation3 + $0x3c] sm:$0x1] }
  0xee   : > { %v822_v32 = vpack.c.bf16 %v813_v29, %v813_v29  ;;  %v823_v41 = vpack.c.bf16 %v806_v28, %v806_v28  ;;  %v943_v42 = vpack.c.bf16 %v925_v30, %v925_v30  ;;  %v750_v58 = vrot.slane %v635_v47, 1  ;;  %v1008_v30 = vld [vmem:[#allocation3 + $0x40] sm:$0xf] }
  0xef   : > { %v945_v45 = vpack.c.bf16 %v911_v33, %v911_v33  ;;  %v994_v36 = vsel %vm11739_vm4, %v944_v37, %v993_v31  ;;  %v1000_v56 = vsel %vm11739_vm4, %v946_v43, %v999_v34  ;;  %v686_v49 = vrot.slane %v648_v54, 1  ;;  %v1011_v33 = vld [vmem:[#allocation3 + $0x44] sm:$0x1] }
  0xf0   : > { %835 = vst.msk [vmem:[#allocation2 + $0x28] sm:$0xf] %vm829_vm6, %v822_v32  ;;  %v991_v35 = vsel %vm11781_vm8, %v943_v42, %v990_v39  ;;  %v617_v38 = vpop.f32.mrf.mxu0 }
  0xf1   : > { %836 = vst.msk [vmem:[#allocation2 + $0x30] sm:$0xf] %vm829_vm6, %v823_v41  ;;  %v997_v46 = vsel %vm11781_vm8, %v945_v45, %v996_v44  ;;  %v618_v55 = vadd.f32 %v11754_v22, %v617_v38 }
  0xf2   : > { %992 = vst [vmem:[#allocation3 + $0x28] sm:$0xf] %v991_v35 }
  0xf3   : > { %995 = vst [vmem:[#allocation3 + $0x2c] sm:$0x1] %v994_v36  ;;  %v649_v48 = vmul.f32 0.75, %v618_v55  ;;  %v716_v57 = vmul.f32 0.25, %v618_v55 }
  0xf4   : > { %998 = vst [vmem:[#allocation3 + $0x30] sm:$0xf] %v997_v46 }
  0xf5   : > { %1001 = vst [vmem:[#allocation3 + $0x34] sm:$0x1] %v1000_v56  ;;  %v687_v59 = vrot.slane %v649_v48, 1  ;;  %v751_v60 = vrot.slane %v716_v57, 1 }
  0xf7   : > { %v688_v50 = vsel %vm670_vm5, %v686_v49, %v687_v59  ;;  %v752_v51 = vsel %vm670_vm5, %v750_v58, %v751_v60  ;;  %v786_v52 = vadd.f32 %v751_v60, %v649_v48 }
  0xf8   : > { %v708_v53 = vadd.f32 %v688_v50, %v635_v47  ;;  %v785_v61 = vadd.f32 %v752_v51, %v648_v54  ;;  %v620_v62 = vpop.f32.mrf.mxu0 }
  0xf9   : > { %v1047_v63 = vld [vmem:[#allocation3 + $0x28] sm:$0x1]  ;;  %v11881_v0 = vmul.f32 0.25, %v786_v52  ;;  %v11883_v1 = vmul.f32 0.75, %v786_v52 }
  0xfa   : > { %v1048_v2 = vsel %vm11739_vm4, 0, %v1047_v63  ;;  %v11887_v3 = vmul.f32 0.25, %v708_v53  ;;  %v11889_v4 = vmul.f32 0.75, %v708_v53  ;;  %v11891_v5 = vmul.f32 0.25, %v785_v61 }
  0xfb   : > { %1049 = vst [vmem:[#allocation3 + $0x28] sm:$0x1] %v1048_v2  ;;  %v1050_v6 = vld [vmem:[#allocation3 + $0x30] sm:$0x1]  ;;  %v11893_v7 = vmul.f32 0.75, %v785_v61  ;;  %v914_v8 = vadd.f32 %v11883_v1, %v11843_v15  ;;  %v928_v9 = vadd.f32 %v11845_v16, %v11881_v0  ;;  %v621_v16 = vadd.f32 %v11754_v22, %v620_v62 }
  0xfc   : > { %v1051_v10 = vsel %vm11739_vm4, 0, %v1050_v6  ;;  %v807_v12 = vadd.f32 %v11889_v4, %v11849_v18  ;;  %v814_v13 = vadd.f32 %v11851_v20, %v11887_v3  ;;  %v927_v14 = vadd.f32 %v899_v24, %v11891_v5  ;;  %v1002_v15 = vld [vmem:[#allocation3 + $0x38] sm:$0xf] }
  0xfd   : > { %1052 = vst [vmem:[#allocation3 + $0x30] sm:$0x1] %v1051_v10  ;;  %v913_v17 = vadd.f32 %v11893_v7, %v11853_v21  ;;  %v948_v23 = vpack.c.bf16 %v928_v9, %v928_v9  ;;  %v950_v29 = vpack.c.bf16 %v914_v8, %v914_v8  ;;  %v636_v39 = vmul.f32 0.25, %v621_v16  ;;  %v1017_v9 = vld [vmem:[#allocation3 + $0x4c] sm:$0x1] }
  0xfe   : > { %v824_v26 = vpack.c.bf16 %v814_v13, %v814_v13  ;;  %v825_v27 = vpack.c.bf16 %v807_v12, %v807_v12  ;;  %v947_v28 = vpack.c.bf16 %v927_v14, %v927_v14  ;;  %v650_v31 = vmul.f32 0.75, %v621_v16  ;;  %v1014_v13 = vld [vmem:[#allocation3 + $0x48] sm:$0xf]  ;;  %v1020_v14 = vld [vmem:[#allocation3 + $0x50] sm:$0xf] }
  0xff   : > { %v949_v18 = vpack.c.bf16 %v913_v17, %v913_v17  ;;  %v1006_v21 = vsel %vm11739_vm4, %v948_v23, %v1005_v25  ;;  %v1012_v32 = vsel %vm11739_vm4, %v950_v29, %v1011_v33  ;;  %v753_v44 = vrot.slane %v636_v39, 1  ;;  %v1023_v23 = vld [vmem:[#allocation3 + $0x54] sm:$0x1] }
 0x100   : > { %837 = vst.msk [vmem:[#allocation2 + $0x38] sm:$0xf] %vm829_vm6, %v824_v26  ;;  %v1003_v20 = vsel %vm11781_vm8, %v947_v28, %v1002_v15  ;;  %v622_v24 = vpop.f32.mrf.mxu0  ;;  %v689_v43 = vrot.slane %v650_v31, 1 }
 0x101   : > { %838 = vst.msk [vmem:[#allocation2 + $0x40] sm:$0xf] %vm829_vm6, %v825_v27  ;;  %v1009_v37 = vsel %vm11781_vm8, %v949_v18, %v1008_v30  ;;  %v623_v40 = vadd.f32 %v11754_v22, %v622_v24 }
 0x102   : > { %1004 = vst [vmem:[#allocation3 + $0x38] sm:$0xf] %v1003_v20 }
 0x103   : > { %1007 = vst [vmem:[#allocation3 + $0x3c] sm:$0x1] %v1006_v21  ;;  %v651_v41 = vmul.f32 0.75, %v623_v40  ;;  %v717_v42 = vmul.f32 0.25, %v623_v40 }
 0x104   : > { %1010 = vst [vmem:[#allocation3 + $0x40] sm:$0xf] %v1009_v37 }
 0x105   : > { %1013 = vst [vmem:[#allocation3 + $0x44] sm:$0x1] %v1012_v32  ;;  %v690_v45 = vrot.slane %v651_v41, 1  ;;  %v754_v34 = vrot.slane %v717_v42, 1 }
 0x107   : > { %v691_v35 = vsel %vm670_vm5, %v689_v43, %v690_v45  ;;  %v755_v36 = vsel %vm670_vm5, %v753_v44, %v754_v34  ;;  %v788_v38 = vadd.f32 %v754_v34, %v651_v41 }
 0x108   : > { %v709_v46 = vadd.f32 %v691_v35, %v636_v39  ;;  %v787_v47 = vadd.f32 %v755_v36, %v650_v31  ;;  %v625_v54 = vpop.f32.mrf.mxu0  ;;  %v1029_v35 = vld [vmem:[#allocation3 + $0x5c] sm:$0x1] }
 0x109   : > { %v1053_v55 = vld [vmem:[#allocation3 + $0x38] sm:$0x1]  ;;  %v904_v56 = vmul.f32 0.75, %v788_v38  ;;  %v918_v48 = vmul.f32 0.25, %v788_v38  ;;  %v626_v53 = vadd.f32 %v11754_v22, %v625_v54 }
 0x10a   : > { %v1054_v57 = vsel %vm11739_vm4, 0, %v1053_v55  ;;  %v802_v49 = vmul.f32 0.75, %v709_v46  ;;  %v809_v58 = vmul.f32 0.25, %v709_v46  ;;  %v903_v59 = vmul.f32 0.75, %v787_v47  ;;  %v1026_v38 = vld [vmem:[#allocation3 + $0x58] sm:$0xf] }
 0x10b   : > { %1055 = vst [vmem:[#allocation3 + $0x38] sm:$0x1] %v1054_v57  ;;  %v1056_v60 = vld [vmem:[#allocation3 + $0x40] sm:$0x1]  ;;  %v916_v50 = vadd.f32 %v904_v56, %v11881_v0  ;;  %v917_v51 = vmul.f32 0.25, %v787_v47  ;;  %v930_v52 = vadd.f32 %v918_v48, %v11883_v1  ;;  %v652_v25 = vmul.f32 0.75, %v626_v53 }
 0x10c   : > { %v1057_v61 = vsel %vm11739_vm4, 0, %v1056_v60  ;;  %v808_v62 = vadd.f32 %v802_v49, %v11887_v3  ;;  %v815_v63 = vadd.f32 %v809_v58, %v11889_v4  ;;  %v915_v2 = vadd.f32 %v903_v59, %v11891_v5 }
 0x10d   : > { %1058 = vst [vmem:[#allocation3 + $0x40] sm:$0x1] %v1057_v61  ;;  %v929_v6 = vadd.f32 %v917_v51, %v11893_v7  ;;  %v952_v8 = vpack.c.bf16 %v930_v52, %v930_v52  ;;  %v954_v1 = vpack.c.bf16 %v916_v50, %v916_v50  ;;  %v637_v4 = vmul.f32 0.25, %v626_v53 }
 0x10e   : > { %v826_v0 = vpack.c.bf16 %v815_v63, %v815_v63  ;;  %v827_v10 = vpack.c.bf16 %v808_v62, %v808_v62  ;;  %v953_v12 = vpack.c.bf16 %v915_v2, %v915_v2  ;;  %v692_v29 = vrot.slane %v652_v25, 1 }
 0x10f   : > { %v951_v17 = vpack.c.bf16 %v929_v6, %v929_v6  ;;  %v1018_v3 = vsel %vm11739_vm4, %v952_v8, %v1017_v9  ;;  %v1024_v26 = vsel %vm11739_vm4, %v954_v1, %v1023_v23  ;;  %v756_v30 = vrot.slane %v637_v4, 1 }
 0x110   : > { %839 = vst.msk [vmem:[#allocation2 + $0x48] sm:$0xf] %vm829_vm6, %v826_v0  ;;  %v627_v5 = vpop.f32.mrf.mxu0  ;;  %v1021_v15 = vsel %vm11781_vm8, %v953_v12, %v1020_v14 }
 0x111   : > { %840 = vst.msk [vmem:[#allocation2 + $0x50] sm:$0xf] %vm829_vm6, %v827_v10  ;;  %v1015_v7 = vsel %vm11781_vm8, %v951_v17, %v1014_v13  ;;  %v628_v16 = vadd.f32 %v11754_v22, %v627_v5 }
 0x112   : > { %1016 = vst [vmem:[#allocation3 + $0x48] sm:$0xf] %v1015_v7 }
 0x113   : > { %1019 = vst [vmem:[#allocation3 + $0x4c] sm:$0x1] %v1018_v3  ;;  %v653_v27 = vmul.f32 0.75, %v628_v16  ;;  %v718_v28 = vmul.f32 0.25, %v628_v16 }
 0x114   : > { %1022 = vst [vmem:[#allocation3 + $0x50] sm:$0xf] %v1021_v15 }
 0x115   : > { %1025 = vst [vmem:[#allocation3 + $0x54] sm:$0x1] %v1024_v26  ;;  %v693_v18 = vrot.slane %v653_v27, 1  ;;  %v757_v33 = vrot.slane %v718_v28, 1 }
 0x117   : > { %v694_v20 = vsel %vm670_vm5, %v692_v29, %v693_v18  ;;  %v758_v21 = vsel %vm670_vm5, %v756_v30, %v757_v33  ;;  %v790_v24 = vadd.f32 %v757_v33, %v653_v27 }
 0x118   : > { %v710_v37 = vadd.f32 %v694_v20, %v637_v4  ;;  %v789_v22 = vadd.f32 %v758_v21, %v652_v25 }
 0x119   : > { %v1059_v39 = vld [vmem:[#allocation3 + $0x48] sm:$0x1]  ;;  %v920_v31 = vmul.f32 0.25, %v790_v24 }
 0x11a   : > { %v1060_v40 = vsel %vm11739_vm4, 0, %v1059_v39  ;;  %v810_v32 = vmul.f32 0.25, %v710_v37  ;;  %v919_v41 = vmul.f32 0.25, %v789_v22 }
 0x11b   : > { %1061 = vst [vmem:[#allocation3 + $0x48] sm:$0x1] %v1060_v40  ;;  %v1062_v42 = vld [vmem:[#allocation3 + $0x50] sm:$0x1]  ;;  %v932_v43 = vadd.f32 %v920_v31, %v904_v56 }
 0x11c   : > { %v1063_v44 = vsel %vm11739_vm4, 0, %v1062_v42  ;;  %v816_v45 = vadd.f32 %v810_v32, %v802_v49  ;;  %v931_v34 = vadd.f32 %v919_v41, %v903_v59 }
 0x11d   : > { %1064 = vst [vmem:[#allocation3 + $0x50] sm:$0x1] %v1063_v44  ;;  %v956_v36 = vpack.c.bf16 %v932_v43, %v932_v43 }
 0x11e   : > { %v828_v46 = vpack.c.bf16 %v816_v45, %v816_v45  ;;  %v955_v47 = vpack.c.bf16 %v931_v34, %v931_v34 }
 0x11f   : > { %v1030_v54 = vsel %vm11739_vm4, %v956_v36, %v1029_v35 }
 0x120   : > { %841 = vst.msk [vmem:[#allocation2 + $0x58] sm:$0xf] %vm829_vm6, %v828_v46  ;;  %v1027_v55 = vsel %vm11781_vm8, %v955_v47, %v1026_v38 }
 0x121   : > { %1028 = vst [vmem:[#allocation3 + $0x58] sm:$0xf] %v1027_v55 }
 0x122   : > { %1031 = vst [vmem:[#allocation3 + $0x5c] sm:$0x1] %v1030_v54 }
 0x126   : > { %1071 = sbr.rel (%p10347_p7) target bundleno = 308 (0x134), region = 76 }
 0x128   : > { %v1065_v56 = vld [vmem:[#allocation3 + $0x58] sm:$0x1] }
 0x129   : > { %v1066_v48 = vsel %vm11739_vm4, 0, %v1065_v56 }
 0x12a   : > { %1067 = vst [vmem:[#allocation3 + $0x58] sm:$0x1] %v1066_v48 }
 0x12b   : > { %v1073_v57 = vld [vmem:[#allocation2 + $0x4] sm:$0x1]  ;;  %v1077_v49 = vld [vmem:[#allocation2 + $0xc] sm:$0x1]  ;;  %v11607_v58 = vmov 0  }
 0x12c   : > { %1072 = vst.msk [vmem:[#allocation2] sm:$0xf] %vm829_vm6, %v11607_v58  ;;  %v1081_v59 = vld [vmem:[#allocation3 + $0x4] sm:$0x1]  ;;  %v1074_v60 = vsel %vm11739_vm4, 0, %v1073_v57  ;;  %v1078_v51 = vsel %vm11739_vm4, 0, %v1077_v49 }
 0x12d   : > { %1076 = vst.msk [vmem:[#allocation2 + $0x8] sm:$0xf] %vm829_vm6, %v11607_v58  ;;  %v1085_v50 = vld [vmem:[#allocation3 + $0xc] sm:$0x1]  ;;  %v1082_v52 = vsel %vm11739_vm4, 0, %v1081_v59 }
 0x12e   : > { %1080 = vst.msk [vmem:[#allocation3] sm:$0xf] %vm829_vm6, %v11607_v58  ;;  %v1086_v53 = vsel %vm11739_vm4, 0, %v1085_v50 }
 0x12f   : > { %1084 = vst.msk [vmem:[#allocation3 + $0x8] sm:$0xf] %vm829_vm6, %v11607_v58 }
 0x130   : > { %1075 = vst [vmem:[#allocation2 + $0x4] sm:$0x1] %v1074_v60 }
 0x131   : > { %1079 = vst [vmem:[#allocation2 + $0xc] sm:$0x1] %v1078_v51 }
 0x132   : > { %1083 = vst [vmem:[#allocation3 + $0x4] sm:$0x1] %v1082_v52 }
 0x133   : > { %1087 = vst [vmem:[#allocation3 + $0xc] sm:$0x1] %v1086_v53 }
 0x134 PF: > { %p10348_p8 = scmp.ne.s32.totalorder %s11589_s25, 1 }
 0x136   : > { %1091 = sbr.rel (%p10348_p8) target bundleno = 324 (0x144), region = 80 }
 0x13b   : > { %v1094_v61 = vld [vmem:[#allocation2 + $0x54] sm:$0x1]  ;;  %v1098_v62 = vld [vmem:[#allocation2 + $0x5c] sm:$0x1]  ;;  %v11608_v63 = vmov 0  }
 0x13c   : > { %1093 = vst.msk [vmem:[#allocation2 + $0x50] sm:$0xf] %vm829_vm6, %v11608_v63  ;;  %v1103_v2 = vld [vmem:[#allocation3 + $0x54] sm:$0x1]  ;;  %v1095_v6 = vsel %vm11739_vm4, 0, %v1094_v61  ;;  %v1099_v9 = vsel %vm11739_vm4, 0, %v1098_v62 }
 0x13d   : > { %1097 = vst.msk [vmem:[#allocation2 + $0x58] sm:$0xf] %vm829_vm6, %v11608_v63  ;;  %v1107_v8 = vld [vmem:[#allocation3 + $0x5c] sm:$0x1]  ;;  %v1104_v0 = vsel %vm11739_vm4, 0, %v1103_v2 }
 0x13e   : > { %1102 = vst.msk [vmem:[#allocation3 + $0x50] sm:$0xf] %vm829_vm6, %v11608_v63  ;;  %v1108_v10 = vsel %vm11739_vm4, 0, %v1107_v8 }
 0x13f   : > { %1106 = vst.msk [vmem:[#allocation3 + $0x58] sm:$0xf] %vm829_vm6, %v11608_v63 }
 0x140   : > { %1096 = vst [vmem:[#allocation2 + $0x54] sm:$0x1] %v1095_v6 }
 0x141   : > { %1100 = vst [vmem:[#allocation2 + $0x5c] sm:$0x1] %v1099_v9 }
 0x142   : > { %1105 = vst [vmem:[#allocation3 + $0x54] sm:$0x1] %v1104_v0 }
 0x143   : > { %1109 = vst [vmem:[#allocation3 + $0x5c] sm:$0x1] %v1108_v10 }
 0x144 PF: > { %v1136_v12 = vld [vmem:[%s14904_s5] sm:$0x3]  ;;  %vm1178_vm9 = vcmask 1041408   ;;  %s11378_s14 = sshll.u32 %s11589_s25, 7  ;;  %vm1162_vm10 = vcmask 31744  }
 0x145   : > { %v1135_v1 = vld [vmem:[%s14903_s4] sm:$0x3]  ;;  %v1180_v13 = vsel %vm1178_vm9, %v1136_v12, 0  ;;  %s11997_s17 = scalar_lea.vmem %s11724_s30, %s11378_s14  ;;  %v11372_v4 = vld [vmem:[#allocation3 + $0x4] sm:$0xf0] }
 0x146   : > { %v1257_v14 = vsel %vm1178_vm9, %v1135_v1, 0  ;;  %v10390_v17 = vld [vmem:[#allocation3] sm:$0xf]  ;;  %11507 = vmatpush.bf16.msra.mxu1 %v1180_v13  ;;  %v10369_v23 = vld [vmem:[%s11997_s17 + $0x28] sm:$0xf]  ;;  %1189 = vmatpush.bf16.msrb.mxu0 %v1180_v13 }
 0x147   : > { %1266 = vmatpush.bf16.msra.mxu2 %v1257_v14  ;;  %v11380_v3 = vld [vmem:[%s11997_s17 + $0x34] sm:$0xf0]  ;;  %v10391_v7 = vor.u32 %v11372_v4, %v10390_v17  ;;  %v1315_v15 = vld [vmem:[%s14903_s4] sm:$0xc]  ;;  %v11384_v30 = vld [vmem:[#allocation2 + $0x4] sm:$0xf0] }
 0x148   : > { %v10370_v5 = vor.u32 %v11380_v3, %v10369_v23  ;;  %v1407_v25 = vld [vmem:[%s14904_s5] sm:$0xc]  ;;  %v1342_v16 = vunpack.c.l.b16 %v1315_v15  ;;  %v10373_v37 = vld [vmem:[%s11997_s17 + $0x48] sm:$0xf]  ;;  %v11381_v22 = vld [vmem:[%s11997_s17 + $0x54] sm:$0xf0] }
 0x149   : > { %v1434_v26 = vunpack.c.l.b16 %v1407_v25  ;;  %v10416_v29 = vld [vmem:[#allocation2] sm:$0xf]  ;;  %v10394_v39 = vld [vmem:[#allocation3 + $0x10] sm:$0xf]  ;;  %v11373_v31 = vld [vmem:[#allocation3 + $0x14] sm:$0xf0]  ;;  %v10374_v40 = vor.u32 %v11381_v22, %v10373_v37 }
 0x14a   : > { %10384 = vmatmul.msk.bf16.vlgmr.msra.gmra.mxu1 %vm1162_vm10, %v10370_v5  ;;  %10408 = vmatmul.msk.bf16.vlgmr.msra.gmra.mxu2 %vm1162_vm10, %v10391_v7  ;;  %v1343_v27 = vpack.c.b16 %v1342_v16, %v1342_v16  ;;  %v10417_v24 = vor.u32 %v11384_v30, %v10416_v29  ;;  %v10395_v32 = vor.u32 %v11373_v31, %v10394_v39  ;;  %v10365_v41 = vld [vmem:[%s11997_s17 + $0x8] sm:$0xf]  ;;  %v11379_v42 = vld [vmem:[%s11997_s17 + $0x14] sm:$0xf0]  ;;  %v10420_v43 = vld [vmem:[#allocation2 + $0x10] sm:$0xf] }
 0x14b   : > { %v1435_v28 = vpack.c.b16 %v1434_v26, %v1434_v26  ;;  %v11385_v44 = vld [vmem:[#allocation2 + $0x14] sm:$0xf0]  ;;  %v10366_v45 = vor.u32 %v11379_v42, %v10365_v41  ;;  %v10377_v35 = vld [vmem:[%s11997_s17 + $0x68] sm:$0xf]  ;;  %v10398_v38 = vld [vmem:[#allocation3 + $0x20] sm:$0xf] }
 0x14c   : > { %v1344_v18 = vrot.slane %v1343_v27, 2  ;;  %v10421_v34 = vor.u32 %v11385_v44, %v10420_v43  ;;  %v11382_v36 = vld [vmem:[%s11997_s17 + $0x74] sm:$0xf0]  ;;  %v11374_v46 = vld [vmem:[#allocation3 + $0x24] sm:$0xf0] }
 0x14d   : > { %v1436_v33 = vrot.slane %v1435_v28, 2  ;;  %10383 = vmatmul.msk.bf16.vlgmr.msrb.gmra.mxu0 %vm1162_vm10, %v10366_v45  ;;  %v1822_v47 = vld [vmem:[%s14903_s4 + $0x4] sm:$0x3]  ;;  %v10378_v48 = vor.u32 %v11382_v36, %v10377_v35  ;;  %v10399_v57 = vor.u32 %v11374_v46, %v10398_v38  ;;  %v2096_v49 = vld [vmem:[%s14904_s5 + $0x4] sm:$0xc] }
 0x14e   : > { %v1361_v20 = vsel %vm1178_vm9, %v1344_v18, 0  ;;  %v1900_v54 = vld [vmem:[%s14904_s5 + $0x4] sm:$0x3]  ;;  %v1854_v55 = vsel %vm1178_vm9, %v1822_v47, 0  ;;  %v2123_v58 = vunpack.c.l.b16 %v2096_v49  ;;  %v10424_v59 = vld [vmem:[#allocation2 + $0x20] sm:$0xf] }
 0x14f   : > { %v1453_v21 = vsel %vm1178_vm9, %v1436_v33, 0  ;;  %1370 = vmatpush.bf16.msra.mxu3 %v1361_v20  ;;  %v1932_v56 = vsel %vm1178_vm9, %v1900_v54, 0  ;;  %1863 = vmatpush.bf16.msrb.mxu2 %v1854_v55  ;;  %v11386_v60 = vld [vmem:[#allocation2 + $0x24] sm:$0xf0]  ;;  %v11383_v62 = vld [vmem:[%s11997_s17 + $0x94] sm:$0xf0] }
 0x150   : > { %1462 = vmatpush.bf16.msrb.mxu1 %v1453_v21  ;;  %v2124_v50 = vpack.c.b16 %v2123_v58, %v2123_v58  ;;  %v10425_v51 = vor.u32 %v11386_v60, %v10424_v59  ;;  %v10381_v61 = vld [vmem:[%s11997_s17 + $0x88] sm:$0xf]  ;;  %v10402_v63 = vld [vmem:[#allocation3 + $0x30] sm:$0xf]  ;;  %v11375_v2 = vld [vmem:[#allocation3 + $0x34] sm:$0xf0] }
 0x151   : > { %v10382_v6 = vor.u32 %v11383_v62, %v10381_v61  ;;  %v10403_v8 = vor.u32 %v11375_v2, %v10402_v63  ;;  %v1499_v9 = vld [vmem:[#allocation3] sm:$0xf]  ;;  %v1501_v0 = vld [vmem:[#allocation3 + $0x8] sm:$0xf]  ;;  %v10428_v10 = vld [vmem:[#allocation2 + $0x30] sm:$0xf] }
 0x152   : > { %10434 = vmatmul.msk.bf16.vlgmr.msra.gmra.mxu3 %vm1162_vm10, %v10417_v24  ;;  %v2125_v52 = vrot.slane %v2124_v50, 2  ;;  %v11387_v12 = vld [vmem:[#allocation2 + $0x34] sm:$0xf0]  ;;  %v1523_v1 = vshrl.u32 %v1499_v9, 16  ;;  %v1526_v13 = vshll.u32 %v1499_v9, 16  ;;  %v1537_v14 = vshrl.u32 %v1501_v0, 16 }
 0x153   : > { %1941 = vmatpush.bf16.msrb.mxu3 %v1932_v56  ;;  %v1540_v17 = vshll.u32 %v1501_v0, 16  ;;  %v10429_v23 = vor.u32 %v11387_v12, %v10428_v10  ;;  %v10406_v3 = vld [vmem:[#allocation3 + $0x40] sm:$0xf]  ;;  %v2004_v4 = vld [vmem:[%s14903_s4 + $0x4] sm:$0xc] }
 0x154   : > { %v2142_v53 = vsel %vm1178_vm9, %v2125_v52, 0  ;;  %v11376_v5 = vld [vmem:[#allocation3 + $0x44] sm:$0xf0]  ;;  %v10441_v7 = vld [vmem:[%s11997_s17] sm:$0xf]  ;;  %v1525_v15 = vrot.slane %v1523_v1, 4  ;;  %v2031_v16 = vunpack.c.l.b16 %v2004_v4 }
 0x155   : > { %2151 = vmatpush.bf16.msra.mxu1 %v2142_v53  ;;  %v1528_v25 = vrot.slane %v1526_v13, 5  ;;  %v11390_v26 = vld [vmem:[%s11997_s17 + $0xc] sm:$0xf0]  ;;  %v1500_v27 = vld [vmem:[#allocation3 + $0x4] sm:$0x1]  ;;  %v1539_v28 = vrot.slane %v1537_v14, 4  ;;  %v10407_v20 = vor.u32 %v11376_v5, %v10406_v3 }
 0x156   : > { %v1542_v29 = vrot.slane %v1540_v17, 5  ;;  %v1502_v30 = vld [vmem:[#allocation3 + $0xc] sm:$0x1]  ;;  %v10464_v18 = vld [vmem:[%s11997_s17 + $0x8] sm:$0xf]  ;;  %v2032_v33 = vpack.c.b16 %v2031_v16, %v2031_v16  ;;  %v10442_v22 = vor.u32 %v11390_v26, %v10441_v7  ;;  %v1532_v31 = vshll.u32 %v1500_v27, 16 }
 0x157   : > { %v10466_v21 = vld [vmem:[%s11997_s17 + $0x18] sm:$0xf]  ;;  %v10509_v24 = vld [vmem:[#allocation3 + $0x8] sm:$0xf]  ;;  %v11395_v37 = vld [vmem:[#allocation3 + $0xc] sm:$0xf0]  ;;  %v1529_v39 = vor.u32 %v1528_v25, %v1525_v15 }
 0x158   : > { %v1546_v41 = vshll.u32 %v1502_v30, 16  ;;  %v1683_v42 = vshrl.u32 %v10464_v18, 16  ;;  %v1686_v43 = vshll.u32 %v10464_v18, 16  ;;  %v1697_v44 = vshrl.u32 %v10466_v21, 16  ;;  %v10432_v36 = vld [vmem:[#allocation2 + $0x40] sm:$0xf] }
 0x159   : > { %v1700_v45 = vshll.u32 %v10466_v21, 16  ;;  %v10510_v35 = vor.u32 %v11395_v37, %v10509_v24  ;;  %vm1519_vm11 = vsmask.f32 3328  ;;  %vm1520_vm12 = vsmask.f32 7440 }
 0x15a   : > { %10385 = vmatmul.msk.bf16.gmra.mxu1 %vm1162_vm10, %v10374_v40  ;;  %10409 = vmatmul.msk.bf16.gmra.mxu2 %vm1162_vm10, %v10395_v32  ;;  %v2033_v40 = vrot.slane %v2032_v33, 2  ;;  %v1543_v32 = vor.u32 %v1542_v29, %v1539_v28  ;;  %v11388_v38 = vld [vmem:[#allocation2 + $0x44] sm:$0xf0]  ;;  %v1530_v46 = vrot.slane %v1529_v39, 4  ;;  %v1534_v47 = vrot.slane %v1532_v31, 5  ;;  %vm12052_vm13 = vmor %vm1519_vm11, %vm1520_vm12 }
 0x15b   : > { %v1548_v55 = vrot.slane %v1546_v41, 5  ;;  %v1503_v56 = vld [vmem:[#allocation3 + $0x10] sm:$0xf]  ;;  %v1688_v49 = vrot.slane %v1686_v43, 5  ;;  %v1699_v58 = vrot.slane %v1697_v44, 4  ;;  %v1702_v59 = vrot.slane %v1700_v45, 5 }
 0x15c   : > { %v1544_v54 = vrot.slane %v1543_v32, 4  ;;  %v1505_v60 = vld [vmem:[#allocation3 + $0x18] sm:$0xf]  ;;  %v10465_v50 = vld [vmem:[%s11997_s17 + $0xc] sm:$0x1]  ;;  %v10433_v52 = vor.u32 %v11388_v38, %v10432_v36  ;;  %v1551_v53 = vshrl.u32 %v1503_v56, 16  ;;  %v1535_v62 = vsel %vm12052_vm13, %v1530_v46, %v1534_v47 }
 0x15d   : > { %v1554_v61 = vshll.u32 %v1503_v56, 16  ;;  %v1565_v2 = vshrl.u32 %v1505_v60, 16  ;;  %v1692_v9 = vshll.u32 %v10465_v50, 16  ;;  %v1703_v0 = vor.u32 %v1702_v59, %v1699_v58  ;;  %v10445_v12 = vld [vmem:[%s11997_s17 + $0x20] sm:$0xf] }
 0x15e   : > { %v1549_v63 = vsel %vm12052_vm13, %v1544_v54, %v1548_v55  ;;  %v1504_v1 = vld [vmem:[#allocation3 + $0x14] sm:$0x1]  ;;  %v1553_v13 = vrot.slane %v1551_v53, 4  ;;  %v1823_v17 = vunpack.c.l.b16 %v1535_v62  ;;  %v1506_v3 = vld [vmem:[#allocation3 + $0x1c] sm:$0x1] }
 0x15f   : > { %v1556_v14 = vrot.slane %v1554_v61, 5  ;;  %v1567_v4 = vrot.slane %v1565_v2, 4  ;;  %v10468_v7 = vld [vmem:[%s11997_s17 + $0x28] sm:$0xf]  ;;  %v11391_v15 = vld [vmem:[%s11997_s17 + $0x2c] sm:$0xf0] }
 0x160   : > { %v1694_v16 = vrot.slane %v1692_v9, 5  ;;  %v1704_v26 = vrot.slane %v1703_v0, 4  ;;  %v10470_v28 = vld [vmem:[%s11997_s17 + $0x38] sm:$0xf]  ;;  %v11396_v30 = vld [vmem:[#allocation3 + $0x1c] sm:$0xf0]  ;;  %v10446_v24 = vor.u32 %v11391_v15, %v10445_v12 }
 0x161   : > { %v10513_v29 = vld [vmem:[#allocation3 + $0x18] sm:$0xf]  ;;  %v1557_v18 = vor.u32 %v1556_v14, %v1553_v13  ;;  %v1560_v33 = vshll.u32 %v1504_v1, 16  ;;  %v1711_v21 = vshrl.u32 %v10468_v7, 16  ;;  %v1714_v39 = vshll.u32 %v10468_v7, 16 }
 0x162   : > { %10435 = vmatmul.msk.bf16.gmra.mxu3 %vm1162_vm10, %v10421_v34  ;;  %v2050_v34 = vsel %vm1178_vm9, %v2033_v40, 0  ;;  %v1725_v31 = vshrl.u32 %v10470_v28, 16  ;;  %v1728_v40 = vshll.u32 %v10470_v28, 16  ;;  %v10514_v32 = vor.u32 %v11396_v30, %v10513_v29  ;;  %v1507_v41 = vld [vmem:[#allocation3 + $0x20] sm:$0xf] }
 0x163   : > { %2059 = vmatpush.bf16.msra.mxu0 %v2050_v34  ;;  %v1558_v44 = vrot.slane %v1557_v18, 4  ;;  %v1562_v45 = vrot.slane %v1560_v33, 5  ;;  %v1509_v36 = vld [vmem:[#allocation3 + $0x28] sm:$0xf]  ;;  %v10469_v46 = vld [vmem:[%s11997_s17 + $0x2c] sm:$0x1] }
 0x164   : > { %v1716_v47 = vrot.slane %v1714_v39, 5  ;;  %v1579_v54 = vshrl.u32 %v1507_v41, 16  ;;  %v1582_v55 = vshll.u32 %v1507_v41, 16  ;;  %v1730_v58 = vrot.slane %v1728_v40, 5  ;;  %v10471_v59 = vld [vmem:[%s11997_s17 + $0x3c] sm:$0x1] }
 0x165   : > { %v1596_v50 = vshll.u32 %v1509_v36, 16  ;;  %v1508_v9 = vld [vmem:[#allocation3 + $0x24] sm:$0x1]  ;;  %v1510_v0 = vld [vmem:[#allocation3 + $0x2c] sm:$0x1] }
 0x166   : > { %10527 = vmatmul.msk.bf16.vlgmr.msra.gmra.mxu0 %vm1162_vm10, %v10510_v35  ;;  %v1713_v35 = vrot.slane %v1711_v21, 4  ;;  %v1581_v62 = vrot.slane %v1579_v54, 4  ;;  %v10472_v1 = vld [vmem:[%s11997_s17 + $0x48] sm:$0xf]  ;;  %v10449_v13 = vld [vmem:[%s11997_s17 + $0x40] sm:$0xf] }
 0x167   : > { %v1598_v12 = vrot.slane %v1596_v50, 5  ;;  %v1588_v15 = vshll.u32 %v1508_v9, 16  ;;  %v1742_v28 = vshll.u32 %v10472_v1, 16  ;;  %v11397_v41 = vld [vmem:[#allocation3 + $0x2c] sm:$0xf0] }
 0x168   : > { %v1717_v61 = vor.u32 %v1716_v47, %v1713_v35  ;;  %v10475_v35 = vld [vmem:[%s11997_s17 + $0x5c] sm:$0x1] }
 0x169   : > { %v1744_v40 = vrot.slane %v1742_v28, 5 }
 0x16a   : > { %10386 = vmatmul.msk.bf16.gmra.mxu1 %vm1162_vm10, %v10378_v48  ;;  %10410 = vmatmul.msk.bf16.gmra.mxu2 %vm1162_vm10, %v10399_v57  ;;  %v1685_v57 = vrot.slane %v1683_v42, 4 }
 0x172   : > { %10436 = vmatmul.msk.bf16.gmra.mxu3 %vm1162_vm10, %v10425_v51  ;;  %v10467_v51 = vld [vmem:[%s11997_s17 + $0x1c] sm:$0x1] }
 0x173   : > { %v1706_v10 = vshll.u32 %v10467_v51, 16  ;;  %v1563_v51 = vsel %vm12052_vm13, %v1558_v44, %v1562_v45 }
 0x174   : > { %v1825_v14 = vunpack.c.l.b16 %v1563_v51 }
 0x175   : > { %v1708_v27 = vrot.slane %v1706_v10, 5 }
 0x176   : > { %10528 = vmatmul.msk.bf16.gmra.mxu0 %vm1162_vm10, %v10514_v32  ;;  %v10517_v32 = vld [vmem:[#allocation3 + $0x28] sm:$0xf] }
 0x177   : > { %v1709_v43 = vsel %vm12052_vm13, %v1704_v26, %v1708_v27  ;;  %v1739_v27 = vshrl.u32 %v10472_v1, 16  ;;  %v10518_v45 = vor.u32 %v11397_v41, %v10517_v32 }
 0x17a   : > { %10387 = vmatmul.msk.bf16.gmra.mxu1 %vm1162_vm10, %v10382_v6  ;;  %10411 = vmatmul.msk.bf16.gmra.mxu2 %vm1162_vm10, %v10403_v8  ;;  %v1568_v6 = vshll.u32 %v1505_v60, 16  ;;  %v1689_v8 = vor.u32 %v1688_v49, %v1685_v57  ;;  %v1902_v57 = vunpack.c.l.b16 %v1709_v43  ;;  %v1727_v49 = vrot.slane %v1725_v31, 4 }
 0x17b   : > { %v1593_v60 = vshrl.u32 %v1509_v36, 16  ;;  %v1741_v31 = vrot.slane %v1739_v27, 4  ;;  %v1511_v36 = vld [vmem:[#allocation3 + $0x30] sm:$0xf] }
 0x17c   : > { %v1570_v5 = vrot.slane %v1568_v6, 5  ;;  %v1690_v25 = vrot.slane %v1689_v8, 4  ;;  %v1731_v6 = vor.u32 %v1730_v58, %v1727_v49  ;;  %v1734_v8 = vshll.u32 %v10471_v59, 16 }
 0x17d   : > { %v1595_v10 = vrot.slane %v1593_v60, 4  ;;  %v1762_v58 = vshll.u32 %v10475_v35, 16  ;;  %v1607_v59 = vshrl.u32 %v1511_v36, 16  ;;  %v1610_v60 = vshll.u32 %v1511_v36, 16  ;;  %v1515_v35 = vld [vmem:[#allocation3 + $0x40] sm:$0xf] }
 0x17e   : > { %v1695_v42 = vsel %vm12052_vm13, %v1690_v25, %v1694_v16  ;;  %v1602_v25 = vshll.u32 %v1510_v0, 16  ;;  %v1732_v16 = vrot.slane %v1731_v6, 4  ;;  %v1736_v26 = vrot.slane %v1734_v8, 5  ;;  %v10477_v36 = vld [vmem:[%s11997_s17 + $0x6c] sm:$0x1] }
 0x17f   : > { %v1901_v56 = vunpack.c.l.b16 %v1695_v42  ;;  %v1599_v29 = vor.u32 %v1598_v12, %v1595_v10  ;;  %v1764_v9 = vrot.slane %v1762_v58, 5  ;;  %v1609_v0 = vrot.slane %v1607_v59, 4 }
 0x180   : > { %v1737_v39 = vsel %vm12052_vm13, %v1732_v16, %v1736_v26  ;;  %v1612_v10 = vrot.slane %v1610_v60, 5  ;;  %v1776_v58 = vshll.u32 %v10477_v36, 16 }
 0x181   : > { %v1911_v2 = vpack.c.b16 %v1902_v57, %v1901_v56  ;;  %v1600_v42 = vrot.slane %v1599_v29, 4  ;;  %v1904_v47 = vunpack.c.l.b16 %v1737_v39 }
 0x182   : > { %10437 = vmatmul.msk.bf16.gmra.mxu3 %vm1162_vm10, %v10429_v23  ;;  %v1824_v23 = vunpack.c.l.b16 %v1549_v63  ;;  %v1584_v63 = vrot.slane %v1582_v55, 5  ;;  %v1745_v55 = vor.u32 %v1744_v40, %v1741_v31  ;;  %v1613_v16 = vor.u32 %v1612_v10, %v1609_v0 }
 0x184   : > { %v1833_v37 = vpack.c.b16 %v1824_v23, %v1823_v17  ;;  %v1585_v7 = vor.u32 %v1584_v63, %v1581_v62  ;;  %v11393_v63 = vld [vmem:[%s11997_s17 + $0x6c] sm:$0xf0]  ;;  %v1614_v40 = vrot.slane %v1613_v16, 4  ;;  %v10480_v16 = vld [vmem:[%s11997_s17 + $0x88] sm:$0xf] }
 0x186   : > { %v1586_v21 = vrot.slane %v1585_v7, 4  ;;  %10529 = vmatmul.msk.bf16.gmra.mxu0 %vm1162_vm10, %v10518_v45 }
 0x18a   : > { %10412 = vmatmul.msk.bf16.gmra.mxu2 %vm1162_vm10, %v10407_v20  ;;  %10459 = vmatmul.msk.bf16.vlgmr.msrb.gmra.mxu1 %vm1162_vm10, %v10442_v22  ;;  %v1574_v20 = vshll.u32 %v1506_v3, 16  ;;  %v1571_v22 = vor.u32 %v1570_v5, %v1567_v4  ;;  %v10474_v3 = vld [vmem:[%s11997_s17 + $0x58] sm:$0xf]  ;;  %v11392_v4 = vld [vmem:[%s11997_s17 + $0x4c] sm:$0xf0]  ;;  %v1718_v5 = vrot.slane %v1717_v61, 4 }
 0x18b   : > { %v1753_v30 = vshrl.u32 %v10474_v3, 16  ;;  %v1756_v18 = vshll.u32 %v10474_v3, 16  ;;  %v10450_v33 = vor.u32 %v11392_v4, %v10449_v13  ;;  %v1512_v13 = vld [vmem:[#allocation3 + $0x34] sm:$0x1]  ;;  %v10478_v3 = vld [vmem:[%s11997_s17 + $0x78] sm:$0xf] }
 0x18c   : > { %v1576_v34 = vrot.slane %v1574_v20, 5  ;;  %v1572_v38 = vrot.slane %v1571_v22, 4  ;;  %v2211_v4 = vld [vmem:[%s14903_s4 + $0x8] sm:$0x3]  ;;  %v1616_v26 = vshll.u32 %v1512_v13, 16  ;;  %v1778_v13 = vrot.slane %v1776_v58, 5 }
 0x18d   : > { %v1755_v43 = vrot.slane %v1753_v30, 4  ;;  %v1758_v44 = vrot.slane %v1756_v18, 5  ;;  %v1781_v18 = vshrl.u32 %v10478_v3, 16 }
 0x18e   : > { %v1577_v53 = vsel %vm12052_vm13, %v1572_v38, %v1576_v34  ;;  %v10473_v34 = vld [vmem:[%s11997_s17 + $0x4c] sm:$0x1]  ;;  %v1513_v38 = vld [vmem:[#allocation3 + $0x38] sm:$0xf]  ;;  %v1618_v32 = vrot.slane %v1616_v26, 5 }
 0x18f   : > { %v1826_v17 = vunpack.c.l.b16 %v1577_v53  ;;  %v1748_v57 = vshll.u32 %v10473_v34, 16  ;;  %v1759_v49 = vor.u32 %v1758_v44, %v1755_v43  ;;  %v1621_v50 = vshrl.u32 %v1513_v38, 16  ;;  %v10453_v53 = vld [vmem:[%s11997_s17 + $0x60] sm:$0xf] }
 0x190   : > { %v1624_v51 = vshll.u32 %v1513_v38, 16  ;;  %v1783_v45 = vrot.slane %v1781_v18, 4  ;;  %v10479_v38 = vld [vmem:[%s11997_s17 + $0x7c] sm:$0x1] }
 0x191   : > { %v1834_v20 = vpack.c.b16 %v1826_v17, %v1825_v14  ;;  %v1750_v6 = vrot.slane %v1748_v57, 5  ;;  %v1760_v8 = vrot.slane %v1759_v49, 4  ;;  %v1623_v12 = vrot.slane %v1621_v50, 4  ;;  %v1514_v14 = vld [vmem:[#allocation3 + $0x3c] sm:$0x1] }
 0x192   : > { %10438 = vmatmul.msk.bf16.gmra.mxu3 %vm1162_vm10, %v10433_v52  ;;  %v1720_v52 = vshll.u32 %v10469_v46, 16  ;;  %v1626_v1 = vrot.slane %v1624_v51, 5  ;;  %v10454_v17 = vor.u32 %v11393_v63, %v10453_v53  ;;  %v1630_v28 = vshll.u32 %v1514_v14, 16  ;;  %v2707_v50 = vld [vmem:[%s14903_s4 + $0x8] sm:$0xc] }
 0x193   : > { %v1638_v57 = vshll.u32 %v1515_v35, 16  ;;  %v1790_v60 = vshll.u32 %v10479_v38, 16  ;;  %v2789_v51 = vld [vmem:[%s14904_s5 + $0x8] sm:$0xc] }
 0x194   : > { %v1722_v23 = vrot.slane %v1720_v52, 5  ;;  %v1627_v27 = vor.u32 %v1626_v1, %v1623_v12 }
 0x195   : > { %v1640_v0 = vrot.slane %v1638_v57, 5 }
 0x196   : > { %v1723_v22 = vsel %vm12052_vm13, %v1718_v5, %v1722_v23  ;;  %v10476_v23 = vld [vmem:[%s11997_s17 + $0x68] sm:$0xf]  ;;  %v1628_v41 = vrot.slane %v1627_v27, 4 }
 0x197   : > { %v1903_v46 = vunpack.c.l.b16 %v1723_v22  ;;  %v1767_v29 = vshrl.u32 %v10476_v23, 16  ;;  %v1770_v30 = vshll.u32 %v10476_v23, 16  ;;  %v1516_v23 = vld [vmem:[#allocation3 + $0x44] sm:$0x1] }
 0x198   : > { %v1644_v27 = vshll.u32 %v1516_v23, 16  ;;  %v10534_v23 = vld [vmem:[%s11997_s17 + $0x18] sm:$0xf] }
 0x199   : > { %v1912_v52 = vpack.c.b16 %v1904_v47, %v1903_v46  ;;  %v1769_v43 = vrot.slane %v1767_v29, 4  ;;  %v1772_v44 = vrot.slane %v1770_v30, 5  ;;  %v1517_v47 = vld [vmem:[#allocation3 + $0x48] sm:$0xf]  ;;  %v10482_v30 = vld [vmem:[%s11997_s17 + $0x98] sm:$0xf] }
 0x19a   : > { %10460 = vmatmul.msk.bf16.gmra.mxu1 %vm1162_vm10, %v10446_v24  ;;  %10484 = vmatmul.msk.bf16.vlgmr.msrb.gmra.mxu2 %vm1162_vm10, %v1833_v37  ;;  %v1590_v24 = vrot.slane %v1588_v15, 5  ;;  %v1604_v37 = vrot.slane %v1602_v25, 5  ;;  %v1765_v15 = vsel %vm12052_vm13, %v1760_v8, %v1764_v9  ;;  %v2253_v25 = vsel %vm1178_vm9, %v2211_v4, 0  ;;  %v11394_v8 = vld [vmem:[%s11997_s17 + $0x8c] sm:$0xf0] }
 0x19b   : > { %2262 = vmatpush.bf16.msra.mxu2 %v2253_v25  ;;  %v1906_v39 = vunpack.c.l.b16 %v1765_v15  ;;  %v1773_v49 = vor.u32 %v1772_v44, %v1769_v43  ;;  %v1652_v53 = vshll.u32 %v1517_v47, 16 }
 0x19c   : > { %v1591_v54 = vsel %vm12052_vm13, %v1586_v21, %v1590_v24  ;;  %v1605_v56 = vsel %vm12052_vm13, %v1600_v42, %v1604_v37  ;;  %v10521_v24 = vld [vmem:[#allocation3 + $0x38] sm:$0xf]  ;;  %v11398_v37 = vld [vmem:[#allocation3 + $0x3c] sm:$0xf0]  ;;  %v1632_v42 = vrot.slane %v1630_v28, 5 }
 0x19d   : > { %v1827_v61 = vunpack.c.l.b16 %v1591_v54  ;;  %v1828_v62 = vunpack.c.l.b16 %v1605_v56  ;;  %v10522_v31 = vor.u32 %v11398_v37, %v10521_v24  ;;  %v1619_v54 = vsel %vm12052_vm13, %v1614_v40, %v1618_v32  ;;  %v11399_v40 = vld [vmem:[#allocation3 + $0x4c] sm:$0xf0] }
 0x19e   : > { %v1635_v56 = vshrl.u32 %v1515_v35, 16  ;;  %v1829_v63 = vunpack.c.l.b16 %v1619_v54  ;;  %v1774_v1 = vrot.slane %v1773_v49, 4  ;;  %v1809_v32 = vshrl.u32 %v10482_v30, 16  ;;  %v10483_v54 = vld [vmem:[%s11997_s17 + $0x9c] sm:$0x1] }
 0x19f   : > { %v1835_v5 = vpack.c.b16 %v1828_v62, %v1827_v61  ;;  %10530 = vmatmul.msk.bf16.gmra.mxu0 %vm1162_vm10, %v10522_v31  ;;  %v2724_v61 = vunpack.c.l.b16 %v2707_v50  ;;  %v2806_v62 = vunpack.c.l.b16 %v2789_v51  ;;  %v10525_v31 = vld [vmem:[#allocation3 + $0x48] sm:$0xf] }
 0x1a0   : > { %v1637_v9 = vrot.slane %v1635_v56, 4 }
 0x1a1   : > { %v2725_v10 = vpack.c.b16 %v2724_v61, %v2724_v61  ;;  %v2807_v12 = vpack.c.b16 %v2806_v62, %v2806_v62 }
 0x1a2   : > { %10489 = vmatmul.msk.bf16.vlgmr.msrb.gmra.mxu3 %vm1162_vm10, %v1911_v2  ;;  %v1746_v2 = vrot.slane %v1745_v55, 4  ;;  %v1633_v55 = vsel %vm12052_vm13, %v1628_v41, %v1632_v42  ;;  %v1641_v26 = vor.u32 %v1640_v0, %v1637_v9  ;;  %v1812_v41 = vshll.u32 %v10482_v30, 16 }
 0x1a3   : > { %v2808_v15 = vrot.slane %v2807_v12, 2  ;;  %v10526_v42 = vor.u32 %v11399_v40, %v10525_v31 }
 0x1a4   : > { %v1751_v7 = vsel %vm12052_vm13, %v1746_v2, %v1750_v6  ;;  %v1830_v2 = vunpack.c.l.b16 %v1633_v55  ;;  %v10457_v6 = vld [vmem:[%s11997_s17 + $0x80] sm:$0xf]  ;;  %v1811_v55 = vrot.slane %v1809_v32, 4  ;;  %v1814_v56 = vrot.slane %v1812_v41, 5 }
 0x1a5   : > { %v1905_v22 = vunpack.c.l.b16 %v1751_v7  ;;  %v2726_v7 = vrot.slane %v2725_v10, 2  ;;  %v10458_v25 = vor.u32 %v11394_v8, %v10457_v6  ;;  %v2825_v29 = vsel %vm1178_vm9, %v2808_v15, 0 }
 0x1a6   : > { %v1836_v18 = vpack.c.b16 %v1830_v2, %v1829_v63  ;;  %2834 = vmatpush.bf16.msrb.mxu1 %v2825_v29  ;;  %v1818_v6 = vshll.u32 %v10483_v54, 16  ;;  %v1815_v8 = vor.u32 %v1814_v56, %v1811_v55 }
 0x1a7   : > { %v1913_v46 = vpack.c.b16 %v1906_v39, %v1905_v22  ;;  %v2743_v28 = vsel %vm1178_vm9, %v2726_v7, 0  ;;  %v1795_v22 = vshrl.u32 %v10480_v16, 16  ;;  %v1798_v39 = vshll.u32 %v10480_v16, 16  ;;  %v11402_v7 = vld [vmem:[%s11997_s17 + $0x24] sm:$0xf0] }
 0x1a8   : > { %2752 = vmatpush.bf16.msrb.mxu0 %v2743_v28  ;;  %v1820_v16 = vrot.slane %v1818_v6, 5 }
 0x1a9   : > { %v1797_v38 = vrot.slane %v1795_v22, 4 }
 0x1aa   : > { %10461 = vmatmul.msk.bf16.gmra.mxu1 %vm1162_vm10, %v10450_v33  ;;  %10485 = vmatmul.msk.bf16.gmra.mxu2 %vm1162_vm10, %v1834_v20  ;;  %v1784_v33 = vshll.u32 %v10478_v3, 16  ;;  %v2299_v20 = vld [vmem:[%s14904_s5 + $0x8] sm:$0x3]  ;;  %v1518_v3 = vld [vmem:[#allocation3 + $0x4c] sm:$0x1] }
 0x1ab   : > { %v2341_v21 = vsel %vm1178_vm9, %v2299_v20, 0 }
 0x1ac   : > { %2350 = vmatpush.bf16.msra.mxu3 %v2341_v21  ;;  %v1786_v34 = vrot.slane %v1784_v33, 5  ;;  %v1779_v33 = vsel %vm12052_vm13, %v1774_v1, %v1778_v13  ;;  %v1658_v21 = vshll.u32 %v1518_v3, 16  ;;  %v2388_v1 = vld [vmem:[#allocation3 + $0xc] sm:$0x1]  ;;  %v2390_v13 = vld [vmem:[#allocation3 + $0x14] sm:$0x1] }
 0x1ad   : > { %v1907_v43 = vunpack.c.l.b16 %v1779_v33 }
 0x1ae   : > { %v1787_v59 = vor.u32 %v1786_v34, %v1783_v45  ;;  %v1642_v45 = vrot.slane %v1641_v26, 4  ;;  %v1646_v34 = vrot.slane %v1644_v27, 5  ;;  %v1660_v36 = vrot.slane %v1658_v21, 5 }
 0x1af   : > { %10531 = vmatmul.msk.bf16.gmra.mxu0 %vm1162_vm10, %v10526_v42  ;;  %v1816_v27 = vrot.slane %v1815_v8, 4 }
 0x1b0   : > { %v1788_v14 = vrot.slane %v1787_v59, 4  ;;  %v1647_v58 = vsel %vm12052_vm13, %v1642_v45, %v1646_v34  ;;  %v2387_v59 = vld [vmem:[#allocation3 + $0x8] sm:$0xf] }
 0x1b1   : > { %v2408_v50 = vshrl.u32 %v2387_v59, 16  ;;  %v2411_v51 = vshll.u32 %v2387_v59, 16  ;;  %v1831_v12 = vunpack.c.l.b16 %v1647_v58  ;;  %v1821_v41 = vsel %vm12052_vm13, %v1816_v27, %v1820_v16 }
 0x1b2   : > { %10490 = vmatmul.msk.bf16.gmra.mxu3 %vm1162_vm10, %v1912_v52  ;;  %v1649_v52 = vshrl.u32 %v1517_v47, 16  ;;  %v10481_v47 = vld [vmem:[%s11997_s17 + $0x8c] sm:$0x1]  ;;  %v1910_v45 = vunpack.c.l.b16 %v1821_v41 }
 0x1b3   : > { %v1804_v2 = vshll.u32 %v10481_v47, 16  ;;  %v2410_v9 = vrot.slane %v2408_v50, 4  ;;  %v2413_v0 = vrot.slane %v2411_v51, 5 }
 0x1b4   : > { %v1651_v4 = vrot.slane %v1649_v52, 4 }
 0x1b5   : > { %v2414_v3 = vor.u32 %v2413_v0, %v2410_v9  ;;  %v11403_v9 = vld [vmem:[%s11997_s17 + $0x44] sm:$0xf0] }
 0x1b6   : > { %v10571_v0 = vld [vmem:[#allocation2 + $0x8] sm:$0xf] }
 0x1b7   : > { %v2415_v28 = vrot.slane %v2414_v3, 4 }
 0x1ba   : > { %10462 = vmatmul.msk.bf16.gmra.mxu1 %vm1162_vm10, %v10454_v17  ;;  %10486 = vmatmul.msk.bf16.gmra.mxu2 %vm1162_vm10, %v1835_v5  ;;  %v1792_v17 = vrot.slane %v1790_v60, 5  ;;  %v1654_v5 = vrot.slane %v1652_v53, 5  ;;  %v2389_v60 = vld [vmem:[#allocation3 + $0x10] sm:$0xf] }
 0x1bb   : > { %v2422_v52 = vshrl.u32 %v2389_v60, 16  ;;  %v2425_v53 = vshll.u32 %v2389_v60, 16 }
 0x1bc   : > { %v1793_v20 = vsel %vm12052_vm13, %v1788_v14, %v1792_v17  ;;  %v1655_v37 = vor.u32 %v1654_v5, %v1651_v4  ;;  %v2417_v4 = vshll.u32 %v2388_v1, 16  ;;  %v2431_v5 = vshll.u32 %v2390_v13, 16 }
 0x1bd   : > { %v1908_v44 = vunpack.c.l.b16 %v1793_v20  ;;  %v2424_v10 = vrot.slane %v2422_v52, 4  ;;  %v2427_v14 = vrot.slane %v2425_v53, 5  ;;  %v2392_v53 = vld [vmem:[#allocation3 + $0x1c] sm:$0x1] }
 0x1be   : > { %v1656_v35 = vrot.slane %v1655_v37, 4  ;;  %v2419_v29 = vrot.slane %v2417_v4, 5  ;;  %v2433_v30 = vrot.slane %v2431_v5, 5  ;;  %v10535_v37 = vor.u32 %v11402_v7, %v10534_v23 }
 0x1bf   : > { %v1914_v49 = vpack.c.b16 %v1908_v44, %v1907_v43  ;;  %v2428_v26 = vor.u32 %v2427_v14, %v2424_v10  ;;  %v2445_v8 = vshll.u32 %v2392_v53, 16  ;;  %v11407_v10 = vld [vmem:[#allocation2 + $0xc] sm:$0xf0] }
 0x1c0   : > { %v1661_v62 = vsel %vm12052_vm13, %v1656_v35, %v1660_v36  ;;  %v2420_v22 = vsel %vm12052_vm13, %v2415_v28, %v2419_v29  ;;  %v2391_v36 = vld [vmem:[#allocation3 + $0x18] sm:$0xf] }
 0x1c1   : > { %v1832_v17 = vunpack.c.l.b16 %v1661_v62  ;;  %v2429_v33 = vrot.slane %v2428_v26, 4  ;;  %v2708_v40 = vunpack.c.l.b16 %v2420_v22  ;;  %v2436_v54 = vshrl.u32 %v2391_v36, 16  ;;  %v2394_v62 = vld [vmem:[#allocation3 + $0x24] sm:$0x1]  ;;  %v2395_v22 = vld [vmem:[#allocation3 + $0x28] sm:$0xf] }
 0x1c2   : > { %10491 = vmatmul.msk.bf16.gmra.mxu3 %vm1162_vm10, %v1913_v46  ;;  %v1800_v46 = vrot.slane %v1798_v39, 5  ;;  %v2439_v55 = vshll.u32 %v2391_v36, 16  ;;  %v2467_v41 = vshll.u32 %v2395_v22, 16 }
 0x1c3   : > { %v1837_v21 = vpack.c.b16 %v1832_v17, %v1831_v12  ;;  %v2434_v31 = vsel %vm12052_vm13, %v2429_v33, %v2433_v30  ;;  %v2438_v50 = vrot.slane %v2436_v54, 4  ;;  %v10596_v33 = vld [vmem:[%s11997_s17 + $0x10] sm:$0xf] }
 0x1c4   : > { %v1801_v63 = vor.u32 %v1800_v46, %v1797_v38  ;;  %v2709_v42 = vunpack.c.l.b16 %v2434_v31  ;;  %v2393_v38 = vld [vmem:[#allocation3 + $0x20] sm:$0xf]  ;;  %v2441_v51 = vrot.slane %v2439_v55, 5  ;;  %v2469_v36 = vrot.slane %v2467_v41, 5  ;;  %v10542_v55 = vld [vmem:[%s11997_s17 + $0x58] sm:$0xf] }
 0x1c5   : > { %v2450_v56 = vshrl.u32 %v2393_v38, 16  ;;  %v2453_v60 = vshll.u32 %v2393_v38, 16  ;;  %v2396_v38 = vld [vmem:[#allocation3 + $0x2c] sm:$0x1]  ;;  %v11405_v41 = vld [vmem:[%s11997_s17 + $0x84] sm:$0xf0] }
 0x1c6   : > { %v1802_v15 = vrot.slane %v1801_v63, 4  ;;  %v2718_v43 = vpack.c.b16 %v2709_v42, %v2708_v40  ;;  %v2442_v6 = vor.u32 %v2441_v51, %v2438_v50  ;;  %v11408_v50 = vld [vmem:[#allocation2 + $0x1c] sm:$0xf0] }
 0x1c7   : > { %v12142_v24 = vpop.f32.mrf.mxu1  ;;  %v2452_v52 = vrot.slane %v2450_v56, 4  ;;  %v2455_v63 = vrot.slane %v2453_v60, 5  ;;  %v10575_v60 = vld [vmem:[#allocation2 + $0x18] sm:$0xf] }
 0x1c8   : > { %10639 = vmatmul.msk.bf16.vlgmr.msrb.gmra.mxu0 %vm1162_vm10, %v2718_v43  ;;  %v2443_v13 = vrot.slane %v2442_v6, 4 }
 0x1c9   : > { %v2456_v12 = vor.u32 %v2455_v63, %v2452_v52 }
 0x1ca   : > { %10463 = vmatmul.msk.bf16.gmra.mxu1 %vm1162_vm10, %v10458_v25  ;;  %10487 = vmatmul.msk.bf16.gmra.mxu2 %vm1162_vm10, %v1836_v18  ;;  %v1806_v25 = vrot.slane %v1804_v2, 5  ;;  %v1191_v34 = vpop.f32.mrf.mxu0  ;;  %v10538_v2 = vld [vmem:[%s11997_s17 + $0x38] sm:$0xf] }
 0x1cb   : > { %v2457_v3 = vrot.slane %v2456_v12, 4  ;;  %v10539_v7 = vor.u32 %v11403_v9, %v10538_v2  ;;  %v10576_v9 = vor.u32 %v11408_v50, %v10575_v60 }
 0x1cc   : > { %v1807_v32 = vsel %vm12052_vm13, %v1802_v15, %v1806_v25  ;;  %v10572_v15 = vor.u32 %v11407_v10, %v10571_v0 }
 0x1cd   : > { %v12149_v57 = vpop.f32.mrf.mxu2  ;;  %v1909_v44 = vunpack.c.l.b16 %v1807_v32  ;;  %v2464_v32 = vshrl.u32 %v2395_v22, 16  ;;  %v2400_v22 = vld [vmem:[#allocation3 + $0x3c] sm:$0x1] }
 0x1ce   : > { %v1269_v59 = vadd.f32 %v12149_v57, %v1191_v34  ;;  %v2447_v57 = vrot.slane %v2445_v8, 5 }
 0x1cf   : > { %v12153_v61 = vpop.f32.mrf.mxu1  ;;  %v1915_v58 = vpack.c.b16 %v1910_v45, %v1909_v44 }
 0x1d0   : > { %v2448_v25 = vsel %vm12052_vm13, %v2443_v13, %v2447_v57 }
 0x1d1   : > { %v2710_v29 = vunpack.c.l.b16 %v2448_v25 }
 0x1d2   : > { %10492 = vmatmul.msk.bf16.gmra.mxu3 %vm1162_vm10, %v1914_v49  ;;  %v1193_v1 = vpop.f32.mrf.mxu0 }
 0x1d5   : > { %v1270_v18 = vpop.f32.mrf.mxu2  ;;  %v1372_v20 = vpop.f32.mrf.mxu3 }
 0x1d6   : > { %v1271_v23 = vadd.f32 %v1270_v18, %v1193_v1  ;;  %v12187_v27 = vadd.f32 %v1372_v20, %v1269_v59  ;;  %v2397_v20 = vld [vmem:[#allocation3 + $0x30] sm:$0xf]  ;;  %v11404_v59 = vld [vmem:[%s11997_s17 + $0x64] sm:$0xf0] }
 0x1d7   : > { %v12162_v39 = vpop.f32.mrf.mxu1  ;;  %v2478_v42 = vshrl.u32 %v2397_v20, 16  ;;  %v2481_v34 = vshll.u32 %v2397_v20, 16  ;;  %v2402_v20 = vld [vmem:[#allocation3 + $0x44] sm:$0x1] }
 0x1d9   : > { %v2483_v54 = vrot.slane %v2481_v34, 5  ;;  %v10579_v34 = vld [vmem:[#allocation2 + $0x28] sm:$0xf] }
 0x1da   : > { %10488 = vmatmul.msk.bf16.gmra.mxu2 %vm1162_vm10, %v1837_v21  ;;  %10552 = vmatmul.msk.bf16.vlgmr.msra.gmra.mxu1 %vm1162_vm10, %v10535_v37  ;;  %v11413_v21 = vld [vmem:[%s11997_s17 + $0x1c] sm:$0xf0] }
 0x1db   : > { %v10597_v45 = vor.u32 %v11413_v21, %v10596_v33 }
 0x1dd   : > { %v1273_v35 = vpop.f32.mrf.mxu2  ;;  %v1374_v46 = vpop.f32.mrf.mxu3 }
 0x1de   : > { %v1274_v47 = vadd.f32 %v1273_v35, %v12142_v24  ;;  %v2459_v24 = vshll.u32 %v2394_v62, 16  ;;  %v12191_v18 = vadd.f32 %v1374_v46, %v1271_v23  ;;  %v2466_v35 = vrot.slane %v2464_v32, 4  ;;  %v2398_v46 = vld [vmem:[#allocation3 + $0x34] sm:$0x1]  ;;  %v10546_v32 = vld [vmem:[%s11997_s17 + $0x78] sm:$0xf] }
 0x1df   : > { %v12174_v49 = vpop.f32.mrf.mxu1  ;;  %v10547_v60 = vor.u32 %v11405_v41, %v10546_v32  ;;  %v3096_v32 = vld [vmem:[%s14903_s4 + $0xc] sm:$0xc] }
 0x1e0   : > { %v2461_v14 = vrot.slane %v2459_v24, 5  ;;  %v2470_v56 = vor.u32 %v2469_v36, %v2466_v35  ;;  %v10543_v24 = vor.u32 %v11404_v59, %v10542_v55  ;;  %v11409_v35 = vld [vmem:[#allocation2 + $0x2c] sm:$0xf0]  ;;  %v2897_v36 = vld [vmem:[%s14903_s4 + $0xc] sm:$0x3] }
 0x1e1   : > { %v10580_v50 = vor.u32 %v11409_v35, %v10579_v34 }
 0x1e2   : > { %10493 = vmatmul.msk.bf16.gmra.mxu3 %vm1162_vm10, %v1915_v58  ;;  %v2462_v28 = vsel %vm12052_vm13, %v2457_v3, %v2461_v14  ;;  %v2473_v58 = vshll.u32 %v2396_v38, 16  ;;  %v2471_v52 = vrot.slane %v2470_v56, 4  ;;  %v2399_v3 = vld [vmem:[#allocation3 + $0x38] sm:$0xf] }
 0x1e3   : > { %v2711_v30 = vunpack.c.l.b16 %v2462_v28  ;;  %v2495_v25 = vshll.u32 %v2399_v3, 16 }
 0x1e4   : > { %v2475_v53 = vrot.slane %v2473_v58, 5 }
 0x1e5   : > { %v1275_v17 = vpop.f32.mrf.mxu2  ;;  %v1377_v4 = vpop.f32.mrf.mxu3 }
 0x1e6   : > { %v1276_v5 = vadd.f32 %v1275_v17, %v12153_v61  ;;  %v12183_v16 = vadd.f32 %v1377_v4, %v1274_v47  ;;  %v2719_v61 = vpack.c.b16 %v2711_v30, %v2710_v29  ;;  %v2480_v47 = vrot.slane %v2478_v42, 4  ;;  %v11414_v17 = vld [vmem:[%s11997_s17 + $0x3c] sm:$0xf0] }
 0x1e7   : > { %v12185_v26 = vpop.f32.mrf.mxu1  ;;  %v2476_v0 = vsel %vm12052_vm13, %v2471_v52, %v2475_v53  ;;  %v2401_v4 = vld [vmem:[#allocation3 + $0x40] sm:$0xf]  ;;  %v10619_v52 = vld [vmem:[%s11997_s17 + $0x18] sm:$0xf] }
 0x1e8   : > { %10640 = vmatmul.msk.bf16.gmra.mxu0 %vm1162_vm10, %v2719_v61  ;;  %v2484_v51 = vor.u32 %v2483_v54, %v2480_v47  ;;  %v2712_v13 = vunpack.c.l.b16 %v2476_v0  ;;  %v2506_v28 = vshrl.u32 %v2401_v4, 16  ;;  %v2509_v33 = vshll.u32 %v2401_v4, 16  ;;  %v10621_v0 = vld [vmem:[%s11997_s17 + $0x28] sm:$0xf] }
 0x1ea   : > { %10553 = vmatmul.msk.bf16.gmra.mxu1 %vm1162_vm10, %v10539_v7  ;;  %10589 = vmatmul.msk.bf16.vlgmr.msra.gmra.mxu2 %vm1162_vm10, %v10572_v15  ;;  %v2485_v2 = vrot.slane %v2484_v51, 4  ;;  %v2492_v15 = vshrl.u32 %v2399_v3, 16  ;;  %v2582_v3 = vshrl.u32 %v10621_v0, 16 }
 0x1ec   : > { %v2494_v21 = vrot.slane %v2492_v15, 4  ;;  %v2403_v15 = vld [vmem:[#allocation3 + $0x48] sm:$0xf]  ;;  %v2584_v34 = vrot.slane %v2582_v3, 4 }
 0x1ed   : > { %v1278_v37 = vpop.f32.mrf.mxu2  ;;  %v1379_v31 = vpop.f32.mrf.mxu3 }
 0x1ee   : > { %v1279_v40 = vadd.f32 %v1278_v37, %v12162_v39  ;;  %v12199_v43 = vadd.f32 %v1379_v31, %v1276_v5  ;;  %v2487_v39 = vshll.u32 %v2398_v46, 16  ;;  %v2497_v37 = vrot.slane %v2495_v25, 5  ;;  %v2405_v25 = vld [vmem:[#allocation3 + $0x50] sm:$0xf] }
 0x1ef   : > { %v12201_v44 = vpop.f32.mrf.mxu1  ;;  %v2508_v31 = vrot.slane %v2506_v28, 4  ;;  %v2939_v46 = vsel %vm1178_vm9, %v2897_v36, 0  ;;  %v2534_v41 = vshrl.u32 %v2405_v25, 16 }
 0x1f0   : > { %v2489_v62 = vrot.slane %v2487_v39, 5  ;;  %v2498_v42 = vor.u32 %v2497_v37, %v2494_v21  ;;  %2948 = vmatpush.bf16.msrb.mxu2 %v2939_v46  ;;  %v2585_v21 = vshll.u32 %v10621_v0, 16  ;;  %v2520_v37 = vshrl.u32 %v2403_v15, 16 }
 0x1f2   : > { %10614 = vmatmul.msk.bf16.vlgmr.msra.gmra.mxu3 %vm1162_vm10, %v10597_v45  ;;  %v2490_v1 = vsel %vm12052_vm13, %v2485_v2, %v2489_v62  ;;  %v2501_v45 = vshll.u32 %v2400_v22, 16  ;;  %v2499_v47 = vrot.slane %v2498_v42, 4  ;;  %v2523_v22 = vshll.u32 %v2403_v15, 16 }
 0x1f3   : > { %v2713_v57 = vunpack.c.l.b16 %v2490_v1  ;;  %v2568_v1 = vshrl.u32 %v10619_v52, 16  ;;  %v2537_v42 = vshll.u32 %v2405_v25, 16  ;;  %v2522_v36 = vrot.slane %v2520_v37, 4 }
 0x1f4   : > { %v2503_v54 = vrot.slane %v2501_v45, 5 }
 0x1f5   : > { %v1280_v63 = vpop.f32.mrf.mxu2  ;;  %v1382_v6 = vpop.f32.mrf.mxu3  ;;  %v2720_v14 = vpack.c.b16 %v2713_v57, %v2712_v13  ;;  %v10604_v13 = vld [vmem:[%s11997_s17 + $0x50] sm:$0xf]  ;;  %v11415_v57 = vld [vmem:[%s11997_s17 + $0x5c] sm:$0xf0] }
 0x1f6   : > { %v1281_v8 = vadd.f32 %v1280_v63, %v12174_v49  ;;  %v12209_v10 = vadd.f32 %v1382_v6, %v1279_v40  ;;  %v10600_v49 = vld [vmem:[%s11997_s17 + $0x30] sm:$0xf]  ;;  %v2511_v40 = vrot.slane %v2509_v33, 5  ;;  %v2504_v51 = vsel %vm12052_vm13, %v2499_v47, %v2503_v54  ;;  %v2985_v63 = vld [vmem:[%s14904_s5 + $0xc] sm:$0x3] }
 0x1f7   : > { %v12211_v12 = vpop.f32.mrf.mxu1  ;;  %v10601_v61 = vor.u32 %v11414_v17, %v10600_v49  ;;  %v2571_v49 = vshll.u32 %v10619_v52, 16  ;;  %v12255_v17 = vld [vmem:[%s11997_s17 + $0x98] sm:$0xf]  ;;  %v11410_v33 = vld [vmem:[#allocation2 + $0x3c] sm:$0xf0] }
 0x1f8   : > { %10641 = vmatmul.msk.bf16.gmra.mxu0 %vm1162_vm10, %v2720_v14  ;;  %v2512_v38 = vor.u32 %v2511_v40, %v2508_v31  ;;  %v3188_v47 = vld [vmem:[%s14904_s5 + $0xc] sm:$0xc]  ;;  %v2404_v54 = vld [vmem:[#allocation3 + $0x4c] sm:$0x1] }
 0x1f9   : > { %v2573_v40 = vrot.slane %v2571_v49, 5  ;;  %v10622_v52 = vld [vmem:[%s11997_s17 + $0x2c] sm:$0x1] }
 0x1fa   : > { %10554 = vmatmul.msk.bf16.gmra.mxu1 %vm1162_vm10, %v10543_v24  ;;  %10590 = vmatmul.msk.bf16.gmra.mxu2 %vm1162_vm10, %v10576_v9  ;;  %v2513_v58 = vrot.slane %v2512_v38, 4  ;;  %v12247_v24 = vpop.f32.mrf.mxu0 }
 0x1fd   : > { %v1283_v23 = vpop.f32.mrf.mxu2  ;;  %v1384_v5 = vpop.f32.mrf.mxu3 }
 0x1fe   : > { %v1284_v7 = vadd.f32 %v1283_v23, %v12185_v26  ;;  %v12221_v29 = vadd.f32 %v1384_v5, %v1281_v8  ;;  %v2515_v26 = vshll.u32 %v2402_v20, 16  ;;  %v3027_v8 = vsel %vm1178_vm9, %v2985_v63, 0  ;;  %v12260_v23 = vld [vmem:[#allocation2 + $0x38] sm:$0xf] }
 0x1ff   : > { %v12223_v30 = vpop.f32.mrf.mxu1  ;;  %3036 = vmatpush.bf16.msrb.mxu3 %v3027_v8  ;;  %v10605_v5 = vor.u32 %v11415_v57, %v10604_v13  ;;  %v10584_v46 = vor.u32 %v11410_v33, %v12260_v23 }
 0x200   : > { %v2517_v55 = vrot.slane %v2515_v26, 5  ;;  %v10620_v26 = vld [vmem:[%s11997_s17 + $0x1c] sm:$0x1] }
 0x202   : > { %10615 = vmatmul.msk.bf16.gmra.mxu3 %vm1162_vm10, %v10601_v61  ;;  %v2518_v2 = vsel %vm12052_vm13, %v2513_v58, %v2517_v55  ;;  %v12275_v35 = vpop.f32.mrf.mxu0  ;;  %v2406_v55 = vld [vmem:[#allocation3 + $0x54] sm:$0x1]  ;;  %v3215_v58 = vunpack.c.l.b16 %v3188_v47 }
 0x203   : > { %v2715_v9 = vunpack.c.l.b16 %v2518_v2 }
 0x204   : > { %v3216_v2 = vpack.c.b16 %v3215_v58, %v3215_v58 }
 0x205   : > { %v1285_v56 = vpop.f32.mrf.mxu2  ;;  %v1387_v39 = vpop.f32.mrf.mxu3 }
 0x206   : > { %v1286_v59 = vadd.f32 %v1285_v56, %v12201_v44  ;;  %v12236_v53 = vadd.f32 %v1387_v39, %v1284_v7  ;;  %v2714_v44 = vunpack.c.l.b16 %v2504_v51  ;;  %v12263_v7 = vrot.slane %v2568_v1, 4 }
 0x207   : > { %v1464_v62 = vpop.f32.mrf.mxu1  ;;  %v2525_v39 = vrot.slane %v2523_v22, 5  ;;  %v2543_v51 = vshll.u32 %v2406_v55, 16 }
 0x208   : > { %v12244_v6 = vadd.f32 %v1464_v62, %v12187_v27  ;;  %v2721_v14 = vpack.c.b16 %v2715_v9, %v2714_v44  ;;  %v12258_v27 = vld [vmem:[%s11997_s17 + $0xa4] sm:$0xf0]  ;;  %v2577_v62 = vshll.u32 %v10620_v26, 16  ;;  %v2574_v9 = vor.u32 %v2573_v40, %v12263_v7 }
 0x209   : > { %v10551_v38 = vor.u32 %v12258_v27, %v12255_v17  ;;  %v2526_v44 = vor.u32 %v2525_v39, %v2522_v36  ;;  %v2545_v13 = vrot.slane %v2543_v51, 5  ;;  %v3217_v17 = vrot.slane %v3216_v2, 2  ;;  %v10625_v26 = vld [vmem:[%s11997_s17 + $0x48] sm:$0xf]  ;;  %v10624_v2 = vld [vmem:[%s11997_s17 + $0x3c] sm:$0x1] }
 0x20a   : > { %10555 = vmatmul.msk.bf16.gmra.mxu1 %vm1162_vm10, %v10547_v60  ;;  %10591 = vmatmul.msk.bf16.gmra.mxu2 %vm1162_vm10, %v10580_v50  ;;  %v2536_v60 = vrot.slane %v2534_v41, 4  ;;  %v2539_v50 = vrot.slane %v2537_v42, 5  ;;  %v2575_v37 = vrot.slane %v2574_v9, 4  ;;  %v2579_v22 = vrot.slane %v2577_v62, 5  ;;  %v10623_v41 = vld [vmem:[%s11997_s17 + $0x38] sm:$0xf] }
 0x20b   : > { %10642 = vmatmul.msk.bf16.gmra.mxu0 %vm1162_vm10, %v2721_v14  ;;  %v2527_v27 = vrot.slane %v2526_v44, 4  ;;  %v3234_v25 = vsel %vm1178_vm9, %v3217_v17, 0  ;;  %v2610_v58 = vshrl.u32 %v10625_v26, 16  ;;  %v2613_v39 = vshll.u32 %v10625_v26, 16  ;;  %v10626_v9 = vld [vmem:[%s11997_s17 + $0x4c] sm:$0x1] }
 0x20c   : > { %v2540_v1 = vor.u32 %v2539_v50, %v2536_v60  ;;  %3243 = vmatpush.bf16.msra.mxu1 %v3234_v25  ;;  %v10587_v60 = vld [vmem:[#allocation2 + $0x48] sm:$0xf]  ;;  %v11411_v50 = vld [vmem:[#allocation2 + $0x4c] sm:$0xf0] }
 0x20d   : > { %v1288_v4 = vpop.f32.mrf.mxu2  ;;  %v1389_v28 = vpop.f32.mrf.mxu3  ;;  %v2612_v44 = vrot.slane %v2610_v58, 4  ;;  %v10726_v25 = vld [vmem:[#allocation2 + $0x10] sm:$0xf] }
 0x20e   : > { %v1289_v61 = vadd.f32 %v1288_v4, %v12211_v12  ;;  %v12266_v20 = vadd.f32 %v1389_v28, %v1286_v59  ;;  %v3123_v12 = vunpack.c.l.b16 %v3096_v32  ;;  %v2529_v59 = vshll.u32 %v2404_v54, 16 }
 0x20f   : > { %v1466_v31 = vpop.f32.mrf.mxu1  ;;  %v2541_v15 = vrot.slane %v2540_v1, 4  ;;  %v2599_v54 = vshll.u32 %v10623_v41, 16  ;;  %v10588_v1 = vor.u32 %v11411_v50, %v10587_v60  ;;  %v10664_v60 = vld [vmem:[#allocation3 + $0x10] sm:$0xf]  ;;  %v11418_v50 = vld [vmem:[#allocation3 + $0x14] sm:$0xf0] }
 0x210   : > { %v12272_v45 = vadd.f32 %v1466_v31, %v12191_v18  ;;  %v2587_v18 = vrot.slane %v2585_v21, 5  ;;  %v3124_v56 = vpack.c.b16 %v3123_v12, %v3123_v12  ;;  %v2531_v0 = vrot.slane %v2529_v59, 5  ;;  %v11416_v21 = vld [vmem:[%s11997_s17 + $0x7c] sm:$0xf0] }
 0x212   : > { %10616 = vmatmul.msk.bf16.gmra.mxu3 %vm1162_vm10, %v10605_v5  ;;  %v3125_v63 = vrot.slane %v3124_v56, 2  ;;  %v2588_v4 = vor.u32 %v2587_v18, %v2584_v34  ;;  %v2591_v5 = vshll.u32 %v10622_v52, 16  ;;  %v2532_v28 = vsel %vm12052_vm13, %v2527_v27, %v2531_v0 }
 0x213   : > { %v2716_v33 = vunpack.c.l.b16 %v2532_v28  ;;  %v11430_v28 = vld [vmem:[#allocation2 + $0x14] sm:$0xf0] }
 0x214   : > { %v3142_v49 = vsel %vm1178_vm9, %v3125_v63, 0  ;;  %v2589_v40 = vrot.slane %v2588_v4, 4  ;;  %v2593_v32 = vrot.slane %v2591_v5, 5  ;;  %v2601_v63 = vrot.slane %v2599_v54, 5 }
 0x215   : > { %v1290_v8 = vpop.f32.mrf.mxu2  ;;  %v1392_v57 = vpop.f32.mrf.mxu3  ;;  %3151 = vmatpush.bf16.msra.mxu0 %v3142_v49  ;;  %v2605_v49 = vshll.u32 %v10624_v2, 16  ;;  %v2619_v4 = vshll.u32 %v10626_v9, 16 }
 0x216   : > { %v1291_v14 = vadd.f32 %v1290_v8, %v12223_v30  ;;  %v12288_v23 = vadd.f32 %v1392_v57, %v1289_v61  ;;  %v12294_v30 = vpop.f32.mrf.mxu0  ;;  %v2546_v61 = vsel %vm12052_vm13, %v2541_v15, %v2545_v13  ;;  %v2594_v56 = vsel %vm12052_vm13, %v2589_v40, %v2593_v32  ;;  %v10629_v40 = vld [vmem:[%s11997_s17 + $0x68] sm:$0xf] }
 0x217   : > { %v1469_v3 = vpop.f32.mrf.mxu1  ;;  %v2717_v31 = vunpack.c.l.b16 %v2546_v61  ;;  %v2791_v52 = vunpack.c.l.b16 %v2594_v56  ;;  %v2615_v8 = vrot.slane %v2613_v39, 5  ;;  %v2641_v54 = vshll.u32 %v10629_v40, 16 }
 0x218   : > { %v12291_v7 = vadd.f32 %v1469_v3, %v12183_v16  ;;  %v10608_v16 = vld [vmem:[%s11997_s17 + $0x70] sm:$0xf] }
 0x219   : > { %v2722_v42 = vpack.c.b16 %v2717_v31, %v2716_v33  ;;  %v10609_v12 = vor.u32 %v11416_v21, %v10608_v16  ;;  %v2616_v3 = vor.u32 %v2615_v8, %v2612_v44  ;;  %v11417_v33 = vld [vmem:[%s11997_s17 + $0x9c] sm:$0xf0]  ;;  %v2607_v21 = vrot.slane %v2605_v49, 5  ;;  %v10630_v44 = vld [vmem:[%s11997_s17 + $0x6c] sm:$0x1] }
 0x21a   : > { %10556 = vmatmul.msk.bf16.gmra.mxu1 %vm1162_vm10, %v10551_v38  ;;  %10592 = vmatmul.msk.bf16.gmra.mxu2 %vm1162_vm10, %v10584_v46  ;;  %v2580_v38 = vsel %vm12052_vm13, %v2575_v37, %v2579_v22  ;;  %v2596_v46 = vshrl.u32 %v10623_v41, 16  ;;  %v10727_v37 = vor.u32 %v11430_v28, %v10726_v25  ;;  %v2621_v31 = vrot.slane %v2619_v4, 5  ;;  %v11431_v4 = vld [vmem:[#allocation2 + $0x24] sm:$0xf0]  ;;  %v11425_v28 = vld [vmem:[%s11997_s17 + $0x34] sm:$0xf0] }
 0x21b   : > { %10643 = vmatmul.msk.bf16.gmra.mxu0 %vm1162_vm10, %v2722_v42  ;;  %v2790_v51 = vunpack.c.l.b16 %v2580_v38  ;;  %v2617_v22 = vrot.slane %v2616_v3, 4  ;;  %v2643_v2 = vrot.slane %v2641_v54, 5  ;;  %v2647_v49 = vshll.u32 %v10630_v44, 16  ;;  %v10730_v3 = vld [vmem:[#allocation2 + $0x20] sm:$0xf] }
 0x21c   : > { %v2598_v62 = vrot.slane %v2596_v46, 4  ;;  %v2638_v46 = vshrl.u32 %v10629_v40, 16 }
 0x21d   : > { %v1865_v34 = vpop.f32.mrf.mxu2  ;;  %v1394_v36 = vpop.f32.mrf.mxu3  ;;  %v2800_v57 = vpack.c.b16 %v2791_v52, %v2790_v51  ;;  %v2622_v38 = vsel %vm12052_vm13, %v2617_v22, %v2621_v31  ;;  %v10633_v22 = vld [vmem:[%s11997_s17 + $0x88] sm:$0xf] }
 0x21e   : > { %v1890_v47 = vadd.f32 %v1865_v34, %v12244_v6  ;;  %v12310_v55 = vadd.f32 %v1394_v36, %v1291_v14  ;;  %v12317_v6 = vpop.f32.mrf.mxu0  ;;  %v2602_v14 = vor.u32 %v2601_v63, %v2598_v62  ;;  %v2793_v39 = vunpack.c.l.b16 %v2622_v38  ;;  %v10628_v62 = vld [vmem:[%s11997_s17 + $0x5c] sm:$0x1] }
 0x21f   : > { %v1471_v18 = vpop.f32.mrf.mxu1  ;;  %v2640_v63 = vrot.slane %v2638_v46, 4 }
 0x220   : > { %v12315_v59 = vadd.f32 %v1471_v18, %v12199_v43  ;;  %v2603_v16 = vrot.slane %v2602_v14, 4 }
 0x221   : > { %v2644_v14 = vor.u32 %v2643_v2, %v2640_v63  ;;  %v10634_v63 = vld [vmem:[%s11997_s17 + $0x8c] sm:$0x1] }
 0x222   : > { %10617 = vmatmul.msk.bf16.gmra.mxu3 %vm1162_vm10, %v10609_v12 }
 0x225   : > { %v1867_v0 = vpop.f32.mrf.mxu2  ;;  %v1943_v13 = vpop.f32.mrf.mxu3 }
 0x226   : > { %v1891_v43 = vadd.f32 %v1867_v0, %v12272_v45  ;;  %v1968_v17 = vadd.f32 %v1943_v13, %v1890_v47  ;;  %v12326_v15 = vpop.f32.mrf.mxu0  ;;  %v10612_v45 = vld [vmem:[%s11997_s17 + $0x90] sm:$0xf]  ;;  %v2633_v13 = vshll.u32 %v10628_v62, 16 }
 0x227   : > { %v1474_v27 = vpop.f32.mrf.mxu1  ;;  %v10613_v41 = vor.u32 %v11417_v33, %v10612_v45 }
 0x228   : > { %v12324_v5 = vadd.f32 %v1474_v27, %v12209_v10  ;;  %v12329_v61 = vadd.f32 %v12247_v24, %v1968_v17  ;;  %v10627_v10 = vld [vmem:[%s11997_s17 + $0x58] sm:$0xf]  ;;  %v2608_v24 = vsel %vm12052_vm13, %v2603_v16, %v2607_v21  ;;  %v2635_v33 = vrot.slane %v2633_v13, 5 }
 0x229   : > { %v2624_v34 = vshrl.u32 %v10627_v10, 16  ;;  %v2627_v12 = vshll.u32 %v10627_v10, 16  ;;  %v2792_v58 = vunpack.c.l.b16 %v2608_v24  ;;  %v10731_v16 = vor.u32 %v11431_v4, %v10730_v3  ;;  %v11426_v4 = vld [vmem:[%s11997_s17 + $0x54] sm:$0xf0] }
 0x22a   : > { %10593 = vmatmul.msk.bf16.gmra.mxu2 %vm1162_vm10, %v10588_v1  ;;  %10644 = vmatmul.msk.bf16.vlgmr.msrb.gmra.mxu1 %vm1162_vm10, %v2800_v57  ;;  %v2645_v21 = vrot.slane %v2644_v14, 4  ;;  %v2675_v13 = vshll.u32 %v10634_v63, 16  ;;  %v10734_v14 = vld [vmem:[#allocation2 + $0x30] sm:$0xf] }
 0x22b   : > { %10744 = vmatmul.msk.bf16.vlgmr.msra.gmra.mxu0 %vm1162_vm10, %v10727_v37  ;;  %v2626_v51 = vrot.slane %v2624_v34, 4  ;;  %v2629_v52 = vrot.slane %v2627_v12, 5  ;;  %v2649_v37 = vrot.slane %v2647_v49, 5  ;;  %v2666_v12 = vshrl.u32 %v10633_v22, 16  ;;  %v11432_v49 = vld [vmem:[#allocation2 + $0x34] sm:$0xf0] }
 0x22d   : > { %v1870_v32 = vpop.f32.mrf.mxu2  ;;  %v1945_v42 = vpop.f32.mrf.mxu3  ;;  %v2630_v1 = vor.u32 %v2629_v52, %v2626_v51  ;;  %v2650_v34 = vsel %vm12052_vm13, %v2645_v21, %v2649_v37  ;;  %v10632_v51 = vld [vmem:[%s11997_s17 + $0x7c] sm:$0x1]  ;;  %v2668_v52 = vrot.slane %v2666_v12, 4  ;;  %v10637_v21 = vld [vmem:[%s11997_s17 + $0xa8] sm:$0xf] }
 0x22e   : > { %v1892_v26 = vadd.f32 %v1870_v32, %v12291_v7  ;;  %v1969_v36 = vadd.f32 %v1945_v42, %v1891_v43  ;;  %v12346_v7 = vpop.f32.mrf.mxu0  ;;  %v2795_v54 = vunpack.c.l.b16 %v2650_v34 }
 0x22f   : > { %v1476_v47 = vpop.f32.mrf.mxu1  ;;  %v2631_v45 = vrot.slane %v2630_v1, 4 }
 0x230   : > { %v12344_v18 = vadd.f32 %v1476_v47, %v12221_v29  ;;  %v12349_v56 = vadd.f32 %v12275_v35, %v1969_v36  ;;  %v10665_v29 = vor.u32 %v11418_v50, %v10664_v60  ;;  %v2801_v35 = vpack.c.b16 %v2793_v39, %v2792_v58  ;;  %v10668_v58 = vld [vmem:[#allocation3 + $0x20] sm:$0xf]  ;;  %v11419_v39 = vld [vmem:[#allocation3 + $0x24] sm:$0xf0] }
 0x231   : > { %v2669_v36 = vshll.u32 %v10633_v22, 16 }
 0x232   : > { %10618 = vmatmul.msk.bf16.gmra.mxu3 %vm1162_vm10, %v10613_v41 }
 0x233   : > { %v2671_v62 = vrot.slane %v2669_v36, 5 }
 0x235   : > { %v1872_v8 = vpop.f32.mrf.mxu2  ;;  %v1948_v9 = vpop.f32.mrf.mxu3  ;;  %v2672_v1 = vor.u32 %v2671_v62, %v2668_v52  ;;  %v10638_v52 = vld [vmem:[%s11997_s17 + $0xac] sm:$0x1] }
 0x236   : > { %v1893_v0 = vadd.f32 %v1872_v8, %v12315_v59  ;;  %v1970_v43 = vadd.f32 %v1948_v9, %v1892_v26  ;;  %v12358_v27 = vpop.f32.mrf.mxu0  ;;  %v10689_v59 = vld [vmem:[%s11997_s17 + $0x28] sm:$0xf]  ;;  %v2661_v9 = vshll.u32 %v10632_v51, 16  ;;  %v10636_v51 = vld [vmem:[%s11997_s17 + $0x9c] sm:$0x1] }
 0x237   : > { %v1479_v57 = vpop.f32.mrf.mxu1  ;;  %v10690_v10 = vor.u32 %v11425_v28, %v10689_v59 }
 0x238   : > { %v12356_v17 = vadd.f32 %v1479_v57, %v12236_v53  ;;  %v12361_v25 = vadd.f32 %v12294_v30, %v1970_v43  ;;  %v10631_v53 = vld [vmem:[%s11997_s17 + $0x78] sm:$0xf]  ;;  %v2636_v30 = vsel %vm12052_vm13, %v2631_v45, %v2635_v33  ;;  %v2663_v28 = vrot.slane %v2661_v9, 5 }
 0x239   : > { %v2652_v41 = vshrl.u32 %v10631_v53, 16  ;;  %v2655_v42 = vshll.u32 %v10631_v53, 16  ;;  %v2794_v46 = vunpack.c.l.b16 %v2636_v30  ;;  %v10735_v45 = vor.u32 %v11432_v49, %v10734_v14  ;;  %v11433_v49 = vld [vmem:[#allocation2 + $0x44] sm:$0xf0] }
 0x23a   : > { %10645 = vmatmul.msk.bf16.gmra.mxu1 %vm1162_vm10, %v2801_v35  ;;  %10682 = vmatmul.msk.bf16.vlgmr.msrb.gmra.mxu2 %vm1162_vm10, %v10665_v29  ;;  %v2673_v33 = vrot.slane %v2672_v1, 4  ;;  %v2689_v9 = vshll.u32 %v10636_v51, 16  ;;  %v3678_v1 = vld [vmem:[%s14904_s5 + $0x10] sm:$0x3]  ;;  %v3843_v51 = vld [vmem:[#allocation4 + $0x2c] sm:$0x1] }
 0x23b   : > { %10745 = vmatmul.msk.bf16.gmra.mxu0 %vm1162_vm10, %v10731_v16  ;;  %v2654_v60 = vrot.slane %v2652_v41, 4  ;;  %v2657_v50 = vrot.slane %v2655_v42, 5  ;;  %v2677_v16 = vrot.slane %v2675_v13, 5  ;;  %v2694_v42 = vshrl.u32 %v10637_v21, 16 }
 0x23c   : > { %v3710_v14 = vsel %vm1178_vm9, %v3678_v1, 0 }
 0x23d   : > { %v1875_v31 = vpop.f32.mrf.mxu2  ;;  %v1950_v40 = vpop.f32.mrf.mxu3  ;;  %v2658_v29 = vor.u32 %v2657_v50, %v2654_v60  ;;  %v2678_v41 = vsel %vm12052_vm13, %v2673_v33, %v2677_v16  ;;  %v2696_v60 = vrot.slane %v2694_v42, 4  ;;  %3719 = vmatpush.bf16.msra.mxu3 %v3710_v14  ;;  %v10697_v16 = vld [vmem:[%s11997_s17 + $0x68] sm:$0xf] }
 0x23e   : > { %v1894_v32 = vadd.f32 %v1875_v31, %v12324_v5  ;;  %v1971_v26 = vadd.f32 %v1950_v40, %v1893_v0  ;;  %v12378_v5 = vpop.f32.mrf.mxu0  ;;  %v2797_v36 = vunpack.c.l.b16 %v2678_v41 }
 0x23f   : > { %v1481_v24 = vpop.f32.mrf.mxu1  ;;  %v2659_v59 = vrot.slane %v2658_v29, 4 }
 0x240   : > { %v12376_v47 = vadd.f32 %v1481_v24, %v12266_v20  ;;  %v12381_v38 = vadd.f32 %v12317_v6, %v1971_v26  ;;  %v10669_v20 = vor.u32 %v11419_v39, %v10668_v58  ;;  %v2802_v6 = vpack.c.b16 %v2795_v54, %v2794_v46  ;;  %v10672_v46 = vld [vmem:[#allocation3 + $0x30] sm:$0xf]  ;;  %v11420_v39 = vld [vmem:[#allocation3 + $0x34] sm:$0xf0] }
 0x241   : > { %v2697_v26 = vshll.u32 %v10637_v21, 16 }
 0x242   : > { %10707 = vmatmul.msk.bf16.vlgmr.msrb.gmra.mxu3 %vm1162_vm10, %v10690_v10 }
 0x243   : > { %v2699_v50 = vrot.slane %v2697_v26, 5 }
 0x245   : > { %v1877_v2 = vpop.f32.mrf.mxu2  ;;  %v1953_v44 = vpop.f32.mrf.mxu3 }
 0x246   : > { %v1895_v8 = vadd.f32 %v1877_v2, %v12344_v18  ;;  %v1972_v0 = vadd.f32 %v1953_v44, %v1894_v32  ;;  %v12390_v57 = vpop.f32.mrf.mxu0  ;;  %v10693_v18 = vld [vmem:[%s11997_s17 + $0x48] sm:$0xf]  ;;  %v10673_v44 = vor.u32 %v11420_v39, %v10672_v46  ;;  %v10676_v46 = vld [vmem:[#allocation3 + $0x40] sm:$0xf] }
 0x247   : > { %v1484_v35 = vpop.f32.mrf.mxu1  ;;  %v10694_v53 = vor.u32 %v11426_v4, %v10693_v18 }
 0x248   : > { %v12388_v43 = vadd.f32 %v1484_v35, %v12288_v23  ;;  %v12393_v3 = vadd.f32 %v12326_v15, %v1972_v0  ;;  %v10635_v23 = vld [vmem:[%s11997_s17 + $0x98] sm:$0xf]  ;;  %v2664_v15 = vsel %vm12052_vm13, %v2659_v59, %v2663_v28  ;;  %v2700_v0 = vor.u32 %v2699_v50, %v2696_v60 }
 0x249   : > { %v2680_v10 = vshrl.u32 %v10635_v23, 16  ;;  %v2683_v40 = vshll.u32 %v10635_v23, 16  ;;  %v2796_v12 = vunpack.c.l.b16 %v2664_v15  ;;  %v2703_v35 = vshll.u32 %v10638_v52, 16  ;;  %v11427_v23 = vld [vmem:[%s11997_s17 + $0x74] sm:$0xf0] }
 0x24a   : > { %10646 = vmatmul.msk.bf16.gmra.mxu1 %vm1162_vm10, %v2802_v6  ;;  %10683 = vmatmul.msk.bf16.gmra.mxu2 %vm1162_vm10, %v10669_v20  ;;  %v2701_v33 = vrot.slane %v2700_v0, 4  ;;  %v3846_v52 = vld [vmem:[#allocation4 + $0x34] sm:$0x1]  ;;  %v3855_v0 = vld [vmem:[#allocation4 + $0x4c] sm:$0x1] }
 0x24b   : > { %10746 = vmatmul.msk.bf16.gmra.mxu0 %vm1162_vm10, %v10735_v45  ;;  %v2682_v54 = vrot.slane %v2680_v10, 4  ;;  %v2685_v58 = vrot.slane %v2683_v40, 5  ;;  %v2803_v20 = vpack.c.b16 %v2797_v36, %v2796_v12  ;;  %v2691_v45 = vrot.slane %v2689_v9, 5  ;;  %v3828_v40 = vld [vmem:[#allocation4 + $0x4] sm:$0x1] }
 0x24c   : > { %v3837_v12 = vld [vmem:[#allocation4 + $0x1c] sm:$0x1]  ;;  %v3856_v14 = vsel %vm11739_vm4, 0, %v3855_v0 }
 0x24d   : > { %v1880_v37 = vpop.f32.mrf.mxu2  ;;  %v1955_v22 = vpop.f32.mrf.mxu3  ;;  %3857 = vst [vmem:[#allocation4 + $0x4c] sm:$0x1] %v3856_v14 }
 0x24e   : > { %v1896_v31 = vadd.f32 %v1880_v37, %v12356_v17  ;;  %v1973_v32 = vadd.f32 %v1955_v22, %v1895_v8  ;;  %v12410_v17 = vpop.f32.mrf.mxu0  ;;  %v2686_v8 = vor.u32 %v2685_v58, %v2682_v54  ;;  %v11421_v54 = vld [vmem:[#allocation3 + $0x44] sm:$0xf0]  ;;  %v3840_v58 = vld [vmem:[#allocation4 + $0x24] sm:$0x1] }
 0x24f   : > { %v1486_v30 = vpop.f32.mrf.mxu1 }
 0x250   : > { %v12408_v24 = vadd.f32 %v1486_v30, %v12310_v55  ;;  %v12413_v34 = vadd.f32 %v12346_v7, %v1973_v32  ;;  %v3600_v55 = vld [vmem:[%s14903_s4 + $0x10] sm:$0x3]  ;;  %v2687_v28 = vrot.slane %v2686_v8, 4  ;;  %v3831_v32 = vld [vmem:[#allocation4 + $0xc] sm:$0x1] }
 0x251   : > { %v3632_v62 = vsel %vm1178_vm9, %v3600_v55, 0  ;;  %v3834_v30 = vld [vmem:[#allocation4 + $0x14] sm:$0x1]  ;;  %v3832_v42 = vsel %vm11739_vm4, 0, %v3831_v32  ;;  %v3841_v55 = vsel %vm11739_vm4, 0, %v3840_v58 }
 0x252   : > { %10708 = vmatmul.msk.bf16.gmra.mxu3 %vm1162_vm10, %v10694_v53  ;;  %3641 = vmatpush.bf16.msra.mxu2 %v3632_v62  ;;  %v2692_v15 = vsel %vm12052_vm13, %v2687_v28, %v2691_v45  ;;  %v3835_v26 = vsel %vm11739_vm4, 0, %v3834_v30  ;;  %3833 = vst [vmem:[#allocation4 + $0xc] sm:$0x1] %v3832_v42  ;;  %v3847_v62 = vsel %vm11739_vm4, 0, %v3846_v52  ;;  %v10774_v32 = vld [vmem:[%s11997_s17 + $0x28] sm:$0xf] }
 0x253   : > { %v2798_v60 = vunpack.c.l.b16 %v2692_v15  ;;  %3836 = vst [vmem:[#allocation4 + $0x14] sm:$0x1] %v3835_v26  ;;  %v10680_v26 = vld [vmem:[#allocation3 + $0x50] sm:$0xf] }
 0x254   : > { %3842 = vst [vmem:[#allocation4 + $0x24] sm:$0x1] %v3841_v55 }
 0x255   : > { %v1882_v7 = vpop.f32.mrf.mxu2  ;;  %v1958_v63 = vpop.f32.mrf.mxu3  ;;  %3848 = vst [vmem:[#allocation4 + $0x34] sm:$0x1] %v3847_v62  ;;  %v3461_v62 = vshrl.u32 %v10774_v32, 16 }
 0x256   : > { %v1897_v2 = vadd.f32 %v1882_v7, %v12376_v47  ;;  %v1974_v6 = vadd.f32 %v1958_v63, %v1896_v31  ;;  %v10738_v47 = vld [vmem:[#allocation2 + $0x40] sm:$0xf]  ;;  %v12433_v4 = vpop.f32.mrf.mxu0  ;;  %v10698_v31 = vor.u32 %v11427_v23, %v10697_v16  ;;  %v3849_v7 = vld [vmem:[#allocation4 + $0x3c] sm:$0x1]  ;;  %v11434_v16 = vld [vmem:[#allocation2 + $0x54] sm:$0xf0] }
 0x257   : > { %v2153_v29 = vpop.f32.mrf.mxu1  ;;  %v10739_v59 = vor.u32 %v11433_v49, %v10738_v47  ;;  %v3879_v47 = vld [vmem:[%s14904_s5] sm:$0x3]  ;;  %v11428_v23 = vld [vmem:[%s11997_s17 + $0x94] sm:$0xf0]  ;;  %v3463_v14 = vrot.slane %v3461_v62, 4 }
 0x258   : > { %v12427_v13 = vadd.f32 %v2153_v29, %v12329_v61  ;;  %v12431_v18 = vadd.f32 %v12358_v27, %v1974_v6  ;;  %v2705_v61 = vrot.slane %v2703_v35, 5  ;;  %v10677_v29 = vor.u32 %v11421_v54, %v10676_v46  ;;  %v3287_v62 = vld [vmem:[#allocation3 + $0x2c] sm:$0x1] }
 0x259   : > { %v3921_v49 = vsel %vm1178_vm9, %v3879_v47, 0 }
 0x25a   : > { %10647 = vmatmul.msk.bf16.gmra.mxu1 %vm1162_vm10, %v2803_v20  ;;  %10684 = vmatmul.msk.bf16.gmra.mxu2 %vm1162_vm10, %v10673_v44  ;;  %v2706_v10 = vsel %vm12052_vm13, %v2701_v33, %v2705_v61  ;;  %v3852_v20 = vld [vmem:[#allocation4 + $0x44] sm:$0x1]  ;;  %v10701_v61 = vld [vmem:[%s11997_s17 + $0x88] sm:$0xf] }
 0x25b   : > { %10747 = vmatmul.msk.bf16.gmra.mxu0 %vm1162_vm10, %v10739_v59  ;;  %v2799_v50 = vunpack.c.l.b16 %v2706_v10  ;;  %v3853_v9 = vsel %vm11739_vm4, 0, %v3852_v20  ;;  %v3878_v59 = vld [vmem:[%s14903_s4] sm:$0x3]  ;;  %v10702_v42 = vor.u32 %v11428_v23, %v10701_v61 }
 0x25c   : > { %3854 = vst [vmem:[#allocation4 + $0x44] sm:$0x1] %v3853_v9  ;;  %3930 = vmatpush.bf16.msrb.mxu0 %v3921_v49  ;;  %v3998_v45 = vsel %vm1178_vm9, %v3878_v59, 0  ;;  %v10775_v9 = vld [vmem:[%s11997_s17 + $0x2c] sm:$0x1] }
 0x25d   : > { %v1885_v21 = vpop.f32.mrf.mxu2  ;;  %v1960_v37 = vpop.f32.mrf.mxu3  ;;  %v2804_v6 = vpack.c.b16 %v2799_v50, %v2798_v60  ;;  %4007 = vmatpush.bf16.msrb.mxu1 %v3998_v45  ;;  %v10751_v60 = vld [vmem:[%s11997_s17 + $0x20] sm:$0xf]  ;;  %v3281_v50 = vld [vmem:[#allocation3 + $0x14] sm:$0x1] }
 0x25e   : > { %v1898_v53 = vadd.f32 %v1885_v21, %v12388_v43  ;;  %v1975_v27 = vadd.f32 %v1960_v37, %v1897_v2  ;;  %v3829_v43 = vsel %vm11739_vm4, 0, %v3828_v40  ;;  %v12459_v39 = vpop.f32.mrf.mxu0  ;;  %v3850_v2 = vsel %vm11739_vm4, 0, %v3849_v7  ;;  %v3282_v37 = vld [vmem:[#allocation3 + $0x18] sm:$0xf] }
 0x25f   : > { %v2155_v22 = vpop.f32.mrf.mxu1  ;;  %3830 = vst [vmem:[#allocation4 + $0x4] sm:$0x1] %v3829_v43  ;;  %v3318_v40 = vshll.u32 %v3282_v37, 16  ;;  %v3464_v7 = vshll.u32 %v10774_v32, 16  ;;  %v10705_v32 = vld [vmem:[%s11997_s17 + $0xa8] sm:$0xf] }
 0x260   : > { %v12446_v41 = vadd.f32 %v2155_v22, %v12349_v56  ;;  %v12455_v36 = vadd.f32 %v12378_v5, %v1975_v27  ;;  %v3838_v56 = vsel %vm11739_vm4, 0, %v3837_v12  ;;  %v3844_v5 = vsel %vm11739_vm4, 0, %v3843_v51  ;;  %3851 = vst [vmem:[#allocation4 + $0x3c] sm:$0x1] %v3850_v2  ;;  %v11422_v12 = vld [vmem:[#allocation3 + $0x54] sm:$0xf0] }
 0x261   : > { %3839 = vst [vmem:[#allocation4 + $0x1c] sm:$0x1] %v3838_v56  ;;  %v10776_v56 = vld [vmem:[%s11997_s17 + $0x38] sm:$0xf]  ;;  %v11436_v51 = vld [vmem:[%s11997_s17 + $0x2c] sm:$0xf0] }
 0x262   : > { %10709 = vmatmul.msk.bf16.gmra.mxu3 %vm1162_vm10, %v10698_v31  ;;  %3845 = vst [vmem:[#allocation4 + $0x2c] sm:$0x1] %v3844_v5  ;;  %v3315_v31 = vshrl.u32 %v3282_v37, 16  ;;  %v3320_v5 = vrot.slane %v3318_v40, 5  ;;  %v3475_v2 = vshrl.u32 %v10776_v56, 16  ;;  %v3478_v20 = vshll.u32 %v10776_v56, 16 }
 0x263   : > { %v3466_v47 = vrot.slane %v3464_v7, 5  ;;  %v3470_v37 = vshll.u32 %v10775_v9, 16  ;;  %v3285_v56 = vld [vmem:[#allocation3 + $0x24] sm:$0x1]  ;;  %v10778_v7 = vld [vmem:[%s11997_s17 + $0x48] sm:$0xf] }
 0x264   : > { %v3317_v55 = vrot.slane %v3315_v31, 4  ;;  %v3477_v45 = vrot.slane %v3475_v2, 4  ;;  %v10806_v31 = vld [vmem:[%s11997_s17] sm:$0xf] }
 0x265   : > { %v1887_v63 = vpop.f32.mrf.mxu2  ;;  %v1963_v44 = vpop.f32.mrf.mxu3 }
 0x266   : > { %v1899_v8 = vadd.f32 %v1887_v63, %v12408_v24  ;;  %v1976_v35 = vadd.f32 %v1963_v44, %v1898_v53  ;;  %v12489_v33 = vpop.f32.mrf.mxu0  ;;  %v3283_v63 = vld [vmem:[#allocation3 + $0x1c] sm:$0x1]  ;;  %v3310_v44 = vshll.u32 %v3281_v50, 16  ;;  %v3321_v0 = vor.u32 %v3320_v5, %v3317_v55 }
 0x267   : > { %v2158_v1 = vpop.f32.mrf.mxu1 }
 0x268   : > { %v12479_v24 = vadd.f32 %v2158_v1, %v12361_v25  ;;  %v12486_v28 = vadd.f32 %v12390_v57, %v1976_v35  ;;  %v10742_v25 = vld [vmem:[#allocation2 + $0x50] sm:$0xf]  ;;  %v3324_v35 = vshll.u32 %v3283_v63, 16  ;;  %v10777_v1 = vld [vmem:[%s11997_s17 + $0x3c] sm:$0x1] }
 0x269   : > { %v10743_v21 = vor.u32 %v11434_v16, %v10742_v25  ;;  %v3280_v57 = vld [vmem:[#allocation3 + $0x10] sm:$0xf]  ;;  %v3480_v25 = vrot.slane %v3478_v20, 5 }
 0x26a   : > { %10648 = vmatmul.msk.bf16.gmra.mxu1 %vm1162_vm10, %v2804_v6  ;;  %10685 = vmatmul.msk.bf16.gmra.mxu2 %vm1162_vm10, %v10677_v29  ;;  %v3301_v27 = vshrl.u32 %v3280_v57, 16  ;;  %v3304_v22 = vshll.u32 %v3280_v57, 16  ;;  %v10681_v6 = vor.u32 %v11422_v12, %v10680_v26  ;;  %v10752_v29 = vor.u32 %v11436_v51, %v10751_v60 }
 0x26b   : > { %10748 = vmatmul.msk.bf16.gmra.mxu0 %vm1162_vm10, %v10743_v21  ;;  %v3312_v57 = vrot.slane %v3310_v44, 5  ;;  %v3472_v51 = vrot.slane %v3470_v37, 5  ;;  %v10755_v37 = vld [vmem:[%s11997_s17 + $0x40] sm:$0xf] }
 0x26c   : > { %v3303_v46 = vrot.slane %v3301_v27, 4  ;;  %v3306_v54 = vrot.slane %v3304_v22, 5  ;;  %v3484_v22 = vshll.u32 %v10777_v1, 16 }
 0x26d   : > { %v2264_v53 = vpop.f32.mrf.mxu2  ;;  %v1965_v15 = vpop.f32.mrf.mxu3 }
 0x26e   : > { %v2289_v10 = vadd.f32 %v2264_v53, %v12427_v13  ;;  %v1977_v30 = vadd.f32 %v1965_v15, %v1899_v8  ;;  %v12507_v52 = vpop.f32.mrf.mxu0  ;;  %v3284_v8 = vld [vmem:[#allocation3 + $0x20] sm:$0xf]  ;;  %v3286_v53 = vld [vmem:[#allocation3 + $0x28] sm:$0xf]  ;;  %v11446_v15 = vld [vmem:[%s11997_s17 + $0xc] sm:$0xf0] }
 0x26f   : > { %v2160_v43 = vpop.f32.mrf.mxu1  ;;  %v3329_v61 = vshrl.u32 %v3284_v8, 16  ;;  %v3332_v40 = vshll.u32 %v3284_v8, 16  ;;  %v10807_v12 = vor.u32 %v11446_v15, %v10806_v31  ;;  %v3346_v60 = vshll.u32 %v3286_v53, 16  ;;  %v10780_v8 = vld [vmem:[%s11997_s17 + $0x58] sm:$0xf] }
 0x270   : > { %v12500_v58 = vadd.f32 %v2160_v43, %v12381_v38  ;;  %v12504_v13 = vadd.f32 %v12410_v17, %v1977_v30  ;;  %v3307_v38 = vor.u32 %v3306_v54, %v3303_v46  ;;  %v11429_v30 = vld [vmem:[%s11997_s17 + $0xb4] sm:$0xf0]  ;;  %v3322_v43 = vrot.slane %v3321_v0, 4 }
 0x271   : > { %v3331_v46 = vrot.slane %v3329_v61, 4  ;;  %v3334_v54 = vrot.slane %v3332_v40, 5  ;;  %v10706_v50 = vor.u32 %v11429_v30, %v10705_v32  ;;  %v3486_v5 = vrot.slane %v3484_v22, 5  ;;  %v3288_v22 = vld [vmem:[#allocation3 + $0x30] sm:$0xf] }
 0x272   : > { %10710 = vmatmul.msk.bf16.gmra.mxu3 %vm1162_vm10, %v10702_v42  ;;  %v3308_v21 = vrot.slane %v3307_v38, 4  ;;  %v3326_v42 = vrot.slane %v3324_v35, 5  ;;  %v3348_v44 = vrot.slane %v3346_v60, 5  ;;  %v3338_v0 = vshll.u32 %v3285_v56, 16 }
 0x273   : > { %v3503_v61 = vshrl.u32 %v10780_v8, 16  ;;  %v3357_v56 = vshrl.u32 %v3288_v22, 16 }
 0x274   : > { %v3313_v55 = vsel %vm12052_vm13, %v3308_v21, %v3312_v57  ;;  %v3327_v2 = vsel %vm12052_vm13, %v3322_v43, %v3326_v42  ;;  %v10779_v43 = vld [vmem:[%s11997_s17 + $0x4c] sm:$0x1] }
 0x275   : > { %v2266_v17 = vpop.f32.mrf.mxu2  ;;  %v2352_v49 = vpop.f32.mrf.mxu3  ;;  %v3602_v21 = vunpack.c.l.b16 %v3327_v2  ;;  %v3505_v42 = vrot.slane %v3503_v61, 4 }
 0x276   : > { %v2290_v59 = vadd.f32 %v2266_v17, %v12446_v41  ;;  %v2377_v16 = vadd.f32 %v2352_v49, %v2289_v10  ;;  %v3467_v10 = vor.u32 %v3466_v47, %v3463_v14  ;;  %v12523_v26 = vpop.f32.mrf.mxu0  ;;  %v3335_v17 = vor.u32 %v3334_v54, %v3331_v46  ;;  %v10781_v54 = vld [vmem:[%s11997_s17 + $0x5c] sm:$0x1] }
 0x277   : > { %v2163_v23 = vpop.f32.mrf.mxu1  ;;  %v3352_v14 = vshll.u32 %v3287_v62, 16  ;;  %v3489_v47 = vshrl.u32 %v10778_v7, 16  ;;  %v3492_v49 = vshll.u32 %v10778_v7, 16 }
 0x278   : > { %v12514_v27 = vadd.f32 %v2163_v23, %v12393_v3  ;;  %v12519_v41 = vadd.f32 %v12433_v4, %v2377_v16  ;;  %v3481_v3 = vor.u32 %v3480_v25, %v3477_v45  ;;  %v3343_v4 = vshrl.u32 %v3286_v53, 16 }
 0x279   : > { %v3468_v20 = vrot.slane %v3467_v10, 4  ;;  %v3506_v16 = vshll.u32 %v10780_v8, 16  ;;  %v3601_v23 = vunpack.c.l.b16 %v3313_v55  ;;  %v3336_v31 = vrot.slane %v3335_v17, 4  ;;  %v10810_v17 = vld [vmem:[%s11997_s17 + $0x20] sm:$0xf] }
 0x27a   : > { %10686 = vmatmul.msk.bf16.gmra.mxu2 %vm1162_vm10, %v10681_v6  ;;  %10769 = vmatmul.msk.bf16.vlgmr.msra.gmra.mxu1 %vm1162_vm10, %v10752_v29  ;;  %v3345_v38 = vrot.slane %v3343_v4, 4  ;;  %v3482_v9 = vrot.slane %v3481_v3, 4  ;;  %v3491_v15 = vrot.slane %v3489_v47, 4  ;;  %v3494_v40 = vrot.slane %v3492_v49, 5  ;;  %v10784_v49 = vld [vmem:[%s11997_s17 + $0x78] sm:$0xf] }
 0x27b   : > { %10824 = vmatmul.msk.bf16.vlgmr.msrb.gmra.mxu0 %vm1162_vm10, %v10807_v12  ;;  %v3473_v53 = vsel %vm12052_vm13, %v3468_v20, %v3472_v51  ;;  %v3354_v30 = vrot.slane %v3352_v14, 5  ;;  %v3508_v10 = vrot.slane %v3506_v16, 5  ;;  %v3611_v46 = vpack.c.b16 %v3602_v21, %v3601_v23  ;;  %v3290_v51 = vld [vmem:[#allocation3 + $0x38] sm:$0xf] }
 0x27c   : > { %v3349_v25 = vor.u32 %v3348_v44, %v3345_v38  ;;  %v3495_v2 = vor.u32 %v3494_v40, %v3491_v15  ;;  %v3498_v20 = vshll.u32 %v10779_v43, 16  ;;  %v3289_v38 = vld [vmem:[#allocation3 + $0x34] sm:$0x1]  ;;  %v10782_v44 = vld [vmem:[%s11997_s17 + $0x68] sm:$0xf]  ;;  %v3371_v14 = vshrl.u32 %v3290_v51, 16 }
 0x27d   : > { %v2269_v63 = vpop.f32.mrf.mxu2  ;;  %v2354_v6 = vpop.f32.mrf.mxu3  ;;  %v3374_v47 = vshll.u32 %v3290_v51, 16  ;;  %v3366_v61 = vshll.u32 %v3289_v38, 16  ;;  %v3517_v16 = vshrl.u32 %v10782_v44, 16 }
 0x27e   : > { %v2291_v29 = vadd.f32 %v2269_v63, %v12479_v24  ;;  %v2378_v35 = vadd.f32 %v2354_v6, %v2290_v59  ;;  %v12541_v57 = vpop.f32.mrf.mxu0  ;;  %v11437_v59 = vld [vmem:[%s11997_s17 + $0x4c] sm:$0xf0]  ;;  %v3350_v32 = vrot.slane %v3349_v25, 4  ;;  %v3509_v6 = vor.u32 %v3508_v10, %v3505_v42  ;;  %v12583_v42 = vld [vmem:[%s11997_s17 + $0x60] sm:$0xf] }
 0x27f   : > { %v2165_v1 = vpop.f32.mrf.mxu1  ;;  %v10756_v12 = vor.u32 %v11437_v59, %v10755_v37  ;;  %v3500_v21 = vrot.slane %v3498_v20, 5  ;;  %v3520_v37 = vshll.u32 %v10782_v44, 16  ;;  %v3373_v40 = vrot.slane %v3371_v14, 4  ;;  %v12586_v10 = vld [vmem:[%s11997_s17 + $0x6c] sm:$0xf0] }
 0x280   : > { %v12536_v45 = vadd.f32 %v2165_v1, %v12413_v34  ;;  %v12539_v24 = vadd.f32 %v12459_v39, %v2378_v35  ;;  %v3487_v34 = vsel %vm12052_vm13, %v3482_v9, %v3486_v5  ;;  %v3340_v39 = vrot.slane %v3338_v0, 5  ;;  %v11447_v0 = vld [vmem:[%s11997_s17 + $0x2c] sm:$0xf0] }
 0x281   : > { %v12555_v55 = vunpack.c.l.b16 %v3487_v34  ;;  %v3360_v5 = vshll.u32 %v3288_v22, 16  ;;  %v3355_v8 = vsel %vm12052_vm13, %v3350_v32, %v3354_v30  ;;  %v3512_v9 = vshll.u32 %v10781_v54, 16  ;;  %v10783_v54 = vld [vmem:[%s11997_s17 + $0x6c] sm:$0x1] }
 0x282   : > { %10711 = vmatmul.msk.bf16.gmra.mxu3 %vm1162_vm10, %v10706_v50  ;;  %v12553_v50 = vunpack.c.l.b16 %v3473_v53  ;;  %v3341_v63 = vsel %vm12052_vm13, %v3336_v31, %v3340_v39  ;;  %v3359_v1 = vrot.slane %v3357_v56, 4  ;;  %v12579_v53 = vunpack.c.l.b16 %v3355_v8 }
 0x283   : > { %v3362_v25 = vrot.slane %v3360_v5, 5  ;;  %v12577_v59 = vunpack.c.l.b16 %v3341_v63  ;;  %v3531_v34 = vshrl.u32 %v10784_v49, 16  ;;  %v3534_v22 = vshll.u32 %v10784_v49, 16  ;;  %v3292_v5 = vld [vmem:[#allocation3 + $0x40] sm:$0xf] }
 0x284   : > { %v3689_v23 = vpack.c.b16 %v12555_v55, %v12553_v50  ;;  %v3510_v39 = vrot.slane %v3509_v6, 4  ;;  %v3514_v15 = vrot.slane %v3512_v9, 5  ;;  %v3376_v32 = vrot.slane %v3374_v47, 5  ;;  %v10785_v63 = vld [vmem:[%s11997_s17 + $0x7c] sm:$0x1] }
 0x285   : > { %v2271_v3 = vpop.f32.mrf.mxu2  ;;  %v2357_v4 = vpop.f32.mrf.mxu3  ;;  %v3519_v56 = vrot.slane %v3517_v16, 4  ;;  %v3522_v51 = vrot.slane %v3520_v37, 5  ;;  %v3385_v20 = vshrl.u32 %v3292_v5, 16  ;;  %v3388_v38 = vshll.u32 %v3292_v5, 16 }
 0x286   : > { %v2292_v60 = vadd.f32 %v2271_v3, %v12500_v58  ;;  %v2379_v62 = vadd.f32 %v2357_v4, %v2291_v29  ;;  %v3291_v3 = vld [vmem:[#allocation3 + $0x3c] sm:$0x1]  ;;  %v3377_v8 = vor.u32 %v3376_v32, %v3373_v40  ;;  %v3526_v9 = vshll.u32 %v10783_v54, 16 }
 0x287   : > { %v2168_v7 = vpop.f32.mrf.mxu1  ;;  %v10760_v14 = vor.u32 %v12586_v10, %v12583_v42  ;;  %v3523_v47 = vor.u32 %v3522_v51, %v3519_v56  ;;  %v3540_v49 = vshll.u32 %v10785_v63, 16  ;;  %v3390_v16 = vrot.slane %v3388_v38, 5 }
 0x288   : > { %v12561_v58 = vadd.f32 %v2168_v7, %v12431_v18  ;;  %v12568_v29 = vadd.f32 %v12489_v33, %v2379_v62  ;;  %v12570_v35 = vpop.f32.mrf.mxu0  ;;  %v10811_v18 = vor.u32 %v11447_v0, %v10810_v17  ;;  %v3496_v33 = vrot.slane %v3495_v2, 4  ;;  %v3294_v62 = vld [vmem:[#allocation3 + $0x48] sm:$0xf] }
 0x289   : > { %v3536_v2 = vrot.slane %v3534_v22, 5  ;;  %v3515_v17 = vsel %vm12052_vm13, %v3510_v39, %v3514_v15  ;;  %v3378_v37 = vrot.slane %v3377_v8, 4  ;;  %v10786_v22 = vld [vmem:[%s11997_s17 + $0x88] sm:$0xf]  ;;  %v3293_v39 = vld [vmem:[#allocation3 + $0x44] sm:$0x1] }
 0x28a   : > { %10770 = vmatmul.msk.bf16.gmra.mxu1 %vm1162_vm10, %v10756_v12  ;;  %10794 = vmatmul.msk.bf16.vlgmr.msra.gmra.mxu2 %vm1162_vm10, %v3611_v46  ;;  %v3363_v12 = vor.u32 %v3362_v25, %v3359_v1  ;;  %v12589_v46 = vrot.slane %v3366_v61, 5  ;;  %v3501_v55 = vsel %vm12052_vm13, %v3496_v33, %v3500_v21  ;;  %v3399_v1 = vshrl.u32 %v3294_v62, 16  ;;  %v3295_v15 = vld [vmem:[#allocation3 + $0x4c] sm:$0x1] }
 0x28b   : > { %10825 = vmatmul.msk.bf16.gmra.mxu0 %vm1162_vm10, %v10811_v18  ;;  %v12610_v18 = vunpack.c.l.b16 %v3501_v55  ;;  %v3387_v61 = vrot.slane %v3385_v20, 4  ;;  %v12612_v21 = vunpack.c.l.b16 %v3515_v17  ;;  %v3524_v10 = vrot.slane %v3523_v47, 4  ;;  %v10787_v8 = vld [vmem:[%s11997_s17 + $0x8c] sm:$0x1] }
 0x28c   : > { %v3364_v0 = vrot.slane %v3363_v12, 4  ;;  %v3401_v40 = vrot.slane %v3399_v1, 4  ;;  %v10788_v12 = vld [vmem:[%s11997_s17 + $0x98] sm:$0xf]  ;;  %v3545_v54 = vshrl.u32 %v10786_v22, 16  ;;  %v3548_v51 = vshll.u32 %v10786_v22, 16 }
 0x28d   : > { %v2274_v31 = vpop.f32.mrf.mxu2  ;;  %v2359_v30 = vpop.f32.mrf.mxu3  ;;  %v3391_v55 = vor.u32 %v3390_v16, %v3387_v61  ;;  %v3408_v5 = vshll.u32 %v3295_v15, 16  ;;  %v3690_v20 = vpack.c.b16 %v12612_v21, %v12610_v18  ;;  %v3298_v15 = vld [vmem:[#allocation3 + $0x58] sm:$0xf] }
 0x28e   : > { %v2293_v43 = vadd.f32 %v2274_v31, %v12514_v27  ;;  %v2380_v4 = vadd.f32 %v2359_v30, %v2292_v60  ;;  %v3533_v27 = vrot.slane %v3531_v34, 4  ;;  %v3380_v60 = vshll.u32 %v3291_v3, 16 }
 0x28f   : > { %v2170_v50 = vpop.f32.mrf.mxu1  ;;  %v3542_v3 = vrot.slane %v3540_v49, 5  ;;  %v3547_v63 = vrot.slane %v3545_v54, 4  ;;  %v3410_v49 = vrot.slane %v3408_v5, 5  ;;  %v3427_v54 = vshrl.u32 %v3298_v15, 16 }
 0x290   : > { %v12595_v7 = vadd.f32 %v2170_v50, %v12455_v36  ;;  %v12599_v44 = vadd.f32 %v12507_v52, %v2380_v4  ;;  %v12601_v6 = vpop.f32.mrf.mxu0  ;;  %v3402_v36 = vshll.u32 %v3294_v62, 16  ;;  %v3612_v52 = vpack.c.b16 %v12579_v53, %v12577_v59  ;;  %v10814_v50 = vld [vmem:[%s11997_s17 + $0x40] sm:$0xf] }
 0x291   : > { %v3537_v25 = vor.u32 %v3536_v2, %v3533_v27  ;;  %v3382_v34 = vrot.slane %v3380_v60, 5  ;;  %v3369_v53 = vsel %vm12052_vm13, %v3364_v0, %v12589_v46  ;;  %v3394_v27 = vshll.u32 %v3293_v39, 16  ;;  %v3296_v39 = vld [vmem:[#allocation3 + $0x50] sm:$0xf] }
 0x292   : > { %10799 = vmatmul.msk.bf16.vlgmr.msra.gmra.mxu3 %vm1162_vm10, %v3689_v23  ;;  %v3528_v23 = vrot.slane %v3526_v9, 5  ;;  %v3404_v32 = vrot.slane %v3402_v36, 5  ;;  %v3550_v2 = vrot.slane %v3548_v51, 5  ;;  %v12634_v38 = vunpack.c.l.b16 %v3369_v53 }
 0x293   : > { %v3538_v4 = vrot.slane %v3537_v25, 4  ;;  %v3559_v60 = vshrl.u32 %v10788_v12, 16  ;;  %v3562_v9 = vshll.u32 %v10788_v12, 16  ;;  %v3392_v36 = vrot.slane %v3391_v55, 4 }
 0x294   : > { %v3405_v62 = vor.u32 %v3404_v32, %v3401_v40  ;;  %v3529_v0 = vsel %vm12052_vm13, %v3524_v10, %v3528_v23  ;;  %v3396_v47 = vrot.slane %v3394_v27, 5  ;;  %v3551_v21 = vor.u32 %v3550_v2, %v3547_v63  ;;  %v4354_v27 = vld [vmem:[%s14903_s4] sm:$0xc] }
 0x295   : > { %v2276_v33 = vpop.f32.mrf.mxu2  ;;  %v2362_v31 = vpop.f32.mrf.mxu3  ;;  %v3543_v1 = vsel %vm12052_vm13, %v3538_v4, %v3542_v3  ;;  %v3561_v18 = vrot.slane %v3559_v60, 4  ;;  %v3564_v25 = vrot.slane %v3562_v9, 5  ;;  %v12648_v22 = vunpack.c.l.b16 %v3529_v0  ;;  %v12661_v3 = vld [vmem:[%s11997_s17 + $0xa0] sm:$0xf]  ;;  %v12666_v4 = vld [vmem:[%s11997_s17 + $0xac] sm:$0xf0] }
 0x296   : > { %v2294_v59 = vadd.f32 %v2276_v33, %v12536_v45  ;;  %v2381_v30 = vadd.f32 %v2362_v31, %v2293_v43  ;;  %v11448_v45 = vld [vmem:[%s11997_s17 + $0x4c] sm:$0xf0]  ;;  %v3383_v43 = vsel %vm12052_vm13, %v3378_v37, %v3382_v34  ;;  %v3406_v33 = vrot.slane %v3405_v62, 4 }
 0x297   : > { %v2173_v42 = vpop.f32.mrf.mxu1  ;;  %v12639_v17 = vunpack.c.l.b16 %v3383_v43  ;;  %v3554_v37 = vshll.u32 %v10787_v8, 16  ;;  %v3565_v31 = vor.u32 %v3564_v25, %v3561_v18  ;;  %v12654_v32 = vunpack.c.l.b16 %v3543_v1  ;;  %v3299_v18 = vld [vmem:[#allocation3 + $0x5c] sm:$0x1] }
 0x298   : > { %v12621_v56 = vadd.f32 %v2173_v42, %v12486_v28  ;;  %v12626_v46 = vadd.f32 %v12523_v26, %v2381_v30  ;;  %v10815_v28 = vor.u32 %v11448_v45, %v10814_v50  ;;  %v12636_v26 = vpop.f32.mrf.mxu0  ;;  %v3413_v30 = vshrl.u32 %v3296_v39, 16 }
 0x299   : > { %v3416_v42 = vshll.u32 %v3296_v39, 16  ;;  %v3397_v12 = vsel %vm12052_vm13, %v3392_v36, %v3396_v47  ;;  %v3552_v50 = vrot.slane %v3551_v21, 4  ;;  %v3556_v45 = vrot.slane %v3554_v37, 5  ;;  %v4436_v21 = vld [vmem:[%s14904_s5] sm:$0xc] }
 0x29a   : > { %10771 = vmatmul.msk.bf16.gmra.mxu1 %vm1162_vm10, %v10760_v14  ;;  %10795 = vmatmul.msk.bf16.gmra.mxu2 %vm1162_vm10, %v3612_v52  ;;  %v10789_v14 = vld [vmem:[%s11997_s17 + $0x9c] sm:$0x1]  ;;  %v3430_v55 = vshll.u32 %v3298_v15, 16  ;;  %v3415_v5 = vrot.slane %v3413_v30, 4  ;;  %v3613_v63 = vpack.c.b16 %v12639_v17, %v12634_v38  ;;  %v3691_v2 = vpack.c.b16 %v12654_v32, %v12648_v22 }
 0x29b   : > { %10826 = vmatmul.msk.bf16.gmra.mxu0 %vm1162_vm10, %v10815_v28  ;;  %v3568_v53 = vshll.u32 %v10789_v14, 16  ;;  %v3418_v28 = vrot.slane %v3416_v42, 5  ;;  %v4371_v8 = vunpack.c.l.b16 %v4354_v27  ;;  %v10768_v9 = vor.u32 %v12666_v4, %v12661_v3  ;;  %v10790_v14 = vld [vmem:[%s11997_s17 + $0xa8] sm:$0xf] }
 0x29c   : > { %v12682_v0 = vunpack.c.l.b16 %v3397_v12  ;;  %v3429_v1 = vrot.slane %v3427_v54, 4  ;;  %v3432_v36 = vrot.slane %v3430_v55, 5  ;;  %v3557_v17 = vsel %vm12052_vm13, %v3552_v50, %v3556_v45  ;;  %v10792_v12 = vld [vmem:[%s11997_s17 + $0xb8] sm:$0xf]  ;;  %v10793_v45 = vld [vmem:[%s11997_s17 + $0xbc] sm:$0x1] }
 0x29d   : > { %v2279_v52 = vpop.f32.mrf.mxu2  ;;  %v2364_v61 = vpop.f32.mrf.mxu3  ;;  %v3570_v43 = vrot.slane %v3568_v53, 5  ;;  %v3419_v37 = vor.u32 %v3418_v28, %v3415_v5  ;;  %v10818_v53 = vld [vmem:[%s11997_s17 + $0x60] sm:$0xf]  ;;  %v3573_v39 = vshrl.u32 %v10790_v14, 16  ;;  %v3436_v42 = vshll.u32 %v3299_v18, 16 }
 0x29e   : > { %v2295_v16 = vadd.f32 %v2279_v52, %v12561_v58  ;;  %v2382_v34 = vadd.f32 %v2364_v61, %v2294_v59  ;;  %v10763_v58 = vld [vmem:[%s11997_s17 + $0x80] sm:$0xf]  ;;  %v11439_v59 = vld [vmem:[%s11997_s17 + $0x8c] sm:$0xf0]  ;;  %v3433_v30 = vor.u32 %v3432_v36, %v3429_v1  ;;  %v3596_v36 = vshll.u32 %v10793_v45, 16 }
 0x29f   : > { %v2175_v23 = vpop.f32.mrf.mxu1  ;;  %v10764_v62 = vor.u32 %v11439_v59, %v10763_v58  ;;  %v12703_v58 = vunpack.c.l.b16 %v3557_v17  ;;  %v10791_v59 = vld [vmem:[%s11997_s17 + $0xac] sm:$0x1]  ;;  %v12715_v55 = vrot.slane %v3419_v37, 4 }
 0x2a0   : > { %v12651_v40 = vadd.f32 %v2175_v23, %v12504_v13  ;;  %v12657_v10 = vadd.f32 %v12541_v57, %v2382_v34  ;;  %v3411_v13 = vsel %vm12052_vm13, %v3406_v33, %v3410_v49  ;;  %v12671_v51 = vpop.f32.mrf.mxu0  ;;  %v3566_v57 = vrot.slane %v3565_v31, 4 }
 0x2a1   : > { %v12686_v38 = vunpack.c.l.b16 %v3411_v13  ;;  %v4372_v49 = vpack.c.b16 %v4371_v8, %v4371_v8  ;;  %v4453_v31 = vunpack.c.l.b16 %v4436_v21  ;;  %v3582_v27 = vshll.u32 %v10791_v59, 16 }
 0x2a2   : > { %10800 = vmatmul.msk.bf16.gmra.mxu3 %vm1162_vm10, %v3690_v20  ;;  %v3297_v20 = vld [vmem:[#allocation3 + $0x54] sm:$0x1]  ;;  %v3571_v33 = vsel %vm12052_vm13, %v3566_v57, %v3570_v43  ;;  %v3575_v57 = vrot.slane %v3573_v39, 4  ;;  %v3576_v43 = vshll.u32 %v10790_v14, 16  ;;  %v3590_v8 = vshll.u32 %v10792_v12, 16 }
 0x2a3   : > { %v4373_v23 = vrot.slane %v4372_v49, 2  ;;  %v4454_v13 = vpack.c.b16 %v4453_v31, %v4453_v31  ;;  %v3584_v18 = vrot.slane %v3582_v27, 5  ;;  %v4035_v27 = vld [vmem:[#allocation3 + $0x4] sm:$0x1] }
 0x2a4   : > { %v3578_v1 = vrot.slane %v3576_v43, 5  ;;  %v3592_v37 = vrot.slane %v3590_v8, 5 }
 0x2a5   : > { %v2281_v60 = vpop.f32.mrf.mxu2  ;;  %v2367_v52 = vpop.f32.mrf.mxu3  ;;  %v4390_v54 = vsel %vm1178_vm9, %v4373_v23, 0  ;;  %v4455_v5 = vrot.slane %v4454_v13, 2  ;;  %v4034_v23 = vld [vmem:[#allocation3] sm:$0xf] }
 0x2a6   : > { %v2296_v47 = vadd.f32 %v2281_v60, %v12595_v7  ;;  %v2383_v25 = vadd.f32 %v2367_v52, %v2295_v16  ;;  %v3422_v7 = vshll.u32 %v3297_v20, 16  ;;  %v11449_v16 = vld [vmem:[%s11997_s17 + $0x6c] sm:$0xf0]  ;;  %4399 = vmatpush.bf16.msrb.mxu2 %v4390_v54  ;;  %v3434_v20 = vrot.slane %v3433_v30, 4  ;;  %v4916_v30 = vld [vmem:[%s14904_s5 + $0x4] sm:$0x3] }
 0x2a7   : > { %v2836_v61 = vpop.f32.mrf.mxu1  ;;  %v10819_v50 = vor.u32 %v11449_v16, %v10818_v53  ;;  %v3438_v60 = vrot.slane %v3436_v42, 5  ;;  %v4472_v49 = vsel %vm1178_vm9, %v4455_v5, 0  ;;  %v3579_v21 = vor.u32 %v3578_v1, %v3575_v57  ;;  %v4036_v53 = vld [vmem:[#allocation3 + $0x8] sm:$0xf]  ;;  %v4037_v5 = vld [vmem:[#allocation3 + $0xc] sm:$0x1] }
 0x2a8   : > { %v12696_v34 = vadd.f32 %v2836_v61, %v12519_v41  ;;  %v12701_v15 = vadd.f32 %v12570_v35, %v2383_v25  ;;  %v12709_v41 = vunpack.c.l.b16 %v3571_v33  ;;  %v12713_v35 = vpop.f32.mrf.mxu0  ;;  %v3424_v28 = vrot.slane %v3422_v7, 5  ;;  %4481 = vmatpush.bf16.msrb.mxu3 %v4472_v49  ;;  %v4838_v33 = vld [vmem:[%s14903_s4 + $0x4] sm:$0x3]  ;;  %v10854_v1 = vld [vmem:[%s11997_s17 + $0x8] sm:$0xf] }
 0x2a9   : > { %v3598_v7 = vrot.slane %v3596_v36, 5  ;;  %v4055_v16 = vshrl.u32 %v4034_v23, 16  ;;  %v4058_v39 = vshll.u32 %v4034_v23, 16  ;;  %v3580_v42 = vrot.slane %v3579_v21, 4 }
 0x2aa   : > { %10772 = vmatmul.msk.bf16.gmra.mxu1 %vm1162_vm10, %v10764_v62  ;;  %10796 = vmatmul.msk.bf16.gmra.mxu2 %vm1162_vm10, %v3613_v63  ;;  %v3587_v62 = vshrl.u32 %v10792_v12, 16  ;;  %v4069_v12 = vshrl.u32 %v4036_v53, 16  ;;  %v4948_v54 = vsel %vm1178_vm9, %v4916_v30, 0  ;;  %v3425_v45 = vsel %vm12052_vm13, %v12715_v55, %v3424_v28  ;;  %v12776_v30 = vld [vmem:[#allocation2 + $0x10] sm:$0xf] }
 0x2ab   : > { %10827 = vmatmul.msk.bf16.gmra.mxu0 %vm1162_vm10, %v10819_v50  ;;  %v4060_v13 = vrot.slane %v4058_v39, 5  ;;  %v4072_v50 = vshll.u32 %v4036_v53, 16  ;;  %4957 = vmatpush.bf16.msra.mxu1 %v4948_v54  ;;  %v3439_v22 = vsel %vm12052_vm13, %v3434_v20, %v3438_v60  ;;  %v4078_v28 = vshll.u32 %v4037_v5, 16  ;;  %v10822_v53 = vld [vmem:[%s11997_s17 + $0x80] sm:$0xf] }
 0x2ac   : > { %v3589_v25 = vrot.slane %v3587_v62, 4  ;;  %v4071_v62 = vrot.slane %v4069_v12, 4  ;;  %v12755_v60 = vunpack.c.l.b16 %v3425_v45 }
 0x2ad   : > { %v2284_v63 = vpop.f32.mrf.mxu2  ;;  %v2369_v52 = vpop.f32.mrf.mxu3  ;;  %v4074_v8 = vrot.slane %v4072_v50, 5  ;;  %v4080_v12 = vrot.slane %v4078_v28, 5 }
 0x2ae   : > { %v2297_v17 = vadd.f32 %v2284_v63, %v12621_v56  ;;  %v2384_v14 = vadd.f32 %v2369_v52, %v2296_v47  ;;  %v4870_v56 = vsel %vm1178_vm9, %v4838_v33, 0  ;;  %v3593_v59 = vor.u32 %v3592_v37, %v3589_v25  ;;  %v12757_v52 = vld [vmem:[#allocation2] sm:$0xf]  ;;  %v10856_v37 = vld [vmem:[%s11997_s17 + $0x18] sm:$0xf] }
 0x2af   : > { %v2838_v61 = vpop.f32.mrf.mxu1  ;;  %4879 = vmatpush.bf16.msra.mxu0 %v4870_v56  ;;  %v12759_v33 = vunpack.c.l.b16 %v3439_v22  ;;  %v4075_v21 = vor.u32 %v4074_v8, %v4071_v62  ;;  %v4229_v62 = vshrl.u32 %v10856_v37, 16  ;;  %v4232_v3 = vshll.u32 %v10856_v37, 16 }
 0x2b0   : > { %v12724_v31 = vadd.f32 %v2838_v61, %v12539_v24  ;;  %v12728_v47 = vadd.f32 %v12601_v6, %v2384_v14  ;;  %v4057_v24 = vrot.slane %v4055_v16, 4  ;;  %v3614_v6 = vpack.c.b16 %v12686_v38, %v12682_v0  ;;  %v12743_v57 = vpop.f32.mrf.mxu0  ;;  %v11450_v16 = vld [vmem:[%s11997_s17 + $0x8c] sm:$0xf0] }
 0x2b1   : > { %v3594_v43 = vrot.slane %v3593_v59, 4  ;;  %v3692_v0 = vpack.c.b16 %v12709_v41, %v12703_v58  ;;  %v3585_v38 = vsel %vm12052_vm13, %v3580_v42, %v3584_v18  ;;  %v12761_v18 = vld [vmem:[#allocation2 + $0x4] sm:$0xf0]  ;;  %v12778_v42 = vld [vmem:[#allocation2 + $0x14] sm:$0xf0]  ;;  %v4076_v59 = vrot.slane %v4075_v21, 4 }
 0x2b2   : > { %10801 = vmatmul.msk.bf16.gmra.mxu3 %vm1162_vm10, %v3691_v2  ;;  %v4061_v32 = vor.u32 %v4060_v13, %v4057_v24  ;;  %v4064_v2 = vshll.u32 %v4035_v27, 16  ;;  %v10823_v54 = vor.u32 %v11450_v16, %v10822_v53  ;;  %v10855_v24 = vld [vmem:[%s11997_s17 + $0xc] sm:$0x1]  ;;  %v10857_v13 = vld [vmem:[%s11997_s17 + $0x1c] sm:$0x1] }
 0x2b3   : > { %v3599_v55 = vsel %vm12052_vm13, %v3594_v43, %v3598_v7  ;;  %v4215_v7 = vshrl.u32 %v10854_v1, 16  ;;  %v3615_v43 = vpack.c.b16 %v12759_v33, %v12755_v60  ;;  %v4224_v5 = vshll.u32 %v10855_v24, 16  ;;  %v10861_v33 = vld [vmem:[%s11997_s17 + $0x3c] sm:$0x1] }
 0x2b4   : > { %v4062_v49 = vrot.slane %v4061_v32, 4  ;;  %v4066_v25 = vrot.slane %v4064_v2, 5  ;;  %v12769_v56 = vunpack.c.l.b16 %v3599_v55  ;;  %v4238_v22 = vshll.u32 %v10857_v13, 16  ;;  %v4518_v55 = vld [vmem:[#allocation2] sm:$0xf] }
 0x2b5   : > { %v2286_v63 = vpop.f32.mrf.mxu2  ;;  %v2372_v36 = vpop.f32.mrf.mxu3  ;;  %v4217_v50 = vrot.slane %v4215_v7, 4  ;;  %v10836_v2 = vor.u32 %v12778_v42, %v12776_v30  ;;  %v4226_v8 = vrot.slane %v4224_v5, 5  ;;  %v4539_v7 = vshrl.u32 %v4518_v55, 16  ;;  %v4521_v13 = vld [vmem:[#allocation2 + $0xc] sm:$0x1] }
 0x2b6   : > { %v2298_v20 = vadd.f32 %v2286_v63, %v12651_v40  ;;  %v2385_v14 = vadd.f32 %v2372_v36, %v2297_v17  ;;  %v12767_v40 = vunpack.c.l.b16 %v3585_v38  ;;  %v4218_v17 = vshll.u32 %v10854_v1, 16 }
 0x2b7   : > { %v2841_v61 = vpop.f32.mrf.mxu1  ;;  %v4231_v63 = vrot.slane %v4229_v62, 4  ;;  %v4234_v38 = vrot.slane %v4232_v3, 5  ;;  %v4081_v36 = vsel %vm12052_vm13, %v4076_v59, %v4080_v12  ;;  %v4542_v53 = vshll.u32 %v4518_v55, 16 }
 0x2b8   : > { %v12765_v23 = vadd.f32 %v2841_v61, %v12568_v29  ;;  %v12774_v39 = vadd.f32 %v12636_v26, %v2385_v14  ;;  %v4067_v29 = vsel %vm12052_vm13, %v4062_v49, %v4066_v25  ;;  %v10832_v26 = vor.u32 %v12761_v18, %v12757_v52  ;;  %v12793_v27 = vpop.f32.mrf.mxu0  ;;  %v4520_v14 = vld [vmem:[#allocation2 + $0x8] sm:$0xf] }
 0x2b9   : > { %v4220_v45 = vrot.slane %v4218_v17, 5  ;;  %v3693_v4 = vpack.c.b16 %v12769_v56, %v12767_v40  ;;  %v4240_v25 = vrot.slane %v4238_v22, 5  ;;  %v4235_v37 = vor.u32 %v4234_v38, %v4231_v63 }
 0x2ba   : > { %10773 = vmatmul.msk.bf16.gmra.mxu1 %vm1162_vm10, %v10768_v9  ;;  %10797 = vmatmul.msk.bf16.gmra.mxu2 %vm1162_vm10, %v3614_v6  ;;  %v12797_v9 = vunpack.c.l.b16 %v4067_v29  ;;  %v4556_v29 = vshll.u32 %v4520_v14, 16  ;;  %v12813_v59 = vunpack.c.l.b16 %v4081_v36  ;;  %v4562_v22 = vshll.u32 %v4521_v13, 16  ;;  %v4040_v36 = vld [vmem:[#allocation3 + $0x18] sm:$0xf] }
 0x2bb   : > { %v4221_v6 = vor.u32 %v4220_v45, %v4217_v50  ;;  %10828 = vmatmul.msk.bf16.gmra.mxu0 %vm1162_vm10, %v10823_v54  ;;  %v4038_v54 = vld [vmem:[#allocation3 + $0x10] sm:$0xf]  ;;  %v4236_v12 = vrot.slane %v4235_v37, 4  ;;  %v4541_v50 = vrot.slane %v4539_v7, 4  ;;  %v4544_v45 = vrot.slane %v4542_v53, 5 }
 0x2bc   : > { %v4564_v58 = vrot.slane %v4562_v22, 5 }
 0x2bd   : > { %v2950_v32 = vpop.f32.mrf.mxu2  ;;  %v2374_v28 = vpop.f32.mrf.mxu3  ;;  %v4222_v49 = vrot.slane %v4221_v6, 4  ;;  %v4545_v38 = vor.u32 %v4544_v45, %v4541_v50  ;;  %v4100_v50 = vshll.u32 %v4040_v36, 16  ;;  %v10858_v45 = vld [vmem:[%s11997_s17 + $0x28] sm:$0xf] }
 0x2be   : > { %v2975_v1 = vadd.f32 %v2950_v32, %v12696_v34  ;;  %v2386_v61 = vadd.f32 %v2374_v28, %v2298_v20  ;;  %v4553_v34 = vshrl.u32 %v4520_v14, 16  ;;  %v4519_v20 = vld [vmem:[#allocation2 + $0x4] sm:$0x1]  ;;  %v4039_v32 = vld [vmem:[#allocation3 + $0x14] sm:$0x1] }
 0x2bf   : > { %v2843_v21 = vpop.f32.mrf.mxu1  ;;  %v4227_v17 = vsel %vm12052_vm13, %v4222_v49, %v4226_v8  ;;  %v4548_v5 = vshll.u32 %v4519_v20, 16  ;;  %v4083_v8 = vshrl.u32 %v4038_v54, 16  ;;  %v4092_v14 = vshll.u32 %v4039_v32, 16  ;;  %v10859_v32 = vld [vmem:[%s11997_s17 + $0x2c] sm:$0x1] }
 0x2c0   : > { %v12806_v16 = vadd.f32 %v2843_v21, %v12599_v44  ;;  %v12811_v24 = vadd.f32 %v12671_v51, %v2386_v61  ;;  %v4555_v62 = vrot.slane %v4553_v34, 4  ;;  %v4558_v44 = vrot.slane %v4556_v29, 5  ;;  %v12819_v3 = vpop.f32.mrf.mxu0  ;;  %v4041_v29 = vld [vmem:[#allocation3 + $0x1c] sm:$0x1] }
 0x2c1   : > { %v4241_v51 = vsel %vm12052_vm13, %v4236_v12, %v4240_v25  ;;  %v12823_v6 = vunpack.c.l.b16 %v4227_v17  ;;  %v4550_v55 = vrot.slane %v4548_v5, 5  ;;  %v4085_v41 = vrot.slane %v4083_v8, 4  ;;  %v12855_v8 = vld [vmem:[#allocation2 + $0x24] sm:$0xf0] }
 0x2c2   : > { %10802 = vmatmul.msk.bf16.gmra.mxu3 %vm1162_vm10, %v3692_v0  ;;  %v12825_v63 = vunpack.c.l.b16 %v4241_v51  ;;  %v4559_v28 = vor.u32 %v4558_v44, %v4555_v62  ;;  %v4086_v0 = vshll.u32 %v4038_v54, 16  ;;  %v4365_v21 = vpack.c.b16 %v12813_v59, %v12797_v9  ;;  %v12841_v44 = vld [vmem:[#allocation2 + $0x20] sm:$0xf] }
 0x2c3   : > { %v4546_v37 = vrot.slane %v4545_v38, 4  ;;  %v4097_v54 = vshrl.u32 %v4040_v36, 16  ;;  %v4094_v22 = vrot.slane %v4092_v14, 5  ;;  %v10840_v52 = vor.u32 %v12855_v8, %v12841_v44 }
 0x2c4   : > { %v4560_v7 = vrot.slane %v4559_v28, 4  ;;  %v4447_v34 = vpack.c.b16 %v12825_v63, %v12823_v6  ;;  %v4088_v12 = vrot.slane %v4086_v0, 5  ;;  %v4106_v28 = vshll.u32 %v4041_v29, 16 }
 0x2c5   : > { %v2952_v49 = vpop.f32.mrf.mxu2  ;;  %v3038_v61 = vpop.f32.mrf.mxu3  ;;  %v4099_v38 = vrot.slane %v4097_v54, 4 }
 0x2c6   : > { %v2976_v25 = vadd.f32 %v2952_v49, %v12724_v31  ;;  %v3063_v53 = vadd.f32 %v3038_v61, %v2975_v1  ;;  %v4551_v31 = vsel %vm12052_vm13, %v4546_v37, %v4550_v55  ;;  %v4565_v13 = vsel %vm12052_vm13, %v4560_v7, %v4564_v58  ;;  %v10860_v1 = vld [vmem:[%s11997_s17 + $0x38] sm:$0xf]  ;;  %v4522_v7 = vld [vmem:[#allocation2 + $0x10] sm:$0xf] }
 0x2c7   : > { %v2846_v17 = vpop.f32.mrf.mxu1  ;;  %v4839_v5 = vunpack.c.l.b16 %v4551_v31  ;;  %v4840_v62 = vunpack.c.l.b16 %v4565_v13  ;;  %v4089_v51 = vor.u32 %v4088_v12, %v4085_v41  ;;  %v4102_v55 = vrot.slane %v4100_v50, 5 }
 0x2c8   : > { %v12833_v20 = vadd.f32 %v2846_v17, %v12626_v46  ;;  %v12845_v46 = vadd.f32 %v12713_v35, %v3063_v53  ;;  %v12857_v36 = vpop.f32.mrf.mxu0  ;;  %v4243_v58 = vshrl.u32 %v10858_v45, 16  ;;  %v4246_v41 = vshll.u32 %v10858_v45, 16 }
 0x2c9   : > { %v4849_v49 = vpack.c.b16 %v4840_v62, %v4839_v5  ;;  %v4090_v35 = vrot.slane %v4089_v51, 4  ;;  %v4103_v0 = vor.u32 %v4102_v55, %v4099_v38  ;;  %v4108_v60 = vrot.slane %v4106_v28, 5  ;;  %v4523_v28 = vld [vmem:[#allocation2 + $0x14] sm:$0x1] }
 0x2ca   : > { %10798 = vmatmul.msk.bf16.gmra.mxu2 %vm1162_vm10, %v3615_v43  ;;  %10849 = vmatmul.msk.bf16.vlgmr.msrb.gmra.mxu1 %vm1162_vm10, %v10832_v26  ;;  %v4252_v43 = vshll.u32 %v10859_v32, 16  ;;  %v4257_v14 = vshrl.u32 %v10860_v1, 16  ;;  %v4245_v18 = vrot.slane %v4243_v58, 4  ;;  %v4248_v26 = vrot.slane %v4246_v41, 5  ;;  %v4525_v58 = vld [vmem:[#allocation2 + $0x1c] sm:$0x1] }
 0x2cb   : > { %v4260_v37 = vshll.u32 %v10860_v1, 16  ;;  %10884 = vmatmul.msk.bf16.vlgmr.msra.gmra.mxu0 %vm1162_vm10, %v4849_v49  ;;  %v4095_v29 = vsel %vm12052_vm13, %v4090_v35, %v4094_v22  ;;  %v4104_v12 = vrot.slane %v4103_v0, 4  ;;  %v4266_v51 = vshll.u32 %v10861_v33, 16  ;;  %v4042_v49 = vld [vmem:[#allocation3 + $0x20] sm:$0xf] }
 0x2cc   : > { %v4254_v54 = vrot.slane %v4252_v43, 5  ;;  %v4249_v50 = vor.u32 %v4248_v26, %v4245_v18  ;;  %v4259_v45 = vrot.slane %v4257_v14, 4  ;;  %v4567_v32 = vshrl.u32 %v4522_v7, 16 }
 0x2cd   : > { %v2955_v61 = vpop.f32.mrf.mxu2  ;;  %v3040_v53 = vpop.f32.mrf.mxu3  ;;  %v4262_v5 = vrot.slane %v4260_v37, 5  ;;  %v4109_v1 = vsel %vm12052_vm13, %v4104_v12, %v4108_v60  ;;  %v12874_v22 = vunpack.c.l.b16 %v4095_v29  ;;  %v4268_v35 = vrot.slane %v4266_v51, 5  ;;  %v4044_v51 = vld [vmem:[#allocation3 + $0x28] sm:$0xf] }
 0x2ce   : > { %v2977_v17 = vadd.f32 %v2955_v61, %v12765_v23  ;;  %v3064_v31 = vadd.f32 %v3040_v53, %v2976_v25  ;;  %v4524_v23 = vld [vmem:[#allocation2 + $0x18] sm:$0xf]  ;;  %v4250_v55 = vrot.slane %v4249_v50, 4  ;;  %v4569_v41 = vrot.slane %v4567_v32, 4  ;;  %v4043_v50 = vld [vmem:[#allocation3 + $0x24] sm:$0x1] }
 0x2cf   : > { %v2848_v13 = vpop.f32.mrf.mxu1  ;;  %v4263_v25 = vor.u32 %v4262_v5, %v4259_v45  ;;  %v4576_v0 = vshll.u32 %v4523_v28, 16  ;;  %v12880_v60 = vunpack.c.l.b16 %v4109_v1  ;;  %v4581_v14 = vshrl.u32 %v4524_v23, 16 }
 0x2d0   : > { %v12867_v62 = vadd.f32 %v2848_v13, %v12657_v10  ;;  %v12872_v38 = vadd.f32 %v12743_v57, %v3064_v31  ;;  %v4570_v10 = vshll.u32 %v4522_v7, 16  ;;  %v12882_v57 = vpop.f32.mrf.mxu0  ;;  %v4255_v33 = vsel %vm12052_vm13, %v4250_v55, %v4254_v54 }
 0x2d1   : > { %v4264_v43 = vrot.slane %v4263_v25, 4  ;;  %v12886_v61 = vunpack.c.l.b16 %v4255_v33  ;;  %v4578_v26 = vrot.slane %v4576_v0, 5  ;;  %v4584_v37 = vshll.u32 %v4524_v23, 16  ;;  %v12906_v0 = vld [vmem:[#allocation2 + $0x34] sm:$0xf0] }
 0x2d2   : > { %10803 = vmatmul.msk.bf16.gmra.mxu3 %vm1162_vm10, %v3693_v4  ;;  %v4572_v18 = vrot.slane %v4570_v10, 5  ;;  %v4583_v56 = vrot.slane %v4581_v14, 4  ;;  %v4590_v4 = vshll.u32 %v4525_v58, 16  ;;  %v4111_v53 = vshrl.u32 %v4042_v49, 16  ;;  %v10862_v58 = vld [vmem:[%s11997_s17 + $0x48] sm:$0xf] }
 0x2d3   : > { %v4269_v40 = vsel %vm12052_vm13, %v4264_v43, %v4268_v35  ;;  %v4586_v13 = vrot.slane %v4584_v37, 5  ;;  %v4366_v1 = vpack.c.b16 %v12880_v60, %v12874_v22  ;;  %v4114_v32 = vshll.u32 %v4042_v49, 16  ;;  %v4045_v35 = vld [vmem:[#allocation3 + $0x2c] sm:$0x1]  ;;  %v12904_v10 = vld [vmem:[#allocation2 + $0x30] sm:$0xf] }
 0x2d4   : > { %v12891_v31 = vunpack.c.l.b16 %v4269_v40  ;;  %v4573_v54 = vor.u32 %v4572_v18, %v4569_v41  ;;  %v4113_v23 = vrot.slane %v4111_v53, 4  ;;  %v4120_v33 = vshll.u32 %v4043_v50, 16  ;;  %v10866_v22 = vld [vmem:[%s11997_s17 + $0x68] sm:$0xf] }
 0x2d5   : > { %v2957_v7 = vpop.f32.mrf.mxu2  ;;  %v3043_v29 = vpop.f32.mrf.mxu3  ;;  %v4587_v28 = vor.u32 %v4586_v13, %v4583_v56  ;;  %v4116_v49 = vrot.slane %v4114_v32, 5  ;;  %v10844_v43 = vor.u32 %v12906_v0, %v12904_v10  ;;  %v4125_v14 = vshrl.u32 %v4044_v51, 16 }
 0x2d6   : > { %v2978_v12 = vadd.f32 %v2957_v7, %v12806_v16  ;;  %v3065_v45 = vadd.f32 %v3043_v29, %v2977_v17  ;;  %v4574_v25 = vrot.slane %v4573_v54, 4  ;;  %v4592_v16 = vrot.slane %v4590_v4, 5 }
 0x2d7   : > { %v2851_v5 = vpop.f32.mrf.mxu1  ;;  %v4448_v17 = vpack.c.b16 %v12891_v31, %v12886_v61  ;;  %v4117_v7 = vor.u32 %v4116_v49, %v4113_v23  ;;  %v4122_v30 = vrot.slane %v4120_v33, 5  ;;  %v4128_v42 = vshll.u32 %v4044_v51, 16  ;;  %v4526_v49 = vld [vmem:[#allocation2 + $0x20] sm:$0xf] }
 0x2d8   : > { %v12896_v55 = vadd.f32 %v2851_v5, %v12701_v15  ;;  %v12900_v41 = vadd.f32 %v12793_v27, %v3065_v45  ;;  %v4579_v15 = vsel %vm12052_vm13, %v4574_v25, %v4578_v26  ;;  %v4588_v27 = vrot.slane %v4587_v28, 4  ;;  %v12920_v18 = vpop.f32.mrf.mxu0  ;;  %v10864_v45 = vld [vmem:[%s11997_s17 + $0x58] sm:$0xf] }
 0x2d9   : > { %v4841_v37 = vunpack.c.l.b16 %v4579_v15  ;;  %v4127_v59 = vrot.slane %v4125_v14, 4  ;;  %v4271_v40 = vshrl.u32 %v10862_v58, 16  ;;  %v4118_v4 = vrot.slane %v4117_v7, 4  ;;  %v4527_v7 = vld [vmem:[#allocation2 + $0x24] sm:$0x1] }
 0x2da   : > { %10850 = vmatmul.msk.bf16.gmra.mxu1 %vm1162_vm10, %v10836_v2  ;;  %10874 = vmatmul.msk.bf16.vlgmr.msrb.gmra.mxu2 %vm1162_vm10, %v4365_v21  ;;  %v10863_v2 = vld [vmem:[%s11997_s17 + $0x4c] sm:$0x1]  ;;  %v4593_v9 = vsel %vm12052_vm13, %v4588_v27, %v4592_v16  ;;  %v4134_v21 = vshll.u32 %v4045_v35, 16  ;;  %v4130_v53 = vrot.slane %v4128_v42, 5  ;;  %v4274_v29 = vshll.u32 %v10862_v58, 16 }
 0x2db   : > { %v4842_v56 = vunpack.c.l.b16 %v4593_v9  ;;  %v4273_v5 = vrot.slane %v4271_v40, 4  ;;  %v4280_v51 = vshll.u32 %v10863_v2, 16  ;;  %v4123_v28 = vsel %vm12052_vm13, %v4118_v4, %v4122_v30  ;;  %v10865_v35 = vld [vmem:[%s11997_s17 + $0x5c] sm:$0x1]  ;;  %v4528_v2 = vld [vmem:[#allocation2 + $0x28] sm:$0xf] }
 0x2dc   : > { %v4136_v50 = vrot.slane %v4134_v21, 5  ;;  %v4131_v16 = vor.u32 %v4130_v53, %v4127_v59  ;;  %v12933_v58 = vunpack.c.l.b16 %v4123_v28  ;;  %v4276_v15 = vrot.slane %v4274_v29, 5  ;;  %v4046_v28 = vld [vmem:[#allocation3 + $0x30] sm:$0xf] }
 0x2dd   : > { %v2960_v26 = vpop.f32.mrf.mxu2  ;;  %v3045_v54 = vpop.f32.mrf.mxu3  ;;  %v4850_v25 = vpack.c.b16 %v4842_v56, %v4841_v37  ;;  %v4285_v14 = vshrl.u32 %v10864_v45, 16  ;;  %v4288_v37 = vshll.u32 %v10864_v45, 16  ;;  %v4294_v42 = vshll.u32 %v10865_v35, 16 }
 0x2de   : > { %v2979_v13 = vadd.f32 %v2960_v26, %v12833_v20  ;;  %v3066_v23 = vadd.f32 %v3045_v54, %v2978_v12  ;;  %v4282_v20 = vrot.slane %v4280_v51, 5  ;;  %v4132_v12 = vrot.slane %v4131_v16, 4 }
 0x2df   : > { %v2853_v32 = vpop.f32.mrf.mxu1  ;;  %10885 = vmatmul.msk.bf16.gmra.mxu0 %vm1162_vm10, %v4850_v25  ;;  %v4277_v30 = vor.u32 %v4276_v15, %v4273_v5  ;;  %v4595_v9 = vshrl.u32 %v4526_v49, 16  ;;  %v4598_v59 = vshll.u32 %v4526_v49, 16  ;;  %v4287_v21 = vrot.slane %v4285_v14, 4  ;;  %v4529_v5 = vld [vmem:[#allocation2 + $0x2c] sm:$0x1] }
 0x2e0   : > { %v12931_v33 = vadd.f32 %v2853_v32, %v12728_v47  ;;  %v12936_v27 = vadd.f32 %v12819_v3, %v3066_v23  ;;  %v4137_v47 = vsel %vm12052_vm13, %v4132_v12, %v4136_v50  ;;  %v12945_v3 = vpop.f32.mrf.mxu0  ;;  %v4290_v40 = vrot.slane %v4288_v37, 5  ;;  %v4048_v14 = vld [vmem:[#allocation3 + $0x38] sm:$0xf] }
 0x2e1   : > { %v4604_v26 = vshll.u32 %v4527_v7, 16  ;;  %v12947_v56 = vunpack.c.l.b16 %v4137_v47  ;;  %v4278_v4 = vrot.slane %v4277_v30, 4  ;;  %v4296_v53 = vrot.slane %v4294_v42, 5  ;;  %v4047_v42 = vld [vmem:[#allocation3 + $0x34] sm:$0x1] }
 0x2e2   : > { %10879 = vmatmul.msk.bf16.vlgmr.msrb.gmra.mxu3 %vm1162_vm10, %v4447_v34  ;;  %v4597_v29 = vrot.slane %v4595_v9, 4  ;;  %v4291_v45 = vor.u32 %v4290_v40, %v4287_v21  ;;  %v4600_v51 = vrot.slane %v4598_v59, 5  ;;  %v4609_v63 = vshrl.u32 %v4528_v2, 16  ;;  %v12966_v59 = vld [vmem:[#allocation2 + $0x44] sm:$0xf0] }
 0x2e3   : > { %v4606_v6 = vrot.slane %v4604_v26, 5  ;;  %v4367_v50 = vpack.c.b16 %v12947_v56, %v12933_v58  ;;  %v4283_v32 = vsel %vm12052_vm13, %v4278_v4, %v4282_v20  ;;  %v4612_v25 = vshll.u32 %v4528_v2, 16  ;;  %v12964_v2 = vld [vmem:[#allocation2 + $0x40] sm:$0xf]  ;;  %v4049_v26 = vld [vmem:[#allocation3 + $0x3c] sm:$0x1] }
 0x2e4   : > { %v4292_v49 = vrot.slane %v4291_v45, 4  ;;  %v12954_v15 = vunpack.c.l.b16 %v4283_v32  ;;  %v4601_v12 = vor.u32 %v4600_v51, %v4597_v29  ;;  %v4611_v7 = vrot.slane %v4609_v63, 4 }
 0x2e5   : > { %v2962_v54 = vpop.f32.mrf.mxu2  ;;  %v3048_v34 = vpop.f32.mrf.mxu3  ;;  %v4618_v30 = vshll.u32 %v4529_v5, 16  ;;  %v4139_v47 = vshrl.u32 %v4046_v28, 16  ;;  %v10848_v40 = vor.u32 %v12966_v59, %v12964_v2  ;;  %v4156_v63 = vshll.u32 %v4048_v14, 16  ;;  %v5518_v59 = vld [vmem:[%s14903_s4 + $0x8] sm:$0x3] }
 0x2e6   : > { %v2980_v23 = vadd.f32 %v2962_v54, %v12867_v62  ;;  %v3067_v16 = vadd.f32 %v3048_v34, %v2979_v13  ;;  %v4614_v62 = vrot.slane %v4612_v25, 5  ;;  %v4297_v20 = vsel %vm12052_vm13, %v4292_v49, %v4296_v53 }
 0x2e7   : > { %v2856_v35 = vpop.f32.mrf.mxu1  ;;  %v4602_v13 = vrot.slane %v4601_v12, 4  ;;  %v4620_v21 = vrot.slane %v4618_v30, 5  ;;  %v4141_v8 = vrot.slane %v4139_v47, 4  ;;  %v4148_v53 = vshll.u32 %v4047_v42, 16  ;;  %v10867_v42 = vld [vmem:[%s11997_s17 + $0x6c] sm:$0x1] }
 0x2e8   : > { %v12957_v37 = vadd.f32 %v2856_v35, %v12774_v39  ;;  %v12960_v9 = vadd.f32 %v12857_v36, %v3067_v16  ;;  %v12976_v39 = vunpack.c.l.b16 %v4297_v20  ;;  %v4615_v36 = vor.u32 %v4614_v62, %v4611_v7  ;;  %v12980_v4 = vpop.f32.mrf.mxu0  ;;  %v10868_v16 = vld [vmem:[%s11997_s17 + $0x78] sm:$0xf]  ;;  %v10869_v20 = vld [vmem:[%s11997_s17 + $0x7c] sm:$0x1] }
 0x2e9   : > { %v4607_v44 = vsel %vm12052_vm13, %v4602_v13, %v4606_v6  ;;  %v4153_v54 = vshrl.u32 %v4048_v14, 16  ;;  %v4150_v51 = vrot.slane %v4148_v53, 5  ;;  %v4162_v34 = vshll.u32 %v4049_v26, 16 }
 0x2ea   : > { %10851 = vmatmul.msk.bf16.gmra.mxu1 %vm1162_vm10, %v10840_v52  ;;  %10875 = vmatmul.msk.bf16.gmra.mxu2 %vm1162_vm10, %v4366_v1  ;;  %v4142_v52 = vshll.u32 %v4046_v28, 16  ;;  %v4449_v60 = vpack.c.b16 %v12976_v39, %v12954_v15  ;;  %v4616_v1 = vrot.slane %v4615_v36, 4  ;;  %v4843_v29 = vunpack.c.l.b16 %v4607_v44 }
 0x2eb   : > { %v4155_v28 = vrot.slane %v4153_v54, 4  ;;  %v4299_v35 = vshrl.u32 %v10866_v22, 16  ;;  %v4158_v30 = vrot.slane %v4156_v63, 5  ;;  %v4164_v14 = vrot.slane %v4162_v34, 5  ;;  %v5014_v54 = vld [vmem:[%s14903_s4 + $0x4] sm:$0xc] }
 0x2ec   : > { %v4144_v5 = vrot.slane %v4142_v52, 5  ;;  %v4621_v25 = vsel %vm12052_vm13, %v4616_v1, %v4620_v21  ;;  %v4302_v36 = vshll.u32 %v10866_v22, 16  ;;  %v4308_v53 = vshll.u32 %v10867_v42, 16 }
 0x2ed   : > { %v2965_v45 = vpop.f32.mrf.mxu2  ;;  %v3050_v32 = vpop.f32.mrf.mxu3  ;;  %v4844_v7 = vunpack.c.l.b16 %v4621_v25  ;;  %v4301_v47 = vrot.slane %v4299_v35, 4  ;;  %v4159_v52 = vor.u32 %v4158_v30, %v4155_v28  ;;  %v4313_v1 = vshrl.u32 %v10868_v16, 16  ;;  %v4531_v28 = vld [vmem:[#allocation2 + $0x34] sm:$0x1] }
 0x2ee   : > { %v2981_v6 = vadd.f32 %v2965_v45, %v12896_v55  ;;  %v3068_v49 = vadd.f32 %v3050_v32, %v2980_v23  ;;  %v4145_v62 = vor.u32 %v4144_v5, %v4141_v8  ;;  %v4530_v55 = vld [vmem:[#allocation2 + $0x30] sm:$0xf]  ;;  %v4304_v23 = vrot.slane %v4302_v36, 5 }
 0x2ef   : > { %v2858_v12 = vpop.f32.mrf.mxu1  ;;  %v4851_v21 = vpack.c.b16 %v4844_v7, %v4843_v29  ;;  %v4316_v8 = vshll.u32 %v10868_v16, 16  ;;  %v4160_v22 = vrot.slane %v4159_v52, 4  ;;  %v4322_v29 = vshll.u32 %v10869_v20, 16 }
 0x2f0   : > { %v12994_v13 = vadd.f32 %v2858_v12, %v12811_v24  ;;  %v12997_v26 = vadd.f32 %v12882_v57, %v3068_v49  ;;  %v4146_v44 = vrot.slane %v4145_v62, 4  ;;  %v13006_v57 = vpop.f32.mrf.mxu0  ;;  %v4623_v45 = vshrl.u32 %v4530_v55, 16 }
 0x2f1   : > { %10886 = vmatmul.msk.bf16.gmra.mxu0 %vm1162_vm10, %v4851_v21  ;;  %v4305_v63 = vor.u32 %v4304_v23, %v4301_v47  ;;  %v4310_v61 = vrot.slane %v4308_v53, 5  ;;  %v4315_v31 = vrot.slane %v4313_v1, 4  ;;  %v4165_v34 = vsel %vm12052_vm13, %v4160_v22, %v4164_v14  ;;  %v4532_v47 = vld [vmem:[#allocation2 + $0x38] sm:$0xf]  ;;  %v4050_v23 = vld [vmem:[#allocation3 + $0x40] sm:$0xf] }
 0x2f2   : > { %10880 = vmatmul.msk.bf16.gmra.mxu3 %vm1162_vm10, %v4448_v17  ;;  %v4151_v24 = vsel %vm12052_vm13, %v4146_v44, %v4150_v51  ;;  %v4318_v32 = vrot.slane %v4316_v8, 5  ;;  %v4324_v51 = vrot.slane %v4322_v29, 5  ;;  %v5041_v25 = vunpack.c.l.b16 %v5014_v54 }
 0x2f3   : > { %v13011_v5 = vunpack.c.l.b16 %v4151_v24  ;;  %v13016_v49 = vunpack.c.l.b16 %v4165_v34  ;;  %v4306_v12 = vrot.slane %v4305_v63, 4  ;;  %v4625_v7 = vrot.slane %v4623_v45, 4  ;;  %v4052_v63 = vld [vmem:[#allocation3 + $0x48] sm:$0xf] }
 0x2f4   : > { %v4319_v42 = vor.u32 %v4318_v32, %v4315_v31  ;;  %v5042_v20 = vpack.c.b16 %v5041_v25, %v5041_v25  ;;  %v4626_v36 = vshll.u32 %v4530_v55, 16  ;;  %v4632_v52 = vshll.u32 %v4531_v28, 16 }
 0x2f5   : > { %v2967_v17 = vpop.f32.mrf.mxu2  ;;  %v3053_v16 = vpop.f32.mrf.mxu3  ;;  %v4368_v14 = vpack.c.b16 %v13016_v49, %v13011_v5  ;;  %v4311_v44 = vsel %vm12052_vm13, %v4306_v12, %v4310_v61  ;;  %v4637_v24 = vshrl.u32 %v4532_v47, 16  ;;  %v4640_v22 = vshll.u32 %v4532_v47, 16 }
 0x2f6   : > { %v2982_v35 = vadd.f32 %v2967_v17, %v12931_v33  ;;  %v3069_v62 = vadd.f32 %v3053_v16, %v2981_v6  ;;  %v4533_v33 = vld [vmem:[#allocation2 + $0x3c] sm:$0x1]  ;;  %v4320_v6 = vrot.slane %v4319_v42, 4  ;;  %v13028_v1 = vunpack.c.l.b16 %v4311_v44  ;;  %v4053_v42 = vld [vmem:[#allocation3 + $0x4c] sm:$0x1] }
 0x2f7   : > { %v3245_v30 = vpop.f32.mrf.mxu1  ;;  %v5043_v8 = vrot.slane %v5042_v20, 2  ;;  %v4634_v55 = vrot.slane %v4632_v52, 5  ;;  %v4646_v10 = vshll.u32 %v4533_v33, 16  ;;  %v4167_v0 = vshrl.u32 %v4050_v23, 16 }
 0x2f8   : > { %v13019_v21 = vadd.f32 %v3245_v30, %v12845_v46  ;;  %v13026_v53 = vadd.f32 %v12920_v18, %v3069_v62  ;;  %v4628_v46 = vrot.slane %v4626_v36, 5  ;;  %v4051_v18 = vld [vmem:[#allocation3 + $0x44] sm:$0x1]  ;;  %v4325_v29 = vsel %vm12052_vm13, %v4320_v6, %v4324_v51  ;;  %v13041_v45 = vpop.f32.mrf.mxu0  ;;  %v4678_v62 = vld [vmem:[%s11997_s17] sm:$0xf] }
 0x2f9   : > { %v5060_v54 = vsel %vm1178_vm9, %v5043_v8, 0  ;;  %v4639_v56 = vrot.slane %v4637_v24, 4  ;;  %v4648_v31 = vrot.slane %v4646_v10, 5  ;;  %v4169_v17 = vrot.slane %v4167_v0, 4 }
 0x2fa   : > { %10852 = vmatmul.msk.bf16.gmra.mxu1 %vm1162_vm10, %v10844_v43  ;;  %10876 = vmatmul.msk.bf16.gmra.mxu2 %vm1162_vm10, %v4367_v50  ;;  %v13043_v43 = vunpack.c.l.b16 %v4325_v29  ;;  %v4629_v58 = vor.u32 %v4628_v46, %v4625_v7  ;;  %v4642_v50 = vrot.slane %v4640_v22, 5  ;;  %v4170_v34 = vshll.u32 %v4050_v23, 16  ;;  %v4679_v23 = vld [vmem:[%s11997_s17 + $0x4] sm:$0x1] }
 0x2fb   : > { %5069 = vmatpush.bf16.msra.mxu2 %v5060_v54  ;;  %v4176_v32 = vshll.u32 %v4051_v18, 16  ;;  %v4181_v36 = vshrl.u32 %v4052_v63, 16  ;;  %v4190_v18 = vshll.u32 %v4053_v42, 16  ;;  %v4702_v54 = vshll.u32 %v4678_v62, 16 }
 0x2fc   : > { %v4450_v28 = vpack.c.b16 %v13043_v43, %v13028_v1  ;;  %v4630_v16 = vrot.slane %v4629_v58, 4  ;;  %v4643_v12 = vor.u32 %v4642_v50, %v4639_v56  ;;  %v4172_v20 = vrot.slane %v4170_v34, 5 }
 0x2fd   : > { %v2970_v61 = vpop.f32.mrf.mxu2  ;;  %v3055_v51 = vpop.f32.mrf.mxu3  ;;  %v4178_v47 = vrot.slane %v4176_v32, 5  ;;  %v4708_v10 = vshll.u32 %v4679_v23, 16  ;;  %v4192_v50 = vrot.slane %v4190_v18, 5  ;;  %v10871_v23 = vld [vmem:[%s11997_s17 + $0x8c] sm:$0x1] }
 0x2fe   : > { %v2983_v25 = vadd.f32 %v2970_v61, %v12957_v37  ;;  %v3070_v30 = vadd.f32 %v3055_v51, %v2982_v35  ;;  %v4635_v33 = vsel %vm12052_vm13, %v4630_v16, %v4634_v55  ;;  %v4644_v52 = vrot.slane %v4643_v12, 4  ;;  %v10873_v18 = vld [vmem:[%s11997_s17 + $0x9c] sm:$0x1] }
 0x2ff   : > { %v3247_v7 = vpop.f32.mrf.mxu1  ;;  %v4184_v37 = vshll.u32 %v4052_v63, 16  ;;  %v4845_v8 = vunpack.c.l.b16 %v4635_v33  ;;  %v4173_v46 = vor.u32 %v4172_v20, %v4169_v17  ;;  %v4183_v35 = vrot.slane %v4181_v36, 4  ;;  %v4680_v63 = vld [vmem:[%s11997_s17 + $0x10] sm:$0xf] }
 0x300   : > { %v13050_v44 = vadd.f32 %v3247_v7, %v12872_v38  ;;  %v13056_v6 = vadd.f32 %v12945_v3, %v3070_v30  ;;  %v4649_v24 = vsel %vm12052_vm13, %v4644_v52, %v4648_v31  ;;  %v4699_v38 = vshrl.u32 %v4678_v62, 16  ;;  %v5106_v3 = vld [vmem:[%s14904_s5 + $0x4] sm:$0xc]  ;;  %v13067_v0 = vpop.f32.mrf.mxu0 }
 0x301   : > { %v4186_v22 = vrot.slane %v4184_v37, 5  ;;  %v4846_v55 = vunpack.c.l.b16 %v4649_v24  ;;  %v4174_v29 = vrot.slane %v4173_v46, 4  ;;  %v5133_v58 = vunpack.c.l.b16 %v5106_v3  ;;  %v10872_v24 = vld [vmem:[%s11997_s17 + $0x98] sm:$0xf] }
 0x302   : > { %10881 = vmatmul.msk.bf16.gmra.mxu3 %vm1162_vm10, %v4449_v60  ;;  %v4701_v61 = vrot.slane %v4699_v38, 4  ;;  %v4681_v60 = vld [vmem:[%s11997_s17 + $0x14] sm:$0x1]  ;;  %v4704_v17 = vrot.slane %v4702_v54, 5  ;;  %v4710_v34 = vrot.slane %v4708_v10, 5  ;;  %v4713_v20 = vshrl.u32 %v4680_v63, 16 }
 0x303   : > { %v4187_v56 = vor.u32 %v4186_v22, %v4183_v35  ;;  %v4852_v15 = vpack.c.b16 %v4846_v55, %v4845_v8  ;;  %v4179_v39 = vsel %vm12052_vm13, %v4174_v29, %v4178_v47  ;;  %v5134_v16 = vpack.c.b16 %v5133_v58, %v5133_v58  ;;  %v10870_v47 = vld [vmem:[%s11997_s17 + $0x88] sm:$0xf]  ;;  %v4534_v58 = vld [vmem:[#allocation2 + $0x40] sm:$0xf] }
 0x304   : > { %v13074_v62 = vunpack.c.l.b16 %v4179_v39  ;;  %v4705_v42 = vor.u32 %v4704_v17, %v4701_v61  ;;  %v4716_v36 = vshll.u32 %v4680_v63, 16  ;;  %v4722_v37 = vshll.u32 %v4681_v60, 16 }
 0x305   : > { %v2972_v31 = vpop.f32.mrf.mxu2  ;;  %v3058_v32 = vpop.f32.mrf.mxu3  ;;  %v4188_v12 = vrot.slane %v4187_v56, 4  ;;  %10887 = vmatmul.msk.bf16.gmra.mxu0 %vm1162_vm10, %v4852_v15  ;;  %v5135_v52 = vrot.slane %v5134_v16, 2  ;;  %v4715_v35 = vrot.slane %v4713_v20, 4  ;;  %v4327_v38 = vshrl.u32 %v10870_v47, 16 }
 0x306   : > { %v2984_v51 = vadd.f32 %v2972_v31, %v12994_v13  ;;  %v3071_v30 = vadd.f32 %v3058_v32, %v2983_v25  ;;  %v4706_v46 = vrot.slane %v4705_v42, 4  ;;  %v4718_v22 = vrot.slane %v4716_v36, 5  ;;  %v4536_v42 = vld [vmem:[#allocation2 + $0x48] sm:$0xf] }
 0x307   : > { %v3250_v7 = vpop.f32.mrf.mxu1  ;;  %v4193_v13 = vsel %vm12052_vm13, %v4188_v12, %v4192_v50  ;;  %v4330_v5 = vshll.u32 %v10870_v47, 16  ;;  %v4336_v49 = vshll.u32 %v10871_v23, 16  ;;  %v5550_v54 = vsel %vm1178_vm9, %v5518_v59, 0  ;;  %v13138_v59 = vld [vmem:[%s14905_s6] ss:$0 sm:$0xff] }
 0x308   : > { %v13079_v33 = vadd.f32 %v3250_v7, %v12900_v41  ;;  %v13085_v25 = vadd.f32 %v12980_v4, %v3071_v30  ;;  %v13087_v8 = vunpack.c.l.b16 %v4193_v13  ;;  %v5152_v41 = vsel %vm1178_vm9, %v5135_v52, 0  ;;  %5559 = vmatpush.bf16.msrb.mxu0 %v5550_v54  ;;  %v4535_v7 = vld [vmem:[#allocation2 + $0x44] sm:$0x1] }
 0x309   : > { %v4724_v4 = vrot.slane %v4722_v37, 5  ;;  %5161 = vmatpush.bf16.msra.mxu3 %v5152_v41  ;;  %v4711_v2 = vsel %vm12052_vm13, %v4706_v46, %v4710_v34  ;;  %v4719_v55 = vor.u32 %v4718_v22, %v4715_v35  ;;  %v4329_v50 = vrot.slane %v4327_v38, 4  ;;  %v4683_v54 = vld [vmem:[%s11997_s17 + $0x24] sm:$0x1] }
 0x30a   : > { %10853 = vmatmul.msk.bf16.gmra.mxu1 %vm1162_vm10, %v10848_v40  ;;  %10877 = vmatmul.msk.bf16.gmra.mxu2 %vm1162_vm10, %v4368_v14  ;;  %v4369_v3 = vpack.c.b16 %v13087_v8, %v13074_v62  ;;  %v5596_v40 = vld [vmem:[%s14904_s5 + $0x8] sm:$0x3]  ;;  %v13110_v14 = vpop.f32.mrf.mxu0  ;;  %v13112_v29 = vunpack.c.l.b16 %v4711_v2  ;;  %v4332_v63 = vrot.slane %v4330_v5, 5  ;;  %v4338_v61 = vrot.slane %v4336_v49, 5 }
 0x30b   : > { %v5628_v10 = vsel %vm1178_vm9, %v5596_v40, 0  ;;  %v4341_v31 = vshrl.u32 %v10872_v24, 16  ;;  %v4720_v60 = vrot.slane %v4719_v55, 4  ;;  %v4344_v17 = vshll.u32 %v10872_v24, 16 }
 0x30c   : > { %5637 = vmatpush.bf16.msrb.mxu1 %v5628_v10  ;;  %v4350_v34 = vshll.u32 %v10873_v18, 16  ;;  %v4333_v12 = vor.u32 %v4332_v63, %v4329_v50  ;;  %v4651_v20 = vshrl.u32 %v4534_v58, 16  ;;  %v4654_v24 = vshll.u32 %v4534_v58, 16  ;;  %v4682_v18 = vld [vmem:[%s11997_s17 + $0x20] sm:$0xf] }
 0x30d   : > { %v3643_v56 = vpop.f32.mrf.mxu2  ;;  %v3060_v15 = vpop.f32.mrf.mxu3  ;;  %v4343_v30 = vrot.slane %v4341_v31, 4  ;;  %v4725_v47 = vsel %vm12052_vm13, %v4720_v60, %v4724_v4  ;;  %v4346_v52 = vrot.slane %v4344_v17, 5  ;;  %v4660_v41 = vshll.u32 %v4535_v7, 16  ;;  %v13150_v60 = vld [vmem:[%s14906_s7] ss:$0 sm:$0xff] }
 0x30e   : > { %v3668_v39 = vadd.f32 %v3643_v56, %v13019_v21  ;;  %v3072_v32 = vadd.f32 %v3060_v15, %v2984_v51  ;;  %v4352_v13 = vrot.slane %v4350_v34, 5  ;;  %v4537_v21 = vld [vmem:[#allocation2 + $0x4c] sm:$0x1]  ;;  %v4918_v51 = vunpack.c.l.b16 %v4725_v47 }
 0x30f   : > { %v3252_v16 = vpop.f32.mrf.mxu1  ;;  %v4334_v23 = vrot.slane %v4333_v12, 4  ;;  %v4653_v46 = vrot.slane %v4651_v20, 4  ;;  %v4347_v35 = vor.u32 %v4346_v52, %v4343_v30  ;;  %v4665_v22 = vshrl.u32 %v4536_v42, 16 }
 0x310   : > { %v13118_v36 = vadd.f32 %v3252_v16, %v12936_v27  ;;  %v13123_v37 = vadd.f32 %v13006_v57, %v3072_v32  ;;  %v4927_v27 = vpack.c.b16 %v4918_v51, %v13112_v29  ;;  %v4668_v4 = vshll.u32 %v4536_v42, 16  ;;  %v4685_v16 = vld [vmem:[%s11997_s17 + $0x34] sm:$0x1]  ;;  %v5198_v51 = vld [vmem:[#allocation3 + $0x8] sm:$0xf] }
 0x311   : > { %v4339_v57 = vsel %vm12052_vm13, %v4334_v23, %v4338_v61  ;;  %v4674_v38 = vshll.u32 %v4537_v21, 16  ;;  %v4348_v40 = vrot.slane %v4347_v35, 4  ;;  %v4656_v43 = vrot.slane %v4654_v24, 5  ;;  %v4684_v61 = vld [vmem:[%s11997_s17 + $0x30] sm:$0xf] }
 0x312   : > { %10882 = vmatmul.msk.bf16.gmra.mxu3 %vm1162_vm10, %v4450_v28  ;;  %v13133_v2 = vpop.f32.mrf.mxu0  ;;  %v13140_v1 = vunpack.c.l.b16 %v4339_v57  ;;  %v4662_v28 = vrot.slane %v4660_v41, 5  ;;  %v4667_v49 = vrot.slane %v4665_v22, 4  ;;  %v4670_v55 = vrot.slane %v4668_v4, 5  ;;  %v13163_v21 = vld [vmem:[#allocation2 + $0xc] sm:$0xf0] }
 0x313   : > { %v4676_v29 = vrot.slane %v4674_v38, 5  ;;  %v4727_v10 = vshrl.u32 %v4682_v18, 16  ;;  %v4353_v50 = vsel %vm12052_vm13, %v4348_v40, %v4352_v13  ;;  %v4657_v63 = vor.u32 %v4656_v43, %v4653_v46  ;;  %v13173_v24 = vld [vmem:[%s11997_s17 + $0x10] sm:$0xf]  ;;  %v13176_v41 = vld [vmem:[%s11997_s17 + $0x1c] sm:$0xf0] }
 0x314   : > { %v4730_v31 = vshll.u32 %v4682_v18, 16  ;;  %v13152_v34 = vunpack.c.l.b16 %v4353_v50  ;;  %v4671_v32 = vor.u32 %v4670_v55, %v4667_v49  ;;  %v4736_v42 = vshll.u32 %v4683_v54, 16  ;;  %v13181_v18 = vld [vmem:[%s14907_s8] ss:$0 sm:$0xff]  ;;  %v5199_v50 = vld [vmem:[#allocation3 + $0xc] sm:$0x1] }
 0x315   : > { %v3645_v5 = vpop.f32.mrf.mxu2  ;;  %v3721_v58 = vpop.f32.mrf.mxu3  ;;  %v4729_v12 = vrot.slane %v4727_v10, 4  ;;  %v4658_v30 = vrot.slane %v4657_v63, 4  ;;  %v4741_v13 = vshrl.u32 %v4684_v61, 16  ;;  %v4744_v35 = vshll.u32 %v4684_v61, 16  ;;  %v5200_v63 = vld [vmem:[#allocation3 + $0x10] sm:$0xf] }
 0x316   : > { %v3669_v56 = vadd.f32 %v3645_v5, %v13050_v44  ;;  %v3746_v15 = vadd.f32 %v3721_v58, %v3668_v39  ;;  %v4732_v7 = vrot.slane %v4730_v31, 5  ;;  %v13158_v39 = vld [vmem:[#allocation2 + $0x8] sm:$0xf]  ;;  %v4451_v47 = vpack.c.b16 %v13152_v34, %v13140_v1 }
 0x317   : > { %v3255_v17 = vpop.f32.mrf.mxu1  ;;  %v4672_v52 = vrot.slane %v4671_v32, 4  ;;  %v4738_v46 = vrot.slane %v4736_v42, 5  ;;  %v4746_v38 = vrot.slane %v4744_v35, 5  ;;  %v4750_v40 = vshll.u32 %v4685_v16, 16  ;;  %v5201_v32 = vld [vmem:[#allocation3 + $0x14] sm:$0x1] }
 0x318   : > { %v13156_v44 = vadd.f32 %v3255_v17, %v12960_v9  ;;  %v3760_v20 = vadd.f32 %v13138_v59, %v3746_v15  ;;  %v4663_v9 = vsel %vm12052_vm13, %v4658_v30, %v4662_v28  ;;  %v4733_v23 = vor.u32 %v4732_v7, %v4729_v12 }
 0x319   : > { %v4677_v62 = vsel %vm12052_vm13, %v4672_v52, %v4676_v29  ;;  %v4847_v8 = vunpack.c.l.b16 %v4663_v9  ;;  %v10907_v28 = vor.u32 %v13163_v21, %v13158_v39  ;;  %v10932_v5 = vor.u32 %v13176_v41, %v13173_v24 }
 0x31a   : > { %10878 = vmatmul.msk.bf16.gmra.mxu2 %vm1162_vm10, %v4369_v3  ;;  %10889 = vmatmul.msk.bf16.vlgmr.msra.gmra.mxu1 %vm1162_vm10, %v4927_v27  ;;  %v3770_v22 = vmax.f32 %v3760_v20, 0.0  ;;  %v4743_v3 = vrot.slane %v4741_v13, 4  ;;  %v13185_v27 = vpop.f32.mrf.mxu0  ;;  %v4848_v57 = vunpack.c.l.b16 %v4677_v62  ;;  %v4734_v4 = vrot.slane %v4733_v23, 4  ;;  %v4686_v13 = vld [vmem:[%s11997_s17 + $0x40] sm:$0xf] }
 0x31b   : > { %v5219_v49 = vshrl.u32 %v5198_v51, 16  ;;  %v4752_v17 = vrot.slane %v4750_v40, 5  ;;  %v5222_v30 = vshll.u32 %v5198_v51, 16  ;;  %v5228_v20 = vshll.u32 %v5199_v50, 16 }
 0x31c   : > { %v3784_v1 = vmul.f32 %v13150_v60, %v3770_v22  ;;  %v4853_v54 = vpack.c.b16 %v4848_v57, %v4847_v8  ;;  %v4739_v10 = vsel %vm12052_vm13, %v4734_v4, %v4738_v46  ;;  %v4747_v58 = vor.u32 %v4746_v38, %v4743_v3 }
 0x31d   : > { %v3648_v43 = vpop.f32.mrf.mxu2  ;;  %v3723_v55 = vpop.f32.mrf.mxu3  ;;  %v4919_v34 = vunpack.c.l.b16 %v4739_v10  ;;  %v5221_v12 = vrot.slane %v5219_v49, 4  ;;  %v5233_v52 = vshrl.u32 %v5200_v63, 16  ;;  %v5224_v9 = vrot.slane %v5222_v30, 5  ;;  %v4688_v49 = vld [vmem:[%s11997_s17 + $0x50] sm:$0xf] }
 0x31e   : > { %v3670_v29 = vadd.f32 %v3648_v43, %v13079_v33  ;;  %v3798_v61 = vadd.f32 %v13181_v18, %v3784_v1  ;;  %v3747_v31 = vadd.f32 %v3723_v55, %v3669_v56  ;;  %10888 = vmatmul.msk.bf16.gmra.mxu0 %vm1162_vm10, %v4853_v54  ;;  %v4748_v33 = vrot.slane %v4747_v58, 4 }
 0x31f   : > { %v3257_v15 = vpop.f32.mrf.mxu1  ;;  %v5236_v23 = vshll.u32 %v5200_v63, 16  ;;  %v5242_v46 = vshll.u32 %v5201_v32, 16  ;;  %v5230_v22 = vrot.slane %v5228_v20, 5  ;;  %v5235_v62 = vrot.slane %v5233_v52, 4 }
 0x320   : > { %v13197_v16 = vadd.f32 %v3257_v15, %v12997_v26  ;;  %v3808_v7 = vpack.c.bf16 %v3798_v61, %v3798_v61  ;;  %v3761_v42 = vadd.f32 %v13138_v59, %v3747_v31  ;;  %v4753_v56 = vsel %vm12052_vm13, %v4748_v33, %v4752_v17  ;;  %v4687_v26 = vld [vmem:[%s11997_s17 + $0x44] sm:$0x1]  ;;  %v4689_v17 = vld [vmem:[%s11997_s17 + $0x54] sm:$0x1] }
 0x321   : > { %v4920_v51 = vunpack.c.l.b16 %v4753_v56  ;;  %v5225_v3 = vor.u32 %v5224_v9, %v5221_v12  ;;  %v5238_v57 = vrot.slane %v5236_v23, 5  ;;  %v5244_v4 = vrot.slane %v5242_v46, 5  ;;  %v13225_v56 = vld [vmem:[%s11997_s17 + $0x30] sm:$0xf]  ;;  %v13228_v9 = vld [vmem:[%s11997_s17 + $0x3c] sm:$0xf0] }
 0x322   : > { %3818 = vst.msk [vmem:[#allocation4] sm:$0xf] %vm829_vm6, %v3808_v7  ;;  %v3771_v35 = vmax.f32 %v3761_v42, 0.0  ;;  %10883 = vmatmul.msk.bf16.gmra.mxu3 %vm1162_vm10, %v4451_v47  ;;  %v13207_v8 = vpop.f32.mrf.mxu0  ;;  %v4755_v38 = vshrl.u32 %v4686_v13, 16  ;;  %v4758_v55 = vshll.u32 %v4686_v13, 16  ;;  %v4764_v54 = vshll.u32 %v4687_v26, 16 }
 0x323   : > { %v4928_v43 = vpack.c.b16 %v4920_v51, %v4919_v34  ;;  %v5226_v58 = vrot.slane %v5225_v3, 4  ;;  %v5239_v50 = vor.u32 %v5238_v57, %v5235_v62  ;;  %v13219_v7 = vld [vmem:[#allocation2 + $0x18] sm:$0xf]  ;;  %v13221_v42 = vld [vmem:[#allocation2 + $0x1c] sm:$0xf0]  ;;  %v4772_v26 = vshll.u32 %v4688_v49, 16 }
 0x324   : > { %v3785_v40 = vmul.f32 %v13150_v60, %v3771_v35  ;;  %v4757_v63 = vrot.slane %v4755_v38, 4  ;;  %v4760_v32 = vrot.slane %v4758_v55, 5  ;;  %v4766_v33 = vrot.slane %v4764_v54, 5  ;;  %v5204_v55 = vld [vmem:[#allocation3 + $0x20] sm:$0xf] }
 0x325   : > { %v3650_v1 = vpop.f32.mrf.mxu2  ;;  %v3726_v10 = vpop.f32.mrf.mxu3  ;;  %v5231_v12 = vsel %vm12052_vm13, %v5226_v58, %v5230_v22  ;;  %v5240_v30 = vrot.slane %v5239_v50, 4  ;;  %v4778_v35 = vshll.u32 %v4689_v17, 16  ;;  %v10911_v3 = vor.u32 %v13221_v42, %v13219_v7 }
 0x326   : > { %v3671_v47 = vadd.f32 %v3650_v1, %v13118_v36  ;;  %v3799_v61 = vadd.f32 %v13181_v18, %v3785_v40  ;;  %v3748_v31 = vadd.f32 %v3726_v10, %v3670_v29  ;;  %v4769_v36 = vshrl.u32 %v4688_v49, 16 }
 0x327   : > { %v3260_v15 = vpop.f32.mrf.mxu1  ;;  %v5519_v52 = vunpack.c.l.b16 %v5231_v12  ;;  %v4761_v13 = vor.u32 %v4760_v32, %v4757_v63  ;;  %v5245_v23 = vsel %vm12052_vm13, %v5240_v30, %v5244_v4  ;;  %v4774_v38 = vrot.slane %v4772_v26, 5  ;;  %v5205_v32 = vld [vmem:[#allocation3 + $0x24] sm:$0x1] }
 0x328   : > { %v13215_v34 = vadd.f32 %v3260_v15, %v13026_v53  ;;  %v3809_v20 = vpack.c.bf16 %v3799_v61, %v3799_v61  ;;  %v3762_v29 = vadd.f32 %v13138_v59, %v3748_v31  ;;  %v5202_v53 = vld [vmem:[#allocation3 + $0x18] sm:$0xf]  ;;  %v4771_v46 = vrot.slane %v4769_v36, 4 }
 0x329   : > { %v5520_v22 = vunpack.c.l.b16 %v5245_v23  ;;  %v4762_v62 = vrot.slane %v4761_v13, 4  ;;  %v4780_v39 = vrot.slane %v4778_v35, 5  ;;  %v10936_v21 = vor.u32 %v13228_v9, %v13225_v56 }
 0x32a   : > { %10890 = vmatmul.msk.bf16.gmra.mxu1 %vm1162_vm10, %v4928_v43  ;;  %10924 = vmatmul.msk.bf16.vlgmr.msra.gmra.mxu2 %vm1162_vm10, %v10907_v28  ;;  %3819 = vst.msk [vmem:[#allocation4 + $0x8] sm:$0xf] %vm829_vm6, %v3809_v20  ;;  %v3772_v51 = vmax.f32 %v3762_v29, 0.0  ;;  %v13240_v57 = vpop.f32.mrf.mxu0  ;;  %v5203_v28 = vld [vmem:[#allocation3 + $0x1c] sm:$0x1]  ;;  %v5247_v4 = vshrl.u32 %v5202_v53, 16  ;;  %v4775_v50 = vor.u32 %v4774_v38, %v4771_v46 }
 0x32b   : > { %v5529_v43 = vpack.c.b16 %v5520_v22, %v5519_v52  ;;  %v4767_v49 = vsel %vm12052_vm13, %v4762_v62, %v4766_v33  ;;  %v5250_v54 = vshll.u32 %v5202_v53, 16  ;;  %v5256_v30 = vshll.u32 %v5203_v28, 16  ;;  %v4690_v29 = vld [vmem:[%s11997_s17 + $0x60] sm:$0xf] }
 0x32c   : > { %v3786_v40 = vmul.f32 %v13150_v60, %v3772_v51  ;;  %v13248_v63 = vunpack.c.l.b16 %v4767_v49  ;;  %v5249_v61 = vrot.slane %v5247_v4, 4  ;;  %v4776_v36 = vrot.slane %v4775_v50, 4 }
 0x32d   : > { %v3653_v1 = vpop.f32.mrf.mxu2  ;;  %v3728_v10 = vpop.f32.mrf.mxu3  ;;  %v5252_v12 = vrot.slane %v5250_v54, 5  ;;  %v5261_v20 = vshrl.u32 %v5204_v55, 16  ;;  %v5258_v23 = vrot.slane %v5256_v30, 5  ;;  %v4783_v38 = vshrl.u32 %v4690_v29, 16 }
 0x32e   : > { %v3672_v58 = vadd.f32 %v3653_v1, %v13156_v44  ;;  %v3800_v31 = vadd.f32 %v13181_v18, %v3786_v40  ;;  %v3749_v15 = vadd.f32 %v3728_v10, %v3671_v47  ;;  %10974 = vmatmul.msk.bf16.vlgmr.msrb.gmra.mxu0 %vm1162_vm10, %v5529_v43  ;;  %v5264_v44 = vshll.u32 %v5204_v55, 16  ;;  %v4691_v47 = vld [vmem:[%s11997_s17 + $0x64] sm:$0x1] }
 0x32f   : > { %v3262_v17 = vpop.f32.mrf.mxu1  ;;  %v5253_v53 = vor.u32 %v5252_v12, %v5249_v61  ;;  %v4781_v46 = vsel %vm12052_vm13, %v4776_v36, %v4780_v39  ;;  %v5263_v26 = vrot.slane %v5261_v20, 4  ;;  %v4692_v39 = vld [vmem:[%s11997_s17 + $0x70] sm:$0xf]  ;;  %v4786_v1 = vshll.u32 %v4690_v29, 16 }
 0x330   : > { %v13252_v33 = vadd.f32 %v3262_v17, %v13056_v6  ;;  %v3810_v52 = vpack.c.bf16 %v3800_v31, %v3800_v31  ;;  %v3763_v13 = vadd.f32 %v13138_v59, %v3749_v15  ;;  %v5266_v35 = vrot.slane %v5264_v44, 5  ;;  %v4693_v31 = vld [vmem:[%s11997_s17 + $0x74] sm:$0x1]  ;;  %v13274_v17 = vld [vmem:[#allocation2 + $0x28] sm:$0xf] }
 0x331   : > { %v5270_v6 = vshll.u32 %v5205_v32, 16  ;;  %v4922_v22 = vunpack.c.l.b16 %v4781_v46  ;;  %v5254_v62 = vrot.slane %v5253_v53, 4  ;;  %v4792_v43 = vshll.u32 %v4691_v47, 16  ;;  %v13277_v20 = vld [vmem:[#allocation2 + $0x2c] sm:$0xf0] }
 0x332   : > { %3820 = vst.msk [vmem:[#allocation4 + $0x10] sm:$0xf] %vm829_vm6, %v3810_v52  ;;  %v3773_v51 = vmax.f32 %v3763_v13, 0.0  ;;  %10949 = vmatmul.msk.bf16.vlgmr.msra.gmra.mxu3 %vm1162_vm10, %v10932_v5  ;;  %v13265_v28 = vpop.f32.mrf.mxu0  ;;  %v5267_v4 = vor.u32 %v5266_v35, %v5263_v26  ;;  %v4785_v41 = vrot.slane %v4783_v38, 4  ;;  %v4788_v15 = vrot.slane %v4786_v1, 5 }
 0x333   : > { %v5272_v40 = vrot.slane %v5270_v6, 5  ;;  %v4929_v54 = vpack.c.b16 %v4922_v22, %v13248_v63  ;;  %v5259_v24 = vsel %vm12052_vm13, %v5254_v62, %v5258_v23  ;;  %v4794_v63 = vrot.slane %v4792_v43, 5  ;;  %v5206_v44 = vld [vmem:[#allocation3 + $0x28] sm:$0xf]  ;;  %v13285_v53 = vld [vmem:[%s11997_s17 + $0x50] sm:$0xf] }
 0x334   : > { %v3787_v49 = vmul.f32 %v13150_v60, %v3773_v51  ;;  %v5268_v50 = vrot.slane %v5267_v4, 4  ;;  %v5521_v61 = vunpack.c.l.b16 %v5259_v24  ;;  %v4797_v36 = vshrl.u32 %v4692_v39, 16  ;;  %v13288_v23 = vld [vmem:[%s11997_s17 + $0x5c] sm:$0xf0]  ;;  %v5207_v22 = vld [vmem:[#allocation3 + $0x2c] sm:$0x1] }
 0x335   : > { %v3655_v55 = vpop.f32.mrf.mxu2  ;;  %v3731_v5 = vpop.f32.mrf.mxu3  ;;  %v4789_v52 = vor.u32 %v4788_v15, %v4785_v41  ;;  %v4800_v13 = vshll.u32 %v4692_v39, 16  ;;  %v4806_v6 = vshll.u32 %v4693_v31, 16  ;;  %v10915_v51 = vor.u32 %v13277_v20, %v13274_v17  ;;  %v5208_v39 = vld [vmem:[#allocation3 + $0x30] sm:$0xf]  ;;  %v5994_v20 = vld [vmem:[%s14903_s4 + $0x8] sm:$0xc] }
 0x336   : > { %v3673_v10 = vadd.f32 %v3655_v55, %v13197_v16  ;;  %v3801_v32 = vadd.f32 %v13181_v18, %v3787_v49  ;;  %v3750_v12 = vadd.f32 %v3731_v5, %v3672_v58  ;;  %v5273_v16 = vsel %vm12052_vm13, %v5268_v50, %v5272_v40 }
 0x337   : > { %v3265_v30 = vpop.f32.mrf.mxu1  ;;  %v5522_v46 = vunpack.c.l.b16 %v5273_v16  ;;  %v4799_v26 = vrot.slane %v4797_v36, 4  ;;  %v4802_v35 = vrot.slane %v4800_v13, 5  ;;  %v10940_v4 = vor.u32 %v13288_v23, %v13285_v53  ;;  %v4694_v16 = vld [vmem:[%s11997_s17 + $0x80] sm:$0xf] }
 0x338   : > { %v13280_v29 = vadd.f32 %v3265_v30, %v13085_v25  ;;  %v3811_v47 = vpack.c.bf16 %v3801_v32, %v3801_v32  ;;  %v3764_v58 = vadd.f32 %v13138_v59, %v3750_v12  ;;  %v4790_v25 = vrot.slane %v4789_v52, 4 }
 0x339   : > { %v5530_v38 = vpack.c.b16 %v5522_v46, %v5521_v61  ;;  %v5275_v7 = vshrl.u32 %v5206_v44, 16  ;;  %v4808_v1 = vrot.slane %v4806_v6, 5  ;;  %v5278_v43 = vshll.u32 %v5206_v44, 16 }
 0x33a   : > { %10891 = vmatmul.msk.bf16.gmra.mxu1 %vm1162_vm10, %v4929_v54  ;;  %10925 = vmatmul.msk.bf16.gmra.mxu2 %vm1162_vm10, %v10911_v3  ;;  %3821 = vst.msk [vmem:[#allocation4 + $0x18] sm:$0xf] %vm829_vm6, %v3811_v47  ;;  %v3774_v62 = vmax.f32 %v3764_v58, 0.0  ;;  %v13301_v40 = vpop.f32.mrf.mxu0  ;;  %v4795_v42 = vsel %vm12052_vm13, %v4790_v25, %v4794_v63  ;;  %v4803_v3 = vor.u32 %v4802_v35, %v4799_v26  ;;  %v5284_v41 = vshll.u32 %v5207_v22, 16  ;;  %v5209_v63 = vld [vmem:[#allocation3 + $0x34] sm:$0x1] }
 0x33b   : > { %v13306_v54 = vunpack.c.l.b16 %v4795_v42  ;;  %v5277_v24 = vrot.slane %v5275_v7, 4  ;;  %v5280_v31 = vrot.slane %v5278_v43, 5  ;;  %v5289_v15 = vshrl.u32 %v5208_v39, 16  ;;  %v4695_v58 = vld [vmem:[%s11997_s17 + $0x84] sm:$0x1] }
 0x33c   : > { %v3788_v49 = vmul.f32 %v13150_v60, %v3774_v62  ;;  %v4804_v61 = vrot.slane %v4803_v3, 4  ;;  %v5286_v36 = vrot.slane %v5284_v41, 5  ;;  %v5292_v44 = vshll.u32 %v5208_v39, 16  ;;  %v4696_v7 = vld [vmem:[%s11997_s17 + $0x90] sm:$0xf] }
 0x33d   : > { %v3658_v55 = vpop.f32.mrf.mxu2  ;;  %v3733_v5 = vpop.f32.mrf.mxu3  ;;  %v5281_v13 = vor.u32 %v5280_v31, %v5277_v24  ;;  %v5291_v47 = vrot.slane %v5289_v15, 4  ;;  %v5298_v6 = vshll.u32 %v5209_v63, 16  ;;  %v4811_v22 = vshrl.u32 %v4694_v16, 16 }
 0x33e   : > { %v3674_v50 = vadd.f32 %v3658_v55, %v13215_v34  ;;  %v3802_v32 = vadd.f32 %v13181_v18, %v3788_v49  ;;  %v3751_v12 = vadd.f32 %v3733_v5, %v3673_v10  ;;  %10975 = vmatmul.msk.bf16.gmra.mxu0 %vm1162_vm10, %v5530_v38  ;;  %v4809_v34 = vsel %vm12052_vm13, %v4804_v61, %v4808_v1  ;;  %v4697_v49 = vld [vmem:[%s11997_s17 + $0x94] sm:$0x1] }
 0x33f   : > { %v3267_v30 = vpop.f32.mrf.mxu1  ;;  %v4924_v26 = vunpack.c.l.b16 %v4809_v34  ;;  %v5294_v25 = vrot.slane %v5292_v44, 5  ;;  %v5282_v35 = vrot.slane %v5281_v13, 4  ;;  %v4820_v42 = vshll.u32 %v4695_v58, 16  ;;  %v13340_v34 = vld [vmem:[#allocation2 + $0x3c] sm:$0xf0] }
 0x340   : > { %v13312_v52 = vadd.f32 %v3267_v30, %v13123_v37  ;;  %v3812_v46 = vpack.c.bf16 %v3802_v32, %v3802_v32  ;;  %v3765_v10 = vadd.f32 %v13138_v59, %v3751_v12  ;;  %v4814_v37 = vshll.u32 %v4694_v16, 16  ;;  %v13335_v12 = vld [vmem:[#allocation2 + $0x38] sm:$0xf] }
 0x341   : > { %v4930_v38 = vpack.c.b16 %v4924_v26, %v13306_v54  ;;  %v5295_v39 = vor.u32 %v5294_v25, %v5291_v47  ;;  %v5287_v1 = vsel %vm12052_vm13, %v5282_v35, %v5286_v36  ;;  %v5300_v43 = vrot.slane %v5298_v6, 5  ;;  %v5210_v13 = vld [vmem:[#allocation3 + $0x38] sm:$0xf]  ;;  %v13349_v26 = vld [vmem:[%s11997_s17 + $0x7c] sm:$0xf0] }
 0x342   : > { %3822 = vst.msk [vmem:[#allocation4 + $0x20] sm:$0xf] %vm829_vm6, %v3812_v46  ;;  %v3775_v62 = vmax.f32 %v3765_v10, 0.0  ;;  %10950 = vmatmul.msk.bf16.gmra.mxu3 %vm1162_vm10, %v10936_v21  ;;  %v13326_v3 = vpop.f32.mrf.mxu0  ;;  %v4813_v55 = vrot.slane %v4811_v22, 4  ;;  %v4816_v24 = vrot.slane %v4814_v37, 5  ;;  %v13332_v9 = vunpack.c.l.b16 %v5287_v1 }
 0x343   : > { %v5296_v56 = vrot.slane %v5295_v39, 4  ;;  %v4822_v21 = vrot.slane %v4820_v42, 5  ;;  %v4825_v15 = vshrl.u32 %v4696_v7, 16  ;;  %v4828_v32 = vshll.u32 %v4696_v7, 16  ;;  %v13346_v10 = vld [vmem:[%s11997_s17 + $0x70] sm:$0xf] }
 0x344   : > { %v3789_v41 = vmul.f32 %v13150_v60, %v3775_v62  ;;  %v4817_v31 = vor.u32 %v4816_v24, %v4813_v55  ;;  %v4834_v16 = vshll.u32 %v4697_v49, 16  ;;  %v5211_v22 = vld [vmem:[#allocation3 + $0x3c] sm:$0x1]  ;;  %v10919_v62 = vor.u32 %v13340_v34, %v13335_v12  ;;  %v5212_v39 = vld [vmem:[#allocation3 + $0x40] sm:$0xf] }
 0x345   : > { %v3660_v5 = vpop.f32.mrf.mxu2  ;;  %v3736_v54 = vpop.f32.mrf.mxu3  ;;  %v5301_v44 = vsel %vm12052_vm13, %v5296_v56, %v5300_v43  ;;  %v4827_v46 = vrot.slane %v4825_v15, 4  ;;  %v4830_v35 = vrot.slane %v4828_v32, 5  ;;  %v5303_v7 = vshrl.u32 %v5210_v13, 16  ;;  %v6076_v43 = vld [vmem:[%s14904_s5 + $0x8] sm:$0xc] }
 0x346   : > { %v3675_v61 = vadd.f32 %v3660_v5, %v13252_v33  ;;  %v3803_v30 = vadd.f32 %v13181_v18, %v3789_v41  ;;  %v3752_v63 = vadd.f32 %v3736_v54, %v3674_v50  ;;  %v5524_v47 = vunpack.c.l.b16 %v5301_v44 }
 0x347   : > { %v4009_v36 = vpop.f32.mrf.mxu1  ;;  %v4818_v58 = vrot.slane %v4817_v31, 4  ;;  %v4836_v6 = vrot.slane %v4834_v16, 5  ;;  %v4831_v1 = vor.u32 %v4830_v35, %v4827_v46  ;;  %v10944_v17 = vor.u32 %v13349_v26, %v13346_v10  ;;  %v13384_v35 = vld [vmem:[#allocation2 + $0x48] sm:$0xf] }
 0x348   : > { %v13343_v33 = vadd.f32 %v4009_v36, %v13041_v45  ;;  %v3813_v25 = vpack.c.bf16 %v3803_v30, %v3803_v30  ;;  %v3766_v50 = vadd.f32 %v13138_v59, %v3752_v63  ;;  %v5531_v45 = vpack.c.b16 %v5524_v47, %v13332_v9 }
 0x349   : > { %v4823_v37 = vsel %vm12052_vm13, %v4818_v58, %v4822_v21  ;;  %v5305_v49 = vrot.slane %v5303_v7, 4  ;;  %v5306_v55 = vshll.u32 %v5210_v13, 16  ;;  %v5312_v24 = vshll.u32 %v5211_v22, 16  ;;  %v5213_v58 = vld [vmem:[#allocation3 + $0x44] sm:$0x1] }
 0x34a   : > { %10892 = vmatmul.msk.bf16.gmra.mxu1 %vm1162_vm10, %v4930_v38  ;;  %10926 = vmatmul.msk.bf16.gmra.mxu2 %vm1162_vm10, %v10915_v51  ;;  %3823 = vst.msk [vmem:[#allocation4 + $0x28] sm:$0xf] %vm829_vm6, %v3813_v25  ;;  %v3776_v42 = vmax.f32 %v3766_v50, 0.0  ;;  %v13363_v38 = vunpack.c.l.b16 %v4823_v37  ;;  %v6011_v51 = vunpack.c.l.b16 %v5994_v20  ;;  %v4832_v56 = vrot.slane %v4831_v1, 4  ;;  %v13374_v21 = vpop.f32.mrf.mxu0  ;;  %v13386_v22 = vld [vmem:[#allocation2 + $0x4c] sm:$0xf0] }
 0x34b   : > { %v6093_v9 = vunpack.c.l.b16 %v6076_v43  ;;  %v5317_v54 = vshrl.u32 %v5212_v39, 16  ;;  %v5308_v30 = vrot.slane %v5306_v55, 5  ;;  %v5314_v63 = vrot.slane %v5312_v24, 5 }
 0x34c   : > { %v3790_v41 = vmul.f32 %v13150_v60, %v3776_v42  ;;  %v6012_v32 = vpack.c.b16 %v6011_v51, %v6011_v51  ;;  %v4837_v13 = vsel %vm12052_vm13, %v4832_v56, %v4836_v6  ;;  %v10954_v42 = vld [vmem:[%s11997_s17 + $0x18] sm:$0xf]  ;;  %v10955_v51 = vld [vmem:[%s11997_s17 + $0x1c] sm:$0x1]  ;;  %v5326_v55 = vshll.u32 %v5213_v58, 16 }
 0x34d   : > { %v3663_v5 = vpop.f32.mrf.mxu2  ;;  %v3738_v31 = vpop.f32.mrf.mxu3  ;;  %v6094_v47 = vpack.c.b16 %v6093_v9, %v6093_v9  ;;  %v5309_v50 = vor.u32 %v5308_v30, %v5305_v49  ;;  %v5319_v6 = vrot.slane %v5317_v54, 4  ;;  %v5382_v56 = vshll.u32 %v10954_v42, 16 }
 0x34e   : > { %v3676_v15 = vadd.f32 %v3663_v5, %v13280_v29  ;;  %v3804_v36 = vadd.f32 %v13181_v18, %v3790_v41  ;;  %v3753_v44 = vadd.f32 %v3738_v31, %v3675_v61  ;;  %10976 = vmatmul.msk.bf16.gmra.mxu0 %vm1162_vm10, %v5531_v45  ;;  %v4926_v29 = vunpack.c.l.b16 %v4837_v13  ;;  %v10956_v41 = vld [vmem:[%s11997_s17 + $0x28] sm:$0xf] }
 0x34f   : > { %v4011_v16 = vpop.f32.mrf.mxu1  ;;  %v6013_v25 = vrot.slane %v6012_v32, 2  ;;  %v6095_v7 = vrot.slane %v6094_v47, 2  ;;  %v5310_v20 = vrot.slane %v5309_v50, 4  ;;  %v5320_v45 = vshll.u32 %v5212_v39, 16 }
 0x350   : > { %v13381_v46 = vadd.f32 %v4011_v16, %v13067_v0  ;;  %v3814_v61 = vpack.c.bf16 %v3804_v36, %v3804_v36  ;;  %v3767_v37 = vadd.f32 %v13138_v59, %v3753_v44  ;;  %v4931_v0 = vpack.c.b16 %v4926_v29, %v13363_v38  ;;  %v10957_v36 = vld [vmem:[%s11997_s17 + $0x2c] sm:$0x1] }
 0x351   : > { %v6030_v1 = vsel %vm1178_vm9, %v6013_v25, 0  ;;  %v6112_v49 = vsel %vm1178_vm9, %v6095_v7, 0  ;;  %v10923_v38 = vor.u32 %v13386_v22, %v13384_v35  ;;  %v5315_v39 = vsel %vm12052_vm13, %v5310_v20, %v5314_v63  ;;  %v6178_v25 = vld [vmem:[%s14903_s4 + $0xc] sm:$0x3]  ;;  %v10984_v35 = vld [vmem:[%s11997_s17 + $0x10] sm:$0xf] }
 0x352   : > { %3824 = vst.msk [vmem:[#allocation4 + $0x30] sm:$0xf] %vm829_vm6, %v3814_v61  ;;  %v3777_v43 = vmax.f32 %v3767_v37, 0.0  ;;  %10951 = vmatmul.msk.bf16.gmra.mxu3 %vm1162_vm10, %v10940_v4  ;;  %6039 = vmatpush.bf16.msrb.mxu2 %v6030_v1  ;;  %v5322_v24 = vrot.slane %v5320_v45, 5  ;;  %v5379_v5 = vshrl.u32 %v10954_v42, 16  ;;  %v5328_v4 = vrot.slane %v5326_v55, 5  ;;  %v13413_v50 = vpop.f32.mrf.mxu0 }
 0x353   : > { %6121 = vmatpush.bf16.msrb.mxu3 %v6112_v49  ;;  %v13405_v9 = vunpack.c.l.b16 %v5315_v39  ;;  %v5388_v54 = vshll.u32 %v10955_v51, 16  ;;  %v5384_v16 = vrot.slane %v5382_v56, 5  ;;  %v5393_v29 = vshrl.u32 %v10956_v41, 16  ;;  %v13423_v51 = vld [vmem:[%s11997_s17 + $0x90] sm:$0xf] }
 0x354   : > { %v3791_v53 = vmul.f32 %v13150_v60, %v3777_v43  ;;  %v5323_v30 = vor.u32 %v5322_v24, %v5319_v6  ;;  %v5381_v44 = vrot.slane %v5379_v5, 4  ;;  %v5396_v7 = vshll.u32 %v10956_v41, 16  ;;  %v5214_v6 = vld [vmem:[#allocation3 + $0x48] sm:$0xf]  ;;  %v13426_v43 = vld [vmem:[%s11997_s17 + $0x9c] sm:$0xf0] }
 0x355   : > { %v3665_v23 = vpop.f32.mrf.mxu2  ;;  %v3741_v31 = vpop.f32.mrf.mxu3  ;;  %v5390_v58 = vrot.slane %v5388_v54, 5  ;;  %v5395_v20 = vrot.slane %v5393_v29, 4  ;;  %v5402_v45 = vshll.u32 %v10957_v36, 16  ;;  %v6220_v39 = vsel %vm1178_vm9, %v6178_v25, 0  ;;  %v5215_v24 = vld [vmem:[#allocation3 + $0x4c] sm:$0x1] }
 0x356   : > { %v3677_v32 = vadd.f32 %v3665_v23, %v13312_v52  ;;  %v3805_v63 = vadd.f32 %v13181_v18, %v3791_v53  ;;  %v3754_v13 = vadd.f32 %v3741_v31, %v3676_v15  ;;  %v5324_v61 = vrot.slane %v5323_v30, 4  ;;  %v6266_v15 = vld [vmem:[%s14904_s5 + $0xc] sm:$0x3]  ;;  %6229 = vmatpush.bf16.msra.mxu0 %v6220_v39  ;;  %v5216_v53 = vld [vmem:[#allocation3 + $0x50] sm:$0xf] }
 0x357   : > { %v4014_v47 = vpop.f32.mrf.mxu1  ;;  %v5385_v37 = vor.u32 %v5384_v16, %v5381_v44  ;;  %v5398_v55 = vrot.slane %v5396_v7, 5  ;;  %v5404_v56 = vrot.slane %v5402_v45, 5  ;;  %v5331_v23 = vshrl.u32 %v5214_v6, 16 }
 0x358   : > { %v13416_v52 = vadd.f32 %v4014_v47, %v13110_v14  ;;  %v3815_v42 = vpack.c.bf16 %v3805_v63, %v3805_v63  ;;  %v3768_v1 = vadd.f32 %v13138_v59, %v3754_v13  ;;  %v5329_v14 = vsel %vm12052_vm13, %v5324_v61, %v5328_v4  ;;  %v5217_v61 = vld [vmem:[#allocation3 + $0x54] sm:$0x1] }
 0x359   : > { %v5386_v49 = vrot.slane %v5385_v37, 4  ;;  %v5526_v5 = vunpack.c.l.b16 %v5329_v14  ;;  %v5399_v34 = vor.u32 %v5398_v55, %v5395_v20  ;;  %v5334_v36 = vshll.u32 %v5214_v6, 16 }
 0x35a   : > { %10893 = vmatmul.msk.bf16.gmra.mxu1 %vm1162_vm10, %v4931_v0  ;;  %10927 = vmatmul.msk.bf16.gmra.mxu2 %vm1162_vm10, %v10919_v62  ;;  %3825 = vst.msk [vmem:[#allocation4 + $0x38] sm:$0xf] %vm829_vm6, %v3815_v42  ;;  %v3778_v41 = vmax.f32 %v3768_v1, 0.0  ;;  %v6308_v0 = vsel %vm1178_vm9, %v6266_v15, 0  ;;  %v10948_v62 = vor.u32 %v13426_v43, %v13423_v51  ;;  %v5333_v13 = vrot.slane %v5331_v23, 4 }
 0x35b   : > { %v5391_v12 = vsel %vm12052_vm13, %v5386_v49, %v5390_v58  ;;  %6317 = vmatpush.bf16.msra.mxu1 %v6308_v0  ;;  %v5532_v31 = vpack.c.b16 %v5526_v5, %v13405_v9  ;;  %v5400_v63 = vrot.slane %v5399_v34, 4  ;;  %v5340_v47 = vshll.u32 %v5215_v24, 16  ;;  %v10958_v15 = vld [vmem:[%s11997_s17 + $0x38] sm:$0xf]  ;;  %v10959_v49 = vld [vmem:[%s11997_s17 + $0x3c] sm:$0x1] }
 0x35c   : > { %v3792_v4 = vmul.f32 %v13150_v60, %v3778_v41  ;;  %v13444_v30 = vunpack.c.l.b16 %v5391_v12  ;;  %v5336_v37 = vrot.slane %v5334_v36, 5  ;;  %v5345_v7 = vshrl.u32 %v5216_v53, 16  ;;  %v13456_v45 = vpop.f32.mrf.mxu0  ;;  %v10961_v36 = vld [vmem:[%s11997_s17 + $0x4c] sm:$0x1] }
 0x35d   : > { %v4401_v54 = vpop.f32.mrf.mxu2  ;;  %v3743_v44 = vpop.f32.mrf.mxu3  ;;  %v5342_v6 = vrot.slane %v5340_v47, 5  ;;  %v5348_v42 = vshll.u32 %v5216_v53, 16  ;;  %v5354_v24 = vshll.u32 %v5217_v61, 16  ;;  %v5407_v41 = vshrl.u32 %v10958_v15, 16 }
 0x35e   : > { %v4426_v16 = vadd.f32 %v4401_v54, %v13343_v33  ;;  %v3806_v58 = vadd.f32 %v13181_v18, %v3792_v4  ;;  %v3755_v29 = vadd.f32 %v3743_v44, %v3677_v32  ;;  %10977 = vmatmul.msk.bf16.gmra.mxu0 %vm1162_vm10, %v5532_v31  ;;  %v5405_v33 = vsel %vm12052_vm13, %v5400_v63, %v5404_v56 }
 0x35f   : > { %v4016_v25 = vpop.f32.mrf.mxu1  ;;  %v5598_v20 = vunpack.c.l.b16 %v5405_v33  ;;  %v5337_v14 = vor.u32 %v5336_v37, %v5333_v13  ;;  %v5347_v55 = vrot.slane %v5345_v7, 4  ;;  %v5350_v39 = vrot.slane %v5348_v42, 5 }
 0x360   : > { %v13450_v9 = vadd.f32 %v4016_v25, %v13133_v2  ;;  %v3816_v1 = vpack.c.bf16 %v3806_v58, %v3806_v58  ;;  %v3769_v32 = vadd.f32 %v13138_v59, %v3755_v29  ;;  %v10960_v2 = vld [vmem:[%s11997_s17 + $0x48] sm:$0xf]  ;;  %v5410_v0 = vshll.u32 %v10958_v15, 16 }
 0x361   : > { %v5607_v59 = vpack.c.b16 %v5598_v20, %v13444_v30  ;;  %v5338_v56 = vrot.slane %v5337_v14, 4  ;;  %v5351_v12 = vor.u32 %v5350_v39, %v5347_v55  ;;  %v5356_v34 = vrot.slane %v5354_v24, 5  ;;  %v5677_v20 = vld [vmem:[#allocation2 + $0x14] sm:$0x1] }
 0x362   : > { %3826 = vst.msk [vmem:[#allocation4 + $0x40] sm:$0xf] %vm829_vm6, %v3816_v1  ;;  %v3779_v5 = vmax.f32 %v3769_v32, 0.0  ;;  %10952 = vmatmul.msk.bf16.gmra.mxu3 %vm1162_vm10, %v10944_v17  ;;  %v5409_v53 = vrot.slane %v5407_v41, 4  ;;  %v5416_v23 = vshll.u32 %v10959_v49, 16  ;;  %v5412_v44 = vrot.slane %v5410_v0, 5 }
 0x363   : > { %v5343_v31 = vsel %vm12052_vm13, %v5338_v56, %v5342_v6  ;;  %v5421_v63 = vshrl.u32 %v10960_v2, 16  ;;  %v5352_v17 = vrot.slane %v5351_v12, 4  ;;  %v5424_v15 = vshll.u32 %v10960_v2, 16  ;;  %v5675_v6 = vld [vmem:[#allocation2 + $0xc] sm:$0x1] }
 0x364   : > { %v3793_v4 = vmul.f32 %v13150_v60, %v3779_v5  ;;  %v5527_v30 = vunpack.c.l.b16 %v5343_v31  ;;  %v5418_v13 = vrot.slane %v5416_v23, 5  ;;  %v5413_v25 = vor.u32 %v5412_v44, %v5409_v53  ;;  %v5674_v60 = vld [vmem:[#allocation2 + $0x8] sm:$0xf]  ;;  %v13488_v2 = vpop.f32.mrf.mxu0  ;;  %v10986_v31 = vld [vmem:[%s11997_s17 + $0x20] sm:$0xf] }
 0x365   : > { %v4403_v54 = vpop.f32.mrf.mxu2  ;;  %v4483_v10 = vpop.f32.mrf.mxu3  ;;  %v5423_v61 = vrot.slane %v5421_v63, 4  ;;  %v5357_v7 = vsel %vm12052_vm13, %v5352_v17, %v5356_v34  ;;  %v5430_v33 = vshll.u32 %v10961_v36, 16  ;;  %v5695_v14 = vshrl.u32 %v5674_v60, 16 }
 0x366   : > { %v4427_v26 = vadd.f32 %v4403_v54, %v13381_v46  ;;  %v3807_v47 = vadd.f32 %v13181_v18, %v3793_v4  ;;  %v4508_v58 = vadd.f32 %v4483_v10, %v4426_v16  ;;  %v5676_v46 = vld [vmem:[#allocation2 + $0x10] sm:$0xf]  ;;  %v5528_v18 = vunpack.c.l.b16 %v5357_v7 }
 0x367   : > { %v4019_v29 = vpop.f32.mrf.mxu1  ;;  %v5414_v16 = vrot.slane %v5413_v25, 4  ;;  %v5432_v32 = vrot.slane %v5430_v33, 5  ;;  %v5698_v49 = vshll.u32 %v5674_v60, 16  ;;  %v5704_v39 = vshll.u32 %v5675_v6, 16  ;;  %v10962_v33 = vld [vmem:[%s11997_s17 + $0x58] sm:$0xf] }
 0x368   : > { %v13473_v37 = vadd.f32 %v4019_v29, %v13185_v27  ;;  %v3817_v42 = vpack.c.bf16 %v3807_v47, %v3807_v47  ;;  %v13478_v1 = vadd.f32 %v13374_v21, %v4508_v58  ;;  %v5426_v27 = vrot.slane %v5424_v15, 5  ;;  %v10987_v29 = vld [vmem:[%s11997_s17 + $0x24] sm:$0x1]  ;;  %v13506_v15 = vld [vmem:[#allocation2 + $0x10] sm:$0xf] }
 0x369   : > { %v5533_v55 = vpack.c.b16 %v5528_v18, %v5527_v30  ;;  %v5419_v21 = vsel %vm12052_vm13, %v5414_v16, %v5418_v13  ;;  %v5709_v24 = vshrl.u32 %v5676_v46, 16  ;;  %v5697_v41 = vrot.slane %v5695_v14, 4  ;;  %v10985_v30 = vld [vmem:[%s11997_s17 + $0x14] sm:$0x1]  ;;  %v13511_v18 = vld [vmem:[#allocation2 + $0x14] sm:$0xf0] }
 0x36a   : > { %10928 = vmatmul.msk.bf16.gmra.mxu2 %vm1162_vm10, %v10923_v38  ;;  %10979 = vmatmul.msk.bf16.vlgmr.msrb.gmra.mxu1 %vm1162_vm10, %v5607_v59  ;;  %3827 = vst.msk [vmem:[#allocation4 + $0x48] sm:$0xf] %vm829_vm6, %v3817_v42  ;;  %v5427_v22 = vor.u32 %v5426_v27, %v5423_v61  ;;  %v13491_v38 = vunpack.c.l.b16 %v5419_v21  ;;  %v5700_v5 = vrot.slane %v5698_v49, 5  ;;  %v5706_v56 = vrot.slane %v5704_v39, 5 }
 0x36b   : > { %v5711_v0 = vrot.slane %v5709_v24, 4  ;;  %v5712_v12 = vshll.u32 %v5676_v46, 16  ;;  %v5718_v34 = vshll.u32 %v5677_v20, 16  ;;  %v5855_v36 = vshrl.u32 %v10984_v35, 16 }
 0x36c   : > { %v5428_v4 = vrot.slane %v5427_v22, 4  ;;  %v5701_v54 = vor.u32 %v5700_v5, %v5697_v41  ;;  %v5858_v13 = vshll.u32 %v10984_v35, 16  ;;  %v5864_v6 = vshll.u32 %v10985_v30, 16 }
 0x36d   : > { %v4406_v59 = vpop.f32.mrf.mxu2  ;;  %v4485_v53 = vpop.f32.mrf.mxu3  ;;  %v5714_v10 = vrot.slane %v5712_v12, 5  ;;  %v5720_v17 = vrot.slane %v5718_v34, 5  ;;  %v5857_v25 = vrot.slane %v5855_v36, 4  ;;  %v5869_v46 = vshrl.u32 %v10986_v31, 16 }
 0x36e   : > { %v4428_v23 = vadd.f32 %v4406_v59, %v13416_v52  ;;  %v4509_v44 = vadd.f32 %v4485_v53, %v4427_v26  ;;  %10978 = vmatmul.msk.bf16.gmra.mxu0 %vm1162_vm10, %v5533_v55  ;;  %v5433_v58 = vsel %vm12052_vm13, %v5428_v4, %v5432_v32  ;;  %v5702_v52 = vrot.slane %v5701_v54, 4  ;;  %v13520_v51 = vpop.f32.mrf.mxu0  ;;  %v10963_v59 = vld [vmem:[%s11997_s17 + $0x5c] sm:$0x1]  ;;  %v10965_v53 = vld [vmem:[%s11997_s17 + $0x6c] sm:$0x1] }
 0x36f   : > { %v4021_v63 = vpop.f32.mrf.mxu1  ;;  %v5600_v26 = vunpack.c.l.b16 %v5433_v58  ;;  %v5715_v60 = vor.u32 %v5714_v10, %v5711_v0  ;;  %v5860_v7 = vrot.slane %v5858_v13, 5  ;;  %v5872_v42 = vshll.u32 %v10986_v31, 16  ;;  %v5678_v31 = vld [vmem:[#allocation2 + $0x18] sm:$0xf]  ;;  %v5680_v13 = vld [vmem:[#allocation2 + $0x20] sm:$0xf] }
 0x370   : > { %v13497_v47 = vadd.f32 %v4021_v63, %v13207_v8  ;;  %v13504_v61 = vadd.f32 %v13413_v50, %v4509_v44  ;;  %v5707_v8 = vsel %vm12052_vm13, %v5702_v52, %v5706_v56  ;;  %v5866_v20 = vrot.slane %v5864_v6, 5  ;;  %v10964_v56 = vld [vmem:[%s11997_s17 + $0x68] sm:$0xf] }
 0x371   : > { %v5608_v50 = vpack.c.b16 %v5600_v26, %v13491_v38  ;;  %v5716_v16 = vrot.slane %v5715_v60, 4  ;;  %v5995_v27 = vunpack.c.l.b16 %v5707_v8  ;;  %v5861_v32 = vor.u32 %v5860_v7, %v5857_v25 }
 0x372   : > { %10953 = vmatmul.msk.bf16.gmra.mxu3 %vm1162_vm10, %v10948_v62  ;;  %v5871_v14 = vrot.slane %v5869_v46, 4  ;;  %v5874_v49 = vrot.slane %v5872_v42, 5  ;;  %v5878_v55 = vshll.u32 %v10987_v29, 16  ;;  %v11027_v43 = vor.u32 %v13511_v18, %v13506_v15  ;;  %v5679_v29 = vld [vmem:[#allocation2 + $0x1c] sm:$0x1] }
 0x373   : > { %v5721_v39 = vsel %vm12052_vm13, %v5716_v16, %v5720_v17  ;;  %v5862_v24 = vrot.slane %v5861_v32, 4  ;;  %v5435_v62 = vshrl.u32 %v10962_v33, 16  ;;  %v5438_v54 = vshll.u32 %v10962_v33, 16 }
 0x374   : > { %v5996_v38 = vunpack.c.l.b16 %v5721_v39  ;;  %v5875_v41 = vor.u32 %v5874_v49, %v5871_v14  ;;  %v5880_v5 = vrot.slane %v5878_v55, 5  ;;  %v5444_v30 = vshll.u32 %v10963_v59, 16  ;;  %v5681_v14 = vld [vmem:[#allocation2 + $0x24] sm:$0x1] }
 0x375   : > { %v4408_v21 = vpop.f32.mrf.mxu2  ;;  %v4488_v35 = vpop.f32.mrf.mxu3  ;;  %v5867_v34 = vsel %vm12052_vm13, %v5862_v24, %v5866_v20  ;;  %v5437_v4 = vrot.slane %v5435_v62, 4  ;;  %v5440_v17 = vrot.slane %v5438_v54, 5  ;;  %v5452_v52 = vshll.u32 %v10964_v56, 16 }
 0x376   : > { %v4429_v22 = vadd.f32 %v4408_v21, %v13450_v9  ;;  %v4510_v0 = vadd.f32 %v4488_v35, %v4428_v23  ;;  %v6005_v44 = vpack.c.b16 %v5996_v38, %v5995_v27  ;;  %v5876_v63 = vrot.slane %v5875_v41, 4  ;;  %v10988_v21 = vld [vmem:[%s11997_s17 + $0x30] sm:$0xf]  ;;  %v13544_v41 = vpop.f32.mrf.mxu0 }
 0x377   : > { %v4024_v12 = vpop.f32.mrf.mxu1  ;;  %v6077_v9 = vunpack.c.l.b16 %v5867_v34  ;;  %v5449_v23 = vshrl.u32 %v10964_v56, 16  ;;  %v5723_v25 = vshrl.u32 %v5678_v31, 16  ;;  %v5441_v60 = vor.u32 %v5440_v17, %v5437_v4  ;;  %v10991_v17 = vld [vmem:[%s11997_s17 + $0x44] sm:$0x1] }
 0x378   : > { %v13531_v36 = vadd.f32 %v4024_v12, %v13240_v57  ;;  %v13534_v10 = vadd.f32 %v13456_v45, %v4510_v0  ;;  %v5881_v58 = vsel %vm12052_vm13, %v5876_v63, %v5880_v5  ;;  %v5458_v57 = vshll.u32 %v10965_v53, 16  ;;  %v10989_v5 = vld [vmem:[%s11997_s17 + $0x34] sm:$0x1]  ;;  %v10990_v53 = vld [vmem:[%s11997_s17 + $0x40] sm:$0xf] }
 0x379   : > { %v6078_v26 = vunpack.c.l.b16 %v5881_v58  ;;  %v5446_v7 = vrot.slane %v5444_v30, 5  ;;  %v5451_v45 = vrot.slane %v5449_v23, 4  ;;  %v5454_v15 = vrot.slane %v5452_v52, 5  ;;  %v13559_v23 = vld [vmem:[#allocation2 + $0x20] sm:$0xf] }
 0x37a   : > { %10980 = vmatmul.msk.bf16.gmra.mxu1 %vm1162_vm10, %v5608_v50  ;;  %11004 = vmatmul.msk.bf16.vlgmr.msrb.gmra.mxu2 %vm1162_vm10, %v6005_v44  ;;  %v5460_v33 = vrot.slane %v5458_v57, 5  ;;  %v5725_v8 = vrot.slane %v5723_v25, 4  ;;  %v5726_v6 = vshll.u32 %v5678_v31, 16  ;;  %v5442_v18 = vrot.slane %v5441_v60, 4  ;;  %v13563_v57 = vld [vmem:[#allocation2 + $0x24] sm:$0xf0] }
 0x37b   : > { %v6087_v42 = vpack.c.b16 %v6078_v26, %v6077_v9  ;;  %v5732_v50 = vshll.u32 %v5679_v29, 16  ;;  %v5737_v16 = vshrl.u32 %v5680_v13, 16  ;;  %v5455_v20 = vor.u32 %v5454_v15, %v5451_v45 }
 0x37c   : > { %v5728_v49 = vrot.slane %v5726_v6, 5  ;;  %v5740_v55 = vshll.u32 %v5680_v13, 16  ;;  %v5447_v62 = vsel %vm12052_vm13, %v5442_v18, %v5446_v7  ;;  %v5746_v34 = vshll.u32 %v5681_v14, 16  ;;  %v10968_v14 = vld [vmem:[%s11997_s17 + $0x88] sm:$0xf] }
 0x37d   : > { %v4411_v46 = vpop.f32.mrf.mxu2  ;;  %v4490_v27 = vpop.f32.mrf.mxu3  ;;  %v5734_v35 = vrot.slane %v5732_v50, 5  ;;  %v5739_v38 = vrot.slane %v5737_v16, 4  ;;  %v5601_v56 = vunpack.c.l.b16 %v5447_v62  ;;  %v5883_v4 = vshrl.u32 %v10988_v21, 16  ;;  %v10969_v62 = vld [vmem:[%s11997_s17 + $0x8c] sm:$0x1] }
 0x37e   : > { %v4430_v32 = vadd.f32 %v4411_v46, %v13473_v37  ;;  %v4511_v39 = vadd.f32 %v4490_v27, %v4429_v22  ;;  %11044 = vmatmul.msk.bf16.vlgmr.msra.gmra.mxu0 %vm1162_vm10, %v11027_v43  ;;  %v5456_v37 = vrot.slane %v5455_v20, 4  ;;  %v5729_v0 = vor.u32 %v5728_v49, %v5725_v8  ;;  %v10966_v46 = vld [vmem:[%s11997_s17 + $0x78] sm:$0xf]  ;;  %v10967_v20 = vld [vmem:[%s11997_s17 + $0x7c] sm:$0x1] }
 0x37f   : > { %v4026_v24 = vpop.f32.mrf.mxu1  ;;  %v5742_v12 = vrot.slane %v5740_v55, 5  ;;  %v5886_v44 = vshll.u32 %v10988_v21, 16  ;;  %v5748_v9 = vrot.slane %v5746_v34, 5  ;;  %v5885_v30 = vrot.slane %v5883_v4, 4 }
 0x380   : > { %v13548_v59 = vadd.f32 %v4026_v24, %v13265_v28  ;;  %v13552_v22 = vadd.f32 %v13488_v2, %v4511_v39  ;;  %v5461_v54 = vsel %vm12052_vm13, %v5456_v37, %v5460_v33  ;;  %v5730_v31 = vrot.slane %v5729_v0, 4  ;;  %v5682_v0 = vld [vmem:[#allocation2 + $0x28] sm:$0xf] }
 0x381   : > { %v5892_v28 = vshll.u32 %v10989_v5, 16  ;;  %v5602_v43 = vunpack.c.l.b16 %v5461_v54  ;;  %v5743_v63 = vor.u32 %v5742_v12, %v5739_v38  ;;  %v5888_v13 = vrot.slane %v5886_v44, 5 }
 0x382   : > { %11009 = vmatmul.msk.bf16.vlgmr.msrb.gmra.mxu3 %vm1162_vm10, %v6087_v42  ;;  %v5735_v2 = vsel %vm12052_vm13, %v5730_v31, %v5734_v35  ;;  %v5897_v52 = vshrl.u32 %v10990_v53, 16  ;;  %v5900_v7 = vshll.u32 %v10990_v53, 16  ;;  %v5906_v6 = vshll.u32 %v10991_v17, 16  ;;  %v13579_v24 = vpop.f32.mrf.mxu0 }
 0x383   : > { %v5894_v58 = vrot.slane %v5892_v28, 5  ;;  %v5609_v25 = vpack.c.b16 %v5602_v43, %v5601_v56  ;;  %v5744_v26 = vrot.slane %v5743_v63, 4  ;;  %v5997_v60 = vunpack.c.l.b16 %v5735_v2 }
 0x384   : > { %v5889_v33 = vor.u32 %v5888_v13, %v5885_v30  ;;  %v5899_v8 = vrot.slane %v5897_v52, 4  ;;  %v5902_v16 = vrot.slane %v5900_v7, 5  ;;  %v11031_v27 = vor.u32 %v13563_v57, %v13559_v23  ;;  %v5684_v57 = vld [vmem:[#allocation2 + $0x30] sm:$0xf] }
 0x385   : > { %v4413_v29 = vpop.f32.mrf.mxu2  ;;  %v4493_v45 = vpop.f32.mrf.mxu3  ;;  %v5749_v50 = vsel %vm12052_vm13, %v5744_v26, %v5748_v9  ;;  %v5908_v21 = vrot.slane %v5906_v6, 5  ;;  %v5463_v35 = vshrl.u32 %v10966_v46, 16  ;;  %v5466_v38 = vshll.u32 %v10966_v46, 16  ;;  %v5683_v9 = vld [vmem:[#allocation2 + $0x2c] sm:$0x1] }
 0x386   : > { %v4431_v15 = vadd.f32 %v4413_v29, %v13497_v47  ;;  %v4512_v42 = vadd.f32 %v4493_v45, %v4430_v32  ;;  %v5998_v47 = vunpack.c.l.b16 %v5749_v50  ;;  %v5890_v55 = vrot.slane %v5889_v33, 4  ;;  %v5685_v6 = vld [vmem:[#allocation2 + $0x34] sm:$0x1]  ;;  %v10992_v46 = vld [vmem:[%s11997_s17 + $0x50] sm:$0xf] }
 0x387   : > { %v4029_v18 = vpop.f32.mrf.mxu1  ;;  %v5903_v32 = vor.u32 %v5902_v16, %v5899_v8  ;;  %v5477_v56 = vshrl.u32 %v10968_v14, 16  ;;  %v5465_v53 = vrot.slane %v5463_v35, 4  ;;  %v5480_v31 = vshll.u32 %v10968_v14, 16  ;;  %v10993_v16 = vld [vmem:[%s11997_s17 + $0x54] sm:$0x1] }
 0x388   : > { %v13574_v49 = vadd.f32 %v4029_v18, %v13301_v40  ;;  %v13577_v39 = vadd.f32 %v13520_v51, %v4512_v42  ;;  %v6006_v5 = vpack.c.b16 %v5998_v47, %v5997_v60  ;;  %v5895_v37 = vsel %vm12052_vm13, %v5890_v55, %v5894_v58 }
 0x389   : > { %v5472_v40 = vshll.u32 %v10967_v20, 16  ;;  %v5904_v12 = vrot.slane %v5903_v32, 4  ;;  %v6079_v34 = vunpack.c.l.b16 %v5895_v37  ;;  %v5468_v51 = vrot.slane %v5466_v38, 5  ;;  %v10994_v38 = vld [vmem:[%s11997_s17 + $0x60] sm:$0xf] }
 0x38a   : > { %10981 = vmatmul.msk.bf16.gmra.mxu1 %vm1162_vm10, %v5609_v25  ;;  %11005 = vmatmul.msk.bf16.gmra.mxu2 %vm1162_vm10, %v6006_v5  ;;  %v5479_v54 = vrot.slane %v5477_v56, 4  ;;  %v5486_v44 = vshll.u32 %v10969_v62, 16  ;;  %v5751_v17 = vshrl.u32 %v5682_v0, 16  ;;  %v5754_v30 = vshll.u32 %v5682_v0, 16  ;;  %v13601_v32 = vpop.f32.mrf.mxu0 }
 0x38b   : > { %v5474_v4 = vrot.slane %v5472_v40, 5  ;;  %v5909_v43 = vsel %vm12052_vm13, %v5904_v12, %v5908_v21  ;;  %v5469_v63 = vor.u32 %v5468_v51, %v5465_v53  ;;  %v5482_v58 = vrot.slane %v5480_v31, 5 }
 0x38c   : > { %v6080_v13 = vunpack.c.l.b16 %v5909_v43  ;;  %v5488_v52 = vrot.slane %v5486_v44, 5  ;;  %v5753_v60 = vrot.slane %v5751_v17, 4  ;;  %v5756_v7 = vrot.slane %v5754_v30, 5  ;;  %v11463_v43 = vld [vmem:[#allocation2 + $0x34] sm:$0xf0] }
 0x38d   : > { %v4416_v28 = vpop.f32.mrf.mxu2  ;;  %v4495_v23 = vpop.f32.mrf.mxu3  ;;  %v5470_v26 = vrot.slane %v5469_v63, 4  ;;  %v5483_v8 = vor.u32 %v5482_v58, %v5479_v54  ;;  %v5765_v50 = vshrl.u32 %v5684_v57, 16  ;;  %v5768_v47 = vshll.u32 %v5684_v57, 16 }
 0x38e   : > { %v4432_v2 = vadd.f32 %v4416_v28, %v13531_v36  ;;  %v4513_v29 = vadd.f32 %v4495_v23, %v4431_v15  ;;  %v6088_v33 = vpack.c.b16 %v6080_v13, %v6079_v34  ;;  %11045 = vmatmul.msk.bf16.gmra.mxu0 %vm1162_vm10, %v11031_v27  ;;  %v5760_v36 = vshll.u32 %v5683_v9, 16  ;;  %v10995_v34 = vld [vmem:[%s11997_s17 + $0x64] sm:$0x1]  ;;  %v11034_v28 = vld [vmem:[#allocation2 + $0x30] sm:$0xf] }
 0x38f   : > { %v4031_v25 = vpop.f32.mrf.mxu1  ;;  %v5475_v15 = vsel %vm12052_vm13, %v5470_v26, %v5474_v4  ;;  %v5757_v18 = vor.u32 %v5756_v7, %v5753_v60  ;;  %v5484_v20 = vrot.slane %v5483_v8, 4  ;;  %v5767_v55 = vrot.slane %v5765_v50, 4  ;;  %v10970_v13 = vld [vmem:[%s11997_s17 + $0x98] sm:$0xf] }
 0x390   : > { %v13590_v45 = vadd.f32 %v4031_v25, %v13326_v3  ;;  %v13595_v42 = vadd.f32 %v13544_v41, %v4513_v29  ;;  %v5603_v3 = vunpack.c.l.b16 %v5475_v15  ;;  %v5762_v14 = vrot.slane %v5760_v36, 5 }
 0x391   : > { %v5758_v27 = vrot.slane %v5757_v18, 4  ;;  %v5774_v21 = vshll.u32 %v5685_v6, 16  ;;  %v5911_v41 = vshrl.u32 %v10992_v46, 16  ;;  %v5489_v62 = vsel %vm12052_vm13, %v5484_v20, %v5488_v52 }
 0x392   : > { %11010 = vmatmul.msk.bf16.gmra.mxu3 %vm1162_vm10, %v6088_v33  ;;  %v5770_v35 = vrot.slane %v5768_v47, 5  ;;  %v5914_v5 = vshll.u32 %v10992_v46, 16  ;;  %v5920_v37 = vshll.u32 %v10993_v16, 16  ;;  %v5604_v56 = vunpack.c.l.b16 %v5489_v62  ;;  %v10973_v16 = vld [vmem:[%s11997_s17 + $0xac] sm:$0x1] }
 0x393   : > { %v5763_v0 = vsel %vm12052_vm13, %v5758_v27, %v5762_v14  ;;  %v5776_v12 = vrot.slane %v5774_v21, 5  ;;  %v5913_v53 = vrot.slane %v5911_v41, 4  ;;  %v5925_v23 = vshrl.u32 %v10994_v38, 16  ;;  %v5686_v14 = vld [vmem:[#allocation2 + $0x38] sm:$0xf] }
 0x394   : > { %v5771_v54 = vor.u32 %v5770_v35, %v5767_v55  ;;  %v5999_v31 = vunpack.c.l.b16 %v5763_v0  ;;  %v5916_v44 = vrot.slane %v5914_v5, 5  ;;  %v5610_v17 = vpack.c.b16 %v5604_v56, %v5603_v3 }
 0x395   : > { %v4418_v40 = vpop.f32.mrf.mxu2  ;;  %v4498_v51 = vpop.f32.mrf.mxu3  ;;  %v5922_v30 = vrot.slane %v5920_v37, 5  ;;  %v5928_v29 = vshll.u32 %v10994_v38, 16  ;;  %v5927_v26 = vrot.slane %v5925_v23, 4  ;;  %v5934_v60 = vshll.u32 %v10995_v34, 16 }
 0x396   : > { %v4433_v4 = vadd.f32 %v4418_v40, %v13548_v59  ;;  %v4514_v63 = vadd.f32 %v4498_v51, %v4432_v2  ;;  %v5772_v52 = vrot.slane %v5771_v54, 4  ;;  %v5917_v57 = vor.u32 %v5916_v44, %v5913_v53  ;;  %v10971_v59 = vld [vmem:[%s11997_s17 + $0x9c] sm:$0x1]  ;;  %v10972_v2 = vld [vmem:[%s11997_s17 + $0xa8] sm:$0xf] }
 0x397   : > { %v4959_v9 = vpop.f32.mrf.mxu1  ;;  %v11035_v7 = vor.u32 %v11463_v43, %v11034_v28  ;;  %v5491_v6 = vshrl.u32 %v10970_v13, 16  ;;  %v5936_v46 = vrot.slane %v5934_v60, 5  ;;  %v5494_v15 = vshll.u32 %v10970_v13, 16  ;;  %v5687_v53 = vld [vmem:[#allocation2 + $0x3c] sm:$0x1] }
 0x398   : > { %v13612_v58 = vadd.f32 %v4959_v9, %v13478_v1  ;;  %v13616_v25 = vadd.f32 %v13579_v24, %v4514_v63  ;;  %v5777_v33 = vsel %vm12052_vm13, %v5772_v52, %v5776_v12  ;;  %v5918_v8 = vrot.slane %v5917_v57, 4  ;;  %v5688_v44 = vld [vmem:[#allocation2 + $0x40] sm:$0xf]  ;;  %v10996_v52 = vld [vmem:[%s11997_s17 + $0x70] sm:$0xf] }
 0x399   : > { %v5930_v1 = vrot.slane %v5928_v29, 5  ;;  %v6000_v36 = vunpack.c.l.b16 %v5777_v33  ;;  %v5500_v18 = vshll.u32 %v10971_v59, 16  ;;  %v5493_v20 = vrot.slane %v5491_v6, 4 }
 0x39a   : > { %10982 = vmatmul.msk.bf16.gmra.mxu1 %vm1162_vm10, %v5610_v17  ;;  %v5923_v24 = vsel %vm12052_vm13, %v5918_v8, %v5922_v30  ;;  %v5505_v3 = vshrl.u32 %v10972_v2, 16  ;;  %v5496_v41 = vrot.slane %v5494_v15, 5  ;;  %v5508_v40 = vshll.u32 %v10972_v2, 16  ;;  %v5689_v17 = vld [vmem:[#allocation2 + $0x44] sm:$0x1] }
 0x39b   : > { %v5931_v50 = vor.u32 %v5930_v1, %v5927_v26  ;;  %v6007_v47 = vpack.c.b16 %v6000_v36, %v5999_v31  ;;  %v6081_v55 = vunpack.c.l.b16 %v5923_v24  ;;  %v13625_v21 = vpop.f32.mrf.mxu0  ;;  %v5502_v62 = vrot.slane %v5500_v18, 5 }
 0x39c   : > { %v5507_v37 = vrot.slane %v5505_v3, 4  ;;  %v5497_v12 = vor.u32 %v5496_v41, %v5493_v20  ;;  %v5514_v34 = vshll.u32 %v10973_v16, 16  ;;  %v5779_v51 = vshrl.u32 %v5686_v14, 16  ;;  %v10998_v16 = vld [vmem:[%s11997_s17 + $0x80] sm:$0xf] }
 0x39d   : > { %v4421_v27 = vpop.f32.mrf.mxu2  ;;  %v4500_v35 = vpop.f32.mrf.mxu3  ;;  %v5932_v5 = vrot.slane %v5931_v50, 4  ;;  %11006 = vmatmul.msk.bf16.gmra.mxu2 %vm1162_vm10, %v6007_v47  ;;  %v5782_v28 = vshll.u32 %v5686_v14, 16  ;;  %v5793_v59 = vshrl.u32 %v5688_v44, 16  ;;  %v5796_v26 = vshll.u32 %v5688_v44, 16  ;;  %v10997_v41 = vld [vmem:[%s11997_s17 + $0x74] sm:$0x1] }
 0x39e   : > { %v4434_v38 = vadd.f32 %v4421_v27, %v13574_v49  ;;  %v4515_v56 = vadd.f32 %v4500_v35, %v4433_v4  ;;  %11046 = vmatmul.msk.bf16.gmra.mxu0 %vm1162_vm10, %v11035_v7  ;;  %v5510_v49 = vrot.slane %v5508_v40, 5  ;;  %v5498_v63 = vrot.slane %v5497_v12, 4  ;;  %v6674_v40 = vld [vmem:[%s14903_s4 + $0xc] sm:$0xc] }
 0x39f   : > { %v4961_v0 = vpop.f32.mrf.mxu1  ;;  %v5937_v31 = vsel %vm12052_vm13, %v5932_v5, %v5936_v46  ;;  %v5516_v9 = vrot.slane %v5514_v34, 5  ;;  %v5781_v23 = vrot.slane %v5779_v51, 4  ;;  %v5784_v13 = vrot.slane %v5782_v28, 5 }
 0x3a0   : > { %v13630_v54 = vadd.f32 %v4961_v0, %v13504_v61  ;;  %v13636_v43 = vadd.f32 %v13601_v32, %v4515_v56  ;;  %v6082_v4 = vunpack.c.l.b16 %v5937_v31  ;;  %v5511_v30 = vor.u32 %v5510_v49, %v5507_v37 }
 0x3a1   : > { %v5788_v61 = vshll.u32 %v5687_v53, 16  ;;  %v5503_v29 = vsel %vm12052_vm13, %v5498_v63, %v5502_v62  ;;  %v5785_v32 = vor.u32 %v5784_v13, %v5781_v23  ;;  %v5795_v8 = vrot.slane %v5793_v59, 4  ;;  %v10999_v62 = vld [vmem:[%s11997_s17 + $0x84] sm:$0x1]  ;;  %v11038_v63 = vld [vmem:[#allocation2 + $0x40] sm:$0xf] }
 0x3a2   : > { %v6089_v57 = vpack.c.b16 %v6082_v4, %v6081_v55  ;;  %v5512_v60 = vrot.slane %v5511_v30, 4  ;;  %v5605_v7 = vunpack.c.l.b16 %v5503_v29  ;;  %v5798_v1 = vrot.slane %v5796_v26, 5  ;;  %v5690_v26 = vld [vmem:[#allocation2 + $0x48] sm:$0xf] }
 0x3a3   : > { %v5790_v2 = vrot.slane %v5788_v61, 5  ;;  %v5802_v6 = vshll.u32 %v5689_v17, 16  ;;  %v13642_v36 = vpop.f32.mrf.mxu0  ;;  %v5939_v46 = vshrl.u32 %v10996_v52, 16  ;;  %v5786_v50 = vrot.slane %v5785_v32, 4 }
 0x3a4   : > { %11011 = vmatmul.msk.bf16.gmra.mxu3 %vm1162_vm10, %v6089_v57  ;;  %v5517_v24 = vsel %vm12052_vm13, %v5512_v60, %v5516_v9  ;;  %v5942_v20 = vshll.u32 %v10996_v52, 16  ;;  %v5799_v27 = vor.u32 %v5798_v1, %v5795_v8  ;;  %v5948_v53 = vshll.u32 %v10997_v41, 16  ;;  %v11464_v9 = vld [vmem:[#allocation2 + $0x44] sm:$0xf0]  ;;  %v5691_v8 = vld [vmem:[#allocation2 + $0x4c] sm:$0x1] }
 0x3a5   : > { %v4423_v33 = vpop.f32.mrf.mxu2  ;;  %v4503_v15 = vpop.f32.mrf.mxu3  ;;  %v5606_v47 = vunpack.c.l.b16 %v5517_v24  ;;  %v5804_v55 = vrot.slane %v5802_v6, 5  ;;  %v5791_v5 = vsel %vm12052_vm13, %v5786_v50, %v5790_v2  ;;  %v5953_v51 = vshrl.u32 %v10998_v16, 16  ;;  %v5692_v1 = vld [vmem:[#allocation2 + $0x50] sm:$0xf] }
 0x3a6   : > { %v4435_v18 = vadd.f32 %v4423_v33, %v13590_v45  ;;  %v4516_v3 = vadd.f32 %v4503_v15, %v4434_v38  ;;  %v5941_v45 = vrot.slane %v5939_v46, 4  ;;  %v5944_v37 = vrot.slane %v5942_v20, 5  ;;  %v6756_v38 = vld [vmem:[%s14904_s5 + $0xc] sm:$0xc]  ;;  %v13673_v20 = vld [vmem:[%s11997_s17 + $0x20] sm:$0xf] }
 0x3a7   : > { %v4964_v14 = vpop.f32.mrf.mxu1  ;;  %v5611_v0 = vpack.c.b16 %v5606_v47, %v5605_v7  ;;  %v5800_v12 = vrot.slane %v5799_v27, 4  ;;  %v5956_v31 = vshll.u32 %v10998_v16, 16  ;;  %v5962_v44 = vshll.u32 %v10999_v62, 16  ;;  %v5693_v16 = vld [vmem:[#allocation2 + $0x54] sm:$0x1] }
 0x3a8   : > { %v13651_v35 = vadd.f32 %v4964_v14, %v13534_v10  ;;  %v13662_v56 = vadd.f32 %v13625_v21, %v4516_v3  ;;  %v6001_v10 = vunpack.c.l.b16 %v5791_v5  ;;  %v5945_v34 = vor.u32 %v5944_v37, %v5941_v45  ;;  %v11466_v27 = vld [vmem:[%s11997_s17 + $0x2c] sm:$0xf0] }
 0x3a9   : > { %v5805_v49 = vsel %vm12052_vm13, %v5800_v12, %v5804_v55  ;;  %v6691_v28 = vunpack.c.l.b16 %v6674_v40  ;;  %v6773_v4 = vunpack.c.l.b16 %v6756_v38  ;;  %v5950_v30 = vrot.slane %v5948_v53, 5  ;;  %v7158_v5 = vld [vmem:[%s14903_s4 + $0x10] sm:$0x3] }
 0x3aa   : > { %10983 = vmatmul.msk.bf16.gmra.mxu1 %vm1162_vm10, %v5611_v0  ;;  %v6002_v17 = vunpack.c.l.b16 %v5805_v49  ;;  %v5946_v21 = vrot.slane %v5945_v34, 4  ;;  %v5955_v23 = vrot.slane %v5953_v51, 4  ;;  %v5958_v61 = vrot.slane %v5956_v31, 5  ;;  %v11000_v34 = vld [vmem:[%s11997_s17 + $0x90] sm:$0xf] }
 0x3ab   : > { %v5964_v52 = vrot.slane %v5962_v44, 5  ;;  %v6692_v57 = vpack.c.b16 %v6691_v28, %v6691_v28  ;;  %v6774_v29 = vpack.c.b16 %v6773_v4, %v6773_v4  ;;  %v13667_v59 = vpop.f32.mrf.mxu0  ;;  %v11039_v33 = vor.u32 %v11464_v9, %v11038_v63  ;;  %v11001_v44 = vld [vmem:[%s11997_s17 + $0x94] sm:$0x1] }
 0x3ac   : > { %v6008_v60 = vpack.c.b16 %v6002_v17, %v6001_v10  ;;  %v5951_v2 = vsel %vm12052_vm13, %v5946_v21, %v5950_v30  ;;  %v5959_v15 = vor.u32 %v5958_v61, %v5955_v23  ;;  %v5807_v14 = vshrl.u32 %v5690_v26, 16  ;;  %v11002_v30 = vld [vmem:[%s11997_s17 + $0xa0] sm:$0xf] }
 0x3ad   : > { %v5071_v13 = vpop.f32.mrf.mxu2  ;;  %v4505_v7 = vpop.f32.mrf.mxu3  ;;  %v6083_v24 = vunpack.c.l.b16 %v5951_v2  ;;  %v6693_v50 = vrot.slane %v6692_v57, 2  ;;  %v5810_v47 = vshll.u32 %v5690_v26, 16  ;;  %v5816_v62 = vshll.u32 %v5691_v8, 16 }
 0x3ae   : > { %v5096_v32 = vadd.f32 %v5071_v13, %v13612_v58  ;;  %v4517_v6 = vadd.f32 %v4505_v7, %v4435_v18  ;;  %11007 = vmatmul.msk.bf16.gmra.mxu2 %vm1162_vm10, %v6008_v60  ;;  %v6775_v58 = vrot.slane %v6774_v29, 2  ;;  %11047 = vmatmul.msk.bf16.gmra.mxu0 %vm1162_vm10, %v11039_v33  ;;  %v5960_v55 = vrot.slane %v5959_v15, 4  ;;  %v11003_v7 = vld [vmem:[%s11997_s17 + $0xa4] sm:$0x1]  ;;  %v11465_v15 = vld [vmem:[#allocation2 + $0x54] sm:$0xf0] }
 0x3af   : > { %v4966_v46 = vpop.f32.mrf.mxu1  ;;  %v6710_v41 = vsel %vm1178_vm9, %v6693_v50, 0  ;;  %v5809_v45 = vrot.slane %v5807_v14, 4  ;;  %v5812_v37 = vrot.slane %v5810_v47, 5  ;;  %v5821_v40 = vshrl.u32 %v5692_v1, 16 }
 0x3b0   : > { %v13677_v3 = vadd.f32 %v4966_v46, %v13552_v22  ;;  %v13682_v18 = vadd.f32 %v13642_v36, %v4517_v6  ;;  %6719 = vmatpush.bf16.msra.mxu2 %v6710_v41  ;;  %v6792_v22 = vsel %vm1178_vm9, %v6775_v58, 0  ;;  %v7236_v36 = vld [vmem:[%s14904_s5 + $0x10] sm:$0x3]  ;;  %v5965_v38 = vsel %vm12052_vm13, %v5960_v55, %v5964_v52 }
 0x3b1   : > { %6801 = vmatpush.bf16.msra.mxu3 %v6792_v22  ;;  %v5818_v0 = vrot.slane %v5816_v62, 5  ;;  %v5824_v12 = vshll.u32 %v5692_v1, 16  ;;  %v5830_v10 = vshll.u32 %v5693_v16, 16  ;;  %v6084_v53 = vunpack.c.l.b16 %v5965_v38  ;;  %v11042_v46 = vld [vmem:[#allocation2 + $0x50] sm:$0xf] }
 0x3b2   : > { %v5813_v51 = vor.u32 %v5812_v37, %v5809_v45  ;;  %v5823_v31 = vrot.slane %v5821_v40, 4  ;;  %v11052_v49 = vor.u32 %v11466_v27, %v13673_v20  ;;  %v7190_v9 = vsel %vm1178_vm9, %v7158_v5, 0  ;;  %v6354_v16 = vld [vmem:[#allocation3 + $0x10] sm:$0xf]  ;;  %v6356_v20 = vld [vmem:[#allocation3 + $0x18] sm:$0xf] }
 0x3b3   : > { %v5826_v4 = vrot.slane %v5824_v12, 5  ;;  %v5832_v63 = vrot.slane %v5830_v10, 5  ;;  %v13698_v17 = vpop.f32.mrf.mxu0  ;;  %v7268_v21 = vsel %vm1178_vm9, %v7236_v36, 0  ;;  %v6090_v23 = vpack.c.b16 %v6084_v53, %v6083_v24  ;;  %7199 = vmatpush.bf16.msrb.mxu0 %v7190_v9  ;;  %v6355_v27 = vld [vmem:[#allocation3 + $0x14] sm:$0x1] }
 0x3b4   : > { %v5814_v52 = vrot.slane %v5813_v51, 4  ;;  %7277 = vmatpush.bf16.msrb.mxu1 %v7268_v21  ;;  %v5967_v57 = vshrl.u32 %v11000_v34, 16  ;;  %v5970_v2 = vshll.u32 %v11000_v34, 16  ;;  %v5976_v33 = vshll.u32 %v11001_v44, 16  ;;  %v13720_v40 = vld [vmem:[%s11997_s17 + $0x4c] sm:$0xf0] }
 0x3b5   : > { %v5073_v28 = vpop.f32.mrf.mxu2  ;;  %v5163_v13 = vpop.f32.mrf.mxu3  ;;  %v5827_v60 = vor.u32 %v5826_v4, %v5823_v31  ;;  %11012 = vmatmul.msk.bf16.gmra.mxu3 %vm1162_vm10, %v6090_v23  ;;  %v5990_v47 = vshll.u32 %v11003_v7, 16  ;;  %v11043_v5 = vor.u32 %v11465_v15, %v11042_v46  ;;  %v6375_v36 = vshrl.u32 %v6354_v16, 16 }
 0x3b6   : > { %v5097_v61 = vadd.f32 %v5073_v28, %v13630_v54  ;;  %v5188_v29 = vadd.f32 %v5163_v13, %v5096_v32  ;;  %v5819_v1 = vsel %vm12052_vm13, %v5814_v52, %v5818_v0  ;;  %v5969_v6 = vrot.slane %v5967_v57, 4  ;;  %v6357_v28 = vld [vmem:[#allocation3 + $0x1c] sm:$0x1]  ;;  %v11074_v13 = vld [vmem:[%s11997_s17 + $0x28] sm:$0xf] }
 0x3b7   : > { %v4969_v26 = vpop.f32.mrf.mxu1  ;;  %v5981_v54 = vshrl.u32 %v11002_v30, 16  ;;  %v5828_v24 = vrot.slane %v5827_v60, 4  ;;  %v5972_v50 = vrot.slane %v5970_v2, 5  ;;  %v6003_v58 = vunpack.c.l.b16 %v5819_v1  ;;  %v11075_v52 = vld [vmem:[%s11997_s17 + $0x2c] sm:$0x1] }
 0x3b8   : > { %v13706_v8 = vadd.f32 %v4969_v26, %v13577_v39  ;;  %v13711_v32 = vadd.f32 %v13667_v59, %v5188_v29  ;;  %v5984_v39 = vshll.u32 %v11002_v30, 16  ;;  %v5978_v62 = vrot.slane %v5976_v33, 5  ;;  %v13717_v59 = vld [vmem:[%s11997_s17 + $0x40] sm:$0xf]  ;;  %v11076_v33 = vld [vmem:[%s11997_s17 + $0x38] sm:$0xf] }
 0x3b9   : > { %v5983_v14 = vrot.slane %v5981_v54, 4  ;;  %v5833_v55 = vsel %vm12052_vm13, %v5828_v24, %v5832_v63  ;;  %v5973_v41 = vor.u32 %v5972_v50, %v5969_v6  ;;  %v5992_v37 = vrot.slane %v5990_v47, 5 }
 0x3ba   : > { %11069 = vmatmul.msk.bf16.vlgmr.msra.gmra.mxu1 %vm1162_vm10, %v11052_v49  ;;  %v6004_v22 = vunpack.c.l.b16 %v5833_v55  ;;  %v5986_v45 = vrot.slane %v5984_v39, 5  ;;  %v6378_v10 = vshll.u32 %v6354_v16, 16  ;;  %v6384_v34 = vshll.u32 %v6355_v27, 16  ;;  %v11077_v16 = vld [vmem:[%s11997_s17 + $0x3c] sm:$0x1] }
 0x3bb   : > { %v5974_v0 = vrot.slane %v5973_v41, 4  ;;  %v13722_v12 = vpop.f32.mrf.mxu0  ;;  %v6389_v53 = vshrl.u32 %v6356_v20, 16  ;;  %v6377_v4 = vrot.slane %v6375_v36, 4  ;;  %v11056_v30 = vor.u32 %v13720_v40, %v13717_v59  ;;  %v6838_v59 = vld [vmem:[#allocation2 + $0x10] sm:$0xf] }
 0x3bc   : > { %v6009_v51 = vpack.c.b16 %v6004_v22, %v6003_v58  ;;  %v5987_v44 = vor.u32 %v5986_v45, %v5983_v14  ;;  %v6380_v23 = vrot.slane %v6378_v10, 5  ;;  %v6392_v7 = vshll.u32 %v6356_v20, 16 }
 0x3bd   : > { %v5076_v38 = vpop.f32.mrf.mxu2  ;;  %v5165_v31 = vpop.f32.mrf.mxu3  ;;  %v5979_v21 = vsel %vm12052_vm13, %v5974_v0, %v5978_v62  ;;  %v6391_v60 = vrot.slane %v6389_v53, 4  ;;  %v6398_v2 = vshll.u32 %v6357_v28, 16  ;;  %v6535_v6 = vshrl.u32 %v11074_v13, 16  ;;  %v6839_v28 = vld [vmem:[#allocation2 + $0x14] sm:$0x1] }
 0x3be   : > { %v5098_v49 = vadd.f32 %v5076_v38, %v13651_v35  ;;  %v13725_v63 = vadd.f32 %v5165_v31, %v5097_v61  ;;  %11008 = vmatmul.msk.bf16.gmra.mxu2 %vm1162_vm10, %v6009_v51  ;;  %v5988_v57 = vrot.slane %v5987_v44, 4  ;;  %v6085_v29 = vunpack.c.l.b16 %v5979_v21  ;;  %11048 = vmatmul.msk.bf16.gmra.mxu0 %vm1162_vm10, %v11043_v5  ;;  %v6840_v51 = vld [vmem:[#allocation2 + $0x18] sm:$0xf] }
 0x3bf   : > { %v4971_v9 = vpop.f32.mrf.mxu1  ;;  %v6386_v61 = vrot.slane %v6384_v34, 5  ;;  %v6381_v26 = vor.u32 %v6380_v23, %v6377_v4  ;;  %v6538_v54 = vshll.u32 %v11074_v13, 16  ;;  %v6544_v46 = vshll.u32 %v11075_v52, 16  ;;  %v6841_v13 = vld [vmem:[#allocation2 + $0x1c] sm:$0x1] }
 0x3c0   : > { %v13735_v35 = vadd.f32 %v4971_v9, %v13595_v42  ;;  %v5993_v1 = vsel %vm12052_vm13, %v5988_v57, %v5992_v37  ;;  %v6394_v24 = vrot.slane %v6392_v7, 5  ;;  %v6400_v50 = vrot.slane %v6398_v2, 5 }
 0x3c1   : > { %v6086_v15 = vunpack.c.l.b16 %v5993_v1  ;;  %v6382_v42 = vrot.slane %v6381_v26, 4  ;;  %v6537_v58 = vrot.slane %v6535_v6, 4  ;;  %v6540_v14 = vrot.slane %v6538_v54, 5  ;;  %v6358_v1 = vld [vmem:[#allocation3 + $0x20] sm:$0xf] }
 0x3c2   : > { %v6546_v39 = vrot.slane %v6544_v46, 5  ;;  %v6549_v47 = vshrl.u32 %v11076_v33, 16  ;;  %v6395_v41 = vor.u32 %v6394_v24, %v6391_v60  ;;  %v6552_v5 = vshll.u32 %v11076_v33, 16 }
 0x3c3   : > { %v6091_v27 = vpack.c.b16 %v6086_v15, %v6085_v29  ;;  %v6387_v20 = vsel %vm12052_vm13, %v6382_v42, %v6386_v61  ;;  %v13744_v62 = vpop.f32.mrf.mxu0  ;;  %v6541_v40 = vor.u32 %v6540_v14, %v6537_v58  ;;  %v6558_v53 = vshll.u32 %v11077_v16, 16 }
 0x3c4   : > { %v6675_v37 = vunpack.c.l.b16 %v6387_v20  ;;  %v6551_v36 = vrot.slane %v6549_v47, 4  ;;  %v6396_v10 = vrot.slane %v6395_v41, 4  ;;  %v6554_v34 = vrot.slane %v6552_v5, 5  ;;  %v6359_v41 = vld [vmem:[#allocation3 + $0x24] sm:$0x1] }
 0x3c5   : > { %v5078_v55 = vpop.f32.mrf.mxu2  ;;  %v5168_v22 = vpop.f32.mrf.mxu3  ;;  %11013 = vmatmul.msk.bf16.gmra.mxu3 %vm1162_vm10, %v6091_v27  ;;  %v6542_v44 = vrot.slane %v6541_v40, 4  ;;  %v6859_v4 = vshrl.u32 %v6838_v59, 16  ;;  %v6862_v9 = vshll.u32 %v6838_v59, 16  ;;  %v6560_v23 = vrot.slane %v6558_v53, 5  ;;  %v6360_v5 = vld [vmem:[#allocation3 + $0x28] sm:$0xf] }
 0x3c6   : > { %v5099_v45 = vadd.f32 %v5078_v55, %v13677_v3  ;;  %v5190_v38 = vadd.f32 %v5168_v22, %v5098_v49  ;;  %v6401_v49 = vsel %vm12052_vm13, %v6396_v10, %v6400_v50  ;;  %v6555_v21 = vor.u32 %v6554_v34, %v6551_v36  ;;  %v13764_v50 = vld [vmem:[%s11997_s17 + $0x60] sm:$0xf] }
 0x3c7   : > { %v4974_v0 = vpop.f32.mrf.mxu1  ;;  %v6676_v52 = vunpack.c.l.b16 %v6401_v49  ;;  %v6547_v57 = vsel %vm12052_vm13, %v6542_v44, %v6546_v39  ;;  %v6861_v29 = vrot.slane %v6859_v4, 4  ;;  %v6868_v26 = vshll.u32 %v6839_v28, 16 }
 0x3c8   : > { %v13749_v31 = vadd.f32 %v4974_v0, %v13616_v25  ;;  %v13752_v3 = vadd.f32 %v13722_v12, %v5190_v38  ;;  %v6864_v25 = vrot.slane %v6862_v9, 5  ;;  %v6556_v61 = vrot.slane %v6555_v21, 4  ;;  %v11079_v9 = vld [vmem:[%s11997_s17 + $0x4c] sm:$0x1] }
 0x3c9   : > { %v6873_v12 = vshrl.u32 %v6840_v51, 16  ;;  %v6685_v60 = vpack.c.b16 %v6676_v52, %v6675_v37  ;;  %v6876_v2 = vshll.u32 %v6840_v51, 16  ;;  %v6882_v33 = vshll.u32 %v6841_v13, 16 }
 0x3ca   : > { %11070 = vmatmul.msk.bf16.gmra.mxu1 %vm1162_vm10, %v11056_v30  ;;  %v6865_v7 = vor.u32 %v6864_v25, %v6861_v29  ;;  %v6561_v54 = vsel %vm12052_vm13, %v6556_v61, %v6560_v23  ;;  %v6757_v46 = vunpack.c.l.b16 %v6547_v57  ;;  %v6870_v42 = vrot.slane %v6868_v26, 5  ;;  %v13767_v30 = vld [vmem:[%s11997_s17 + $0x6c] sm:$0xf0]  ;;  %v11080_v29 = vld [vmem:[%s11997_s17 + $0x58] sm:$0xf] }
 0x3cb   : > { %v13761_v15 = vpop.f32.mrf.mxu0  ;;  %v6875_v24 = vrot.slane %v6873_v12, 4  ;;  %v6758_v14 = vunpack.c.l.b16 %v6561_v54  ;;  %v6878_v47 = vrot.slane %v6876_v2, 5  ;;  %v13772_v27 = vadd.f32 %v13698_v17, %v13725_v63  ;;  %v6361_v17 = vld [vmem:[#allocation3 + $0x2c] sm:$0x1]  ;;  %v11078_v63 = vld [vmem:[%s11997_s17 + $0x48] sm:$0xf] }
 0x3cc   : > { %v6866_v39 = vrot.slane %v6865_v7, 4  ;;  %v6403_v59 = vshrl.u32 %v6358_v1, 16  ;;  %v6406_v22 = vshll.u32 %v6358_v1, 16  ;;  %v6884_v40 = vrot.slane %v6882_v33, 5 }
 0x3cd   : > { %v5081_v6 = vpop.f32.mrf.mxu2  ;;  %v5170_v16 = vpop.f32.mrf.mxu3  ;;  %v6879_v37 = vor.u32 %v6878_v47, %v6875_v24  ;;  %v11060_v36 = vor.u32 %v13767_v30, %v13764_v50  ;;  %v6412_v53 = vshll.u32 %v6359_v41, 16  ;;  %v6417_v51 = vshrl.u32 %v6360_v5, 16  ;;  %v11081_v30 = vld [vmem:[%s11997_s17 + $0x5c] sm:$0x1]  ;;  %v6843_v41 = vld [vmem:[#allocation2 + $0x24] sm:$0x1] }
 0x3ce   : > { %v5100_v58 = vadd.f32 %v5081_v6, %v13706_v8  ;;  %v13774_v55 = vadd.f32 %v5170_v16, %v5099_v45  ;;  %11094 = vmatmul.msk.bf16.vlgmr.msra.gmra.mxu2 %vm1162_vm10, %v6685_v60  ;;  %v6871_v8 = vsel %vm12052_vm13, %v6866_v39, %v6870_v42  ;;  %v6767_v45 = vpack.c.b16 %v6758_v14, %v6757_v46  ;;  %v6842_v16 = vld [vmem:[#allocation2 + $0x20] sm:$0xf] }
 0x3cf   : > { %v4976_v20 = vpop.f32.mrf.mxu1  ;;  %v7159_v38 = vunpack.c.l.b16 %v6871_v8  ;;  %v6405_v0 = vrot.slane %v6403_v59, 4  ;;  %v6408_v10 = vrot.slane %v6406_v22, 5  ;;  %v6880_v34 = vrot.slane %v6879_v37, 4  ;;  %v6844_v8 = vld [vmem:[#allocation2 + $0x28] sm:$0xf] }
 0x3d0   : > { %v6420_v44 = vshll.u32 %v6360_v5, 16  ;;  %v6426_v4 = vshll.u32 %v6361_v17, 16  ;;  %v6563_v49 = vshrl.u32 %v11078_v63, 16  ;;  %v6566_v21 = vshll.u32 %v11078_v63, 16 }
 0x3d1   : > { %v6409_v28 = vor.u32 %v6408_v10, %v6405_v0  ;;  %v6885_v23 = vsel %vm12052_vm13, %v6880_v34, %v6884_v40  ;;  %v6414_v13 = vrot.slane %v6412_v53, 5  ;;  %v6419_v52 = vrot.slane %v6417_v51, 4  ;;  %v6845_v34 = vld [vmem:[#allocation2 + $0x2c] sm:$0x1] }
 0x3d2   : > { %v6422_v57 = vrot.slane %v6420_v44, 5  ;;  %v13787_v25 = vadd.f32 %v4976_v20, %v13636_v43  ;;  %v7160_v26 = vunpack.c.l.b16 %v6885_v23  ;;  %v6565_v7 = vrot.slane %v6563_v49, 4 }
 0x3d3   : > { %v6410_v12 = vrot.slane %v6409_v28, 4  ;;  %v13789_v60 = vpop.f32.mrf.mxu0  ;;  %v6428_v1 = vrot.slane %v6426_v4, 5  ;;  %v6568_v6 = vrot.slane %v6566_v21, 5  ;;  %v6572_v54 = vshll.u32 %v11079_v9, 16  ;;  %v6362_v21 = vld [vmem:[#allocation3 + $0x30] sm:$0xf] }
 0x3d4   : > { %v6423_v33 = vor.u32 %v6422_v57, %v6419_v52  ;;  %v7169_v24 = vpack.c.b16 %v7160_v26, %v7159_v38  ;;  %v6577_v43 = vshrl.u32 %v11080_v29, 16  ;;  %v6580_v22 = vshll.u32 %v11080_v29, 16  ;;  %v13816_v57 = vld [vmem:[%s11997_s17 + $0x80] sm:$0xf]  ;;  %v13819_v29 = vld [vmem:[%s11997_s17 + $0x8c] sm:$0xf0] }
 0x3d5   : > { %v5083_v61 = vpop.f32.mrf.mxu2  ;;  %v5173_v2 = vpop.f32.mrf.mxu3  ;;  %v6415_v50 = vsel %vm12052_vm13, %v6410_v12, %v6414_v13  ;;  %11099 = vmatmul.msk.bf16.vlgmr.msra.gmra.mxu3 %vm1162_vm10, %v6767_v45  ;;  %v6569_v20 = vor.u32 %v6568_v6, %v6565_v7  ;;  %v6586_v17 = vshll.u32 %v11081_v30, 16  ;;  %v6890_v38 = vshll.u32 %v6842_v16, 16  ;;  %v6363_v6 = vld [vmem:[#allocation3 + $0x34] sm:$0x1] }
 0x3d6   : > { %v5192_v46 = vadd.f32 %v5173_v2, %v5100_v58  ;;  %v6424_v39 = vrot.slane %v6423_v33, 4  ;;  %v6677_v47 = vunpack.c.l.b16 %v6415_v50  ;;  %11124 = vmatmul.msk.bf16.vlgmr.msrb.gmra.mxu0 %vm1162_vm10, %v7169_v24  ;;  %v6574_v58 = vrot.slane %v6572_v54, 5 }
 0x3d7   : > { %v4979_v42 = vpop.f32.mrf.mxu1  ;;  %v6579_v59 = vrot.slane %v6577_v43, 4  ;;  %v6570_v40 = vrot.slane %v6569_v20, 4  ;;  %v6582_v45 = vrot.slane %v6580_v22, 5  ;;  %v6896_v0 = vshll.u32 %v6843_v41, 16  ;;  %v11082_v22 = vld [vmem:[%s11997_s17 + $0x68] sm:$0xf] }
 0x3d8   : > { %v13796_v14 = vadd.f32 %v4979_v42, %v13662_v56  ;;  %v13799_v5 = vadd.f32 %v13761_v15, %v5192_v46  ;;  %v6429_v37 = vsel %vm12052_vm13, %v6424_v39, %v6428_v1  ;;  %v6887_v56 = vshrl.u32 %v6842_v16, 16  ;;  %v6365_v16 = vld [vmem:[#allocation3 + $0x3c] sm:$0x1] }
 0x3d9   : > { %v6678_v63 = vunpack.c.l.b16 %v6429_v37  ;;  %v13807_v15 = vadd.f32 %v13744_v62, %v13774_v55  ;;  %v6575_v10 = vsel %vm12052_vm13, %v6570_v40, %v6574_v58  ;;  %v6901_v51 = vshrl.u32 %v6844_v8, 16 }
 0x3da   : > { %11071 = vmatmul.msk.bf16.gmra.mxu1 %vm1162_vm10, %v11060_v36  ;;  %v6889_v53 = vrot.slane %v6887_v56, 4  ;;  %v6583_v4 = vor.u32 %v6582_v45, %v6579_v59  ;;  %v6588_v36 = vrot.slane %v6586_v17, 5  ;;  %v6892_v49 = vrot.slane %v6890_v38, 5 }
 0x3db   : > { %v6686_v44 = vpack.c.b16 %v6678_v63, %v6677_v47  ;;  %v13811_v9 = vpop.f32.mrf.mxu0  ;;  %v5101_v23 = vadd.f32 %v5083_v61, %v13735_v35  ;;  %v6903_v13 = vrot.slane %v6901_v51, 4  ;;  %v6904_v52 = vshll.u32 %v6844_v8, 16 }
 0x3dc   : > { %v6584_v12 = vrot.slane %v6583_v4, 4  ;;  %v6893_v7 = vor.u32 %v6892_v49, %v6889_v53  ;;  %v6898_v2 = vrot.slane %v6896_v0, 5  ;;  %v6910_v33 = vshll.u32 %v6845_v34, 16 }
 0x3dd   : > { %v5086_v28 = vpop.f32.mrf.mxu2  ;;  %v5175_v62 = vpop.f32.mrf.mxu3  ;;  %v6759_v35 = vunpack.c.l.b16 %v6575_v10  ;;  %v6906_v61 = vrot.slane %v6904_v52, 5  ;;  %v6431_v54 = vshrl.u32 %v6362_v21, 16  ;;  %v11064_v50 = vor.u32 %v13819_v29, %v13816_v57  ;;  %v11085_v29 = vld [vmem:[%s11997_s17 + $0x7c] sm:$0x1] }
 0x3de   : > { %v5102_v55 = vadd.f32 %v5086_v28, %v13749_v31  ;;  %11095 = vmatmul.msk.bf16.gmra.mxu2 %vm1162_vm10, %v6686_v44  ;;  %v13824_v1 = vadd.f32 %v5175_v62, %v5101_v23  ;;  %v6364_v31 = vld [vmem:[#allocation3 + $0x38] sm:$0xf]  ;;  %v6589_v46 = vsel %vm12052_vm13, %v6584_v12, %v6588_v36  ;;  %v6894_v42 = vrot.slane %v6893_v7, 4  ;;  %v11083_v28 = vld [vmem:[%s11997_s17 + $0x6c] sm:$0x1] }
 0x3df   : > { %v13821_v26 = vpop.f32.mrf.mxu1  ;;  %v6912_v24 = vrot.slane %v6910_v33, 5  ;;  %v6760_v30 = vunpack.c.l.b16 %v6589_v46  ;;  %v6907_v43 = vor.u32 %v6906_v61, %v6903_v13  ;;  %v6433_v39 = vrot.slane %v6431_v54, 4  ;;  %v11084_v13 = vld [vmem:[%s11997_s17 + $0x78] sm:$0xf]  ;;  %v6847_v46 = vld [vmem:[#allocation2 + $0x34] sm:$0x1] }
 0x3e0   : > { %v6434_v47 = vshll.u32 %v6362_v21, 16  ;;  %v6899_v20 = vsel %vm12052_vm13, %v6894_v42, %v6898_v2  ;;  %v6440_v41 = vshll.u32 %v6363_v6, 16  ;;  %v6445_v58 = vshrl.u32 %v6364_v31, 16 }
 0x3e1   : > { %v6448_v59 = vshll.u32 %v6364_v31, 16  ;;  %v6768_v8 = vpack.c.b16 %v6760_v30, %v6759_v35  ;;  %v6908_v37 = vrot.slane %v6907_v43, 4  ;;  %v7161_v40 = vunpack.c.l.b16 %v6899_v20  ;;  %v6846_v35 = vld [vmem:[#allocation2 + $0x30] sm:$0xf] }
 0x3e2   : > { %v6436_v17 = vrot.slane %v6434_v47, 5  ;;  %v6442_v63 = vrot.slane %v6440_v41, 5  ;;  %v6447_v45 = vrot.slane %v6445_v58, 4  ;;  %v6454_v0 = vshll.u32 %v6365_v16, 16  ;;  %v6848_v58 = vld [vmem:[#allocation2 + $0x38] sm:$0xf] }
 0x3e3   : > { %v6450_v38 = vrot.slane %v6448_v59, 5  ;;  %v13833_v10 = vpop.f32.mrf.mxu0  ;;  %v6913_v51 = vsel %vm12052_vm13, %v6908_v37, %v6912_v24  ;;  %v6591_v4 = vshrl.u32 %v11082_v22, 16  ;;  %v6594_v12 = vshll.u32 %v11082_v22, 16 }
 0x3e4   : > { %v6437_v44 = vor.u32 %v6436_v17, %v6433_v39  ;;  %v7162_v21 = vunpack.c.l.b16 %v6913_v51  ;;  %v6456_v62 = vrot.slane %v6454_v0, 5  ;;  %v6605_v31 = vshrl.u32 %v11084_v13, 16 }
 0x3e5   : > { %v5088_v56 = vpop.f32.mrf.mxu2  ;;  %v5178_v34 = vpop.f32.mrf.mxu3  ;;  %v6451_v23 = vor.u32 %v6450_v38, %v6447_v45  ;;  %11100 = vmatmul.msk.bf16.gmra.mxu3 %vm1162_vm10, %v6768_v8  ;;  %v6596_v6 = vrot.slane %v6594_v12, 5  ;;  %v6608_v54 = vshll.u32 %v11084_v13, 16  ;;  %v6614_v24 = vshll.u32 %v11085_v29, 16  ;;  %v6368_v13 = vld [vmem:[#allocation3 + $0x48] sm:$0xf] }
 0x3e6   : > { %v5103_v53 = vadd.f32 %v5088_v56, %v13787_v25  ;;  %v5194_v36 = vadd.f32 %v5178_v34, %v5102_v55  ;;  %v6438_v57 = vrot.slane %v6437_v44, 4  ;;  %v6593_v25 = vrot.slane %v6591_v4, 4  ;;  %v11067_v44 = vld [vmem:[%s11997_s17 + $0xa0] sm:$0xf] }
 0x3e7   : > { %v5639_v49 = vpop.f32.mrf.mxu1  ;;  %v7170_v2 = vpack.c.b16 %v7162_v21, %v7161_v40  ;;  %v6452_v33 = vrot.slane %v6451_v23, 4  ;;  %v6600_v55 = vshll.u32 %v11083_v28, 16  ;;  %v6607_v16 = vrot.slane %v6605_v31, 4  ;;  %v11470_v28 = vld [vmem:[%s11997_s17 + $0xac] sm:$0xf0] }
 0x3e8   : > { %v13842_v52 = vadd.f32 %v5639_v49, %v13711_v32  ;;  %v13846_v7 = vadd.f32 %v13811_v9, %v5194_v36  ;;  %v6443_v61 = vsel %vm12052_vm13, %v6438_v57, %v6442_v63  ;;  %v6597_v43 = vor.u32 %v6596_v6, %v6593_v25  ;;  %v6849_v63 = vld [vmem:[#allocation2 + $0x3c] sm:$0x1]  ;;  %v6366_v21 = vld [vmem:[#allocation3 + $0x40] sm:$0xf] }
 0x3e9   : > { %11125 = vmatmul.msk.bf16.gmra.mxu0 %vm1162_vm10, %v7170_v2  ;;  %v6457_v32 = vsel %vm12052_vm13, %v6452_v33, %v6456_v62  ;;  %v6679_v9 = vunpack.c.l.b16 %v6443_v61  ;;  %v6602_v42 = vrot.slane %v6600_v55, 5  ;;  %v6610_v39 = vrot.slane %v6608_v54, 5  ;;  %v6367_v62 = vld [vmem:[#allocation3 + $0x44] sm:$0x1] }
 0x3ea   : > { %11072 = vmatmul.msk.bf16.gmra.mxu1 %vm1162_vm10, %v11064_v50  ;;  %v6680_v30 = vunpack.c.l.b16 %v6457_v32  ;;  %v6616_v20 = vrot.slane %v6614_v24, 5  ;;  %v6915_v59 = vshrl.u32 %v6846_v35, 16  ;;  %v6918_v22 = vshll.u32 %v6846_v35, 16 }
 0x3eb   : > { %v13854_v41 = vpop.f32.mrf.mxu0  ;;  %v6924_v50 = vshll.u32 %v6847_v46, 16  ;;  %v6598_v17 = vrot.slane %v6597_v43, 4  ;;  %v6611_v56 = vor.u32 %v6610_v39, %v6607_v16  ;;  %v4993_v45 = vadd.f32 %v13821_v26, %v13682_v18  ;;  %v11086_v43 = vld [vmem:[%s11997_s17 + $0x88] sm:$0xf] }
 0x3ec   : > { %v6687_v8 = vpack.c.b16 %v6680_v30, %v6679_v9  ;;  %v6917_v34 = vrot.slane %v6915_v59, 4  ;;  %v6920_v51 = vrot.slane %v6918_v22, 5  ;;  %v6929_v49 = vshrl.u32 %v6848_v58, 16 }
 0x3ed   : > { %v5091_v47 = vpop.f32.mrf.mxu2  ;;  %v5180_v37 = vpop.f32.mrf.mxu3  ;;  %v6603_v4 = vsel %vm12052_vm13, %v6598_v17, %v6602_v42  ;;  %v6612_v36 = vrot.slane %v6611_v56, 4  ;;  %v6938_v25 = vshll.u32 %v6849_v63, 16  ;;  %v11068_v12 = vor.u32 %v11470_v28, %v11067_v44  ;;  %v6369_v42 = vld [vmem:[#allocation3 + $0x4c] sm:$0x1]  ;;  %v11089_v28 = vld [vmem:[%s11997_s17 + $0x9c] sm:$0x1] }
 0x3ee   : > { %v5104_v40 = vadd.f32 %v5091_v47, %v13796_v14  ;;  %v5195_v38 = vadd.f32 %v5180_v37, %v5103_v53  ;;  %11096 = vmatmul.msk.bf16.gmra.mxu2 %vm1162_vm10, %v6687_v8  ;;  %v6926_v14 = vrot.slane %v6924_v50, 5  ;;  %v6761_v18 = vunpack.c.l.b16 %v6603_v4 }
 0x3ef   : > { %v13859_v0 = vpop.f32.mrf.mxu1  ;;  %v6921_v26 = vor.u32 %v6920_v51, %v6917_v34  ;;  %v6932_v53 = vshll.u32 %v6848_v58, 16  ;;  %v6617_v57 = vsel %vm12052_vm13, %v6612_v36, %v6616_v20  ;;  %v6931_v29 = vrot.slane %v6929_v49, 4  ;;  %v11088_v34 = vld [vmem:[%s11997_s17 + $0x98] sm:$0xf] }
 0x3f0   : > { %v13867_v23 = vadd.f32 %v13833_v10, %v5195_v38  ;;  %v6762_v2 = vunpack.c.l.b16 %v6617_v57  ;;  %v6459_v35 = vshrl.u32 %v6366_v21, 16  ;;  %v6940_v61 = vrot.slane %v6938_v25, 5  ;;  %v11087_v38 = vld [vmem:[%s11997_s17 + $0x8c] sm:$0x1] }
 0x3f1   : > { %v6922_v33 = vrot.slane %v6921_v26, 4  ;;  %v6934_v55 = vrot.slane %v6932_v53, 5  ;;  %v6462_v6 = vshll.u32 %v6366_v21, 16  ;;  %v6468_v10 = vshll.u32 %v6367_v62, 16 }
 0x3f2   : > { %v6473_v31 = vshrl.u32 %v6368_v13, 16  ;;  %v6769_v54 = vpack.c.b16 %v6762_v2, %v6761_v18  ;;  %v6461_v24 = vrot.slane %v6459_v35, 4  ;;  %v6476_v37 = vshll.u32 %v6368_v13, 16 }
 0x3f3   : > { %v6927_v32 = vsel %vm12052_vm13, %v6922_v33, %v6926_v14  ;;  %v6935_v9 = vor.u32 %v6934_v55, %v6931_v29  ;;  %v5583_v30 = vpop.f32.mrf.mxu0  ;;  %v6464_v20 = vrot.slane %v6462_v6, 5  ;;  %v6470_v58 = vrot.slane %v6468_v10, 5  ;;  %v6850_v29 = vld [vmem:[#allocation2 + $0x40] sm:$0xf] }
 0x3f4   : > { %v7163_v47 = vunpack.c.l.b16 %v6927_v32  ;;  %v6475_v8 = vrot.slane %v6473_v31, 4  ;;  %v6482_v63 = vshll.u32 %v6369_v42, 16  ;;  %v6619_v51 = vshrl.u32 %v11086_v43, 16 }
 0x3f5   : > { %v5093_v46 = vpop.f32.mrf.mxu2  ;;  %v5183_v16 = vpop.f32.mrf.mxu3  ;;  %v6936_v50 = vrot.slane %v6935_v9, 4  ;;  %11101 = vmatmul.msk.bf16.gmra.mxu3 %vm1162_vm10, %v6769_v54  ;;  %v6465_v56 = vor.u32 %v6464_v20, %v6461_v24  ;;  %v6478_v44 = vrot.slane %v6476_v37, 5  ;;  %v6622_v4 = vshll.u32 %v11086_v43, 16  ;;  %v6853_v20 = vld [vmem:[#allocation2 + $0x4c] sm:$0x1] }
 0x3f6   : > { %v5105_v39 = vadd.f32 %v5093_v46, %v4993_v45  ;;  %v5196_v59 = vadd.f32 %v5183_v16, %v5104_v40  ;;  %v6484_v49 = vrot.slane %v6482_v63, 5  ;;  %v6621_v21 = vrot.slane %v6619_v51, 4  ;;  %v6851_v46 = vld [vmem:[#allocation2 + $0x44] sm:$0x1] }
 0x3f7   : > { %v5644_v22 = vpop.f32.mrf.mxu1  ;;  %v6941_v40 = vsel %vm12052_vm13, %v6936_v50, %v6940_v61  ;;  %v6466_v14 = vrot.slane %v6465_v56, 4  ;;  %v6624_v18 = vrot.slane %v6622_v4, 5  ;;  %v6628_v26 = vshll.u32 %v11087_v38, 16 }
 0x3f8   : > { %v13876_v17 = vadd.f32 %v5644_v22, %v13752_v3  ;;  %v13881_v45 = vadd.f32 %v13854_v41, %v5196_v59  ;;  %v7164_v36 = vunpack.c.l.b16 %v6941_v40  ;;  %v6479_v3 = vor.u32 %v6478_v44, %v6475_v8  ;;  %v6370_v8 = vld [vmem:[#allocation3 + $0x50] sm:$0xf] }
 0x3f9   : > { %v6633_v53 = vshrl.u32 %v11088_v34, 16  ;;  %v6471_v41 = vsel %vm12052_vm13, %v6466_v14, %v6470_v58  ;;  %v6636_v13 = vshll.u32 %v11088_v34, 16  ;;  %v6642_v57 = vshll.u32 %v11089_v28, 16  ;;  %v6371_v28 = vld [vmem:[#allocation3 + $0x54] sm:$0x1] }
 0x3fa   : > { %11073 = vmatmul.msk.bf16.gmra.mxu1 %vm1162_vm10, %v11068_v12  ;;  %v7171_v62 = vpack.c.b16 %v7164_v36, %v7163_v47  ;;  %v5665_v25 = vadd.f32 %v13859_v0, %v13772_v27  ;;  %v6480_v2 = vrot.slane %v6479_v3, 4  ;;  %v6625_v55 = vor.u32 %v6624_v18, %v6621_v21  ;;  %v6852_v47 = vld [vmem:[#allocation2 + $0x48] sm:$0xf] }
 0x3fb   : > { %v6630_v35 = vrot.slane %v6628_v26, 5  ;;  %v13891_v61 = vpop.f32.mrf.mxu0  ;;  %v6681_v12 = vunpack.c.l.b16 %v6471_v41  ;;  %v6635_v31 = vrot.slane %v6633_v53, 4  ;;  %v6638_v54 = vrot.slane %v6636_v13, 5  ;;  %v6372_v26 = vld [vmem:[#allocation3 + $0x58] sm:$0xf] }
 0x3fc   : > { %11126 = vmatmul.msk.bf16.gmra.mxu0 %vm1162_vm10, %v7171_v62  ;;  %v6485_v32 = vsel %vm12052_vm13, %v6480_v2, %v6484_v49  ;;  %v6626_v0 = vrot.slane %v6625_v55, 4  ;;  %v6943_v42 = vshrl.u32 %v6850_v29, 16  ;;  %v6644_v16 = vrot.slane %v6642_v57, 5 }
 0x3fd   : > { %v6041_v33 = vpop.f32.mrf.mxu2  ;;  %v5185_v6 = vpop.f32.mrf.mxu3  ;;  %v6682_v24 = vunpack.c.l.b16 %v6485_v32  ;;  %v6639_v43 = vor.u32 %v6638_v54, %v6635_v31  ;;  %v6946_v58 = vshll.u32 %v6850_v29, 16  ;;  %v6952_v50 = vshll.u32 %v6851_v46, 16 }
 0x3fe   : > { %v6066_v10 = vadd.f32 %v6041_v33, %v13842_v52  ;;  %v5197_v9 = vadd.f32 %v5185_v6, %v5105_v39  ;;  %v6631_v52 = vsel %vm12052_vm13, %v6626_v0, %v6630_v35  ;;  %v6945_v22 = vrot.slane %v6943_v42, 4 }
 0x3ff   : > { %v13897_v27 = vpop.f32.mrf.mxu1  ;;  %v6688_v37 = vpack.c.b16 %v6682_v24, %v6681_v12  ;;  %v6640_v39 = vrot.slane %v6639_v43, 4  ;;  %v6763_v56 = vunpack.c.l.b16 %v6631_v52  ;;  %v6948_v63 = vrot.slane %v6946_v58, 5  ;;  %v6373_v12 = vld [vmem:[#allocation3 + $0x5c] sm:$0x1]  ;;  %v11106_v58 = vld [vmem:[%s11997_s17 + $0x30] sm:$0xf] }
 0x400   : > { %v13899_v59 = vadd.f32 %v5583_v30, %v5197_v9  ;;  %v6954_v38 = vrot.slane %v6952_v50, 5  ;;  %v6957_v34 = vshrl.u32 %v6852_v47, 16  ;;  %v6960_v51 = vshll.u32 %v6852_v47, 16  ;;  %v11104_v9 = vld [vmem:[%s11997_s17 + $0x20] sm:$0xf] }
 0x401   : > { %v6966_v40 = vshll.u32 %v6853_v20, 16  ;;  %11097 = vmatmul.msk.bf16.gmra.mxu2 %vm1162_vm10, %v6688_v37  ;;  %v6645_v30 = vsel %vm12052_vm13, %v6640_v39, %v6644_v16  ;;  %v6949_v44 = vor.u32 %v6948_v63, %v6945_v22  ;;  %v6487_v4 = vshrl.u32 %v6370_v8, 16  ;;  %v11090_v63 = vld [vmem:[%s11997_s17 + $0xa8] sm:$0xf] }
 0x402   : > { %v6490_v36 = vshll.u32 %v6370_v8, 16  ;;  %v6764_v14 = vunpack.c.l.b16 %v6645_v30  ;;  %v6959_v21 = vrot.slane %v6957_v34, 4  ;;  %v6962_v3 = vrot.slane %v6960_v51, 5 }
 0x403   : > { %v6968_v18 = vrot.slane %v6966_v40, 5  ;;  %v13906_v53 = vpop.f32.mrf.mxu0  ;;  %v6950_v13 = vrot.slane %v6949_v44, 4  ;;  %v6489_v57 = vrot.slane %v6487_v4, 4  ;;  %v6496_v6 = vshll.u32 %v6371_v28, 16 }
 0x404   : > { %v6492_v29 = vrot.slane %v6490_v36, 5  ;;  %v6770_v2 = vpack.c.b16 %v6764_v14, %v6763_v56  ;;  %v6963_v35 = vor.u32 %v6962_v3, %v6959_v21  ;;  %v6501_v32 = vshrl.u32 %v6372_v26, 16  ;;  %v11107_v56 = vld [vmem:[%s11997_s17 + $0x34] sm:$0x1] }
 0x405   : > { %v6043_v49 = vpop.f32.mrf.mxu2  ;;  %v6123_v62 = vpop.f32.mrf.mxu3  ;;  %v6955_v54 = vsel %vm12052_vm13, %v6950_v13, %v6954_v38  ;;  %v6498_v24 = vrot.slane %v6496_v6, 5  ;;  %v6504_v16 = vshll.u32 %v6372_v26, 16  ;;  %v6510_v47 = vshll.u32 %v6373_v12, 16 }
 0x406   : > { %v6067_v41 = vadd.f32 %v6043_v49, %v5665_v25  ;;  %v6148_v33 = vadd.f32 %v6123_v62, %v6066_v10  ;;  %v6493_v46 = vor.u32 %v6492_v29, %v6489_v57  ;;  %v11105_v25 = vld [vmem:[%s11997_s17 + $0x24] sm:$0x1]  ;;  %11102 = vmatmul.msk.bf16.gmra.mxu3 %vm1162_vm10, %v6770_v2  ;;  %v6964_v10 = vrot.slane %v6963_v35, 4  ;;  %v11091_v2 = vld [vmem:[%s11997_s17 + $0xac] sm:$0x1] }
 0x407   : > { %v5649_v55 = vpop.f32.mrf.mxu1  ;;  %v7165_v42 = vunpack.c.l.b16 %v6955_v54  ;;  %v6503_v43 = vrot.slane %v6501_v32, 4  ;;  %v7019_v52 = vshrl.u32 %v11104_v9, 16  ;;  %v7022_v22 = vshll.u32 %v11104_v9, 16  ;;  %v11093_v54 = vld [vmem:[%s11997_s17 + $0xbc] sm:$0x1] }
 0x408   : > { %v13909_v31 = vadd.f32 %v5649_v55, %v13799_v5  ;;  %v13917_v0 = vadd.f32 %v13891_v61, %v6148_v33  ;;  %v6494_v5 = vrot.slane %v6493_v46, 4  ;;  %v6969_v20 = vsel %vm12052_vm13, %v6964_v10, %v6968_v18  ;;  %v11092_v18 = vld [vmem:[%s11997_s17 + $0xb8] sm:$0xf] }
 0x409   : > { %v7028_v50 = vshll.u32 %v11105_v25, 16  ;;  %v13924_v61 = vadd.f32 %v13897_v27, %v13807_v15  ;;  %v7166_v8 = vunpack.c.l.b16 %v6969_v20  ;;  %v6506_v39 = vrot.slane %v6504_v16, 5 }
 0x40a   : > { %v6499_v37 = vsel %vm12052_vm13, %v6494_v5, %v6498_v24  ;;  %v6512_v38 = vrot.slane %v6510_v47, 5  ;;  %v7021_v34 = vrot.slane %v7019_v52, 4  ;;  %v7024_v51 = vrot.slane %v7022_v22, 5 }
 0x40b   : > { %v7030_v40 = vrot.slane %v7028_v50, 5  ;;  %v6236_v30 = vpop.f32.mrf.mxu0  ;;  %v7172_v44 = vpack.c.b16 %v7166_v8, %v7165_v42  ;;  %v6507_v28 = vor.u32 %v6506_v39, %v6503_v43  ;;  %v7033_v4 = vshrl.u32 %v11106_v58, 16  ;;  %v6854_v42 = vld [vmem:[#allocation2 + $0x50] sm:$0xf] }
 0x40c   : > { %v7036_v36 = vshll.u32 %v11106_v58, 16  ;;  %v7025_v27 = vor.u32 %v7024_v51, %v7021_v34  ;;  %v7042_v14 = vshll.u32 %v11107_v56, 16  ;;  %v6647_v26 = vshrl.u32 %v11090_v63, 16 }
 0x40d   : > { %v6125_v15 = vpop.f32.mrf.mxu3  ;;  %v6046_v21 = vpop.f32.mrf.mxu2  ;;  %11127 = vmatmul.msk.bf16.gmra.mxu0 %vm1162_vm10, %v7172_v44  ;;  %v6508_v62 = vrot.slane %v6507_v28, 4  ;;  %v7035_v13 = vrot.slane %v7033_v4, 4  ;;  %v6683_v33 = vunpack.c.l.b16 %v6499_v37  ;;  %v6650_v32 = vshll.u32 %v11090_v63, 16  ;;  %v6856_v44 = vld [vmem:[#allocation2 + $0x58] sm:$0xf] }
 0x40e   : > { %v6149_v49 = vadd.f32 %v6125_v15, %v6067_v41  ;;  %v7038_v57 = vrot.slane %v7036_v36, 5  ;;  %v6068_v29 = vadd.f32 %v6046_v21, %v13876_v17  ;;  %v7026_v55 = vrot.slane %v7025_v27, 4 }
 0x40f   : > { %v13930_v3 = vpop.f32.mrf.mxu1  ;;  %v7044_v35 = vrot.slane %v7042_v14, 5  ;;  %v6513_v41 = vsel %vm12052_vm13, %v6508_v62, %v6512_v38  ;;  %v6649_v46 = vrot.slane %v6647_v26, 4  ;;  %v6656_v10 = vshll.u32 %v11091_v2, 16  ;;  %v6857_v14 = vld [vmem:[#allocation2 + $0x5c] sm:$0x1] }
 0x410   : > { %v13937_v12 = vadd.f32 %v13906_v53, %v6149_v49  ;;  %v7039_v6 = vor.u32 %v7038_v57, %v7035_v13  ;;  %v6684_v9 = vunpack.c.l.b16 %v6513_v41  ;;  %v7031_v25 = vsel %vm12052_vm13, %v7026_v55, %v7030_v40  ;;  %v6855_v40 = vld [vmem:[#allocation2 + $0x54] sm:$0x1]  ;;  %v11108_v62 = vld [vmem:[%s11997_s17 + $0x40] sm:$0xf]  ;;  %v11110_v41 = vld [vmem:[%s11997_s17 + $0x50] sm:$0xf] }
 0x411   : > { %v6661_v17 = vshrl.u32 %v11092_v18, 16  ;;  %v7237_v5 = vunpack.c.l.b16 %v7031_v25  ;;  %v6652_v43 = vrot.slane %v6650_v32, 5  ;;  %v6664_v16 = vshll.u32 %v11092_v18, 16 }
 0x412   : > { %v7040_v24 = vrot.slane %v7039_v6, 4  ;;  %v6689_v53 = vpack.c.b16 %v6684_v9, %v6683_v33  ;;  %v6658_v47 = vrot.slane %v6656_v10, 5  ;;  %v6670_v58 = vshll.u32 %v11093_v54, 16 }
 0x413   : > { %v6663_v20 = vrot.slane %v6661_v17, 4  ;;  %v6653_v22 = vor.u32 %v6652_v43, %v6649_v46  ;;  %v6666_v50 = vrot.slane %v6664_v16, 5  ;;  %v6971_v37 = vshrl.u32 %v6854_v42, 16  ;;  %v13946_v39 = vpop.f32.mrf.mxu0  ;;  %v11111_v17 = vld [vmem:[%s11997_s17 + $0x54] sm:$0x1] }
 0x414   : > { %v7045_v52 = vsel %vm12052_vm13, %v7040_v24, %v7044_v35  ;;  %11098 = vmatmul.msk.bf16.gmra.mxu2 %vm1162_vm10, %v6689_v53  ;;  %v6672_v63 = vrot.slane %v6670_v58, 5  ;;  %v6974_v28 = vshll.u32 %v6854_v42, 16  ;;  %v6985_v2 = vshrl.u32 %v6856_v44, 16  ;;  %v11109_v35 = vld [vmem:[%s11997_s17 + $0x44] sm:$0x1] }
 0x415   : > { %v6128_v8 = vpop.f32.mrf.mxu3  ;;  %v7238_v56 = vunpack.c.l.b16 %v7045_v52  ;;  %v6048_v34 = vpop.f32.mrf.mxu2  ;;  %v6654_v4 = vrot.slane %v6653_v22, 4  ;;  %v6667_v36 = vor.u32 %v6666_v50, %v6663_v20  ;;  %v6973_v18 = vrot.slane %v6971_v37, 4  ;;  %v11112_v22 = vld [vmem:[%s11997_s17 + $0x60] sm:$0xf] }
 0x416   : > { %v6150_v38 = vadd.f32 %v6128_v8, %v6068_v29  ;;  %v6069_v15 = vadd.f32 %v6048_v34, %v13924_v61  ;;  %v6976_v26 = vrot.slane %v6974_v28, 5  ;;  %v6980_v29 = vshll.u32 %v6855_v40, 16 }
 0x417   : > { %v5654_v51 = vpop.f32.mrf.mxu1  ;;  %v7247_v49 = vpack.c.b16 %v7238_v56, %v7237_v5  ;;  %v6659_v13 = vsel %vm12052_vm13, %v6654_v4, %v6658_v47  ;;  %v6668_v57 = vrot.slane %v6667_v36, 4  ;;  %v6988_v33 = vshll.u32 %v6856_v44, 16  ;;  %v11114_v36 = vld [vmem:[%s11997_s17 + $0x70] sm:$0xf] }
 0x418   : > { %v13951_v27 = vadd.f32 %v5654_v51, %v13846_v7  ;;  %v13953_v21 = vadd.f32 %v6236_v30, %v6150_v38  ;;  %v6765_v7 = vunpack.c.l.b16 %v6659_v13  ;;  %v6977_v61 = vor.u32 %v6976_v26, %v6973_v18 }
 0x419   : > { %11129 = vmatmul.msk.bf16.vlgmr.msrb.gmra.mxu1 %vm1162_vm10, %v7247_v49  ;;  %v6994_v55 = vshll.u32 %v6857_v14, 16  ;;  %v6673_v30 = vsel %vm12052_vm13, %v6668_v57, %v6672_v63  ;;  %v6982_v6 = vrot.slane %v6980_v29, 5  ;;  %v6987_v54 = vrot.slane %v6985_v2, 4  ;;  %v11113_v2 = vld [vmem:[%s11997_s17 + $0x64] sm:$0x1] }
 0x41a   : > { %v7047_v46 = vshrl.u32 %v11108_v62, 16  ;;  %v6766_v32 = vunpack.c.l.b16 %v6673_v30  ;;  %v6978_v9 = vrot.slane %v6977_v61, 4  ;;  %v6990_v25 = vrot.slane %v6988_v33, 5 }
 0x41b   : > { %v6996_v10 = vrot.slane %v6994_v55, 5  ;;  %v7050_v24 = vshll.u32 %v11108_v62, 16  ;;  %v7056_v5 = vshll.u32 %v11109_v35, 16  ;;  %v7061_v43 = vshrl.u32 %v11110_v41, 16  ;;  %v6241_v40 = vpop.f32.mrf.mxu0 }
 0x41c   : > { %v7049_v42 = vrot.slane %v7047_v46, 4  ;;  %v6771_v53 = vpack.c.b16 %v6766_v32, %v6765_v7  ;;  %v6983_v47 = vsel %vm12052_vm13, %v6978_v9, %v6982_v6  ;;  %v6991_v20 = vor.u32 %v6990_v25, %v6987_v54 }
 0x41d   : > { %v6130_v16 = vpop.f32.mrf.mxu3  ;;  %v7064_v58 = vshll.u32 %v11110_v41, 16  ;;  %v7167_v50 = vunpack.c.l.b16 %v6983_v47  ;;  %v7052_v8 = vrot.slane %v7050_v24, 5  ;;  %v7058_v37 = vrot.slane %v7056_v5, 5  ;;  %v11115_v41 = vld [vmem:[%s11997_s17 + $0x74] sm:$0x1] }
 0x41e   : > { %v7063_v56 = vrot.slane %v7061_v43, 4  ;;  %11103 = vmatmul.msk.bf16.gmra.mxu3 %vm1162_vm10, %v6771_v53  ;;  %v6992_v63 = vrot.slane %v6991_v20, 4  ;;  %v7070_v34 = vshll.u32 %v11111_v17, 16  ;;  %v6151_v51 = vadd.f32 %v6130_v16, %v6069_v15 }
 0x41f   : > { %v5656_v52 = vpop.f32.mrf.mxu1  ;;  %v7066_v38 = vrot.slane %v7064_v58, 5  ;;  %v7053_v44 = vor.u32 %v7052_v8, %v7049_v42  ;;  %v7075_v14 = vshrl.u32 %v11112_v22, 16  ;;  %v7078_v49 = vshll.u32 %v11112_v22, 16  ;;  %v11116_v22 = vld [vmem:[%s11997_s17 + $0x80] sm:$0xf] }
 0x420   : > { %v6051_v28 = vpop.f32.mrf.mxu2  ;;  %v13969_v4 = vadd.f32 %v5656_v52, %v13867_v23  ;;  %v6997_v18 = vsel %vm12052_vm13, %v6992_v63, %v6996_v10  ;;  %v7072_v62 = vrot.slane %v7070_v34, 5  ;;  %v13976_v15 = vadd.f32 %v13946_v39, %v6151_v51  ;;  %v11118_v8 = vld [vmem:[%s11997_s17 + $0x90] sm:$0xf] }
 0x421   : > { %v7067_v26 = vor.u32 %v7066_v38, %v7063_v56  ;;  %v6070_v13 = vadd.f32 %v6051_v28, %v13909_v31  ;;  %v7168_v57 = vunpack.c.l.b16 %v6997_v18  ;;  %v7054_v29 = vrot.slane %v7053_v44, 4 }
 0x422   : > { %v7077_v7 = vrot.slane %v7075_v14, 4  ;;  %v7080_v61 = vrot.slane %v7078_v49, 5  ;;  %v7089_v33 = vshrl.u32 %v11114_v36, 16  ;;  %v7092_v30 = vshll.u32 %v11114_v36, 16 }
 0x423   : > { %v7068_v23 = vrot.slane %v7067_v26, 4  ;;  %v7173_v55 = vpack.c.b16 %v7168_v57, %v7167_v50  ;;  %v7059_v35 = vsel %vm12052_vm13, %v7054_v29, %v7058_v37  ;;  %v5591_v6 = vadd.f32 %v13789_v60, %v13824_v1  ;;  %v6243_v20 = vpop.f32.mrf.mxu0  ;;  %v11117_v29 = vld [vmem:[%s11997_s17 + $0x84] sm:$0x1] }
 0x424   : > { %v7239_v54 = vunpack.c.l.b16 %v7059_v35  ;;  %v7084_v39 = vshll.u32 %v11113_v2, 16  ;;  %v7081_v25 = vor.u32 %v7080_v61, %v7077_v7  ;;  %v7091_v10 = vrot.slane %v7089_v33, 4 }
 0x425   : > { %v7073_v31 = vsel %vm12052_vm13, %v7068_v23, %v7072_v62  ;;  %11128 = vmatmul.msk.bf16.gmra.mxu0 %vm1162_vm10, %v7173_v55  ;;  %v7094_v17 = vrot.slane %v7092_v30, 5  ;;  %v5669_v42 = vadd.f32 %v13930_v3, %v5591_v6  ;;  %v7098_v1 = vshll.u32 %v11115_v41, 16  ;;  %v11119_v23 = vld [vmem:[%s11997_s17 + $0x94] sm:$0x1] }
 0x426   : > { %v7240_v46 = vunpack.c.l.b16 %v7073_v31  ;;  %v7082_v58 = vrot.slane %v7081_v25, 4  ;;  %v7086_v52 = vrot.slane %v7084_v39, 5  ;;  %v7103_v37 = vshrl.u32 %v11116_v22, 16  ;;  %v11120_v25 = vld [vmem:[%s11997_s17 + $0xa0] sm:$0xf] }
 0x427   : > { %v6133_v32 = vpop.f32.mrf.mxu3  ;;  %v5659_v9 = vpop.f32.mrf.mxu1  ;;  %v7095_v16 = vor.u32 %v7094_v17, %v7091_v10  ;;  %v7100_v3 = vrot.slane %v7098_v1, 5  ;;  %v7106_v38 = vshll.u32 %v11116_v22, 16  ;;  %v7117_v34 = vshrl.u32 %v11118_v8, 16  ;;  %v11122_v17 = vld [vmem:[%s11997_s17 + $0xb0] sm:$0xf] }
 0x428   : > { %v6152_v24 = vadd.f32 %v6133_v32, %v6070_v13  ;;  %v13989_v60 = vadd.f32 %v5659_v9, %v13881_v45  ;;  %v7248_v5 = vpack.c.b16 %v7240_v46, %v7239_v54  ;;  %v6053_v43 = vpop.f32.mrf.mxu2  ;;  %v7087_v45 = vsel %vm12052_vm13, %v7082_v58, %v7086_v52 }
 0x429   : > { %v6071_v53 = vadd.f32 %v6053_v43, %v5669_v42  ;;  %v7096_v50 = vrot.slane %v7095_v16, 4  ;;  %v7120_v28 = vshll.u32 %v11118_v8, 16  ;;  %v7105_v49 = vrot.slane %v7103_v37, 4  ;;  %v11121_v8 = vld [vmem:[%s11997_s17 + $0xa4] sm:$0x1] }
 0x42a   : > { %v13991_v47 = vadd.f32 %v6241_v40, %v6152_v24  ;;  %11130 = vmatmul.msk.bf16.gmra.mxu1 %vm1162_vm10, %v7248_v5  ;;  %v7241_v18 = vunpack.c.l.b16 %v7087_v45  ;;  %v7108_v13 = vrot.slane %v7106_v38, 5  ;;  %v7119_v2 = vrot.slane %v7117_v34, 4  ;;  %v11123_v34 = vld [vmem:[%s11997_s17 + $0xb4] sm:$0x1] }
 0x42b   : > { %v7101_v51 = vsel %vm12052_vm13, %v7096_v50, %v7100_v3  ;;  %v6246_v57 = vpop.f32.mrf.mxu0  ;;  %v7122_v7 = vrot.slane %v7120_v28, 5  ;;  %v7112_v55 = vshll.u32 %v11117_v29, 16  ;;  %v7126_v30 = vshll.u32 %v11119_v23, 16 }
 0x42c   : > { %v7242_v26 = vunpack.c.l.b16 %v7101_v51  ;;  %v7131_v1 = vshrl.u32 %v11120_v25, 16  ;;  %v7134_v5 = vshll.u32 %v11120_v25, 16  ;;  %v7145_v16 = vshrl.u32 %v11122_v17, 16 }
 0x42d   : > { %v7123_v41 = vor.u32 %v7122_v7, %v7119_v2  ;;  %v7114_v46 = vrot.slane %v7112_v55, 5  ;;  %v7128_v9 = vrot.slane %v7126_v30, 5 }
 0x42e   : > { %v7249_v61 = vpack.c.b16 %v7242_v26, %v7241_v18  ;;  %v7133_v37 = vrot.slane %v7131_v1, 4  ;;  %v7136_v45 = vrot.slane %v7134_v5, 5  ;;  %v7154_v26 = vshll.u32 %v11123_v34, 16 }
 0x42f   : > { %v6135_v56 = vpop.f32.mrf.mxu3  ;;  %v5661_v63 = vpop.f32.mrf.mxu1  ;;  %v7124_v32 = vrot.slane %v7123_v41, 4 }
 0x430   : > { %v6153_v40 = vadd.f32 %v6135_v56, %v6071_v53  ;;  %v14001_v44 = vadd.f32 %v5661_v63, %v13899_v59  ;;  %v7109_v59 = vor.u32 %v7108_v13, %v7105_v49  ;;  %v7148_v53 = vshll.u32 %v11122_v17, 16 }
 0x431   : > { %v6056_v36 = vpop.f32.mrf.mxu2  ;;  %v7129_v43 = vsel %vm12052_vm13, %v7124_v32, %v7128_v9  ;;  %v7147_v56 = vrot.slane %v7145_v16, 4  ;;  %v7137_v49 = vor.u32 %v7136_v45, %v7133_v37  ;;  %v7156_v23 = vrot.slane %v7154_v26, 5 }
 0x432   : > { %v14003_v14 = vadd.f32 %v6243_v20, %v6153_v40  ;;  %v6072_v62 = vadd.f32 %v6056_v36, %v13951_v27  ;;  %v7110_v39 = vrot.slane %v7109_v59, 4  ;;  %v7244_v22 = vunpack.c.l.b16 %v7129_v43 }
 0x433   : > { %v6248_v42 = vpop.f32.mrf.mxu0  ;;  %v7150_v63 = vrot.slane %v7148_v53, 5  ;;  %v7138_v29 = vrot.slane %v7137_v49, 4 }
 0x435   : > { %v7151_v18 = vor.u32 %v7150_v63, %v7147_v56 }
 0x437   : > { %v6319_v33 = vpop.f32.mrf.mxu1  ;;  %v7152_v7 = vrot.slane %v7151_v18, 4 }
 0x438   : > { %v14009_v35 = vadd.f32 %v6319_v33, %v13917_v0  ;;  %v6138_v6 = vpop.f32.mrf.mxu3  ;;  %v7115_v0 = vsel %vm12052_vm13, %v7110_v39, %v7114_v46 }
 0x439   : > { %v6058_v31 = vpop.f32.mrf.mxu2  ;;  %v6154_v27 = vadd.f32 %v6138_v6, %v6072_v62  ;;  %v7243_v52 = vunpack.c.l.b16 %v7115_v0  ;;  %v7157_v59 = vsel %vm12052_vm13, %v7152_v7, %v7156_v23 }
 0x43a   : > { %11131 = vmatmul.msk.bf16.gmra.mxu1 %vm1162_vm10, %v7249_v61  ;;  %v6073_v54 = vadd.f32 %v6058_v31, %v13969_v4  ;;  %v7246_v31 = vunpack.c.l.b16 %v7157_v59 }
 0x43b   : > { %v6262_v10 = vadd.f32 %v6246_v57, %v6154_v27  ;;  %v7250_v51 = vpack.c.b16 %v7244_v22, %v7243_v52  ;;  %v6251_v28 = vpop.f32.mrf.mxu0 }
 0x43f   : > { %v6321_v24 = vpop.f32.mrf.mxu1 }
 0x440   : > { %v14020_v4 = vadd.f32 %v6321_v24, %v13937_v12  ;;  %v6140_v20 = vpop.f32.mrf.mxu3  ;;  %v7140_v12 = vshll.u32 %v11121_v8, 16  ;;  %v14056_v8 = vld [vmem:[%s14905_s6] ss:$0 sm:$0xff] }
 0x441   : > { %v6061_v58 = vpop.f32.mrf.mxu2  ;;  %v6155_v50 = vadd.f32 %v6140_v20, %v6073_v54 }
 0x442   : > { %v6074_v3 = vadd.f32 %v6061_v58, %v13989_v60  ;;  %v7142_v2 = vrot.slane %v7140_v12, 5  ;;  %v14068_v12 = vld [vmem:[%s14907_s8] ss:$0 sm:$0xff] }
 0x443   : > { %v6263_v38 = vadd.f32 %v6248_v42, %v6155_v50  ;;  %v6253_v30 = vpop.f32.mrf.mxu0 }
 0x447   : > { %v6324_v40 = vpop.f32.mrf.mxu1 }
 0x448   : > { %v14026_v36 = vadd.f32 %v6324_v40, %v13953_v21  ;;  %v6143_v62 = vpop.f32.mrf.mxu3  ;;  %v7143_v21 = vsel %vm12052_vm13, %v7138_v29, %v7142_v2 }
 0x449   : > { %v6063_v13 = vpop.f32.mrf.mxu2  ;;  %v6156_v60 = vadd.f32 %v6143_v62, %v6074_v3  ;;  %v7245_v6 = vunpack.c.l.b16 %v7143_v21 }
 0x44a   : > { %11132 = vmatmul.msk.bf16.gmra.mxu1 %vm1162_vm10, %v7250_v51  ;;  %v6075_v57 = vadd.f32 %v6063_v13, %v14001_v44 }
 0x44b   : > { %v6264_v61 = vadd.f32 %v6251_v28, %v6156_v60  ;;  %v7251_v54 = vpack.c.b16 %v7246_v31, %v7245_v6  ;;  %v7479_v6 = vld [vmem:[#allocation5 + $0x4] sm:$0x1] }
 0x44f   : > { %v6326_v33 = vpop.f32.mrf.mxu1 }
 0x450   : > { %v14035_v55 = vadd.f32 %v6326_v33, %v13976_v15  ;;  %v6145_v41 = vpop.f32.mrf.mxu3 }
 0x451   : > { %v6157_v44 = vadd.f32 %v6145_v41, %v6075_v57  ;;  %v6721_v1 = vpop.f32.mrf.mxu2 }
 0x453   : > { %v6265_v27 = vadd.f32 %v6253_v30, %v6157_v44  ;;  %v7201_v16 = vpop.f32.mrf.mxu0  ;;  %v7476_v30 = vld [vmem:[#allocation5] sm:$0xf] }
 0x457   : > { %v6329_v39 = vpop.f32.mrf.mxu1 }
 0x458   : > { %v14038_v46 = vadd.f32 %v6329_v39, %v13991_v47  ;;  %v6803_v5 = vpop.f32.mrf.mxu3 }
 0x459   : > { %v6723_v53 = vpop.f32.mrf.mxu2 }
 0x45a   : > { %11133 = vmatmul.msk.bf16.gmra.mxu1 %vm1162_vm10, %v7251_v54  ;;  %v6747_v45 = vadd.f32 %v6723_v53, %v14020_v4 }
 0x45b   : > { %v7203_v58 = vpop.f32.mrf.mxu0 }
 0x45f   : > { %v6331_v32 = vpop.f32.mrf.mxu1 }
 0x460   : > { %v14042_v9 = vadd.f32 %v6331_v32, %v14003_v14  ;;  %v6805_v20 = vpop.f32.mrf.mxu3  ;;  %v6746_v14 = vadd.f32 %v6721_v1, %v14009_v35  ;;  %v14063_v35 = vld [vmem:[%s14906_s7] ss:$0 sm:$0xff] }
 0x461   : > { %v6726_v52 = vpop.f32.mrf.mxu2  ;;  %v6829_v63 = vadd.f32 %v6805_v20, %v6747_v45 }
 0x462   : > { %v6748_v13 = vadd.f32 %v6726_v52, %v14026_v36  ;;  %v7485_v52 = vld [vmem:[#allocation5 + $0xc] sm:$0x1] }
 0x463   : > { %v7227_v28 = vadd.f32 %v7203_v58, %v6829_v63 }
 0x466   : > { %v7206_v3 = vpop.f32.mrf.mxu0 }
 0x467   : > { %v6334_v25 = vpop.f32.mrf.mxu1 }
 0x468   : > { %v14044_v15 = vadd.f32 %v6334_v25, %v6262_v10  ;;  %v6828_v10 = vadd.f32 %v6803_v5, %v6746_v14  ;;  %v6808_v22 = vpop.f32.mrf.mxu3  ;;  %v7482_v14 = vld [vmem:[#allocation5 + $0x8] sm:$0xf] }
 0x469   : > { %v6830_v29 = vadd.f32 %v6808_v22, %v6748_v13 }
 0x46a   : > { %v7226_v50 = vadd.f32 %v7201_v16, %v6828_v10 }
 0x46b   : > { %v7228_v41 = vadd.f32 %v7206_v3, %v6830_v29 }
 0x46e   : > { %v7208_v18 = vpop.f32.mrf.mxu0 }
 0x46f   : > { %v6336_v17 = vpop.f32.mrf.mxu1 }
 0x470   : > { %v14046_v42 = vadd.f32 %v6336_v17, %v6263_v38  ;;  %v6728_v38 = vpop.f32.mrf.mxu2  ;;  %v6810_v51 = vpop.f32.mrf.mxu3 }
 0x471   : > { %v6749_v54 = vadd.f32 %v6728_v38, %v14035_v55 }
 0x473   : > { %v6831_v1 = vadd.f32 %v6810_v51, %v6749_v54 }
 0x475   : > { %v7229_v55 = vadd.f32 %v7208_v18, %v6831_v1 }
 0x477   : > { %v6339_v0 = vpop.f32.mrf.mxu1 }
 0x478   : > { %v14048_v24 = vadd.f32 %v6339_v0, %v6264_v61  ;;  %v6731_v2 = vpop.f32.mrf.mxu2  ;;  %v6813_v61 = vpop.f32.mrf.mxu3 }
 0x479   : > { %v7211_v32 = vpop.f32.mrf.mxu0  ;;  %v6750_v45 = vadd.f32 %v6731_v2, %v14038_v46 }
 0x47f   : > { %v6341_v43 = vpop.f32.mrf.mxu1 }
 0x480   : > { %v14050_v47 = vadd.f32 %v6341_v43, %v6265_v27  ;;  %v6733_v53 = vpop.f32.mrf.mxu2  ;;  %v6815_v22 = vpop.f32.mrf.mxu3 }
 0x481   : > { %v7213_v18 = vpop.f32.mrf.mxu0  ;;  %v6751_v29 = vadd.f32 %v6733_v53, %v14042_v9 }
 0x488   : > { %v6736_v2 = vpop.f32.mrf.mxu2 }
 0x496   : > { %v7279_v37 = vpop.f32.mrf.mxu1 }
 0x497   : > { %v7304_v56 = vadd.f32 %v7279_v37, %v7226_v50 }
 0x499   : > { %v7318_v34 = vadd.f32 %v14056_v8, %v7304_v56 }
 0x49b   : > { %v7328_v40 = vmax.f32 %v7318_v34, 0.0 }
 0x49d   : > { %v7342_v4 = vmul.f32 %v14063_v35, %v7328_v40  ;;  %v6832_v40 = vadd.f32 %v6813_v61, %v6750_v45 }
 0x49e   : > { %v7281_v49 = vpop.f32.mrf.mxu1 }
 0x49f   : > { %v7356_v26 = vadd.f32 %v14068_v12, %v7342_v4  ;;  %v7305_v62 = vadd.f32 %v7281_v49, %v7227_v28 }
 0x4a1   : > { %v7366_v60 = vpack.c.bf16 %v7356_v26, %v7356_v26  ;;  %v7319_v57 = vadd.f32 %v14056_v8, %v7305_v62  ;;  %v7230_v62 = vadd.f32 %v7211_v32, %v6832_v40  ;;  %v7216_v32 = vpop.f32.mrf.mxu0 }
 0x4a3   : > { %v7377_v7 = vshrl.u32 %v7366_v60, 16  ;;  %v7329_v23 = vmax.f32 %v7319_v57, 0.0  ;;  %v7380_v21 = vshll.u32 %v7366_v60, 16 }
 0x4a5   : > { %v7379_v33 = vrot.slane %v7377_v7, 7  ;;  %v7343_v59 = vmul.f32 %v14063_v35, %v7329_v23  ;;  %v7488_v7 = vld [vmem:[#allocation5 + $0x10] sm:$0xf]  ;;  %v7491_v23 = vld [vmem:[#allocation5 + $0x14] sm:$0x1] }
 0x4a7   : > { %v7382_v31 = vor.u32 %v7380_v21, %v7379_v33  ;;  %v7383_v44 = vrot.slane %v7379_v33, 4  ;;  %v7357_v27 = vadd.f32 %v14068_v12, %v7343_v59  ;;  %v7284_v36 = vpop.f32.mrf.mxu1 }
 0x4a8   : > { %v7306_v39 = vadd.f32 %v7284_v36, %v7228_v41 }
 0x4a9   : > { %v7477_v25 = vsel %vm11781_vm8, %v7382_v31, %v7476_v30  ;;  %v7480_v17 = vsel %vm11739_vm4, %v7383_v44, %v7479_v6  ;;  %v7367_v0 = vpack.c.bf16 %v7357_v27, %v7357_v27  ;;  %v6833_v30 = vadd.f32 %v6815_v22, %v6751_v29  ;;  %v6818_v6 = vpop.f32.mrf.mxu3 }
 0x4aa   : > { %7478 = vst [vmem:[#allocation5] sm:$0xf] %v7477_v25  ;;  %v7320_v5 = vadd.f32 %v14056_v8, %v7306_v39 }
 0x4ab   : > { %7481 = vst [vmem:[#allocation5 + $0x4] sm:$0x1] %v7480_v17  ;;  %v7385_v43 = vshrl.u32 %v7367_v0, 16  ;;  %v7388_v58 = vshll.u32 %v7367_v0, 16  ;;  %v7231_v17 = vadd.f32 %v7213_v18, %v6833_v30 }
 0x4ac   : > { %v7330_v16 = vmax.f32 %v7320_v5, 0.0  ;;  %v7494_v5 = vld [vmem:[#allocation5 + $0x18] sm:$0xf] }
 0x4ad   : > { %v7387_v20 = vrot.slane %v7385_v43, 7  ;;  %v7497_v43 = vld [vmem:[#allocation5 + $0x1c] sm:$0x1] }
 0x4ae   : > { %v7344_v10 = vmul.f32 %v14063_v35, %v7330_v16 }
 0x4af   : > { %v7390_v50 = vor.u32 %v7388_v58, %v7387_v20  ;;  %v7391_v3 = vrot.slane %v7387_v20, 4  ;;  %v7286_v37 = vpop.f32.mrf.mxu1  ;;  %v6752_v20 = vadd.f32 %v6736_v2, %v14044_v15 }
 0x4b0   : > { %v7358_v56 = vadd.f32 %v14068_v12, %v7344_v10  ;;  %v7307_v63 = vadd.f32 %v7286_v37, %v7229_v55 }
 0x4b1   : > { %v7536_v38 = vld [vmem:[#allocation5] sm:$0x1]  ;;  %v7483_v34 = vsel %vm11781_vm8, %v7390_v50, %v7482_v14  ;;  %v7486_v51 = vsel %vm11739_vm4, %v7391_v3, %v7485_v52  ;;  %v6738_v52 = vpop.f32.mrf.mxu2  ;;  %v6834_v22 = vadd.f32 %v6818_v6, %v6752_v20  ;;  %v6820_v45 = vpop.f32.mrf.mxu3 }
 0x4b2   : > { %v7537_v28 = vsel %vm11739_vm4, 0, %v7536_v38  ;;  %7484 = vst [vmem:[#allocation5 + $0x8] sm:$0xf] %v7483_v34  ;;  %v7368_v4 = vpack.c.bf16 %v7358_v56, %v7358_v56  ;;  %v7321_v49 = vadd.f32 %v14056_v8, %v7307_v63 }
 0x4b3   : > { %7538 = vst [vmem:[#allocation5] sm:$0x1] %v7537_v28  ;;  %v7218_v28 = vpop.f32.mrf.mxu0 }
 0x4b4   : > { %7487 = vst [vmem:[#allocation5 + $0xc] sm:$0x1] %v7486_v51  ;;  %v7393_v46 = vshrl.u32 %v7368_v4, 16  ;;  %v7331_v26 = vmax.f32 %v7321_v49, 0.0  ;;  %v7396_v60 = vshll.u32 %v7368_v4, 16  ;;  %v7232_v51 = vadd.f32 %v7216_v32, %v6834_v22 }
 0x4b6   : > { %v7395_v13 = vrot.slane %v7393_v46, 7  ;;  %v7345_v57 = vmul.f32 %v14063_v35, %v7331_v26  ;;  %v6753_v46 = vadd.f32 %v6738_v52, %v14046_v42  ;;  %v7500_v26 = vld [vmem:[#allocation5 + $0x20] sm:$0xf] }
 0x4b7   : > { %v7289_v61 = vpop.f32.mrf.mxu1 }
 0x4b8   : > { %v7398_v33 = vor.u32 %v7396_v60, %v7395_v13  ;;  %v7399_v21 = vrot.slane %v7395_v13, 4  ;;  %v7359_v59 = vadd.f32 %v14068_v12, %v7345_v57  ;;  %v7308_v41 = vadd.f32 %v7289_v61, %v7230_v62  ;;  %v7503_v62 = vld [vmem:[#allocation5 + $0x24] sm:$0x1] }
 0x4b9   : > { %v7539_v31 = vld [vmem:[#allocation5 + $0x8] sm:$0x1]  ;;  %v6835_v2 = vadd.f32 %v6820_v45, %v6753_v46  ;;  %v6823_v6 = vpop.f32.mrf.mxu3  ;;  %v7512_v45 = vld [vmem:[#allocation5 + $0x30] sm:$0xf] }
 0x4ba   : > { %v7540_v44 = vsel %vm11739_vm4, 0, %v7539_v31  ;;  %v7489_v27 = vsel %vm11781_vm8, %v7398_v33, %v7488_v7  ;;  %v7492_v9 = vsel %vm11739_vm4, %v7399_v21, %v7491_v23  ;;  %v7369_v36 = vpack.c.bf16 %v7359_v59, %v7359_v59  ;;  %v6741_v33 = vpop.f32.mrf.mxu2 }
 0x4bb   : > { %7541 = vst [vmem:[#allocation5 + $0x8] sm:$0x1] %v7540_v44  ;;  %v7322_v54 = vadd.f32 %v14056_v8, %v7308_v41  ;;  %v7233_v31 = vadd.f32 %v7218_v28, %v6835_v2 }
 0x4bc   : > { %7490 = vst [vmem:[#allocation5 + $0x10] sm:$0xf] %v7489_v27  ;;  %v7401_v39 = vshrl.u32 %v7369_v36, 16  ;;  %v7404_v1 = vshll.u32 %v7369_v36, 16  ;;  %v6754_v36 = vadd.f32 %v6741_v33, %v14048_v24  ;;  %v7518_v33 = vld [vmem:[#allocation5 + $0x38] sm:$0xf] }
 0x4bd   : > { %7493 = vst [vmem:[#allocation5 + $0x14] sm:$0x1] %v7492_v9  ;;  %v7332_v25 = vmax.f32 %v7322_v54, 0.0  ;;  %v7506_v54 = vld [vmem:[#allocation5 + $0x28] sm:$0xf] }
 0x4be   : > { %v7403_v0 = vrot.slane %v7401_v39, 7  ;;  %v7509_v39 = vld [vmem:[#allocation5 + $0x2c] sm:$0x1] }
 0x4bf   : > { %v7346_v16 = vmul.f32 %v14063_v35, %v7332_v25  ;;  %v7291_v53 = vpop.f32.mrf.mxu1 }
 0x4c0   : > { %v7406_v58 = vor.u32 %v7404_v1, %v7403_v0  ;;  %v7407_v55 = vrot.slane %v7403_v0, 4  ;;  %v7309_v14 = vadd.f32 %v7291_v53, %v7231_v17 }
 0x4c1   : > { %v7360_v10 = vadd.f32 %v14068_v12, %v7346_v16 }
 0x4c2   : > { %v7495_v50 = vsel %vm11781_vm8, %v7406_v58, %v7494_v5  ;;  %v7498_v3 = vsel %vm11739_vm4, %v7407_v55, %v7497_v43  ;;  %v7323_v37 = vadd.f32 %v14056_v8, %v7309_v14  ;;  %v6836_v5 = vadd.f32 %v6823_v6, %v6754_v36  ;;  %v7221_v43 = vpop.f32.mrf.mxu0  ;;  %v6743_v14 = vpop.f32.mrf.mxu2 }
 0x4c3   : > { %v7542_v56 = vld [vmem:[#allocation5 + $0x10] sm:$0x1]  ;;  %7496 = vst [vmem:[#allocation5 + $0x18] sm:$0xf] %v7495_v50  ;;  %v7370_v63 = vpack.c.bf16 %v7360_v10, %v7360_v10 }
 0x4c4   : > { %v7543_v15 = vsel %vm11739_vm4, 0, %v7542_v56  ;;  %7499 = vst [vmem:[#allocation5 + $0x1c] sm:$0x1] %v7498_v3  ;;  %v7333_v38 = vmax.f32 %v7323_v37, 0.0  ;;  %v7234_v22 = vadd.f32 %v7221_v43, %v6836_v5  ;;  %v6825_v37 = vpop.f32.mrf.mxu3  ;;  %v7515_v56 = vld [vmem:[#allocation5 + $0x34] sm:$0x1] }
 0x4c5   : > { %7544 = vst [vmem:[#allocation5 + $0x10] sm:$0x1] %v7543_v15  ;;  %v7409_v34 = vshrl.u32 %v7370_v63, 16  ;;  %v7412_v49 = vshll.u32 %v7370_v63, 16 }
 0x4c6   : > { %v7347_v40 = vmul.f32 %v14063_v35, %v7333_v38  ;;  %v6755_v38 = vadd.f32 %v6743_v14, %v14050_v47 }
 0x4c7   : > { %v7411_v4 = vrot.slane %v7409_v34, 7  ;;  %v7294_v18 = vpop.f32.mrf.mxu1 }
 0x4c8   : > { %v7361_v13 = vadd.f32 %v14068_v12, %v7347_v40  ;;  %v7310_v60 = vadd.f32 %v7294_v18, %v7232_v51 }
 0x4c9   : > { %v7414_v57 = vor.u32 %v7412_v49, %v7411_v4  ;;  %v7415_v29 = vrot.slane %v7411_v4, 4  ;;  %v6837_v4 = vadd.f32 %v6825_v37, %v6755_v38 }
 0x4ca   : > { %v7545_v7 = vld [vmem:[#allocation5 + $0x18] sm:$0x1]  ;;  %v7371_v23 = vpack.c.bf16 %v7361_v13, %v7361_v13  ;;  %v7324_v61 = vadd.f32 %v14056_v8, %v7310_v60 }
 0x4cb   : > { %v7546_v21 = vsel %vm11739_vm4, 0, %v7545_v7  ;;  %v7501_v59 = vsel %vm11781_vm8, %v7414_v57, %v7500_v26  ;;  %v7504_v42 = vsel %vm11739_vm4, %v7415_v29, %v7503_v62  ;;  %v7223_v62 = vpop.f32.mrf.mxu0 }
 0x4cc   : > { %7547 = vst [vmem:[#allocation5 + $0x18] sm:$0x1] %v7546_v21  ;;  %v7417_v41 = vshrl.u32 %v7371_v23, 16  ;;  %v7334_v30 = vmax.f32 %v7324_v61, 0.0  ;;  %v7420_v27 = vshll.u32 %v7371_v23, 16  ;;  %v7235_v29 = vadd.f32 %v7223_v62, %v6837_v4 }
 0x4cd   : > { %7502 = vst [vmem:[#allocation5 + $0x20] sm:$0xf] %v7501_v59  ;;  %v7521_v21 = vld [vmem:[#allocation5 + $0x3c] sm:$0x1] }
 0x4ce   : > { %7505 = vst [vmem:[#allocation5 + $0x24] sm:$0x1] %v7504_v42  ;;  %v7419_v44 = vrot.slane %v7417_v41, 7  ;;  %v7348_v9 = vmul.f32 %v14063_v35, %v7334_v30 }
 0x4cf   : > { %v7296_v32 = vpop.f32.mrf.mxu1 }
 0x4d0   : > { %v7422_v25 = vor.u32 %v7420_v27, %v7419_v44  ;;  %v7423_v17 = vrot.slane %v7419_v44, 4  ;;  %v7362_v0 = vadd.f32 %v14068_v12, %v7348_v9  ;;  %v7311_v1 = vadd.f32 %v7296_v32, %v7233_v31 }
 0x4d2   : > { %v7507_v16 = vsel %vm11781_vm8, %v7422_v25, %v7506_v54  ;;  %v7510_v53 = vsel %vm11739_vm4, %v7423_v17, %v7509_v39  ;;  %v7372_v20 = vpack.c.bf16 %v7362_v0, %v7362_v0  ;;  %v7325_v58 = vadd.f32 %v14056_v8, %v7311_v1  ;;  %v7524_v0 = vld [vmem:[#allocation5 + $0x40] sm:$0xf] }
 0x4d3   : > { %7508 = vst [vmem:[#allocation5 + $0x28] sm:$0xf] %v7507_v16 }
 0x4d4   : > { %v7548_v24 = vld [vmem:[#allocation5 + $0x20] sm:$0x1]  ;;  %7511 = vst [vmem:[#allocation5 + $0x2c] sm:$0x1] %v7510_v53  ;;  %v7425_v55 = vshrl.u32 %v7372_v20, 16  ;;  %v7335_v10 = vmax.f32 %v7325_v58, 0.0 }
 0x4d5   : > { %v7549_v52 = vsel %vm11739_vm4, 0, %v7548_v24  ;;  %v7428_v3 = vshll.u32 %v7372_v20, 16 }
 0x4d6   : > { %7550 = vst [vmem:[#allocation5 + $0x20] sm:$0x1] %v7549_v52  ;;  %v7427_v50 = vrot.slane %v7425_v55, 7  ;;  %v7349_v63 = vmul.f32 %v14063_v35, %v7335_v10  ;;  %v7530_v52 = vld [vmem:[#allocation5 + $0x48] sm:$0xf] }
 0x4d7   : > { %v7299_v15 = vpop.f32.mrf.mxu1  ;;  %v7533_v10 = vld [vmem:[#allocation5 + $0x4c] sm:$0x1] }
 0x4d8   : > { %v7430_v34 = vor.u32 %v7428_v3, %v7427_v50  ;;  %v7431_v51 = vrot.slane %v7427_v50, 4  ;;  %v7312_v40 = vadd.f32 %v7299_v15, %v7234_v22  ;;  %v7363_v28 = vadd.f32 %v14068_v12, %v7349_v63 }
 0x4da   : > { %v7551_v49 = vld [vmem:[#allocation5 + $0x28] sm:$0x1]  ;;  %v7513_v18 = vsel %vm11781_vm8, %v7430_v34, %v7512_v45  ;;  %v7516_v46 = vsel %vm11739_vm4, %v7431_v51, %v7515_v56  ;;  %v7326_v26 = vadd.f32 %v14056_v8, %v7312_v40  ;;  %v7373_v47 = vpack.c.bf16 %v7363_v28, %v7363_v28 }
 0x4db   : > { %v7552_v13 = vsel %vm11739_vm4, 0, %v7551_v49  ;;  %7514 = vst [vmem:[#allocation5 + $0x30] sm:$0xf] %v7513_v18 }
 0x4dc   : > { %7553 = vst [vmem:[#allocation5 + $0x28] sm:$0x1] %v7552_v13  ;;  %v7336_v60 = vmax.f32 %v7326_v26, 0.0  ;;  %v7433_v57 = vshrl.u32 %v7373_v47, 16  ;;  %v7436_v23 = vshll.u32 %v7373_v47, 16 }
 0x4dd   : > { %7517 = vst [vmem:[#allocation5 + $0x34] sm:$0x1] %v7516_v46 }
 0x4de   : > { %v7350_v2 = vmul.f32 %v14063_v35, %v7336_v60  ;;  %v7435_v7 = vrot.slane %v7433_v57, 7 }
 0x4df   : > { %v7301_v61 = vpop.f32.mrf.mxu1 }
 0x4e0   : > { %v7364_v59 = vadd.f32 %v14068_v12, %v7350_v2  ;;  %v7313_v42 = vadd.f32 %v7301_v61, %v7235_v29  ;;  %v7438_v41 = vor.u32 %v7436_v23, %v7435_v7  ;;  %v7439_v30 = vrot.slane %v7435_v7, 4 }
 0x4e2   : > { %v7554_v6 = vld [vmem:[#allocation5 + $0x30] sm:$0x1]  ;;  %v7374_v31 = vpack.c.bf16 %v7364_v59, %v7364_v59  ;;  %v7327_v44 = vadd.f32 %v14056_v8, %v7313_v42  ;;  %v7519_v9 = vsel %vm11781_vm8, %v7438_v41, %v7518_v33  ;;  %v7522_v36 = vsel %vm11739_vm4, %v7439_v30, %v7521_v21  ;;  %v7527_v8 = vld [vmem:[#allocation5 + $0x44] sm:$0x1] }
 0x4e3   : > { %v7555_v27 = vsel %vm11739_vm4, 0, %v7554_v6  ;;  %7520 = vst [vmem:[#allocation5 + $0x38] sm:$0xf] %v7519_v9 }
 0x4e4   : > { %7556 = vst [vmem:[#allocation5 + $0x30] sm:$0x1] %v7555_v27  ;;  %v7441_v54 = vshrl.u32 %v7374_v31, 16  ;;  %v7337_v39 = vmax.f32 %v7327_v44, 0.0  ;;  %v7444_v25 = vshll.u32 %v7374_v31, 16 }
 0x4e5   : > { %7523 = vst [vmem:[#allocation5 + $0x3c] sm:$0x1] %v7522_v36 }
 0x4e6   : > { %v7443_v32 = vrot.slane %v7441_v54, 7  ;;  %v7351_v17 = vmul.f32 %v14063_v35, %v7337_v39 }
 0x4e8   : > { %v7446_v1 = vor.u32 %v7444_v25, %v7443_v32  ;;  %v7447_v5 = vrot.slane %v7443_v32, 4  ;;  %v7365_v43 = vadd.f32 %v14068_v12, %v7351_v17 }
 0x4ea   : > { %v7525_v16 = vsel %vm11781_vm8, %v7446_v1, %v7524_v0  ;;  %v7528_v53 = vsel %vm11739_vm4, %v7447_v5, %v7527_v8  ;;  %v7375_v20 = vpack.c.bf16 %v7365_v43, %v7365_v43  ;;  %v7557_v58 = vld [vmem:[#allocation5 + $0x38] sm:$0x1] }
 0x4eb   : > { %7526 = vst [vmem:[#allocation5 + $0x40] sm:$0xf] %v7525_v16  ;;  %v7558_v35 = vsel %vm11739_vm4, 0, %v7557_v58 }
 0x4ec   : > { %7529 = vst [vmem:[#allocation5 + $0x44] sm:$0x1] %v7528_v53  ;;  %v7449_v24 = vshrl.u32 %v7375_v20, 16  ;;  %v7452_v14 = vshll.u32 %v7375_v20, 16 }
 0x4ed   : > { %7559 = vst [vmem:[#allocation5 + $0x38] sm:$0x1] %v7558_v35 }
 0x4ee   : > { %v7451_v55 = vrot.slane %v7449_v24, 7 }
 0x4f0   : > { %v7454_v12 = vor.u32 %v7452_v14, %v7451_v55  ;;  %v7455_v22 = vrot.slane %v7451_v55, 4 }
 0x4f2   : > { %v7560_v50 = vld [vmem:[#allocation5 + $0x40] sm:$0x1]  ;;  %v7531_v3 = vsel %vm11781_vm8, %v7454_v12, %v7530_v52  ;;  %v7534_v37 = vsel %vm11739_vm4, %v7455_v22, %v7533_v10 }
 0x4f3   : > { %v7561_v45 = vsel %vm11739_vm4, 0, %v7560_v50  ;;  %7532 = vst [vmem:[#allocation5 + $0x48] sm:$0xf] %v7531_v3 }
 0x4f4   : > { %7562 = vst [vmem:[#allocation5 + $0x40] sm:$0x1] %v7561_v45 }
 0x4f5   : > { %7535 = vst [vmem:[#allocation5 + $0x4c] sm:$0x1] %v7534_v37 }
 0x4f8   : > { %7568 = sbr.rel (%p10347_p7) target bundleno = 1282 (0x502), region = 84 }
 0x4fa   : > { %v7563_v56 = vld [vmem:[#allocation5 + $0x48] sm:$0x1] }
 0x4fb   : > { %v7564_v63 = vsel %vm11739_vm4, 0, %v7563_v56 }
 0x4fc   : > { %7565 = vst [vmem:[#allocation5 + $0x48] sm:$0x1] %v7564_v63 }
 0x4fd   : > { %v7570_v15 = vld [vmem:[#allocation4 + $0x4] sm:$0x1]  ;;  %v7574_v19 = vld [vmem:[#allocation5 + $0x4] sm:$0x1]  ;;  %v11609_v38 = vmov 0  }
 0x4fe   : > { %7569 = vst.msk [vmem:[#allocation4] sm:$0xf] %vm829_vm6, %v11609_v38  ;;  %v7571_v34 = vsel %vm11739_vm4, 0, %v7570_v15  ;;  %v7575_v51 = vsel %vm11739_vm4, 0, %v7574_v19 }
 0x4ff   : > { %7573 = vst.msk [vmem:[#allocation5] sm:$0xf] %vm829_vm6, %v11609_v38 }
 0x500   : > { %7572 = vst [vmem:[#allocation4 + $0x4] sm:$0x1] %v7571_v34 }
 0x501   : > { %7576 = vst [vmem:[#allocation5 + $0x4] sm:$0x1] %v7575_v51 }
 0x502 PF: > { %7579 = sbr.rel (%p10348_p8) target bundleno = 1292 (0x50c), region = 88 }
 0x507   : > { %v7582_v40 = vld [vmem:[#allocation4 + $0x4c] sm:$0x1]  ;;  %v7587_v28 = vld [vmem:[#allocation5 + $0x4c] sm:$0x1]  ;;  %v11610_v4 = vmov 0  }
 0x508   : > { %7581 = vst.msk [vmem:[#allocation4 + $0x48] sm:$0xf] %vm829_vm6, %v11610_v4  ;;  %v7583_v49 = vsel %vm11739_vm4, 0, %v7582_v40  ;;  %v7588_v18 = vsel %vm11739_vm4, 0, %v7587_v28 }
 0x509   : > { %7586 = vst.msk [vmem:[#allocation5 + $0x48] sm:$0xf] %vm829_vm6, %v11610_v4 }
 0x50a   : > { %7584 = vst [vmem:[#allocation4 + $0x4c] sm:$0x1] %v7583_v49 }
 0x50b   : > { %7589 = vst [vmem:[#allocation5 + $0x4c] sm:$0x1] %v7588_v18 }
 0x50c PF: > { %v7598_v46 = vld [vmem:[%s14908_s9] sm:$0x3]  ;;  %v11158_v26 = vld [vmem:[#allocation5] sm:$0xf]  ;;  %v11471_v62 = vld [vmem:[#allocation5 + $0x4] sm:$0xf0] }
 0x50d   : > { %v7709_v13 = vsel %vm1178_vm9, %v7598_v46, 0  ;;  %v11159_v47 = vor.u32 %v11471_v62, %v11158_v26  ;;  %v7607_v60 = vld [vmem:[%s14908_s9] sm:$0xc]  ;;  %v7868_v57 = vld [vmem:[%s14908_s9 + $0x4] sm:$0x3]  ;;  %s14942_s25 = sld [smem:[#allocation21_spill]] }
 0x50e   : > { %7718 = vmatpush.bf16.msrb.mxu3 %v7709_v13  ;;  %v7629_v11 = vunpack.c.l.b16 %v7607_v60  ;;  %v7942_v29 = vld [vmem:[%s14908_s9 + $0x4] sm:$0xc]  ;;  %v11138_v2 = vld [vmem:[#allocation4] sm:$0xf]  ;;  %v11475_v7 = vld [vmem:[#allocation4 + $0x4] sm:$0xf0] }
 0x50f   : > { %v7894_v23 = vsel %vm1178_vm9, %v7868_v57, 0  ;;  %v7964_v61 = vunpack.c.l.b16 %v7942_v29  ;;  %v8028_v33 = vld [vmem:[%s14908_s9 + $0x8] sm:$0x3]  ;;  %v7740_v21 = vld [vmem:[#allocation5] sm:$0xf]  ;;  %v11139_v5 = vor.u32 %v11475_v7, %v11138_v2  ;;  %s14944_s29 = sld [smem:[#allocation22_spill]] }
 0x510   : > { %v7630_v59 = vpack.c.b16 %v7629_v11, %v7629_v11  ;;  %7903 = vmatpush.bf16.msra.mxu0 %v7894_v23  ;;  %v8062_v42 = vsel %vm1178_vm9, %v8028_v33, 0  ;;  %v7741_v41 = vld [vmem:[#allocation5 + $0x4] sm:$0x1]  ;;  %v7742_v30 = vld [vmem:[#allocation5 + $0x8] sm:$0xf]  ;;  %v7757_v6 = vshrl.u32 %v7740_v21, 16 }
 0x511   : > { %11172 = vmatmul.msk.bf16.vlgmr.msrb.gmra.mxu3 %vm1162_vm10, %v11159_v47  ;;  %v7965_v31 = vpack.c.b16 %v7964_v61, %v7964_v61  ;;  %v7743_v44 = vld [vmem:[#allocation5 + $0xc] sm:$0x1]  ;;  %v7760_v27 = vshll.u32 %v7740_v21, 16  ;;  %v7766_v9 = vshll.u32 %v7741_v41, 16  ;;  %v7771_v36 = vshrl.u32 %v7742_v30, 16 }
 0x512   : > { %v7631_v54 = vrot.slane %v7630_v59, 2  ;;  %8071 = vmatpush.bf16.msra.mxu3 %v8062_v42  ;;  %v7759_v39 = vrot.slane %v7757_v6, 4  ;;  %v7774_v32 = vshll.u32 %v7742_v30, 16  ;;  %v7780_v25 = vshll.u32 %v7743_v44, 16  ;;  %v7744_v58 = vld [vmem:[#allocation5 + $0x10] sm:$0xf] }
 0x513   : > { %v7966_v17 = vrot.slane %v7965_v31, 2  ;;  %v7762_v0 = vrot.slane %v7760_v27, 5  ;;  %v7773_v8 = vrot.slane %v7771_v36, 4  ;;  %v7768_v20 = vrot.slane %v7766_v9, 5  ;;  %v7746_v55 = vld [vmem:[#allocation5 + $0x18] sm:$0xf]  ;;  %s14943_s14 = smov %s14942_s25 }
 0x514   : > { %v7645_v1 = vsel %vm1178_vm9, %v7631_v54, 0  ;;  %v7776_v43 = vrot.slane %v7774_v32, 5  ;;  %v7782_v35 = vrot.slane %v7780_v25, 5  ;;  %v7785_v52 = vshrl.u32 %v7744_v58, 16  ;;  %v7745_v37 = vld [vmem:[#allocation5 + $0x14] sm:$0x1] }
 0x515   : > { %7654 = vmatpush.bf16.msrb.mxu2 %v7645_v1  ;;  %v7980_v16 = vsel %vm1178_vm9, %v7966_v17, 0  ;;  %v7763_v53 = vor.u32 %v7762_v0, %v7759_v39  ;;  %v7788_v10 = vshll.u32 %v7744_v58, 16  ;;  %v7799_v22 = vshrl.u32 %v7746_v55, 16  ;;  %v7747_v45 = vld [vmem:[#allocation5 + $0x1c] sm:$0x1]  ;;  %s14945_s18 = smov %s14944_s29 }
 0x516   : > { %v7777_v24 = vor.u32 %v7776_v43, %v7773_v8  ;;  %v7802_v50 = vshll.u32 %v7746_v55, 16  ;;  %v7787_v56 = vrot.slane %v7785_v52, 4  ;;  %v11162_v38 = vld [vmem:[#allocation5 + $0x10] sm:$0xf]  ;;  %v11472_v34 = vld [vmem:[#allocation5 + $0x14] sm:$0xf0] }
 0x517   : > { %v7764_v14 = vrot.slane %v7763_v53, 4  ;;  %v7790_v63 = vrot.slane %v7788_v10, 5  ;;  %v7801_v51 = vrot.slane %v7799_v22, 4  ;;  %v7794_v49 = vshll.u32 %v7745_v37, 16  ;;  %v7748_v26 = vld [vmem:[#allocation5 + $0x20] sm:$0xf] }
 0x518   : > { %11152 = vmatmul.msk.bf16.vlgmr.msrb.gmra.mxu2 %vm1162_vm10, %v11139_v5  ;;  %v7778_v12 = vrot.slane %v7777_v24, 4  ;;  %v7804_v40 = vrot.slane %v7802_v50, 5  ;;  %v7808_v46 = vshll.u32 %v7747_v45, 16  ;;  %v11163_v13 = vor.u32 %v11472_v34, %v11162_v38  ;;  %v11142_v47 = vld [vmem:[#allocation4 + $0x10] sm:$0xf] }
 0x519   : > { %7989 = vmatpush.bf16.msra.mxu2 %v7980_v16  ;;  %v7769_v3 = vsel %vm12052_vm13, %v7764_v14, %v7768_v20  ;;  %v7791_v4 = vor.u32 %v7790_v63, %v7787_v56  ;;  %v11476_v60 = vld [vmem:[#allocation4 + $0x14] sm:$0xf0]  ;;  %v7813_v11 = vshrl.u32 %v7748_v26, 16  ;;  %v7816_v57 = vshll.u32 %v7748_v26, 16  ;;  %v7749_v30 = vld [vmem:[#allocation5 + $0x24] sm:$0x1] }
 0x51a   : > { %v7783_v15 = vsel %vm12052_vm13, %v7778_v12, %v7782_v35  ;;  %v7869_v19 = vunpack.c.l.b16 %v7769_v3  ;;  %v7805_v18 = vor.u32 %v7804_v40, %v7801_v51  ;;  %v7796_v2 = vrot.slane %v7794_v49, 5  ;;  %v7750_v61 = vld [vmem:[#allocation5 + $0x28] sm:$0xf]  ;;  %v7751_v32 = vld [vmem:[#allocation5 + $0x2c] sm:$0x1] }
 0x51b   : > { %v7870_v28 = vunpack.c.l.b16 %v7783_v15  ;;  %v7792_v29 = vrot.slane %v7791_v4, 4  ;;  %v7810_v23 = vrot.slane %v7808_v46, 5  ;;  %v11143_v33 = vor.u32 %v11476_v60, %v11142_v47  ;;  %v11166_v25 = vld [vmem:[#allocation5 + $0x20] sm:$0xf]  ;;  %v11473_v17 = vld [vmem:[#allocation5 + $0x24] sm:$0xf0] }
 0x51c   : > { %v7806_v7 = vrot.slane %v7805_v18, 4  ;;  %v7815_v21 = vrot.slane %v7813_v11, 4  ;;  %v7818_v59 = vrot.slane %v7816_v57, 5  ;;  %v7827_v6 = vshrl.u32 %v7750_v61, 16  ;;  %v7752_v16 = vld [vmem:[#allocation5 + $0x30] sm:$0xf] }
 0x51d   : > { %v7877_v62 = vpack.c.b16 %v7870_v28, %v7869_v19  ;;  %v7797_v42 = vsel %vm12052_vm13, %v7792_v29, %v7796_v2  ;;  %v7830_v31 = vshll.u32 %v7750_v61, 16  ;;  %v7822_v36 = vshll.u32 %v7749_v30, 16  ;;  %v11146_v20 = vld [vmem:[#allocation4 + $0x20] sm:$0xf]  ;;  %v11477_v58 = vld [vmem:[#allocation4 + $0x24] sm:$0xf0] }
 0x51e   : > { %v7811_v41 = vsel %vm12052_vm13, %v7806_v7, %v7810_v23  ;;  %v7871_v44 = vunpack.c.l.b16 %v7797_v42  ;;  %v7819_v9 = vor.u32 %v7818_v59, %v7815_v21  ;;  %v7829_v54 = vrot.slane %v7827_v6, 4  ;;  %v7754_v24 = vld [vmem:[#allocation5 + $0x38] sm:$0xf]  ;;  %v8101_v12 = vld [vmem:[#allocation5 + $0x8] sm:$0xf] }
 0x51f   : > { %11176 = vmatmul.msk.bf16.vlgmr.msra.gmra.mxu0 %vm1162_vm10, %v7877_v62  ;;  %v7872_v27 = vunpack.c.l.b16 %v7811_v41  ;;  %v7832_v39 = vrot.slane %v7830_v31, 5  ;;  %v7824_v1 = vrot.slane %v7822_v36, 5  ;;  %v7836_v43 = vshll.u32 %v7751_v32, 16  ;;  %v8103_v22 = vld [vmem:[#allocation5 + $0x10] sm:$0xf] }
 0x520   : > { %v7820_v8 = vrot.slane %v7819_v9, 4  ;;  %v11167_v53 = vor.u32 %v11473_v17, %v11166_v25  ;;  %v7841_v55 = vshrl.u32 %v7752_v16, 16  ;;  %v7844_v14 = vshll.u32 %v7752_v16, 16  ;;  %v8229_v45 = vld [vmem:[%s14908_s9 + $0x8] sm:$0xc] }
 0x521   : > { %11173 = vmatmul.msk.bf16.gmra.mxu3 %vm1162_vm10, %v11163_v13  ;;  %v7878_v0 = vpack.c.b16 %v7872_v27, %v7871_v44  ;;  %v7833_v5 = vor.u32 %v7832_v39, %v7829_v54  ;;  %v7838_v10 = vrot.slane %v7836_v43, 5  ;;  %v11147_v50 = vor.u32 %v11477_v58, %v11146_v20  ;;  %v8102_v49 = vld [vmem:[#allocation5 + $0xc] sm:$0x1]  ;;  %v8104_v18 = vld [vmem:[#allocation5 + $0x14] sm:$0x1] }
 0x522   : > { %v7825_v35 = vsel %vm12052_vm13, %v7820_v8, %v7824_v1  ;;  %v7855_v3 = vshrl.u32 %v7754_v24, 16  ;;  %v7858_v37 = vshll.u32 %v7754_v24, 16  ;;  %v8243_v63 = vunpack.c.l.b16 %v8229_v45  ;;  %v7753_v23 = vld [vmem:[#allocation5 + $0x34] sm:$0x1]  ;;  %v8307_v42 = vld [vmem:[%s14908_s9 + $0xc] sm:$0x3] }
 0x523   : > { %v7834_v52 = vrot.slane %v7833_v5, 4  ;;  %v7873_v56 = vunpack.c.l.b16 %v7825_v35  ;;  %v8118_v15 = vshrl.u32 %v8101_v12, 16  ;;  %v8121_v19 = vshll.u32 %v8101_v12, 16  ;;  %v8389_v41 = vld [vmem:[%s14908_s9 + $0xc] sm:$0xc] }
 0x524   : > { %v7843_v38 = vrot.slane %v7841_v55, 4  ;;  %v7846_v34 = vrot.slane %v7844_v14, 5  ;;  %v8132_v51 = vshrl.u32 %v8103_v22, 16  ;;  %v8135_v40 = vshll.u32 %v8103_v22, 16  ;;  %v7755_v6 = vld [vmem:[#allocation5 + $0x3c] sm:$0x1] }
 0x525   : > { %v7839_v28 = vsel %vm12052_vm13, %v7834_v52, %v7838_v10  ;;  %v8244_v4 = vpack.c.b16 %v8243_v63, %v8243_v63  ;;  %v8120_v46 = vrot.slane %v8118_v15, 4  ;;  %v8123_v26 = vrot.slane %v8121_v19, 5  ;;  %v8594_v9 = vld [vmem:[%s14908_s9 + $0x10] sm:$0x3]  ;;  %v11170_v36 = vld [vmem:[#allocation5 + $0x30] sm:$0xf] }
 0x526   : > { %v8127_v62 = vshll.u32 %v8102_v49, 16  ;;  %v8134_v13 = vrot.slane %v8132_v51, 4  ;;  %v8137_v47 = vrot.slane %v8135_v40, 5  ;;  %v8141_v60 = vshll.u32 %v8104_v18, 16  ;;  %v11474_v54 = vld [vmem:[#allocation5 + $0x34] sm:$0xf0] }
 0x527   : > { %v7857_v11 = vrot.slane %v7855_v3, 4  ;;  %v7860_v57 = vrot.slane %v7858_v37, 5  ;;  %v8245_v29 = vrot.slane %v8244_v4, 2  ;;  %v8124_v2 = vor.u32 %v8123_v26, %v8120_v46  ;;  %v11150_v24 = vld [vmem:[#allocation4 + $0x30] sm:$0xf] }
 0x528   : > { %11153 = vmatmul.msk.bf16.gmra.mxu2 %vm1162_vm10, %v11143_v33  ;;  %v7874_v7 = vunpack.c.l.b16 %v7839_v28  ;;  %v8129_v61 = vrot.slane %v8127_v62, 5  ;;  %v8138_v33 = vor.u32 %v8137_v47, %v8134_v13  ;;  %v8143_v21 = vrot.slane %v8141_v60, 5  ;;  %v11478_v55 = vld [vmem:[#allocation4 + $0x34] sm:$0xf0]  ;;  %v8107_v3 = vld [vmem:[#allocation5 + $0x20] sm:$0xf] }
 0x529   : > { %v8259_v59 = vsel %vm1178_vm9, %v8245_v29, 0  ;;  %v8125_v30 = vrot.slane %v8124_v2, 4  ;;  %v8341_v31 = vsel %vm1178_vm9, %v8307_v42, 0  ;;  %v8411_v44 = vunpack.c.l.b16 %v8389_v41  ;;  %v8848_v37 = vld [vmem:[%s14908_s9] sm:$0xc] }
 0x52a   : > { %8268 = vmatpush.bf16.msra.mxu1 %v8259_v59  ;;  %v8139_v27 = vrot.slane %v8138_v33, 4  ;;  %v7847_v39 = vor.u32 %v7846_v34, %v7843_v38  ;;  %v7850_v32 = vshll.u32 %v7753_v23, 16  ;;  %8350 = vmatpush.bf16.msrb.mxu0 %v8341_v31  ;;  %v8620_v17 = vsel %vm1178_vm9, %v8594_v9, 0  ;;  %v8106_v28 = vld [vmem:[#allocation5 + $0x1c] sm:$0x1] }
 0x52b   : > { %v8130_v25 = vsel %vm12052_vm13, %v8125_v30, %v8129_v61  ;;  %v8412_v8 = vpack.c.b16 %v8411_v44, %v8411_v44  ;;  %8629 = vmatpush.bf16.msrb.mxu3 %v8620_v17  ;;  %v7861_v43 = vor.u32 %v7860_v57, %v7857_v11  ;;  %v7864_v16 = vshll.u32 %v7755_v6, 16  ;;  %v8108_v4 = vld [vmem:[#allocation5 + $0x24] sm:$0x1]  ;;  %v11483_v59 = vld [vmem:[#allocation4 + $0xc] sm:$0xf0] }
 0x52c   : > { %v8144_v1 = vsel %vm12052_vm13, %v8139_v27, %v8143_v21  ;;  %v8230_v5 = vunpack.c.l.b16 %v8130_v25  ;;  %v11171_v20 = vor.u32 %v11474_v54, %v11170_v36  ;;  %v7848_v14 = vrot.slane %v7847_v39, 4  ;;  %v11202_v21 = vld [vmem:[#allocation4 + $0x8] sm:$0xf]  ;;  %v8109_v9 = vld [vmem:[#allocation5 + $0x28] sm:$0xf] }
 0x52d   : > { %v8413_v58 = vrot.slane %v8412_v8, 2  ;;  %v7852_v52 = vrot.slane %v7850_v32, 5  ;;  %v7862_v12 = vrot.slane %v7861_v43, 4  ;;  %v7866_v22 = vrot.slane %v7864_v16, 5  ;;  %v8111_v36 = vld [vmem:[#allocation5 + $0x30] sm:$0xf] }
 0x52e   : > { %v8862_v45 = vunpack.c.l.b16 %v8848_v37  ;;  %v11151_v15 = vor.u32 %v11478_v55, %v11150_v24  ;;  %v8160_v38 = vshrl.u32 %v8107_v3, 16  ;;  %v8163_v34 = vshll.u32 %v8107_v3, 16  ;;  %v11182_v54 = vld [vmem:[#allocation5 + $0x8] sm:$0xf]  ;;  %v11479_v39 = vld [vmem:[#allocation5 + $0xc] sm:$0xf0] }
 0x52f   : > { %11177 = vmatmul.msk.bf16.gmra.mxu0 %vm1162_vm10, %v7878_v0  ;;  %v7879_v0 = vpack.c.b16 %v7874_v7, %v7873_v56  ;;  %v8427_v10 = vsel %vm1178_vm9, %v8413_v58, 0  ;;  %v7853_v19 = vsel %vm12052_vm13, %v7848_v14, %v7852_v52  ;;  %v7867_v51 = vsel %vm12052_vm13, %v7862_v12, %v7866_v22  ;;  %v8110_v43 = vld [vmem:[#allocation5 + $0x2c] sm:$0x1]  ;;  %v8112_v16 = vld [vmem:[#allocation5 + $0x34] sm:$0x1] }
 0x530   : > { %8436 = vmatpush.bf16.msrb.mxu2 %v8427_v10  ;;  %v8863_v40 = vpack.c.b16 %v8862_v45, %v8862_v45  ;;  %v8155_v46 = vshll.u32 %v8106_v28, 16  ;;  %v8162_v26 = vrot.slane %v8160_v38, 4  ;;  %v8165_v62 = vrot.slane %v8163_v34, 5  ;;  %v11226_v12 = vld [vmem:[#allocation5 + $0x10] sm:$0xf] }
 0x531   : > { %11174 = vmatmul.msk.bf16.gmra.mxu3 %vm1162_vm10, %v11167_v53  ;;  %v8231_v53 = vunpack.c.l.b16 %v8144_v1  ;;  %v8169_v13 = vshll.u32 %v8108_v4, 16  ;;  %v7875_v47 = vunpack.c.l.b16 %v7853_v19  ;;  %v7876_v57 = vunpack.c.l.b16 %v7867_v51  ;;  %v11487_v22 = vld [vmem:[#allocation5 + $0x14] sm:$0xf0]  ;;  %v11206_v37 = vld [vmem:[#allocation4 + $0x18] sm:$0xf] }
 0x532   : > { %v8864_v60 = vrot.slane %v8863_v40, 2  ;;  %v8157_v29 = vrot.slane %v8155_v46, 5  ;;  %v8166_v2 = vor.u32 %v8165_v62, %v8162_v26  ;;  %v11203_v44 = vor.u32 %v11483_v59, %v11202_v21  ;;  %v11484_v45 = vld [vmem:[#allocation4 + $0x1c] sm:$0xf0]  ;;  %v8113_v51 = vld [vmem:[#allocation5 + $0x38] sm:$0xf] }
 0x533   : > { %v8238_v35 = vpack.c.b16 %v8231_v53, %v8230_v5  ;;  %v8171_v7 = vrot.slane %v8169_v13, 5  ;;  %v7880_v41 = vpack.c.b16 %v7876_v57, %v7875_v47  ;;  %v8174_v32 = vshrl.u32 %v8109_v9, 16  ;;  %v8115_v40 = vld [vmem:[#allocation5 + $0x40] sm:$0xf]  ;;  %v11186_v28 = vld [vmem:[#allocation5 + $0x18] sm:$0xf] }
 0x534   : > { %v8878_v23 = vsel %vm1178_vm9, %v8864_v60, 0  ;;  %v8167_v33 = vrot.slane %v8166_v2, 4  ;;  %v8177_v25 = vshll.u32 %v8109_v9, 16  ;;  %v8188_v17 = vshrl.u32 %v8111_v36, 16  ;;  %v11480_v4 = vld [vmem:[#allocation5 + $0x1c] sm:$0xf0] }
 0x535   : > { %11220 = vmatmul.msk.bf16.vlgmr.msra.gmra.mxu1 %vm1162_vm10, %v8238_v35  ;;  %v8176_v8 = vrot.slane %v8174_v32, 4  ;;  %v11183_v5 = vor.u32 %v11479_v39, %v11182_v54  ;;  %v8183_v24 = vshll.u32 %v8110_v43, 16  ;;  %v8197_v35 = vshll.u32 %v8112_v16, 16  ;;  %v8114_v60 = vld [vmem:[#allocation5 + $0x3c] sm:$0x1] }
 0x536   : > { %8887 = vmatpush.bf16.msrb.mxu1 %v8878_v23  ;;  %v8172_v30 = vsel %vm12052_vm13, %v8167_v33, %v8171_v7  ;;  %v8179_v1 = vrot.slane %v8177_v25, 5  ;;  %v8190_v53 = vrot.slane %v8188_v17, 4  ;;  %v11207_v38 = vor.u32 %v11484_v45, %v11206_v37  ;;  %v11190_v25 = vld [vmem:[#allocation5 + $0x28] sm:$0xf]  ;;  %v8466_v17 = vld [vmem:[#allocation5 + $0x10] sm:$0xf] }
 0x537   : > { %v8233_v31 = vunpack.c.l.b16 %v8172_v30  ;;  %v8185_v52 = vrot.slane %v8183_v24, 5  ;;  %v8199_v10 = vrot.slane %v8197_v35, 5  ;;  %v8216_v46 = vshrl.u32 %v8115_v40, 16 }
 0x538   : > { %11154 = vmatmul.msk.bf16.gmra.mxu2 %vm1162_vm10, %v11147_v50  ;;  %v8105_v50 = vld [vmem:[#allocation5 + $0x18] sm:$0xf]  ;;  %v8180_v58 = vor.u32 %v8179_v1, %v8176_v8  ;;  %v8219_v26 = vshll.u32 %v8115_v40, 16  ;;  %v11187_v47 = vor.u32 %v11480_v4, %v11186_v28  ;;  %v8211_v7 = vshll.u32 %v8114_v60, 16  ;;  %v8720_v8 = vld [vmem:[#allocation5] sm:$0xf] }
 0x539   : > { %v8146_v56 = vshrl.u32 %v8105_v50, 16  ;;  %v8149_v63 = vshll.u32 %v8105_v50, 16  ;;  %v8218_v57 = vrot.slane %v8216_v46, 4  ;;  %v8722_v1 = vld [vmem:[#allocation5 + $0x8] sm:$0xf]  ;;  %v8737_v43 = vshrl.u32 %v8720_v8, 16 }
 0x53a   : > { %v8181_v14 = vrot.slane %v8180_v58, 4  ;;  %v8213_v21 = vrot.slane %v8211_v7, 5  ;;  %v8740_v16 = vshll.u32 %v8720_v8, 16  ;;  %v8486_v58 = vshll.u32 %v8466_v17, 16  ;;  %v8467_v4 = vld [vmem:[#allocation5 + $0x14] sm:$0x1] }
 0x53b   : > { %v8148_v49 = vrot.slane %v8146_v56, 4  ;;  %v8151_v18 = vrot.slane %v8149_v63, 5  ;;  %v8754_v24 = vshll.u32 %v8722_v1, 16  ;;  %v11486_v60 = vld [vmem:[#allocation4 + $0x3c] sm:$0xf0]  ;;  %v8492_v7 = vshll.u32 %v8467_v4, 16 }
 0x53c   : > { %v8186_v3 = vsel %vm12052_vm13, %v8181_v14, %v8185_v52  ;;  %v8739_v14 = vrot.slane %v8737_v43, 4  ;;  %v8742_v52 = vrot.slane %v8740_v16, 5 }
 0x53d   : > { %v8152_v11 = vor.u32 %v8151_v18, %v8148_v49  ;;  %v8234_v63 = vunpack.c.l.b16 %v8186_v3  ;;  %v8202_v49 = vshrl.u32 %v8113_v51, 16  ;;  %v8205_v18 = vshll.u32 %v8113_v51, 16 }
 0x53e   : > { %v8756_v3 = vrot.slane %v8754_v24, 5  ;;  %v8743_v37 = vor.u32 %v8742_v52, %v8739_v14 }
 0x53f   : > { %11178 = vmatmul.msk.bf16.gmra.mxu0 %vm1162_vm10, %v7879_v0  ;;  %v8153_v61 = vrot.slane %v8152_v11, 4  ;;  %v8191_v0 = vshll.u32 %v8111_v36, 16  ;;  %v8204_v62 = vrot.slane %v8202_v49, 4  ;;  %v8207_v13 = vrot.slane %v8205_v18, 5  ;;  %v8116_v11 = vld [vmem:[#allocation5 + $0x44] sm:$0x1] }
 0x540   : > { %v8225_v23 = vshll.u32 %v8116_v11, 16  ;;  %v8744_v51 = vrot.slane %v8743_v37, 4  ;;  %v8719_v11 = vld [vmem:[%s14908_s9] sm:$0x3]  ;;  %v8727_v37 = vld [vmem:[#allocation5 + $0x1c] sm:$0x1] }
 0x541   : > { %11175 = vmatmul.msk.bf16.gmra.mxu3 %vm1162_vm10, %v11171_v20  ;;  %v8158_v42 = vsel %vm12052_vm13, %v8153_v61, %v8157_v29  ;;  %v8193_v20 = vrot.slane %v8191_v0, 5  ;;  %v8221_v29 = vrot.slane %v8219_v26, 5  ;;  %v8208_v2 = vor.u32 %v8207_v13, %v8204_v62  ;;  %v8468_v0 = vld [vmem:[#allocation5 + $0x18] sm:$0xf]  ;;  %v8469_v26 = vld [vmem:[#allocation5 + $0x1c] sm:$0x1] }
 0x542   : > { %v8232_v6 = vunpack.c.l.b16 %v8158_v42  ;;  %v8227_v59 = vrot.slane %v8225_v23, 5  ;;  %v11230_v42 = vld [vmem:[#allocation5 + $0x20] sm:$0xf]  ;;  %v8497_v35 = vshrl.u32 %v8468_v0, 16  ;;  %v8942_v23 = vsel %vm1178_vm9, %v8719_v11, 0 }
 0x543   : > { %v8194_v55 = vor.u32 %v8193_v20, %v8190_v53  ;;  %v8222_v61 = vor.u32 %v8221_v29, %v8218_v57  ;;  %v8209_v33 = vrot.slane %v8208_v2, 4  ;;  %v8751_v53 = vshrl.u32 %v8722_v1, 16  ;;  %8951 = vmatpush.bf16.msra.mxu0 %v8942_v23 }
 0x544   : > { %v8239_v27 = vpack.c.b16 %v8233_v31, %v8232_v6  ;;  %v11210_v31 = vld [vmem:[#allocation4 + $0x28] sm:$0xf]  ;;  %v8483_v20 = vshrl.u32 %v8466_v17, 16  ;;  %v8499_v49 = vrot.slane %v8497_v35, 4 }
 0x545   : > { %v8195_v50 = vrot.slane %v8194_v55, 4  ;;  %v8223_v30 = vrot.slane %v8222_v61, 4  ;;  %v8214_v6 = vsel %vm12052_vm13, %v8209_v33, %v8213_v21  ;;  %v8500_v55 = vshll.u32 %v8468_v0, 16  ;;  %v8726_v17 = vld [vmem:[#allocation5 + $0x18] sm:$0xf] }
 0x546   : > { %11221 = vmatmul.msk.bf16.gmra.mxu1 %vm1162_vm10, %v8239_v27  ;;  %v8236_v9 = vunpack.c.l.b16 %v8214_v6  ;;  %v8506_v21 = vshll.u32 %v8469_v26, 16  ;;  %v11482_v0 = vld [vmem:[#allocation5 + $0x3c] sm:$0xf0]  ;;  %v8779_v16 = vshrl.u32 %v8726_v17, 16 }
 0x547   : > { %v8200_v56 = vsel %vm12052_vm13, %v8195_v50, %v8199_v10  ;;  %v8228_v27 = vsel %vm12052_vm13, %v8223_v30, %v8227_v59  ;;  %v8753_v50 = vrot.slane %v8751_v53, 4  ;;  %v8502_v18 = vrot.slane %v8500_v55, 5  ;;  %v9101_v59 = vld [vmem:[%s14908_s9 + $0x4] sm:$0x3] }
 0x548   : > { %11155 = vmatmul.msk.bf16.gmra.mxu2 %vm1162_vm10, %v11151_v15  ;;  %v11227_v15 = vor.u32 %v11487_v22, %v11226_v12  ;;  %v8235_v19 = vunpack.c.l.b16 %v8200_v56  ;;  %v8237_v54 = vunpack.c.l.b16 %v8228_v27  ;;  %v8721_v12 = vld [vmem:[#allocation5 + $0x4] sm:$0x1]  ;;  %v8723_v22 = vld [vmem:[#allocation5 + $0xc] sm:$0x1]  ;;  %v9127_v30 = vsel %vm1178_vm9, %v9101_v59, 0 }
 0x549   : > { %v8746_v45 = vshll.u32 %v8721_v12, 16  ;;  %v8760_v56 = vshll.u32 %v8723_v22, 16  ;;  %v8503_v33 = vor.u32 %v8502_v18, %v8499_v49  ;;  %v8782_v53 = vshll.u32 %v8726_v17, 16  ;;  %v9379_v12 = vld [vmem:[%s14908_s9 + $0x8] sm:$0x3] }
 0x54a   : > { %v8240_v34 = vpack.c.b16 %v8235_v19, %v8234_v63  ;;  %v8241_v32 = vpack.c.b16 %v8237_v54, %v8236_v9  ;;  %v11234_v63 = vld [vmem:[#allocation5 + $0x30] sm:$0xf]  ;;  %v8757_v19 = vor.u32 %v8756_v3, %v8753_v50  ;;  %v8494_v9 = vrot.slane %v8492_v7, 5  ;;  %v8470_v54 = vld [vmem:[#allocation5 + $0x20] sm:$0xf] }
 0x54b   : > { %v8748_v40 = vrot.slane %v8746_v45, 5  ;;  %v8762_v28 = vrot.slane %v8760_v56, 5  ;;  %v8511_v43 = vshrl.u32 %v8470_v54, 16  ;;  %v8514_v24 = vshll.u32 %v8470_v54, 16  ;;  %v8725_v22 = vld [vmem:[#allocation5 + $0x14] sm:$0x1] }
 0x54c   : > { %v8758_v46 = vrot.slane %v8757_v19, 4  ;;  %v8781_v50 = vrot.slane %v8779_v16, 4  ;;  %v9405_v3 = vsel %vm1178_vm9, %v9379_v12, 0  ;;  %v8774_v56 = vshll.u32 %v8725_v22, 16  ;;  %v11238_v49 = vld [vmem:[#allocation5 + $0x40] sm:$0xf] }
 0x54d   : > { %v8749_v62 = vsel %vm12052_vm13, %v8744_v51, %v8748_v40  ;;  %9414 = vmatpush.bf16.msra.mxu1 %v9405_v3  ;;  %v8516_v51 = vrot.slane %v8514_v24, 5  ;;  %v11490_v18 = vld [vmem:[#allocation5 + $0x44] sm:$0xf0]  ;;  %v8473_v7 = vld [vmem:[#allocation5 + $0x2c] sm:$0x1] }
 0x54e   : > { %v8763_v57 = vsel %vm12052_vm13, %v8758_v46, %v8762_v28  ;;  %v8849_v29 = vunpack.c.l.b16 %v8749_v62  ;;  %v8776_v28 = vrot.slane %v8774_v56, 5 }
 0x54f   : > { %11179 = vmatmul.msk.bf16.gmra.mxu0 %vm1162_vm10, %v7880_v41  ;;  %v11488_v41 = vld [vmem:[#allocation5 + $0x24] sm:$0xf0]  ;;  %v8850_v61 = vunpack.c.l.b16 %v8763_v57 }
 0x550   : > { %v11231_v36 = vor.u32 %v11488_v41, %v11230_v42  ;;  %v9174_v42 = vld [vmem:[%s14908_s9 + $0x4] sm:$0xc] }
 0x551   : > { %11216 = vmatmul.msk.bf16.vlgmr.msra.gmra.mxu3 %vm1162_vm10, %v11203_v44  ;;  %v11485_v44 = vld [vmem:[#allocation4 + $0x2c] sm:$0xf0]  ;;  %v8857_v6 = vpack.c.b16 %v8850_v61, %v8849_v29 }
 0x552   : > { %v11211_v39 = vor.u32 %v11485_v44, %v11210_v31  ;;  %v9196_v31 = vunpack.c.l.b16 %v9174_v42  ;;  %v11194_v44 = vld [vmem:[#allocation5 + $0x38] sm:$0xf] }
 0x553   : > { %v11195_v14 = vor.u32 %v11482_v0, %v11194_v44  ;;  %v8474_v44 = vld [vmem:[#allocation5 + $0x30] sm:$0xf] }
 0x554   : > { %v8542_v24 = vshll.u32 %v8474_v44, 16 }
 0x556   : > { %11222 = vmatmul.msk.bf16.gmra.mxu1 %vm1162_vm10, %v8240_v34  ;;  %v8488_v34 = vrot.slane %v8486_v58, 5  ;;  %v8472_v58 = vld [vmem:[#allocation5 + $0x28] sm:$0xf] }
 0x557   : > { %v8525_v19 = vshrl.u32 %v8472_v58, 16 }
 0x558   : > { %11196 = vmatmul.msk.bf16.vlgmr.msra.gmra.mxu2 %vm1162_vm10, %v11183_v5  ;;  %v11481_v5 = vld [vmem:[#allocation5 + $0x2c] sm:$0xf0] }
 0x559   : > { %v11191_v10 = vor.u32 %v11481_v5, %v11190_v25  ;;  %9136 = vmatpush.bf16.msra.mxu2 %v9127_v30  ;;  %v8724_v25 = vld [vmem:[#allocation5 + $0x10] sm:$0xf]  ;;  %v8527_v11 = vrot.slane %v8525_v19, 4 }
 0x55a   : > { %v8765_v1 = vshrl.u32 %v8724_v25, 16  ;;  %v8768_v5 = vshll.u32 %v8724_v25, 16 }
 0x55c   : > { %v8767_v35 = vrot.slane %v8765_v1, 4  ;;  %v8770_v55 = vrot.slane %v8768_v5, 5  ;;  %v8476_v1 = vld [vmem:[#allocation5 + $0x38] sm:$0xf]  ;;  %v8539_v5 = vshrl.u32 %v8474_v44, 16 }
 0x55e   : > { %v8771_v45 = vor.u32 %v8770_v55, %v8767_v35  ;;  %v8729_v35 = vld [vmem:[#allocation5 + $0x24] sm:$0x1]  ;;  %v8731_v55 = vld [vmem:[#allocation5 + $0x2c] sm:$0x1] }
 0x55f   : > { %11240 = vmatmul.msk.bf16.vlgmr.msrb.gmra.mxu0 %vm1162_vm10, %v11227_v15  ;;  %v8485_v15 = vrot.slane %v8483_v20, 4  ;;  %v8802_v12 = vshll.u32 %v8729_v35, 16  ;;  %v8816_v22 = vshll.u32 %v8731_v55, 16 }
 0x560   : > { %v8772_v40 = vrot.slane %v8771_v45, 4  ;;  %v8556_v45 = vshll.u32 %v8476_v1, 16 }
 0x561   : > { %11217 = vmatmul.msk.bf16.gmra.mxu3 %vm1162_vm10, %v11207_v38  ;;  %v11489_v38 = vld [vmem:[#allocation5 + $0x34] sm:$0xf0]  ;;  %v8489_v2 = vor.u32 %v8488_v34, %v8485_v15  ;;  %v8513_v15 = vrot.slane %v8511_v43, 4  ;;  %v8788_v34 = vshll.u32 %v8727_v37, 16  ;;  %v8553_v37 = vshrl.u32 %v8476_v1, 16 }
 0x562   : > { %v11235_v13 = vor.u32 %v11489_v38, %v11234_v63  ;;  %v8784_v63 = vrot.slane %v8782_v53, 5  ;;  %v8528_v38 = vshll.u32 %v8472_v58, 16 }
 0x563   : > { %v8490_v27 = vrot.slane %v8489_v2, 4  ;;  %v8790_v46 = vrot.slane %v8788_v34, 5  ;;  %v11239_v2 = vor.u32 %v11490_v18, %v11238_v49  ;;  %v8517_v23 = vor.u32 %v8516_v51, %v8513_v15  ;;  %v8475_v51 = vld [vmem:[#allocation5 + $0x34] sm:$0x1] }
 0x564   : > { %v8785_v4 = vor.u32 %v8784_v63, %v8781_v50  ;;  %v8530_v57 = vrot.slane %v8528_v38, 5  ;;  %v11274_v50 = vld [vmem:[#allocation4] sm:$0xf]  ;;  %v11495_v63 = vld [vmem:[#allocation4 + $0x4] sm:$0xf0]  ;;  %v8541_v15 = vrot.slane %v8539_v5, 4 }
 0x565   : > { %v8495_v52 = vsel %vm12052_vm13, %v8490_v27, %v8494_v9  ;;  %v8728_v27 = vld [vmem:[#allocation5 + $0x20] sm:$0xf]  ;;  %v8730_v9 = vld [vmem:[#allocation5 + $0x28] sm:$0xf]  ;;  %v8804_v38 = vrot.slane %v8802_v12, 5  ;;  %v8818_v34 = vrot.slane %v8816_v22, 5 }
 0x566   : > { %11223 = vmatmul.msk.bf16.gmra.mxu1 %vm1162_vm10, %v8241_v32  ;;  %v8508_v32 = vrot.slane %v8506_v21, 5  ;;  %v8595_v26 = vunpack.c.l.b16 %v8495_v52  ;;  %v8531_v42 = vor.u32 %v8530_v57, %v8527_v11  ;;  %v8807_v25 = vshrl.u32 %v8730_v9, 16  ;;  %v8735_v12 = vld [vmem:[#allocation5 + $0x3c] sm:$0x1] }
 0x567   : > { %v11275_v11 = vor.u32 %v11495_v63, %v11274_v50  ;;  %v8548_v57 = vshll.u32 %v8475_v51, 16  ;;  %v8481_v51 = vld [vmem:[#allocation5 + $0x4c] sm:$0x1] }
 0x568   : > { %11197 = vmatmul.msk.bf16.gmra.mxu2 %vm1162_vm10, %v11187_v47  ;;  %v11214_v47 = vld [vmem:[#allocation4 + $0x38] sm:$0xf]  ;;  %v8532_v17 = vrot.slane %v8531_v42, 4  ;;  %v8809_v53 = vrot.slane %v8807_v25, 4  ;;  %v8478_v42 = vld [vmem:[#allocation5 + $0x40] sm:$0xf] }
 0x569   : > { %v11215_v41 = vor.u32 %v11486_v60, %v11214_v47  ;;  %v8786_v47 = vrot.slane %v8785_v4, 4  ;;  %v8471_v60 = vld [vmem:[#allocation5 + $0x24] sm:$0x1] }
 0x56a   : > { %v8520_v59 = vshll.u32 %v8471_v60, 16 }
 0x56b   : > { %v8791_v61 = vsel %vm12052_vm13, %v8786_v47, %v8790_v46 }
 0x56c   : > { %v8522_v54 = vrot.slane %v8520_v59, 5 }
 0x56f   : > { %11241 = vmatmul.msk.bf16.gmra.mxu0 %vm1162_vm10, %v11231_v36  ;;  %v9197_v36 = vpack.c.b16 %v9196_v31, %v9196_v31  ;;  %v8518_v31 = vrot.slane %v8517_v23, 4 }
 0x571   : > { %11218 = vmatmul.msk.bf16.gmra.mxu3 %vm1162_vm10, %v11211_v39  ;;  %v8504_v39 = vrot.slane %v8503_v33, 4  ;;  %v9198_v8 = vrot.slane %v9197_v36, 2  ;;  %v8852_v33 = vunpack.c.l.b16 %v8791_v61  ;;  %v11491_v36 = vld [vmem:[#allocation4 + $0x14] sm:$0xf0]  ;;  %v8523_v52 = vsel %vm12052_vm13, %v8518_v31, %v8522_v54  ;;  %v8732_v54 = vld [vmem:[#allocation5 + $0x30] sm:$0xf] }
 0x572   : > { %v8597_v49 = vunpack.c.l.b16 %v8523_v52  ;;  %v8550_v31 = vrot.slane %v8548_v57, 5  ;;  %v8821_v25 = vshrl.u32 %v8732_v54, 16  ;;  %v8590_v57 = vshll.u32 %v8481_v51, 16 }
 0x573   : > { %v9212_v20 = vsel %vm1178_vm9, %v9198_v8, 0  ;;  %v8810_v8 = vshll.u32 %v8730_v9, 16 }
 0x574   : > { %9221 = vmatpush.bf16.msra.mxu3 %v9212_v20 }
 0x576   : > { %11268 = vmatmul.msk.bf16.vlgmr.msrb.gmra.mxu1 %vm1162_vm10, %v8857_v6  ;;  %v11246_v6 = vld [vmem:[#allocation4 + $0x10] sm:$0xf] }
 0x577   : > { %v11247_v58 = vor.u32 %v11491_v36, %v11246_v6  ;;  %v11492_v6 = vld [vmem:[#allocation4 + $0x24] sm:$0xf0]  ;;  %v8567_v36 = vshrl.u32 %v8478_v42, 16 }
 0x578   : > { %11198 = vmatmul.msk.bf16.gmra.mxu2 %vm1162_vm10, %v11191_v10  ;;  %v8509_v10 = vsel %vm12052_vm13, %v8504_v39, %v8508_v32  ;;  %v8793_v39 = vshrl.u32 %v8728_v27, 16  ;;  %v8796_v32 = vshll.u32 %v8728_v27, 16  ;;  %v8480_v27 = vld [vmem:[#allocation5 + $0x48] sm:$0xf] }
 0x579   : > { %v8596_v62 = vunpack.c.l.b16 %v8509_v10  ;;  %v8581_v1 = vshrl.u32 %v8480_v27, 16  ;;  %v8584_v5 = vshll.u32 %v8480_v27, 16  ;;  %v8569_v52 = vrot.slane %v8567_v36, 4  ;;  %v8973_v36 = vld [vmem:[#allocation4] sm:$0xf] }
 0x57a   : > { %v8795_v43 = vrot.slane %v8793_v39, 4  ;;  %v8798_v16 = vrot.slane %v8796_v32, 5  ;;  %v8734_v39 = vld [vmem:[#allocation5 + $0x38] sm:$0xf]  ;;  %v8570_v32 = vshll.u32 %v8478_v42, 16  ;;  %v8592_v27 = vrot.slane %v8590_v57, 5 }
 0x57b   : > { %v8603_v21 = vpack.c.b16 %v8596_v62, %v8595_v26  ;;  %v8555_v26 = vrot.slane %v8553_v37, 4  ;;  %v8558_v62 = vrot.slane %v8556_v45, 5  ;;  %v9444_v57 = vld [vmem:[#allocation4 + $0x8] sm:$0xf] }
 0x57c   : > { %v8799_v10 = vor.u32 %v8798_v16, %v8795_v43  ;;  %v8838_v43 = vshll.u32 %v8734_v39, 16 }
 0x57e   : > { %v8800_v19 = vrot.slane %v8799_v10, 4  ;;  %v8733_v10 = vld [vmem:[#allocation5 + $0x34] sm:$0x1]  ;;  %v8840_v22 = vrot.slane %v8838_v43, 5  ;;  %v8990_v43 = vshrl.u32 %v8973_v36, 16 }
 0x57f   : > { %11242 = vmatmul.msk.bf16.gmra.mxu0 %vm1162_vm10, %v11235_v13  ;;  %v8777_v13 = vsel %vm12052_vm13, %v8772_v40, %v8776_v28  ;;  %v8477_v40 = vld [vmem:[#allocation5 + $0x3c] sm:$0x1]  ;;  %v8544_v28 = vrot.slane %v8542_v24, 5  ;;  %v8830_v45 = vshll.u32 %v8733_v10, 16 }
 0x580   : > { %v8851_v29 = vunpack.c.l.b16 %v8777_v13  ;;  %v8805_v46 = vsel %vm12052_vm13, %v8800_v19, %v8804_v38  ;;  %v8583_v19 = vrot.slane %v8581_v1, 4  ;;  %v8586_v38 = vrot.slane %v8584_v5, 5 }
 0x581   : > { %11219 = vmatmul.msk.bf16.gmra.mxu3 %vm1162_vm10, %v11215_v41  ;;  %v8534_v41 = vshll.u32 %v8473_v7, 16  ;;  %v8853_v47 = vunpack.c.l.b16 %v8805_v46  ;;  %v8992_v51 = vrot.slane %v8990_v43, 4 }
 0x582   : > { %v8858_v30 = vpack.c.b16 %v8852_v33, %v8851_v29  ;;  %v8562_v29 = vshll.u32 %v8477_v40, 16  ;;  %v8545_v33 = vor.u32 %v8544_v28, %v8541_v15  ;;  %v8479_v15 = vld [vmem:[#allocation5 + $0x44] sm:$0x1]  ;;  %v8832_v28 = vrot.slane %v8830_v45, 5 }
 0x583   : > { %v8536_v0 = vrot.slane %v8534_v41, 5  ;;  %v11250_v41 = vld [vmem:[#allocation4 + $0x20] sm:$0xf] }
 0x584   : > { %v8564_v44 = vrot.slane %v8562_v29, 5  ;;  %v8546_v9 = vrot.slane %v8545_v33, 4 }
 0x585   : > { %v8537_v3 = vsel %vm12052_vm13, %v8532_v17, %v8536_v0  ;;  %v8824_v17 = vshll.u32 %v8732_v54, 16  ;;  %v8835_v0 = vshrl.u32 %v8734_v39, 16  ;;  %v9251_v54 = vld [vmem:[#allocation5 + $0x8] sm:$0xf]  ;;  %v11254_v39 = vld [vmem:[#allocation4 + $0x30] sm:$0xf] }
 0x586   : > { %11269 = vmatmul.msk.bf16.gmra.mxu1 %vm1162_vm10, %v8858_v30  ;;  %v8598_v18 = vunpack.c.l.b16 %v8537_v3  ;;  %v8559_v30 = vor.u32 %v8558_v62, %v8555_v26  ;;  %v8572_v3 = vrot.slane %v8570_v32, 5  ;;  %v11493_v32 = vld [vmem:[#allocation4 + $0x34] sm:$0xf0]  ;;  %v9271_v1 = vshll.u32 %v9251_v54, 16 }
 0x587   : > { %v8837_v24 = vrot.slane %v8835_v0, 4  ;;  %v8975_v0 = vld [vmem:[#allocation4 + $0x8] sm:$0xf] }
 0x588   : > { %11199 = vmatmul.msk.bf16.gmra.mxu2 %vm1162_vm10, %v11195_v14  ;;  %v8812_v14 = vrot.slane %v8810_v8, 5  ;;  %v8560_v8 = vrot.slane %v8559_v30, 4  ;;  %v9273_v10 = vrot.slane %v9271_v1, 5  ;;  %v14381_v1 = vld [vmem:[#allocation4 + $0x40] sm:$0xf] }
 0x58a   : > { %v8813_v56 = vor.u32 %v8812_v14, %v8809_v53  ;;  %v11251_v53 = vor.u32 %v11492_v6, %v11250_v41  ;;  %v8551_v14 = vsel %vm12052_vm13, %v8546_v9, %v8550_v31  ;;  %v8565_v63 = vsel %vm12052_vm13, %v8560_v8, %v8564_v44 }
 0x58b   : > { %v8599_v46 = vunpack.c.l.b16 %v8551_v14  ;;  %v8600_v62 = vunpack.c.l.b16 %v8565_v63  ;;  %v9268_v8 = vshrl.u32 %v9251_v54, 16  ;;  %v9254_v14 = vld [vmem:[#allocation5 + $0x14] sm:$0x1] }
 0x58c   : > { %v8814_v4 = vrot.slane %v8813_v56, 4  ;;  %v8844_v56 = vshll.u32 %v8735_v12, 16 }
 0x58d   : > { %v8605_v41 = vpack.c.b16 %v8600_v62, %v8599_v46 }
 0x58e   : > { %v8819_v13 = vsel %vm12052_vm13, %v8814_v4, %v8818_v34  ;;  %v8841_v34 = vor.u32 %v8840_v22, %v8837_v24  ;;  %v8846_v4 = vrot.slane %v8844_v56, 5  ;;  %v11255_v24 = vor.u32 %v11493_v32, %v11254_v39 }
 0x58f   : > { %11243 = vmatmul.msk.bf16.gmra.mxu0 %vm1162_vm10, %v11239_v2  ;;  %v8854_v2 = vunpack.c.l.b16 %v8819_v13  ;;  %v8573_v13 = vor.u32 %v8572_v3, %v8569_v52  ;;  %v9270_v52 = vrot.slane %v9268_v8, 4  ;;  %v9004_v3 = vshrl.u32 %v8975_v0, 16  ;;  %v9572_v8 = vld [vmem:[%s14908_s9 + $0x8] sm:$0xc] }
 0x590   : > { %v8842_v26 = vrot.slane %v8841_v34, 4  ;;  %v9291_v34 = vshll.u32 %v9254_v14, 16 }
 0x591   : > { %11264 = vmatmul.msk.bf16.vlgmr.msrb.gmra.mxu3 %vm1162_vm10, %v8603_v21  ;;  %v8604_v21 = vpack.c.b16 %v8598_v18, %v8597_v49  ;;  %v8859_v59 = vpack.c.b16 %v8854_v2, %v8853_v47  ;;  %v11278_v49 = vld [vmem:[#allocation4 + $0x10] sm:$0xf]  ;;  %v11496_v18 = vld [vmem:[#allocation4 + $0x14] sm:$0xf0]  ;;  %v8576_v47 = vshll.u32 %v8479_v15, 16  ;;  %v8574_v6 = vrot.slane %v8573_v13, 4 }
 0x592   : > { %v8847_v29 = vsel %vm12052_vm13, %v8842_v26, %v8846_v4  ;;  %v11279_v33 = vor.u32 %v11496_v18, %v11278_v49  ;;  %v9274_v45 = vor.u32 %v9273_v10, %v9270_v52  ;;  %v8974_v18 = vld [vmem:[#allocation4 + $0x4] sm:$0x1]  ;;  %v9006_v46 = vrot.slane %v9004_v3, 4  ;;  %v14388_v10 = vld [vmem:[#allocation4 + $0x30] sm:$0xf] }
 0x593   : > { %v8578_v31 = vrot.slane %v8576_v47, 5  ;;  %v8999_v32 = vshll.u32 %v8974_v18, 16 }
 0x594   : > { %v7720_v20 = vpop.f32.mrf.mxu3 }
 0x596   : > { %11270 = vmatmul.msk.bf16.gmra.mxu1 %vm1162_vm10, %v8859_v59 }
 0x598   : > { %11260 = vmatmul.msk.bf16.vlgmr.msrb.gmra.mxu2 %vm1162_vm10, %v11247_v58  ;;  %v8826_v58 = vrot.slane %v8824_v17, 5 }
 0x59b   : > { %v7656_v60 = vpop.f32.mrf.mxu2 }
 0x59c   : > { %v14323_v7 = vpop.f32.mrf.mxu0  ;;  %v14325_v23 = vadd.f32 %v7720_v20, %v7656_v60  ;;  %v7722_v61 = vpop.f32.mrf.mxu3  ;;  %v8823_v20 = vrot.slane %v8821_v25, 4  ;;  %v8579_v25 = vsel %vm12052_vm13, %v8574_v6, %v8578_v31 }
 0x59d   : > { %v14356_v12 = vunpack.c.l.b16 %v8579_v25 }
 0x59e   : > { %v8827_v37 = vor.u32 %v8826_v58, %v8823_v20 }
 0x59f   : > { %11288 = vmatmul.msk.bf16.vlgmr.msra.gmra.mxu0 %vm1162_vm10, %v11275_v11  ;;  %v8587_v11 = vor.u32 %v8586_v38, %v8583_v19  ;;  %v11282_v19 = vld [vmem:[#allocation4 + $0x20] sm:$0xf]  ;;  %v11497_v38 = vld [vmem:[#allocation4 + $0x24] sm:$0xf0] }
 0x5a0   : > { %v8828_v40 = vrot.slane %v8827_v37, 4  ;;  %v9007_v37 = vshll.u32 %v8975_v0, 16  ;;  %v11283_v13 = vor.u32 %v11497_v38, %v11282_v19 }
 0x5a1   : > { %11265 = vmatmul.msk.bf16.gmra.mxu3 %vm1162_vm10, %v8604_v21  ;;  %v8856_v21 = vunpack.c.l.b16 %v8847_v29  ;;  %v8588_v44 = vrot.slane %v8587_v11, 4  ;;  %v9293_v11 = vrot.slane %v9291_v34, 5  ;;  %v9446_v29 = vld [vmem:[#allocation4 + $0x10] sm:$0xf]  ;;  %v9001_v34 = vrot.slane %v8999_v32, 5 }
 0x5a2   : > { %v8833_v60 = vsel %vm12052_vm13, %v8828_v40, %v8832_v28  ;;  %v9275_v28 = vrot.slane %v9274_v45, 4  ;;  %v9478_v54 = vshll.u32 %v9446_v29, 16  ;;  %v9445_v45 = vld [vmem:[#allocation4 + $0xc] sm:$0x1] }
 0x5a3   : > { %v7658_v16 = vpop.f32.mrf.mxu2  ;;  %v8855_v2 = vunpack.c.l.b16 %v8833_v60  ;;  %v8593_v17 = vsel %vm12052_vm13, %v8588_v44, %v8592_v27  ;;  %v9009_v60 = vrot.slane %v9007_v37, 5  ;;  %v9649_v44 = vld [vmem:[%s14908_s9 + $0xc] sm:$0x3]  ;;  %v9850_v27 = vld [vmem:[%s14908_s9 + $0xc] sm:$0xc] }
 0x5a4   : > { %v14330_v35 = vadd.f32 %v7722_v61, %v7658_v16  ;;  %v7725_v55 = vpop.f32.mrf.mxu3  ;;  %v14334_v50 = vpop.f32.mrf.mxu0  ;;  %v8993_v16 = vshll.u32 %v8973_v36, 16  ;;  %v14358_v22 = vunpack.c.l.b16 %v8593_v17  ;;  %v9475_v36 = vshrl.u32 %v9446_v29, 16  ;;  %v8979_v29 = vld [vmem:[#allocation4 + $0x18] sm:$0xf] }
 0x5a5   : > { %v8860_v30 = vpack.c.b16 %v8856_v21, %v8855_v2  ;;  %v9683_v25 = vsel %vm1178_vm9, %v9649_v44, 0  ;;  %v9864_v0 = vunpack.c.l.b16 %v9850_v27  ;;  %v9010_v43 = vor.u32 %v9009_v60, %v9006_v46 }
 0x5a6   : > { %v8995_v40 = vrot.slane %v8993_v16, 5  ;;  %v8606_v47 = vpack.c.b16 %v14358_v22, %v14356_v12  ;;  %9692 = vmatpush.bf16.msrb.mxu2 %v9683_v25  ;;  %v14390_v12 = vld [vmem:[#allocation4 + $0x34] sm:$0xf0]  ;;  %v14392_v22 = vld [vmem:[#allocation4 + $0x8] sm:$0xf] }
 0x5a7   : > { %11271 = vmatmul.msk.bf16.gmra.mxu1 %vm1162_vm10, %v8860_v30  ;;  %v11287_v44 = vor.u32 %v14390_v12, %v14388_v10 }
 0x5a8   : > { %11261 = vmatmul.msk.bf16.gmra.mxu2 %vm1162_vm10, %v11251_v53  ;;  %v9253_v53 = vld [vmem:[#allocation5 + $0x10] sm:$0xf]  ;;  %v8996_v31 = vor.u32 %v8995_v40, %v8992_v51  ;;  %v8977_v40 = vld [vmem:[#allocation4 + $0x10] sm:$0xf] }
 0x5a9   : > { %v9282_v63 = vshrl.u32 %v9253_v53, 16  ;;  %v9285_v15 = vshll.u32 %v9253_v53, 16  ;;  %v9021_v25 = vshll.u32 %v8977_v40, 16 }
 0x5aa   : > { %v8997_v38 = vrot.slane %v8996_v31, 4  ;;  %v9255_v31 = vld [vmem:[#allocation5 + $0x18] sm:$0xf] }
 0x5ab   : > { %v7661_v61 = vpop.f32.mrf.mxu2  ;;  %v9284_v26 = vrot.slane %v9282_v63, 4  ;;  %v9287_v62 = vrot.slane %v9285_v15, 5  ;;  %v9477_v63 = vrot.slane %v9475_v36, 4  ;;  %v9480_v15 = vrot.slane %v9478_v54, 5 }
 0x5ac   : > { %v14343_v59 = vadd.f32 %v7725_v55, %v7661_v61  ;;  %v7727_v42 = vpop.f32.mrf.mxu3  ;;  %v14345_v9 = vpop.f32.mrf.mxu0  ;;  %v9252_v55 = vld [vmem:[#allocation5 + $0xc] sm:$0x1]  ;;  %v8976_v61 = vld [vmem:[#allocation4 + $0xc] sm:$0x1]  ;;  %v9002_v54 = vsel %vm12052_vm13, %v8997_v38, %v9001_v34 }
 0x5ad   : > { %v9277_v56 = vshll.u32 %v9252_v55, 16  ;;  %v9288_v21 = vor.u32 %v9287_v62, %v9284_v26  ;;  %v9013_v16 = vshll.u32 %v8976_v61, 16  ;;  %v9865_v55 = vpack.c.b16 %v9864_v0, %v9864_v0  ;;  %v9257_v0 = vld [vmem:[#allocation5 + $0x20] sm:$0xf] }
 0x5ae   : > { %v14421_v38 = vunpack.c.l.b16 %v9002_v54 }
 0x5af   : > { %11289 = vmatmul.msk.bf16.gmra.mxu0 %vm1162_vm10, %v11279_v33  ;;  %v9279_v4 = vrot.slane %v9277_v56, 5  ;;  %v9289_v17 = vrot.slane %v9288_v21, 4  ;;  %v9447_v56 = vld [vmem:[#allocation4 + $0x14] sm:$0x1]  ;;  %v9866_v51 = vrot.slane %v9865_v55, 2  ;;  %v9015_v18 = vrot.slane %v9013_v16, 5 }
 0x5b0   : > { %v10047_v21 = vld [vmem:[%s14908_s9 + $0x10] sm:$0x3]  ;;  %v9299_v16 = vshll.u32 %v9255_v31, 16 }
 0x5b1   : > { %11266 = vmatmul.msk.bf16.gmra.mxu3 %vm1162_vm10, %v8605_v41  ;;  %v9280_v33 = vsel %vm12052_vm13, %v9275_v28, %v9279_v4  ;;  %v9464_v41 = vshll.u32 %v9444_v57, 16  ;;  %v14397_v28 = vld [vmem:[#allocation4 + $0xc] sm:$0xf0]  ;;  %v9011_v4 = vrot.slane %v9010_v43, 4  ;;  %v9880_v60 = vsel %vm1178_vm9, %v9866_v51, 0 }
 0x5b2   : > { %v14375_v39 = vpop.f32.mrf.mxu1  ;;  %v9380_v53 = vunpack.c.l.b16 %v9280_v33  ;;  %9889 = vmatpush.bf16.msrb.mxu3 %v9880_v60  ;;  %v10073_v36 = vsel %vm1178_vm9, %v10047_v21, 0  ;;  %v9296_v43 = vshrl.u32 %v9255_v31, 16 }
 0x5b3   : > { %v7663_v5 = vpop.f32.mrf.mxu2  ;;  %v9466_v52 = vrot.slane %v9464_v41, 5  ;;  %v9018_v41 = vshrl.u32 %v8977_v40, 16  ;;  %v9016_v32 = vsel %vm12052_vm13, %v9011_v4, %v9015_v18  ;;  %10082 = vmatpush.bf16.msrb.mxu1 %v10073_v36 }
 0x5b4   : > { %v14354_v20 = vadd.f32 %v7727_v42, %v7663_v5  ;;  %v7730_v58 = vpop.f32.mrf.mxu3  ;;  %v14361_v49 = vpop.f32.mrf.mxu0  ;;  %v9461_v42 = vshrl.u32 %v9444_v57, 16  ;;  %v14383_v5 = vld [vmem:[#allocation4 + $0x44] sm:$0xf0]  ;;  %v9484_v57 = vshll.u32 %v9447_v56, 16  ;;  %v9298_v12 = vrot.slane %v9296_v43, 4 }
 0x5b5   : > { %v11259_v19 = vor.u32 %v14383_v5, %v14381_v1  ;;  %v9035_v1 = vshll.u32 %v8979_v29, 16  ;;  %v9256_v5 = vld [vmem:[#allocation5 + $0x1c] sm:$0x1]  ;;  %v9020_v55 = vrot.slane %v9018_v41, 4  ;;  %v9310_v56 = vshrl.u32 %v9257_v0, 16 }
 0x5b6   : > { %v9463_v14 = vrot.slane %v9461_v42, 4  ;;  %v9481_v42 = vor.u32 %v9480_v15, %v9477_v63  ;;  %v9313_v63 = vshll.u32 %v9257_v0, 16  ;;  %v14423_v34 = vunpack.c.l.b16 %v9016_v32  ;;  %v9450_v41 = vld [vmem:[#allocation4 + $0x20] sm:$0xf] }
 0x5b7   : > { %v9503_v43 = vshrl.u32 %v9450_v41, 16 }
 0x5b8   : > { %11262 = vmatmul.msk.bf16.gmra.mxu2 %vm1162_vm10, %v11255_v24  ;;  %v9294_v24 = vsel %vm12052_vm13, %v9289_v17, %v9293_v11  ;;  %v9467_v11 = vor.u32 %v9466_v52, %v9463_v14  ;;  %v9032_v17 = vshrl.u32 %v8979_v29, 16  ;;  %v9258_v14 = vld [vmem:[#allocation5 + $0x24] sm:$0x1]  ;;  %v9023_v52 = vrot.slane %v9021_v25, 5 }
 0x5b9   : > { %v9381_v3 = vunpack.c.l.b16 %v9294_v24  ;;  %v9486_v24 = vrot.slane %v9484_v57, 5  ;;  %v9319_v40 = vshll.u32 %v9258_v14, 16  ;;  %v9449_v14 = vld [vmem:[#allocation4 + $0x1c] sm:$0x1] }
 0x5ba   : > { %v14413_v27 = vpop.f32.mrf.mxu1  ;;  %v9034_v10 = vrot.slane %v9032_v17, 4  ;;  %v9024_v21 = vor.u32 %v9023_v52, %v9020_v55  ;;  %v9110_v17 = vpack.c.b16 %v14423_v34, %v14421_v38  ;;  %v8981_v52 = vld [vmem:[#allocation4 + $0x20] sm:$0xf]  ;;  %v9505_v38 = vrot.slane %v9503_v43, 4 }
 0x5bb   : > { %v7666_v2 = vpop.f32.mrf.mxu2  ;;  %v9388_v46 = vpack.c.b16 %v9381_v3, %v9380_v53  ;;  %v9468_v53 = vrot.slane %v9467_v11, 4  ;;  %v8978_v3 = vld [vmem:[#allocation4 + $0x14] sm:$0x1]  ;;  %v9321_v32 = vrot.slane %v9319_v40, 5  ;;  %v9046_v40 = vshrl.u32 %v8981_v52, 16 }
 0x5bc   : > { %v14367_v30 = vadd.f32 %v7730_v58, %v7666_v2  ;;  %v7732_v6 = vpop.f32.mrf.mxu3  ;;  %v9586_v58 = vunpack.c.l.b16 %v9572_v8  ;;  %v14399_v62 = vpop.f32.mrf.mxu0  ;;  %v9027_v57 = vshll.u32 %v8978_v3, 16 }
 0x5bd   : > { %11316 = vmatmul.msk.bf16.vlgmr.msra.gmra.mxu1 %vm1162_vm10, %v9388_v46 }
 0x5be   : > { %v9587_v37 = vpack.c.b16 %v9586_v58, %v9586_v58  ;;  %v9482_v58 = vrot.slane %v9481_v42, 4 }
 0x5bf   : > { %11290 = vmatmul.msk.bf16.gmra.mxu0 %vm1162_vm10, %v11283_v13 }
 0x5c0   : > { %v9588_v26 = vrot.slane %v9587_v37, 2  ;;  %v9037_v37 = vrot.slane %v9035_v1, 5  ;;  %v9487_v11 = vsel %vm12052_vm13, %v9482_v58, %v9486_v24  ;;  %v14445_v1 = vld [vmem:[#allocation4 + $0x1c] sm:$0xf0]  ;;  %v14451_v58 = vrot.slane %v9024_v21, 4 }
 0x5c1   : > { %11267 = vmatmul.msk.bf16.gmra.mxu3 %vm1162_vm10, %v8606_v47  ;;  %v9470_v47 = vshll.u32 %v9445_v45, 16  ;;  %v9305_v45 = vshll.u32 %v9256_v5, 16  ;;  %v14447_v5 = vrot.slane %v9027_v57, 5 }
 0x5c2   : > { %v9602_v33 = vsel %vm1178_vm9, %v9588_v26, 0  ;;  %v9038_v42 = vor.u32 %v9037_v37, %v9034_v10  ;;  %v8983_v37 = vld [vmem:[#allocation4 + $0x28] sm:$0xf] }
 0x5c3   : > { %v7668_v13 = vpop.f32.mrf.mxu2  ;;  %9611 = vmatpush.bf16.msrb.mxu0 %v9602_v33  ;;  %v9472_v8 = vrot.slane %v9470_v47, 5  ;;  %v9307_v26 = vrot.slane %v9305_v45, 5  ;;  %v14433_v47 = vpop.f32.mrf.mxu1  ;;  %v9315_v33 = vrot.slane %v9313_v63, 5  ;;  %v9063_v21 = vshll.u32 %v8983_v37, 16 }
 0x5c4   : > { %v14402_v2 = vadd.f32 %v7732_v6, %v7668_v13  ;;  %v7735_v61 = vpop.f32.mrf.mxu3  ;;  %v11299_v6 = vor.u32 %v14397_v28, %v14392_v22  ;;  %v9301_v22 = vrot.slane %v9299_v16, 5  ;;  %v9448_v28 = vld [vmem:[#allocation4 + $0x18] sm:$0xf]  ;;  %v9312_v13 = vrot.slane %v9310_v56, 4  ;;  %v14429_v60 = vpop.f32.mrf.mxu0 }
 0x5c5   : > { %v9473_v46 = vsel %vm12052_vm13, %v9468_v53, %v9472_v8  ;;  %v9489_v31 = vshrl.u32 %v9448_v28, 16  ;;  %v9492_v25 = vshll.u32 %v9448_v28, 16  ;;  %v14443_v8 = vld [vmem:[#allocation4 + $0x18] sm:$0xf]  ;;  %v9506_v16 = vshll.u32 %v9450_v41, 16 }
 0x5c6   : > { %v9302_v51 = vor.u32 %v9301_v22, %v9298_v12  ;;  %v9316_v54 = vor.u32 %v9315_v33, %v9312_v13  ;;  %v14440_v0 = vunpack.c.l.b16 %v9473_v46  ;;  %v14449_v53 = vunpack.c.l.b16 %v9487_v11  ;;  %v9259_v46 = vld [vmem:[#allocation5 + $0x28] sm:$0xf] }
 0x5c7   : > { %v9491_v22 = vrot.slane %v9489_v31, 4  ;;  %v9494_v3 = vrot.slane %v9492_v25, 5  ;;  %v9508_v34 = vrot.slane %v9506_v16, 5  ;;  %v9049_v28 = vshll.u32 %v8981_v52, 16 }
 0x5c8   : > { %11263 = vmatmul.msk.bf16.gmra.mxu2 %vm1162_vm10, %v11259_v19  ;;  %v8980_v19 = vld [vmem:[#allocation4 + $0x1c] sm:$0x1]  ;;  %v9303_v29 = vrot.slane %v9302_v51, 4  ;;  %v9498_v51 = vshll.u32 %v9449_v14, 16  ;;  %v9060_v11 = vshrl.u32 %v8983_v37, 16  ;;  %v9065_v43 = vrot.slane %v9063_v21, 5 }
 0x5c9   : > { %v9509_v31 = vor.u32 %v9508_v34, %v9505_v38 }
 0x5ca   : > { %v9308_v36 = vsel %vm12052_vm13, %v9303_v29, %v9307_v26  ;;  %v11303_v26 = vor.u32 %v14445_v1, %v14443_v8  ;;  %v9495_v29 = vor.u32 %v9494_v3, %v9491_v22  ;;  %v9500_v25 = vrot.slane %v9498_v51, 5 }
 0x5cb   : > { %v7671_v15 = vpop.f32.mrf.mxu2  ;;  %v9382_v55 = vunpack.c.l.b16 %v9308_v36  ;;  %v8982_v36 = vld [vmem:[#allocation4 + $0x24] sm:$0x1]  ;;  %v9048_v8 = vrot.slane %v9046_v40, 4  ;;  %v9327_v1 = vshll.u32 %v9259_v46, 16 }
 0x5cc   : > { %v14425_v4 = vadd.f32 %v7735_v61, %v7671_v15  ;;  %v7737_v18 = vpop.f32.mrf.mxu3  ;;  %v9041_v61 = vshll.u32 %v8980_v19, 16  ;;  %v9451_v15 = vld [vmem:[#allocation4 + $0x24] sm:$0x1]  ;;  %v14463_v19 = vpop.f32.mrf.mxu1 }
 0x5cd   : > { %v14467_v57 = vpop.f32.mrf.mxu0  ;;  %v9512_v33 = vshll.u32 %v9451_v15, 16  ;;  %v9329_v14 = vrot.slane %v9327_v1, 5 }
 0x5ce   : > { %14933 = vst [vmem:[#allocation11_spill] sm:$0xff] %v14425_v4  ;;  %v14453_v24 = vrot.slane %v9041_v61, 5  ;;  %v9030_v61 = vsel %vm12052_vm13, %v14451_v58, %v14447_v5  ;;  %v9496_v58 = vrot.slane %v9495_v29, 4  ;;  %v9452_v29 = vld [vmem:[#allocation4 + $0x28] sm:$0xf] }
 0x5cf   : > { %11291 = vmatmul.msk.bf16.gmra.mxu0 %vm1162_vm10, %v11287_v44  ;;  %v9317_v44 = vrot.slane %v9316_v54, 4  ;;  %14935 = vst [vmem:[#allocation13_spill] sm:$0xff] %v14467_v57  ;;  %v9261_v54 = vld [vmem:[#allocation5 + $0x30] sm:$0xf] }
 0x5d0   : > { %v9338_v52 = vshrl.u32 %v9261_v54, 16  ;;  %v9341_v3 = vshll.u32 %v9261_v54, 16 }
 0x5d1   : > { %11312 = vmatmul.msk.bf16.vlgmr.msra.gmra.mxu3 %vm1162_vm10, %v11299_v6  ;;  %v14455_v6 = vrot.slane %v9038_v42, 4  ;;  %v9322_v12 = vsel %vm12052_vm13, %v9317_v44, %v9321_v32  ;;  %v9260_v42 = vld [vmem:[#allocation5 + $0x2c] sm:$0x1]  ;;  %v9324_v32 = vshrl.u32 %v9259_v46, 16  ;;  %v9062_v44 = vrot.slane %v9060_v11, 4 }
 0x5d2   : > { %v9383_v63 = vunpack.c.l.b16 %v9322_v12  ;;  %v9333_v5 = vshll.u32 %v9260_v42, 16  ;;  %v9055_v12 = vshll.u32 %v8982_v36, 16  ;;  %v9340_v34 = vrot.slane %v9338_v52, 4  ;;  %v9454_v36 = vld [vmem:[#allocation4 + $0x30] sm:$0xf] }
 0x5d3   : > { %v7673_v10 = vpop.f32.mrf.mxu2  ;;  %v9044_v41 = vsel %vm12052_vm13, %v14455_v6, %v14453_v24  ;;  %v9326_v16 = vrot.slane %v9324_v32, 4  ;;  %v9262_v24 = vld [vmem:[#allocation5 + $0x34] sm:$0x1]  ;;  %v9510_v6 = vrot.slane %v9509_v31, 4  ;;  %v9066_v51 = vor.u32 %v9065_v43, %v9062_v44 }
 0x5d4   : > { %v14459_v45 = vadd.f32 %v7737_v18, %v7673_v10  ;;  %v14461_v56 = vpop.f32.mrf.mxu3  ;;  %v9389_v13 = vpack.c.b16 %v9383_v63, %v9382_v55  ;;  %v9581_v18 = vpack.c.b16 %v14449_v53, %v14440_v0  ;;  %v8984_v0 = vld [vmem:[#allocation4 + $0x2c] sm:$0x1]  ;;  %v9514_v55 = vrot.slane %v9512_v33, 5  ;;  %v14485_v37 = vpop.f32.mrf.mxu1 }
 0x5d5   : > { %v9069_v22 = vshll.u32 %v8984_v0, 16  ;;  %14936 = vst [vmem:[#allocation14_spill] sm:$0xff] %v14485_v37  ;;  %v9330_v15 = vor.u32 %v9329_v14, %v9326_v16  ;;  %v9335_v38 = vrot.slane %v9333_v5, 5  ;;  %v9343_v40 = vrot.slane %v9341_v3, 5  ;;  %v14490_v54 = vpop.f32.mrf.mxu0  ;;  %v14505_v14 = vld [vmem:[#allocation4 + $0x2c] sm:$0xf0] }
 0x5d6   : > { %14934 = vst [vmem:[#allocation12_spill] sm:$0xff] %v14459_v45  ;;  %11317 = vmatmul.msk.bf16.gmra.mxu1 %vm1162_vm10, %v9389_v13  ;;  %v9104_v46 = vunpack.c.l.b16 %v9030_v61  ;;  %v9105_v13 = vunpack.c.l.b16 %v9044_v41  ;;  %v9501_v33 = vsel %vm12052_vm13, %v9496_v58, %v9500_v25  ;;  %v9057_v21 = vrot.slane %v9055_v12, 5  ;;  %v14501_v58 = vld [vmem:[#allocation4 + $0x28] sm:$0xf] }
 0x5d7   : > { %v9331_v11 = vrot.slane %v9330_v15, 4  ;;  %v9344_v42 = vor.u32 %v9343_v40, %v9340_v34  ;;  %14937 = vst [vmem:[#allocation15_spill] sm:$0xff] %v14490_v54  ;;  %v9515_v32 = vsel %vm12052_vm13, %v9510_v6, %v9514_v55  ;;  %v9067_v41 = vrot.slane %v9066_v51, 4  ;;  %v8987_v15 = vld [vmem:[#allocation4 + $0x38] sm:$0xf] }
 0x5d8   : > { %11292 = vmatmul.msk.bf16.vlgmr.msra.gmra.mxu2 %vm1162_vm10, %v9110_v17  ;;  %v9051_v17 = vrot.slane %v9049_v28, 5  ;;  %v9347_v28 = vshll.u32 %v9262_v24, 16  ;;  %v9520_v25 = vshll.u32 %v9452_v29, 16  ;;  %v9531_v43 = vshrl.u32 %v9454_v36, 16  ;;  %v8985_v24 = vld [vmem:[#allocation4 + $0x30] sm:$0xf] }
 0x5d9   : > { %v9336_v61 = vsel %vm12052_vm13, %v9331_v11, %v9335_v38  ;;  %v9534_v16 = vshll.u32 %v9454_v36, 16  ;;  %v9575_v52 = vunpack.c.l.b16 %v9501_v33  ;;  %v9576_v6 = vunpack.c.l.b16 %v9515_v32 }
 0x5da   : > { %v9052_v63 = vor.u32 %v9051_v17, %v9048_v8  ;;  %v9349_v31 = vrot.slane %v9347_v28, 5  ;;  %v9345_v8 = vrot.slane %v9344_v42, 4  ;;  %v9517_v17 = vshrl.u32 %v9452_v29, 16  ;;  %v9263_v29 = vld [vmem:[#allocation5 + $0x38] sm:$0xf] }
 0x5db   : > { %v14481_v53 = vpop.f32.mrf.mxu2  ;;  %v9384_v44 = vunpack.c.l.b16 %v9336_v61  ;;  %v9522_v51 = vrot.slane %v9520_v25, 5  ;;  %v9074_v40 = vshrl.u32 %v8985_v24, 16  ;;  %v9077_v11 = vshll.u32 %v8985_v24, 16 }
 0x5dc   : > { %v14483_v10 = vpop.f32.mrf.mxu3  ;;  %v9053_v0 = vrot.slane %v9052_v63, 4  ;;  %v9350_v55 = vsel %vm12052_vm13, %v9345_v8, %v9349_v31  ;;  %v14509_v3 = vpop.f32.mrf.mxu1  ;;  %v9453_v63 = vld [vmem:[#allocation4 + $0x2c] sm:$0x1]  ;;  %v9519_v34 = vrot.slane %v9517_v17, 4  ;;  %v11307_v33 = vor.u32 %v14505_v14, %v14501_v58 }
 0x5dd   : > { %14938 = vst [vmem:[#allocation16_spill] sm:$0xff] %v14509_v3  ;;  %v9526_v42 = vshll.u32 %v9453_v63, 16  ;;  %v9076_v31 = vrot.slane %v9074_v40, 4  ;;  %v9088_v36 = vshrl.u32 %v8987_v15, 16  ;;  %v9582_v32 = vpack.c.b16 %v9576_v6, %v9575_v52  ;;  %v9264_v8 = vld [vmem:[#allocation5 + $0x3c] sm:$0x1]  ;;  %v14521_v58 = vpop.f32.mrf.mxu0 }
 0x5de   : > { %v9058_v12 = vsel %vm12052_vm13, %v9053_v0, %v9057_v21  ;;  %v9455_v21 = vld [vmem:[#allocation4 + $0x34] sm:$0x1]  ;;  %v9079_v61 = vrot.slane %v9077_v11, 5  ;;  %v9523_v25 = vor.u32 %v9522_v51, %v9519_v34  ;;  %v9361_v40 = vshll.u32 %v9264_v8, 16 }
 0x5df   : > { %11320 = vmatmul.msk.bf16.vlgmr.msrb.gmra.mxu0 %vm1162_vm10, %v9581_v18  ;;  %v9071_v18 = vrot.slane %v9069_v22, 5  ;;  %v9385_v22 = vunpack.c.l.b16 %v9350_v55  ;;  %v14516_v0 = vunpack.c.l.b16 %v9058_v12  ;;  %v9540_v14 = vshll.u32 %v9455_v21, 16  ;;  %v9266_v6 = vld [vmem:[#allocation5 + $0x44] sm:$0x1] }
 0x5e0   : > { %v9355_v12 = vshll.u32 %v9263_v29, 16  ;;  %v9080_v63 = vor.u32 %v9079_v61, %v9076_v31  ;;  %v9524_v54 = vrot.slane %v9523_v25, 4  ;;  %v9528_v45 = vrot.slane %v9526_v42, 5 }
 0x5e1   : > { %11313 = vmatmul.msk.bf16.gmra.mxu3 %vm1162_vm10, %v11303_v26  ;;  %v9111_v26 = vpack.c.b16 %v9105_v13, %v9104_v46  ;;  %v9072_v38 = vsel %vm12052_vm13, %v9067_v41, %v9071_v18  ;;  %v9390_v28 = vpack.c.b16 %v9385_v22, %v9384_v44  ;;  %v9533_v46 = vrot.slane %v9531_v43, 4  ;;  %v8986_v18 = vld [vmem:[#allocation4 + $0x34] sm:$0x1]  ;;  %v8988_v44 = vld [vmem:[#allocation4 + $0x3c] sm:$0x1] }
 0x5e2   : > { %v9536_v13 = vrot.slane %v9534_v16, 5  ;;  %v9091_v41 = vshll.u32 %v8987_v15, 16  ;;  %v14519_v17 = vunpack.c.l.b16 %v9072_v38  ;;  %v9090_v43 = vrot.slane %v9088_v36, 4  ;;  %v9265_v16 = vld [vmem:[#allocation5 + $0x40] sm:$0xf] }
 0x5e3   : > { %v14497_v1 = vpop.f32.mrf.mxu2  ;;  %v9083_v15 = vshll.u32 %v8986_v18, 16  ;;  %v9357_v11 = vrot.slane %v9355_v12, 5  ;;  %v9366_v36 = vshrl.u32 %v9265_v16, 16  ;;  %v9369_v3 = vshll.u32 %v9265_v16, 16  ;;  %v9724_v16 = vld [vmem:[#allocation5 + $0x18] sm:$0xf] }
 0x5e4   : > { %v14499_v5 = vpop.f32.mrf.mxu3  ;;  %v9537_v24 = vor.u32 %v9536_v13, %v9533_v46  ;;  %v9093_v52 = vrot.slane %v9091_v41, 5  ;;  %v14527_v34 = vpop.f32.mrf.mxu1  ;;  %v9375_v46 = vshll.u32 %v9266_v6, 16  ;;  %v9542_v13 = vrot.slane %v9540_v14, 5  ;;  %v9456_v14 = vld [vmem:[#allocation4 + $0x38] sm:$0xf] }
 0x5e5   : > { %14939 = vst [vmem:[#allocation17_spill] sm:$0xff] %v14527_v34  ;;  %v9363_v21 = vrot.slane %v9361_v40, 5  ;;  %v9368_v41 = vrot.slane %v9366_v36, 4  ;;  %v9081_v18 = vrot.slane %v9080_v63, 4  ;;  %v9085_v61 = vrot.slane %v9083_v15, 5  ;;  %v14545_v40 = vpop.f32.mrf.mxu0 }
 0x5e6   : > { %11318 = vmatmul.msk.bf16.gmra.mxu1 %vm1162_vm10, %v9390_v28  ;;  %v9094_v51 = vor.u32 %v9093_v52, %v9090_v43  ;;  %v9097_v28 = vshll.u32 %v8988_v44, 16  ;;  %v9538_v31 = vrot.slane %v9537_v24, 4  ;;  %v9371_v8 = vrot.slane %v9369_v3, 5  ;;  %v9722_v52 = vld [vmem:[#allocation5 + $0x10] sm:$0xf] }
 0x5e7   : > { %v9377_v42 = vrot.slane %v9375_v46, 5  ;;  %v9529_v24 = vsel %vm12052_vm13, %v9524_v54, %v9528_v45  ;;  %v9086_v63 = vsel %vm12052_vm13, %v9081_v18, %v9085_v61  ;;  %v9756_v46 = vshll.u32 %v9724_v16, 16  ;;  %v9457_v18 = vld [vmem:[#allocation4 + $0x3c] sm:$0x1] }
 0x5e8   : > { %11293 = vmatmul.msk.bf16.gmra.mxu2 %vm1162_vm10, %v9111_v26  ;;  %v9352_v26 = vshrl.u32 %v9263_v29, 16  ;;  %v9095_v43 = vrot.slane %v9094_v51, 4  ;;  %v9099_v44 = vrot.slane %v9097_v28, 5  ;;  %v9372_v25 = vor.u32 %v9371_v8, %v9368_v41  ;;  %v9458_v28 = vld [vmem:[#allocation4 + $0x40] sm:$0xf] }
 0x5e9   : > { %v9543_v12 = vsel %vm12052_vm13, %v9538_v31, %v9542_v13  ;;  %v9753_v51 = vshrl.u32 %v9724_v16, 16  ;;  %v9545_v13 = vshrl.u32 %v9456_v14, 16  ;;  %v9723_v31 = vld [vmem:[#allocation5 + $0x14] sm:$0x1]  ;;  %v9548_v61 = vshll.u32 %v9456_v14, 16 }
 0x5ea   : > { %v9354_v38 = vrot.slane %v9352_v26, 4  ;;  %v9373_v15 = vrot.slane %v9372_v25, 4  ;;  %v11310_v8 = vld [vmem:[#allocation4 + $0x38] sm:$0xf]  ;;  %v9562_v14 = vshll.u32 %v9458_v28, 16 }
 0x5eb   : > { %v14523_v55 = vpop.f32.mrf.mxu2  ;;  %v9547_v25 = vrot.slane %v9545_v13, 4 }
 0x5ec   : > { %v14525_v22 = vpop.f32.mrf.mxu3  ;;  %v9358_v29 = vor.u32 %v9357_v11, %v9354_v38  ;;  %v9739_v38 = vshrl.u32 %v9722_v52, 16  ;;  %v14549_v54 = vpop.f32.mrf.mxu1  ;;  %v9577_v11 = vunpack.c.l.b16 %v9529_v24  ;;  %v9378_v36 = vsel %vm12052_vm13, %v9373_v15, %v9377_v42  ;;  %v9725_v15 = vld [vmem:[#allocation5 + $0x1c] sm:$0x1] }
 0x5ed   : > { %14940 = vst [vmem:[#allocation18_spill] sm:$0xff] %v14549_v54  ;;  %v9387_v41 = vunpack.c.l.b16 %v9378_v36  ;;  %v9559_v24 = vshrl.u32 %v9458_v28, 16  ;;  %v9758_v36 = vrot.slane %v9756_v46, 5  ;;  %v9554_v54 = vshll.u32 %v9457_v18, 16  ;;  %v9921_v28 = vld [vmem:[#allocation4 + $0x18] sm:$0xf] }
 0x5ee   : > { %v9359_v26 = vrot.slane %v9358_v29, 4  ;;  %v9578_v29 = vunpack.c.l.b16 %v9543_v12  ;;  %v9550_v12 = vrot.slane %v9548_v61, 5  ;;  %v9762_v61 = vshll.u32 %v9725_v15, 16 }
 0x5ef   : > { %11321 = vmatmul.msk.bf16.gmra.mxu0 %vm1162_vm10, %v9582_v32  ;;  %v9112_v32 = vpack.c.b16 %v14519_v17, %v14516_v0  ;;  %v9100_v0 = vsel %vm12052_vm13, %v9095_v43, %v9099_v44  ;;  %v9742_v17 = vshll.u32 %v9722_v52, 16  ;;  %v11502_v43 = vld [vmem:[#allocation4 + $0x3c] sm:$0xf0]  ;;  %v9459_v52 = vld [vmem:[#allocation4 + $0x44] sm:$0x1]  ;;  %v9561_v34 = vrot.slane %v9559_v24, 4 }
 0x5f0   : > { %v9364_v3 = vsel %vm12052_vm13, %v9359_v26, %v9363_v21  ;;  %v14553_v21 = vunpack.c.l.b16 %v9086_v63  ;;  %v14556_v44 = vunpack.c.l.b16 %v9100_v0  ;;  %v9741_v26 = vrot.slane %v9739_v38, 4  ;;  %v9919_v63 = vld [vmem:[#allocation4 + $0x10] sm:$0xf] }
 0x5f1   : > { %11314 = vmatmul.msk.bf16.gmra.mxu3 %vm1162_vm10, %v11307_v33  ;;  %v9386_v45 = vunpack.c.l.b16 %v9364_v3  ;;  %v9744_v16 = vrot.slane %v9742_v17, 5  ;;  %v9755_v3 = vrot.slane %v9753_v51, 4  ;;  %v9551_v0 = vor.u32 %v9550_v12, %v9547_v25  ;;  %v9922_v25 = vld [vmem:[#allocation4 + $0x1c] sm:$0x1]  ;;  %v14567_v12 = vpop.f32.mrf.mxu0 }
 0x5f2   : > { %v9568_v38 = vshll.u32 %v9459_v52, 16  ;;  %v9936_v4 = vshrl.u32 %v9919_v63, 16  ;;  %v9564_v17 = vrot.slane %v9562_v14, 5  ;;  %v9939_v51 = vshll.u32 %v9919_v63, 16  ;;  %v9920_v52 = vld [vmem:[#allocation4 + $0x14] sm:$0x1] }
 0x5f3   : > { %v14531_v6 = vpop.f32.mrf.mxu2  ;;  %v9391_v42 = vpack.c.b16 %v9387_v41, %v9386_v45  ;;  %v9748_v45 = vshll.u32 %v9723_v31, 16  ;;  %v11311_v41 = vor.u32 %v11502_v43, %v11310_v8  ;;  %v9113_v46 = vpack.c.b16 %v14556_v44, %v14553_v21 }
 0x5f4   : > { %v14539_v33 = vpop.f32.mrf.mxu3  ;;  %v9745_v18 = vor.u32 %v9744_v16, %v9741_v26  ;;  %v9759_v24 = vor.u32 %v9758_v36, %v9755_v3  ;;  %v9552_v37 = vrot.slane %v9551_v0, 4  ;;  %v9570_v31 = vrot.slane %v9568_v38, 5 }
 0x5f5   : > { %v9938_v8 = vrot.slane %v9936_v4, 4  ;;  %v9941_v43 = vrot.slane %v9939_v51, 5  ;;  %v9945_v63 = vshll.u32 %v9920_v52, 16  ;;  %v9750_v21 = vrot.slane %v9748_v45, 5  ;;  %v9728_v51 = vld [vmem:[#allocation5 + $0x28] sm:$0xf] }
 0x5f6   : > { %11319 = vmatmul.msk.bf16.gmra.mxu1 %vm1162_vm10, %v9391_v42  ;;  %v14565_v42 = vpop.f32.mrf.mxu1  ;;  %v9950_v26 = vshrl.u32 %v9921_v28, 16  ;;  %v9953_v16 = vshll.u32 %v9921_v28, 16  ;;  %v9959_v15 = vshll.u32 %v9922_v25, 16  ;;  %v9760_v36 = vrot.slane %v9759_v24, 4 }
 0x5f7   : > { %14941 = vst [vmem:[#allocation19_spill] sm:$0xff] %v14565_v42  ;;  %v9947_v3 = vrot.slane %v9945_v63, 5  ;;  %v9764_v14 = vrot.slane %v9762_v61, 5  ;;  %v9726_v42 = vld [vmem:[#allocation5 + $0x20] sm:$0xf]  ;;  %v9781_v61 = vshrl.u32 %v9728_v51, 16 }
 0x5f8   : > { %11294 = vmatmul.msk.bf16.gmra.mxu2 %vm1162_vm10, %v9112_v32  ;;  %v9583_v32 = vpack.c.b16 %v9578_v29, %v9577_v11  ;;  %v9556_v11 = vrot.slane %v9554_v54, 5  ;;  %v9565_v29 = vor.u32 %v9564_v17, %v9561_v34  ;;  %v9746_v54 = vrot.slane %v9745_v18, 4 }
 0x5f9   : > { %v9942_v34 = vor.u32 %v9941_v43, %v9938_v8  ;;  %v9952_v0 = vrot.slane %v9950_v26, 4  ;;  %v9955_v17 = vrot.slane %v9953_v16, 5  ;;  %v9770_v24 = vshll.u32 %v9726_v42, 16 }
 0x5fa   : > { %v9566_v44 = vrot.slane %v9565_v29, 4  ;;  %v9557_v4 = vsel %vm12052_vm13, %v9552_v37, %v9556_v11  ;;  %v9961_v29 = vrot.slane %v9959_v15, 5  ;;  %v9784_v25 = vshll.u32 %v9728_v51, 16  ;;  %v14590_v15 = vpop.f32.mrf.mxu0 }
 0x5fb   : > { %v14558_v57 = vpop.f32.mrf.mxu2  ;;  %v9943_v45 = vrot.slane %v9942_v34, 4  ;;  %v9956_v28 = vor.u32 %v9955_v17, %v9952_v0  ;;  %v9751_v8 = vsel %vm12052_vm13, %v9746_v54, %v9750_v21  ;;  %v9765_v37 = vsel %vm12052_vm13, %v9760_v36, %v9764_v14  ;;  %v9727_v14 = vld [vmem:[#allocation5 + $0x24] sm:$0x1]  ;;  %v9729_v0 = vld [vmem:[#allocation5 + $0x2c] sm:$0x1] }
 0x5fc   : > { %v14561_v13 = vpop.f32.mrf.mxu3  ;;  %v9571_v38 = vsel %vm12052_vm13, %v9566_v44, %v9570_v31  ;;  %v9579_v31 = vunpack.c.l.b16 %v9557_v4  ;;  %v9772_v16 = vrot.slane %v9770_v24, 5  ;;  %v9783_v34 = vrot.slane %v9781_v61, 4 }
 0x5fd   : > { %v9948_v52 = vsel %vm12052_vm13, %v9943_v45, %v9947_v3  ;;  %v9957_v11 = vrot.slane %v9956_v28, 4  ;;  %v9580_v43 = vunpack.c.l.b16 %v9571_v38  ;;  %v9786_v3 = vrot.slane %v9784_v25, 5  ;;  %v11503_v25 = vld [vmem:[#allocation4 + $0x14] sm:$0xf0] }
 0x5fe   : > { %v10048_v63 = vunpack.c.l.b16 %v9948_v52  ;;  %v14588_v26 = vpop.f32.mrf.mxu1  ;;  %v9851_v21 = vunpack.c.l.b16 %v9751_v8  ;;  %v9852_v54 = vunpack.c.l.b16 %v9765_v37  ;;  %v7925_v17 = vadd.f32 %v14323_v7, %v14325_v23  ;;  %v11326_v52 = vld [vmem:[#allocation4 + $0x10] sm:$0xf] }
 0x5ff   : > { %11322 = vmatmul.msk.bf16.gmra.mxu0 %vm1162_vm10, %v9583_v32  ;;  %v9787_v28 = vor.u32 %v9786_v3, %v9783_v34 }
 0x600   : > { %v8011_v24 = vadd.f32 %v14481_v53, %v7925_v17  ;;  %v9859_v61 = vpack.c.b16 %v9852_v54, %v9851_v21  ;;  %v9924_v53 = vld [vmem:[#allocation4 + $0x24] sm:$0x1] }
 0x601   : > { %11315 = vmatmul.msk.bf16.gmra.mxu3 %vm1162_vm10, %v11311_v41  ;;  %v9767_v41 = vshrl.u32 %v9726_v42, 16  ;;  %v9962_v42 = vsel %vm12052_vm13, %v9957_v11, %v9961_v29  ;;  %v9790_v29 = vshll.u32 %v9729_v0, 16  ;;  %v9788_v8 = vrot.slane %v9787_v28, 4 }
 0x602   : > { %v10049_v36 = vunpack.c.l.b16 %v9962_v42  ;;  %v9926_v42 = vld [vmem:[#allocation4 + $0x2c] sm:$0x1]  ;;  %v9973_v3 = vshll.u32 %v9924_v53, 16  ;;  %v14607_v54 = vpop.f32.mrf.mxu0 }
 0x603   : > { %v14571_v32 = vpop.f32.mrf.mxu2  ;;  %v9769_v44 = vrot.slane %v9767_v41, 4  ;;  %v9776_v41 = vshll.u32 %v9727_v14, 16  ;;  %v9792_v37 = vrot.slane %v9790_v29, 5  ;;  %v9987_v0 = vshll.u32 %v9926_v42, 16 }
 0x604   : > { %v14577_v18 = vpop.f32.mrf.mxu3  ;;  %v10056_v38 = vpack.c.b16 %v10049_v36, %v10048_v63  ;;  %v7926_v63 = vadd.f32 %v14334_v50, %v14330_v35 }
 0x605   : > { %v9773_v51 = vor.u32 %v9772_v16, %v9769_v44  ;;  %v9778_v23 = vrot.slane %v9776_v41, 5  ;;  %v9925_v44 = vld [vmem:[#allocation4 + $0x28] sm:$0xf] }
 0x606   : > { %11348 = vmatmul.msk.bf16.vlgmr.msrb.gmra.mxu1 %vm1162_vm10, %v10056_v38  ;;  %v14601_v11 = vpop.f32.mrf.mxu1  ;;  %v9978_v21 = vshrl.u32 %v9925_v44, 16  ;;  %v9981_v14 = vshll.u32 %v9925_v44, 16  ;;  %v7927_v38 = vadd.f32 %v14345_v9, %v14343_v59  ;;  %v9732_v44 = vld [vmem:[#allocation5 + $0x38] sm:$0xf] }
 0x607   : > { %v9774_v7 = vrot.slane %v9773_v51, 4 }
 0x608   : > { %11295 = vmatmul.msk.bf16.gmra.mxu2 %vm1162_vm10, %v9113_v46  ;;  %v9584_v46 = vpack.c.b16 %v9580_v43, %v9579_v31  ;;  %v9923_v31 = vld [vmem:[#allocation4 + $0x20] sm:$0xf]  ;;  %v8093_v43 = vadd.f32 %v14461_v56, %v8011_v24  ;;  %v8012_v56 = vadd.f32 %v14497_v1, %v7926_v63  ;;  %v9980_v41 = vrot.slane %v9978_v21, 4 }
 0x609   : > { %v9964_v16 = vshrl.u32 %v9923_v31, 16  ;;  %v9967_v34 = vshll.u32 %v9923_v31, 16  ;;  %v9983_v28 = vrot.slane %v9981_v14, 5  ;;  %v9779_v29 = vsel %vm12052_vm13, %v9774_v7, %v9778_v23  ;;  %v9731_v23 = vld [vmem:[#allocation5 + $0x34] sm:$0x1] }
 0x60a   : > { %v8290_v51 = vadd.f32 %v14375_v39, %v8093_v43  ;;  %v9793_v24 = vsel %vm12052_vm13, %v9788_v8, %v9792_v37  ;;  %v9975_v31 = vrot.slane %v9973_v3, 5  ;;  %v9989_v63 = vrot.slane %v9987_v0, 5  ;;  %v9730_v39 = vld [vmem:[#allocation5 + $0x30] sm:$0xf] }
 0x60b   : > { %v14594_v4 = vpop.f32.mrf.mxu2  ;;  %v9966_v35 = vrot.slane %v9964_v16, 4  ;;  %v9969_v50 = vrot.slane %v9967_v34, 5  ;;  %v9984_v1 = vor.u32 %v9983_v28, %v9980_v41  ;;  %v9853_v43 = vunpack.c.l.b16 %v9779_v29 }
 0x60c   : > { %v14596_v45 = vpop.f32.mrf.mxu3  ;;  %v9854_v53 = vunpack.c.l.b16 %v9793_v24  ;;  %v9795_v8 = vshrl.u32 %v9730_v39, 16  ;;  %v8372_v37 = vadd.f32 %v14521_v58, %v8290_v51  ;;  %v9798_v16 = vshll.u32 %v9730_v39, 16  ;;  %v14634_v51 = vpop.f32.mrf.mxu0  ;;  %v14641_v39 = vld [vmem:[%s14942_s25] ss:$0 sm:$0xff] }
 0x60d   : > { %v9985_v7 = vrot.slane %v9984_v1, 4  ;;  %v9812_v0 = vshll.u32 %v9732_v44, 16 }
 0x60e   : > { %v14622_v9 = vpop.f32.mrf.mxu1  ;;  %v9797_v14 = vrot.slane %v9795_v8, 4  ;;  %v9860_v41 = vpack.c.b16 %v9854_v53, %v9853_v43  ;;  %v11330_v53 = vld [vmem:[#allocation4 + $0x20] sm:$0xf]  ;;  %v9927_v8 = vld [vmem:[#allocation4 + $0x30] sm:$0xf] }
 0x60f   : > { %11323 = vmatmul.msk.bf16.gmra.mxu0 %vm1162_vm10, %v9584_v46  ;;  %v11327_v46 = vor.u32 %v11503_v25, %v11326_v52  ;;  %v8094_v52 = vadd.f32 %v14483_v10, %v8012_v56  ;;  %v8013_v25 = vadd.f32 %v14523_v55, %v7927_v38  ;;  %v9733_v10 = vld [vmem:[#allocation5 + $0x3c] sm:$0x1]  ;;  %v9809_v55 = vshrl.u32 %v9732_v44, 16  ;;  %v11504_v44 = vld [vmem:[#allocation4 + $0x24] sm:$0xf0] }
 0x610   : > { %v9990_v3 = vsel %vm12052_vm13, %v9985_v7, %v9989_v63  ;;  %v9804_v38 = vshll.u32 %v9731_v23, 16  ;;  %v9814_v29 = vrot.slane %v9812_v0, 5  ;;  %v9818_v24 = vshll.u32 %v9733_v10, 16 }
 0x611   : > { %11344 = vmatmul.msk.bf16.vlgmr.msrb.gmra.mxu3 %vm1162_vm10, %v9859_v61  ;;  %v9970_v61 = vor.u32 %v9969_v50, %v9966_v35  ;;  %v10051_v35 = vunpack.c.l.b16 %v9990_v3  ;;  %v9800_v50 = vrot.slane %v9798_v16, 5  ;;  %v9811_v28 = vrot.slane %v9809_v55, 4  ;;  %v9929_v16 = vld [vmem:[#allocation4 + $0x38] sm:$0xf] }
 0x612   : > { %v7928_v23 = vadd.f32 %v14361_v49, %v14354_v20  ;;  %v14654_v20 = vld [vmem:[%s14944_s29] ss:$0 sm:$0xff]  ;;  %v9992_v55 = vshrl.u32 %v9927_v8, 16 }
 0x613   : > { %v14609_v36 = vpop.f32.mrf.mxu2  ;;  %v9971_v59 = vrot.slane %v9970_v61, 4  ;;  %v9801_v63 = vor.u32 %v9800_v50, %v9797_v14  ;;  %v9815_v7 = vor.u32 %v9814_v29, %v9811_v28  ;;  %v9995_v14 = vshll.u32 %v9927_v8, 16  ;;  %v9736_v8 = vld [vmem:[#allocation5 + $0x48] sm:$0xf] }
 0x614   : > { %v8631_v17 = vpop.f32.mrf.mxu3  ;;  %v11331_v50 = vor.u32 %v11504_v44, %v11330_v53 }
 0x615   : > { %v9976_v42 = vsel %vm12052_vm13, %v9971_v59, %v9975_v31  ;;  %v8291_v31 = vadd.f32 %v14413_v27, %v8094_v52  ;;  %v8095_v59 = vadd.f32 %v14499_v5, %v8013_v25  ;;  %v9806_v27 = vrot.slane %v9804_v38, 5  ;;  %v9930_v38 = vld [vmem:[#allocation4 + $0x3c] sm:$0x1] }
 0x616   : > { %v10050_v21 = vunpack.c.l.b16 %v9976_v42  ;;  %v14647_v52 = vpop.f32.mrf.mxu1  ;;  %v9802_v5 = vrot.slane %v9801_v63, 4  ;;  %v9816_v25 = vrot.slane %v9815_v7, 4  ;;  %v8014_v42 = vadd.f32 %v14531_v6, %v7928_v23 }
 0x617   : > { %v8373_v49 = vadd.f32 %v14545_v40, %v8291_v31  ;;  %v14667_v31 = vpop.f32.mrf.mxu0  ;;  %v10015_v7 = vshll.u32 %v9930_v38, 16 }
 0x618   : > { %11340 = vmatmul.msk.bf16.vlgmr.msrb.gmra.mxu2 %vm1162_vm10, %v11327_v46  ;;  %v14632_v46 = vld [vmem:[%s14909_s10] ss:$0 sm:$0xff]  ;;  %v10057_v1 = vpack.c.b16 %v10051_v35, %v10050_v21  ;;  %v8292_v21 = vadd.f32 %v14433_v47, %v8095_v59  ;;  %v9807_v40 = vsel %vm12052_vm13, %v9802_v5, %v9806_v27  ;;  %v8096_v47 = vadd.f32 %v14525_v22, %v8014_v42  ;;  %v9734_v27 = vld [vmem:[#allocation5 + $0x40] sm:$0xf] }
 0x61a   : > { %11349 = vmatmul.msk.bf16.gmra.mxu1 %vm1162_vm10, %v10057_v1 }
 0x61b   : > { %v8438_v34 = vpop.f32.mrf.mxu2 }
 0x61c   : > { %v8458_v56 = vadd.f32 %v8438_v34, %v8372_v37  ;;  %v8633_v58 = vpop.f32.mrf.mxu3  ;;  %v9928_v37 = vld [vmem:[#allocation4 + $0x34] sm:$0x1]  ;;  %v7929_v34 = vadd.f32 %v14399_v62, %v14367_v30  ;;  %v9997_v30 = vrot.slane %v9995_v14, 5  ;;  %v10006_v62 = vshrl.u32 %v9929_v16, 16 }
 0x61d   : > { %v10001_v0 = vshll.u32 %v9928_v37, 16 }
 0x61e   : > { %v8651_v61 = vadd.f32 %v8631_v17, %v8458_v56  ;;  %v9820_v17 = vrot.slane %v9818_v24, 5  ;;  %v10008_v59 = vrot.slane %v10006_v62, 4  ;;  %v14673_v22 = vpop.f32.mrf.mxu1 }
 0x61f   : > { %v10003_v63 = vrot.slane %v10001_v0, 5  ;;  %v9837_v0 = vshrl.u32 %v9736_v8, 16 }
 0x620   : > { %v8663_v43 = vadd.f32 %v14632_v46, %v8651_v61  ;;  %v9821_v28 = vsel %vm12052_vm13, %v9816_v25, %v9820_v17  ;;  %v10009_v61 = vshll.u32 %v9929_v16, 16  ;;  %v8374_v17 = vadd.f32 %v14567_v12, %v8292_v21 }
 0x621   : > { %11345 = vmatmul.msk.bf16.gmra.mxu3 %vm1162_vm10, %v9860_v41  ;;  %v9994_v41 = vrot.slane %v9992_v55, 4  ;;  %v9856_v53 = vunpack.c.l.b16 %v9821_v28  ;;  %v10017_v25 = vrot.slane %v10015_v7, 5  ;;  %v9826_v16 = vshll.u32 %v9734_v27, 16 }
 0x622   : > { %v8671_v10 = vmax.f32 %v8663_v43, 0.0  ;;  %v9855_v43 = vunpack.c.l.b16 %v9807_v40  ;;  %v10011_v44 = vrot.slane %v10009_v61, 5 }
 0x623   : > { %v8440_v3 = vpop.f32.mrf.mxu2  ;;  %v9998_v1 = vor.u32 %v9997_v30, %v9994_v41  ;;  %v9828_v40 = vrot.slane %v9826_v16, 5 }
 0x624   : > { %v8683_v6 = vmul.f32 %v14641_v39, %v8671_v10  ;;  %v8459_v56 = vadd.f32 %v8440_v3, %v8373_v49  ;;  %v8636_v35 = vpop.f32.mrf.mxu3  ;;  %v10012_v42 = vor.u32 %v10011_v44, %v10008_v59  ;;  %v9735_v10 = vld [vmem:[#allocation5 + $0x44] sm:$0x1]  ;;  %v9823_v49 = vshrl.u32 %v9734_v27, 16 }
 0x625   : > { %v9999_v5 = vrot.slane %v9998_v1, 4  ;;  %v8293_v3 = vadd.f32 %v14463_v19, %v8096_v47  ;;  %v9861_v21 = vpack.c.b16 %v9856_v53, %v9855_v43  ;;  %v9832_v28 = vshll.u32 %v9735_v10, 16  ;;  %v11505_v43 = vld [vmem:[#allocation4 + $0x34] sm:$0xf0]  ;;  %v14692_v53 = vpop.f32.mrf.mxu0 }
 0x626   : > { %v8695_v29 = vadd.f32 %v14654_v20, %v8683_v6  ;;  %v8652_v24 = vadd.f32 %v8633_v58, %v8459_v56  ;;  %v8015_v58 = vadd.f32 %v14558_v57, %v7929_v34  ;;  %v9840_v6 = vshll.u32 %v9736_v8, 16 }
 0x627   : > { %v10004_v14 = vsel %vm12052_vm13, %v9999_v5, %v10003_v63  ;;  %v10013_v56 = vrot.slane %v10012_v42, 4  ;;  %v9825_v41 = vrot.slane %v9823_v49, 4  ;;  %v9839_v47 = vrot.slane %v9837_v0, 4  ;;  %v9933_v49 = vld [vmem:[#allocation4 + $0x48] sm:$0xf] }
 0x628   : > { %8703 = vst.msk [vmem:[%s11729_s12] sm:$0xff] %vm1162_vm10, %v8695_v29  ;;  %v8664_v23 = vadd.f32 %v14632_v46, %v8652_v24  ;;  %11341 = vmatmul.msk.bf16.gmra.mxu2 %vm1162_vm10, %v11331_v50  ;;  %v9737_v50 = vld [vmem:[#allocation5 + $0x4c] sm:$0x1]  ;;  %v10052_v38 = vunpack.c.l.b16 %v10004_v14  ;;  %v9842_v61 = vrot.slane %v9840_v6, 5  ;;  %v8097_v63 = vadd.f32 %v14539_v33, %v8015_v58  ;;  %v9931_v33 = vld [vmem:[#allocation4 + $0x40] sm:$0xf] }
 0x629   : > { %v10018_v62 = vsel %vm12052_vm13, %v10013_v56, %v10017_v25  ;;  %v9829_v24 = vor.u32 %v9828_v40, %v9825_v41  ;;  %v9846_v1 = vshll.u32 %v9737_v50, 16  ;;  %v7930_v59 = vadd.f32 %v14429_v60, %v14402_v2  ;;  %v9932_v58 = vld [vmem:[#allocation4 + $0x44] sm:$0x1] }
 0x62a   : > { %v8672_v37 = vmax.f32 %v8664_v23, 0.0  ;;  %v10053_v29 = vunpack.c.l.b16 %v10018_v62  ;;  %v11334_v23 = vld [vmem:[#allocation4 + $0x30] sm:$0xf]  ;;  %v9843_v5 = vor.u32 %v9842_v61, %v9839_v47  ;;  %v8375_v2 = vadd.f32 %v14590_v15, %v8293_v3  ;;  %v14946_v15 = vld [vmem:[#allocation14_spill] sm:$0xff] }
 0x62b   : > { %v8443_v55 = vpop.f32.mrf.mxu2  ;;  %v9830_v27 = vrot.slane %v9829_v24, 4  ;;  %v9848_v60 = vrot.slane %v9846_v1, 5  ;;  %v10020_v8 = vshrl.u32 %v9931_v33, 16  ;;  %v10023_v16 = vshll.u32 %v9931_v33, 16  ;;  %v14948_v33 = vld [vmem:[#allocation13_spill] sm:$0xff] }
 0x62c   : > { %v8684_v57 = vmul.f32 %v14641_v39, %v8672_v37  ;;  %v8460_v34 = vadd.f32 %v8443_v55, %v8374_v17  ;;  %v8638_v12 = vpop.f32.mrf.mxu3  ;;  %v10058_v44 = vpack.c.b16 %v10053_v29, %v10052_v38  ;;  %v9834_v17 = vrot.slane %v9832_v28, 5 }
 0x62d   : > { %v8016_v37 = vadd.f32 %v14571_v32, %v7930_v59  ;;  %v9844_v10 = vrot.slane %v9843_v5, 4  ;;  %v10029_v55 = vshll.u32 %v9932_v58, 16  ;;  %v8294_v3 = vadd.f32 %v14946_v15, %v8097_v63  ;;  %v14947_v5 = vld [vmem:[#allocation11_spill] sm:$0xff] }
 0x62e   : > { %v8696_v30 = vadd.f32 %v14654_v20, %v8684_v57  ;;  %v8653_v19 = vadd.f32 %v8636_v35, %v8460_v34  ;;  %v14690_v35 = vpop.f32.mrf.mxu1  ;;  %11350 = vmatmul.msk.bf16.gmra.mxu1 %vm1162_vm10, %v10058_v44  ;;  %v11335_v57 = vor.u32 %v11505_v43, %v11334_v23  ;;  %v9934_v34 = vld [vmem:[#allocation4 + $0x4c] sm:$0x1]  ;;  %v9835_v32 = vsel %vm12052_vm13, %v9830_v27, %v9834_v17  ;;  %v14713_v43 = vpop.f32.mrf.mxu0 }
 0x62f   : > { %v10025_v56 = vrot.slane %v10023_v16, 5  ;;  %v9849_v41 = vsel %vm12052_vm13, %v9844_v10, %v9848_v60  ;;  %v10034_v40 = vshrl.u32 %v9933_v49, 16  ;;  %v10043_v62 = vshll.u32 %v9934_v34, 16  ;;  %v11338_v34 = vld [vmem:[#allocation4 + $0x40] sm:$0xf] }
 0x630   : > { %8704 = vst.msk [vmem:[%s11729_s12 + $0x10] sm:$0xff] %vm1162_vm10, %v8696_v30  ;;  %v8665_v7 = vadd.f32 %v14632_v46, %v8653_v19  ;;  %v10031_v30 = vrot.slane %v10029_v55, 5  ;;  %v10037_v19 = vshll.u32 %v9933_v49, 16  ;;  %v8098_v47 = vadd.f32 %v14561_v13, %v8016_v37  ;;  %v14949_v37 = vld [vmem:[#allocation16_spill] sm:$0xff] }
 0x631   : > { %11346 = vmatmul.msk.bf16.gmra.mxu3 %vm1162_vm10, %v9861_v21  ;;  %v10022_v21 = vrot.slane %v10020_v8, 4  ;;  %v10036_v24 = vrot.slane %v10034_v40, 4  ;;  %v9858_v1 = vunpack.c.l.b16 %v9849_v41  ;;  %v8376_v23 = vadd.f32 %v14607_v54, %v8294_v3 }
 0x632   : > { %v8673_v25 = vmax.f32 %v8665_v7, 0.0  ;;  %v10039_v59 = vrot.slane %v10037_v19, 5  ;;  %v10045_v17 = vrot.slane %v10043_v62, 5  ;;  %v7931_v58 = vadd.f32 %v14948_v33, %v14947_v5 }
 0x633   : > { %v8445_v42 = vpop.f32.mrf.mxu2  ;;  %v10026_v28 = vor.u32 %v10025_v56, %v10022_v21  ;;  %v11506_v21 = vld [vmem:[#allocation4 + $0x44] sm:$0xf0] }
 0x634   : > { %v8685_v14 = vmul.f32 %v14641_v39, %v8673_v25  ;;  %v8461_v0 = vadd.f32 %v8445_v42, %v8375_v2  ;;  %v8641_v6 = vpop.f32.mrf.mxu3  ;;  %v10040_v27 = vor.u32 %v10039_v59, %v10036_v24  ;;  %v8295_v42 = vadd.f32 %v14949_v37, %v8098_v47  ;;  %v14950_v56 = vld [vmem:[#allocation12_spill] sm:$0xff] }
 0x635   : > { %v10027_v63 = vrot.slane %v10026_v28, 4  ;;  %v8017_v10 = vadd.f32 %v14594_v4, %v7931_v58 }
 0x636   : > { %v8697_v50 = vadd.f32 %v14654_v20, %v8685_v14  ;;  %v8654_v38 = vadd.f32 %v8638_v12, %v8461_v0  ;;  %v14710_v61 = vpop.f32.mrf.mxu1  ;;  %v9857_v12 = vunpack.c.l.b16 %v9835_v32  ;;  %v10041_v54 = vrot.slane %v10040_v27, 4  ;;  %v14737_v19 = vpop.f32.mrf.mxu0 }
 0x637   : > { %v10032_v13 = vsel %vm12052_vm13, %v10027_v63, %v10031_v30  ;;  %v8099_v4 = vadd.f32 %v14577_v18, %v8017_v10  ;;  %v11339_v30 = vor.u32 %v11506_v21, %v11338_v34 }
 0x638   : > { %8705 = vst.msk [vmem:[%s11729_s12 + $0x20] sm:$0xff] %vm1162_vm10, %v8697_v50  ;;  %v8666_v29 = vadd.f32 %v14632_v46, %v8654_v38  ;;  %11342 = vmatmul.msk.bf16.gmra.mxu2 %vm1162_vm10, %v11335_v57  ;;  %v9862_v8 = vpack.c.b16 %v9858_v1, %v9857_v12  ;;  %v10054_v55 = vunpack.c.l.b16 %v10032_v13  ;;  %v10046_v14 = vsel %vm12052_vm13, %v10041_v54, %v10045_v17  ;;  %v14951_v50 = vld [vmem:[#allocation15_spill] sm:$0xff]  ;;  %v14953_v17 = vld [vmem:[#allocation18_spill] sm:$0xff] }
 0x639   : > { %v10055_v57 = vunpack.c.l.b16 %v10046_v14  ;;  %v7932_v38 = vadd.f32 %v14951_v50, %v14950_v56 }
 0x63a   : > { %v8674_v7 = vmax.f32 %v8666_v29, 0.0 }
 0x63b   : > { %v8448_v44 = vpop.f32.mrf.mxu2  ;;  %v10059_v32 = vpack.c.b16 %v10055_v57, %v10054_v55  ;;  %v8018_v18 = vadd.f32 %v14609_v36, %v7932_v38 }
 0x63c   : > { %v8686_v25 = vmul.f32 %v14641_v39, %v8674_v7  ;;  %v8462_v2 = vadd.f32 %v8448_v44, %v8376_v23  ;;  %v8643_v60 = vpop.f32.mrf.mxu3 }
 0x63d   : > { %v8100_v12 = vadd.f32 %v14596_v45, %v8018_v18 }
 0x63e   : > { %v8698_v49 = vadd.f32 %v14654_v20, %v8686_v25  ;;  %v8655_v16 = vadd.f32 %v8641_v6, %v8462_v2  ;;  %v14729_v15 = vpop.f32.mrf.mxu1  ;;  %v8377_v6 = vadd.f32 %v14634_v51, %v8295_v42  ;;  %11351 = vmatmul.msk.bf16.gmra.mxu1 %vm1162_vm10, %v10059_v32  ;;  %v14952_v51 = vld [vmem:[#allocation17_spill] sm:$0xff]  ;;  %v8958_v33 = vpop.f32.mrf.mxu0 }
 0x63f   : > { %v8296_v29 = vadd.f32 %v14952_v51, %v8099_v4  ;;  %v8297_v5 = vadd.f32 %v14953_v17, %v8100_v12  ;;  %v14954_v51 = vld [vmem:[#allocation19_spill] sm:$0xff] }
 0x640   : > { %8706 = vst.msk [vmem:[%s11729_s12 + $0x30] sm:$0xff] %vm1162_vm10, %v8698_v49  ;;  %v8667_v0 = vadd.f32 %v14632_v46, %v8655_v16 }
 0x641   : > { %11347 = vmatmul.msk.bf16.gmra.mxu3 %vm1162_vm10, %v9862_v8  ;;  %v8378_v63 = vadd.f32 %v14667_v31, %v8296_v29  ;;  %v8379_v31 = vadd.f32 %v14692_v53, %v8297_v5  ;;  %v8954_v29 = vadd.f32 %v14713_v43, %v14954_v51  ;;  %v8959_v43 = vadd.f32 %v8958_v33, %v14601_v11  ;;  %v14816_v11 = vld [vmem:[%s14943_s14] ss:$0 sm:$0xff] }
 0x642   : > { %v8675_v3 = vmax.f32 %v8667_v0, 0.0 }
 0x643   : > { %v8450_v48 = vpop.f32.mrf.mxu2 }
 0x644   : > { %v8687_v41 = vmul.f32 %v14641_v39, %v8675_v3  ;;  %v8463_v40 = vadd.f32 %v8450_v48, %v8377_v6  ;;  %v8646_v28 = vpop.f32.mrf.mxu3 }
 0x646   : > { %v8699_v62 = vadd.f32 %v14654_v20, %v8687_v41  ;;  %v8656_v47 = vadd.f32 %v8643_v60, %v8463_v40  ;;  %v14748_v7 = vpop.f32.mrf.mxu1  ;;  %v8960_v49 = vpop.f32.mrf.mxu0 }
 0x648   : > { %8707 = vst.msk [vmem:[%s11729_s12 + $0x40] sm:$0xff] %vm1162_vm10, %v8699_v62  ;;  %v8668_v24 = vadd.f32 %v14632_v46, %v8656_v47  ;;  %11343 = vmatmul.msk.bf16.gmra.mxu2 %vm1162_vm10, %v11339_v30 }
 0x64a   : > { %v8676_v1 = vmax.f32 %v8668_v24, 0.0 }
 0x64b   : > { %v8453_v59 = vpop.f32.mrf.mxu2 }
 0x64c   : > { %v8688_v36 = vmul.f32 %v14641_v39, %v8676_v1  ;;  %v8464_v23 = vadd.f32 %v8453_v59, %v8378_v63  ;;  %v8648_v44 = vpop.f32.mrf.mxu3 }
 0x64e   : > { %v8700_v13 = vadd.f32 %v14654_v20, %v8688_v36  ;;  %v8657_v27 = vadd.f32 %v8646_v28, %v8464_v23  ;;  %v14770_v34 = vpop.f32.mrf.mxu0  ;;  %v8956_v23 = vadd.f32 %v14737_v19, %v14588_v26  ;;  %v14810_v26 = vld [vmem:[%s14909_s10] ss:$0 sm:$0xff] }
 0x650   : > { %8708 = vst.msk [vmem:[%s11729_s12 + $0x50] sm:$0xff] %vm1162_vm10, %v8700_v13  ;;  %v8669_v45 = vadd.f32 %v14632_v46, %v8657_v27 }
 0x652   : > { %v8677_v58 = vmax.f32 %v8669_v45, 0.0 }
 0x653   : > { %v8455_v25 = vpop.f32.mrf.mxu2  ;;  %v14758_v37 = vpop.f32.mrf.mxu1 }
 0x654   : > { %v8689_v2 = vmul.f32 %v14641_v39, %v8677_v58  ;;  %v8465_v60 = vadd.f32 %v8455_v25, %v8379_v31  ;;  %v9223_v8 = vpop.f32.mrf.mxu3 }
 0x656   : > { %v8701_v42 = vadd.f32 %v14654_v20, %v8689_v2  ;;  %v8658_v54 = vadd.f32 %v8648_v44, %v8465_v60  ;;  %v14774_v32 = vpop.f32.mrf.mxu0 }
 0x658   : > { %8709 = vst.msk [vmem:[%s11729_s12 + $0x60] sm:$0xff] %vm1162_vm10, %v8701_v42  ;;  %v8670_v10 = vadd.f32 %v14632_v46, %v8658_v54 }
 0x65a   : > { %v8678_v16 = vmax.f32 %v8670_v10, 0.0 }
 0x65b   : > { %v9138_v55 = vpop.f32.mrf.mxu2  ;;  %v14766_v57 = vpop.f32.mrf.mxu1 }
 0x65c   : > { %v8690_v53 = vmul.f32 %v14641_v39, %v8678_v16  ;;  %v9225_v14 = vpop.f32.mrf.mxu3  ;;  %v9158_v12 = vadd.f32 %v9138_v55, %v8954_v29  ;;  %v14822_v55 = vld [vmem:[%s14945_s18] ss:$0 sm:$0xff] }
 0x65e   : > { %v8702_v0 = vadd.f32 %v14654_v20, %v8690_v53  ;;  %v14780_v20 = vpop.f32.mrf.mxu0  ;;  %v9243_v63 = vadd.f32 %v9223_v8, %v9158_v12 }
 0x660   : > { %8710 = vst.msk [vmem:[%s11729_s12 + $0x70] sm:$0xff] %vm1162_vm10, %v8702_v0  ;;  %v9436_v13 = vadd.f32 %v14729_v15, %v9243_v63 }
 0x663   : > { %v9140_v21 = vpop.f32.mrf.mxu2  ;;  %v14772_v3 = vpop.f32.mrf.mxu1 }
 0x664   : > { %v9228_v4 = vpop.f32.mrf.mxu3  ;;  %v9159_v27 = vadd.f32 %v9140_v21, %v8956_v23 }
 0x666   : > { %v14786_v40 = vpop.f32.mrf.mxu0  ;;  %v9244_v5 = vadd.f32 %v9225_v14, %v9159_v27 }
 0x668   : > { %v9437_v60 = vadd.f32 %v14748_v7, %v9244_v5  ;;  %v8961_v7 = vadd.f32 %v8960_v49, %v14622_v9 }
 0x66b   : > { %v9143_v6 = vpop.f32.mrf.mxu2  ;;  %v14776_v56 = vpop.f32.mrf.mxu1 }
 0x66c   : > { %v9230_v46 = vpop.f32.mrf.mxu3  ;;  %v9160_v8 = vadd.f32 %v9143_v6, %v8959_v43 }
 0x66e   : > { %v9613_v62 = vpop.f32.mrf.mxu0  ;;  %v9245_v54 = vadd.f32 %v9228_v4, %v9160_v8 }
 0x66f   : > { %v9633_v17 = vadd.f32 %v9613_v62, %v9436_v13 }
 0x670   : > { %v9438_v21 = vadd.f32 %v14758_v37, %v9245_v54 }
 0x673   : > { %v9145_v48 = vpop.f32.mrf.mxu2  ;;  %v14784_v41 = vpop.f32.mrf.mxu1 }
 0x674   : > { %v14778_v39 = vpop.f32.mrf.mxu3  ;;  %v9161_v4 = vadd.f32 %v9145_v48, %v8961_v7 }
 0x676   : > { %v9615_v59 = vpop.f32.mrf.mxu0  ;;  %v9246_v49 = vadd.f32 %v9230_v46, %v9161_v4 }
 0x677   : > { %v9634_v19 = vadd.f32 %v9615_v59, %v9437_v60  ;;  %v8964_v59 = vadd.f32 %v14770_v34, %v14647_v52 }
 0x67b   : > { %v9148_v50 = vpop.f32.mrf.mxu2  ;;  %v14792_v18 = vpop.f32.mrf.mxu1 }
 0x67c   : > { %v14782_v38 = vpop.f32.mrf.mxu3  ;;  %v9162_v13 = vadd.f32 %v9148_v50, %v8964_v59 }
 0x67e   : > { %v9618_v2 = vpop.f32.mrf.mxu0 }
 0x67f   : > { %v9635_v9 = vadd.f32 %v9618_v2, %v9438_v21 }
 0x683   : > { %v14788_v28 = vpop.f32.mrf.mxu2  ;;  %v10084_v1 = vpop.f32.mrf.mxu1 }
 0x684   : > { %v14790_v30 = vpop.f32.mrf.mxu3 }
 0x686   : > { %v9620_v51 = vpop.f32.mrf.mxu0 }
 0x68b   : > { %v14794_v47 = vpop.f32.mrf.mxu2  ;;  %v10086_v58 = vpop.f32.mrf.mxu1 }
 0x68c   : > { %v14798_v24 = vpop.f32.mrf.mxu3 }
 0x693   : > { %v14800_v36 = vpop.f32.mrf.mxu2 }
 0x694   : > { %v9891_v44 = vpop.f32.mrf.mxu3 }
 0x697   : > { %v10089_v0 = vpop.f32.mrf.mxu1 }
 0x69b   : > { %v9694_v45 = vpop.f32.mrf.mxu2 }
 0x69c   : > { %v9714_v31 = vadd.f32 %v9694_v45, %v9633_v17  ;;  %v9893_v25 = vpop.f32.mrf.mxu3 }
 0x69e   : > { %v9911_v42 = vadd.f32 %v9891_v44, %v9714_v31  ;;  %v9439_v44 = vadd.f32 %v14766_v57, %v9246_v49  ;;  %v9247_v31 = vadd.f32 %v14778_v39, %v9162_v13  ;;  %v8966_v57 = vadd.f32 %v14774_v32, %v14673_v22 }
 0x69f   : > { %v10091_v5 = vpop.f32.mrf.mxu1 }
 0x6a0   : > { %v10104_v15 = vadd.f32 %v10084_v1, %v9911_v42  ;;  %v9636_v43 = vadd.f32 %v9620_v51, %v9439_v44  ;;  %v9440_v2 = vadd.f32 %v14772_v3, %v9247_v31  ;;  %v9163_v60 = vadd.f32 %v14788_v28, %v8966_v57 }
 0x6a1   : > { %v8969_v28 = vadd.f32 %v14780_v20, %v14690_v35 }
 0x6a2   : > { %v10116_v10 = vadd.f32 %v14810_v26, %v10104_v15 }
 0x6a3   : > { %v9696_v33 = vpop.f32.mrf.mxu2 }
 0x6a4   : > { %v10124_v16 = vmax.f32 %v10116_v10, 0.0  ;;  %v9715_v53 = vadd.f32 %v9696_v33, %v9634_v19  ;;  %v9896_v14 = vpop.f32.mrf.mxu3  ;;  %v9248_v33 = vadd.f32 %v14782_v38, %v9163_v60 }
 0x6a6   : > { %v10136_v6 = vmul.f32 %v14816_v11, %v10124_v16  ;;  %v9912_v62 = vadd.f32 %v9893_v25, %v9715_v53  ;;  %v9441_v53 = vadd.f32 %v14776_v56, %v9248_v33  ;;  %v8971_v56 = vadd.f32 %v14786_v40, %v14710_v61 }
 0x6a8   : > { %v10148_v29 = vadd.f32 %v14822_v55, %v10136_v6  ;;  %v10105_v12 = vadd.f32 %v10086_v58, %v9912_v62  ;;  %v9623_v58 = vpop.f32.mrf.mxu0 }
 0x6a9   : > { %v9637_v10 = vadd.f32 %v9623_v58, %v9440_v2 }
 0x6aa   : > { %11352 = vst.msk [vmem:[%s11729_s12 + $0x8] sm:$0xff] %vm1162_vm10, %v10148_v29  ;;  %v10117_v1 = vadd.f32 %v14810_v26, %v10105_v12 }
 0x6ab   : > { %v9699_v63 = vpop.f32.mrf.mxu2  ;;  %v10094_v54 = vpop.f32.mrf.mxu1 }
 0x6ac   : > { %v10125_v37 = vmax.f32 %v10117_v1, 0.0  ;;  %v9716_v48 = vadd.f32 %v9699_v63, %v9635_v9  ;;  %v9898_v23 = vpop.f32.mrf.mxu3  ;;  %v9165_v1 = vadd.f32 %v14800_v36, %v8971_v56 }
 0x6ae   : > { %v10137_v27 = vmul.f32 %v14816_v11, %v10125_v37  ;;  %v9913_v17 = vadd.f32 %v9896_v14, %v9716_v48  ;;  %v9164_v14 = vadd.f32 %v14794_v47, %v8969_v28 }
 0x6b0   : > { %v10149_v46 = vadd.f32 %v14822_v55, %v10137_v27  ;;  %v10106_v45 = vadd.f32 %v10089_v0, %v9913_v17  ;;  %v9625_v32 = vpop.f32.mrf.mxu0  ;;  %v9249_v51 = vadd.f32 %v14790_v30, %v9164_v14 }
 0x6b1   : > { %v9638_v62 = vadd.f32 %v9625_v32, %v9441_v53 }
 0x6b2   : > { %11353 = vst.msk [vmem:[%s11729_s12 + $0x18] sm:$0xff] %vm1162_vm10, %v10149_v46  ;;  %v10118_v52 = vadd.f32 %v14810_v26, %v10106_v45  ;;  %v9442_v49 = vadd.f32 %v14784_v41, %v9249_v51 }
 0x6b3   : > { %v9701_v34 = vpop.f32.mrf.mxu2  ;;  %v10096_v20 = vpop.f32.mrf.mxu1 }
 0x6b4   : > { %v10126_v50 = vmax.f32 %v10118_v52, 0.0  ;;  %v9717_v25 = vadd.f32 %v9701_v34, %v9636_v43  ;;  %v9901_v15 = vpop.f32.mrf.mxu3 }
 0x6b6   : > { %v10138_v8 = vmul.f32 %v14816_v11, %v10126_v50  ;;  %v9914_v42 = vadd.f32 %v9898_v23, %v9717_v25  ;;  %v9250_v23 = vadd.f32 %v14798_v24, %v9165_v1 }
 0x6b8   : > { %v10150_v39 = vadd.f32 %v14822_v55, %v10138_v8  ;;  %v10107_v19 = vadd.f32 %v10091_v5, %v9914_v42  ;;  %v9628_v9 = vpop.f32.mrf.mxu0  ;;  %v9443_v36 = vadd.f32 %v14792_v18, %v9250_v23 }
 0x6b9   : > { %v9639_v48 = vadd.f32 %v9628_v9, %v9442_v49 }
 0x6ba   : > { %11354 = vst.msk [vmem:[%s11729_s12 + $0x28] sm:$0xff] %vm1162_vm10, %v10150_v39  ;;  %v10119_v22 = vadd.f32 %v14810_v26, %v10107_v19 }
 0x6bb   : > { %v9704_v3 = vpop.f32.mrf.mxu2  ;;  %v10099_v27 = vpop.f32.mrf.mxu1 }
 0x6bc   : > { %v10127_v7 = vmax.f32 %v10119_v22, 0.0  ;;  %v9718_v16 = vadd.f32 %v9704_v3, %v9637_v10  ;;  %v9903_v6 = vpop.f32.mrf.mxu3 }
 0x6be   : > { %v10139_v0 = vmul.f32 %v14816_v11, %v10127_v7  ;;  %v9915_v21 = vadd.f32 %v9901_v15, %v9718_v16 }
 0x6c0   : > { %v10151_v38 = vadd.f32 %v14822_v55, %v10139_v0  ;;  %v10108_v4 = vadd.f32 %v10094_v54, %v9915_v21  ;;  %v9630_v46 = vpop.f32.mrf.mxu0 }
 0x6c1   : > { %v9640_v24 = vadd.f32 %v9630_v46, %v9443_v36 }
 0x6c2   : > { %11355 = vst.msk [vmem:[%s11729_s12 + $0x38] sm:$0xff] %vm1162_vm10, %v10151_v38  ;;  %v10120_v35 = vadd.f32 %v14810_v26, %v10108_v4 }
 0x6c3   : > { %v9706_v29 = vpop.f32.mrf.mxu2  ;;  %v10101_v25 = vpop.f32.mrf.mxu1 }
 0x6c4   : > { %v10128_v47 = vmax.f32 %v10120_v35, 0.0  ;;  %v9719_v12 = vadd.f32 %v9706_v29, %v9638_v62  ;;  %v9906_v40 = vpop.f32.mrf.mxu3 }
 0x6c6   : > { %v10140_v63 = vmul.f32 %v14816_v11, %v10128_v47  ;;  %v9916_v30 = vadd.f32 %v9903_v6, %v9719_v12 }
 0x6c8   : > { %v10152_v59 = vadd.f32 %v14822_v55, %v10140_v63  ;;  %v10109_v37 = vadd.f32 %v10096_v20, %v9916_v30 }
 0x6ca   : > { %11356 = vst.msk [vmem:[%s11729_s12 + $0x48] sm:$0xff] %vm1162_vm10, %v10152_v59  ;;  %v10121_v61 = vadd.f32 %v14810_v26, %v10109_v37 }
 0x6cb   : > { %v9709_v44 = vpop.f32.mrf.mxu2 }
 0x6cc   : > { %v10129_v13 = vmax.f32 %v10121_v61, 0.0  ;;  %v9720_v41 = vadd.f32 %v9709_v44, %v9639_v48  ;;  %v9908_v57 = vpop.f32.mrf.mxu3 }
 0x6ce   : > { %v10141_v17 = vmul.f32 %v14816_v11, %v10129_v13  ;;  %v9917_v5 = vadd.f32 %v9906_v40, %v9720_v41 }
 0x6d0   : > { %v10153_v45 = vadd.f32 %v14822_v55, %v10141_v17  ;;  %v10110_v58 = vadd.f32 %v10099_v27, %v9917_v5 }
 0x6d2   : > { %11357 = vst.msk [vmem:[%s11729_s12 + $0x58] sm:$0xff] %vm1162_vm10, %v10153_v45  ;;  %v10122_v43 = vadd.f32 %v14810_v26, %v10110_v58 }
 0x6d3   : > { %v9711_v31 = vpop.f32.mrf.mxu2 }
 0x6d4   : > { %v10130_v52 = vmax.f32 %v10122_v43, 0.0  ;;  %v9721_v34 = vadd.f32 %v9711_v31, %v9640_v24 }
 0x6d6   : > { %v10142_v18 = vmul.f32 %v14816_v11, %v10130_v52  ;;  %v9918_v50 = vadd.f32 %v9908_v57, %v9721_v34 }
 0x6d8   : > { %v10154_v2 = vadd.f32 %v14822_v55, %v10142_v18  ;;  %v10111_v60 = vadd.f32 %v10101_v25, %v9918_v50 }
 0x6da   : > { %11358 = vst.msk [vmem:[%s11729_s12 + $0x68] sm:$0xff] %vm1162_vm10, %v10154_v2  ;;  %v10123_v8 = vadd.f32 %v14810_v26, %v10111_v60 }
 0x6dc   : > { %v10131_v42 = vmax.f32 %v10123_v8, 0.0 }
 0x6de   : > { %v10143_v15 = vmul.f32 %v14816_v11, %v10131_v42 }
 0x6e0   : > { %v10155_v39 = vadd.f32 %v14822_v55, %v10143_v15 }
 0x6e2   : > { %11359 = vst.msk [vmem:[%s11729_s12 + $0x78] sm:$0xff] %vm1162_vm10, %v10155_v39 }
 0x6e3 PF: > { %s14955_s23 = sld [smem:[#allocation8_spill]] }
 0x6e4   : > { %s14956_s25 = sld [smem:[#allocation6_spill]] }
 0x6e5   : > { %s14957_s26 = sld [smem:[#allocation7_spill]] }
 0x6e6   : > { %s14958_s27 = sld [smem:[#allocation9_spill]] }
 0x6e7   : > { %s14959_s28 = sld [smem:[#allocation10_spill]] }
 0x6e9   : > { %s23_s29 = sadd.s32 1, %s14955_s23  }
 0x6ea   : > { %p20_p9 = scmp.ge.s32.totalorder %s23_s29, 6  }
 0x6ec   :  { %22 = sbr.rel (!%p20_p9) target bundleno = 4 (0x4), region = 141 }

</bundles_post_ra>
